<compile_context>
chip_gen: v6e
topology: v6e:2x2x1
jax: 0.10.0
libtpu: 0.0.40
codegen_flags: <defaults>
</compile_context>

<pallas_src>
import math

import numpy as np
import jax
import jax.numpy as jnp
from jax.experimental import pallas as pl
from jax.experimental.pallas import tpu as pltpu


# ---------------------------------------------------------------------------
# Hyper-parameters ("AP") implied by forward(): 3x3 FOV, kernel_size=2 convs with
# padding=1 (3->4->5->6), MaxPool2d(2) twice, final conv kernel_size=fov -> 1x1.
# ---------------------------------------------------------------------------
class AP:
    num_observation_in_dim = 4
    num_observation_hidden_channels = 32   # N
    convolution_size = 2
    fov = 3
    goal_in_dim = 3
    goal_embedding_size = 8
    memory_dim = 32


CONV_DTYPE = jnp.bfloat16      # MXU operand dtype for the big conv matrices (f32 accumulate)

# Lane layout of the packed (B, 128) activation input.
IN_W = 128
C_OFF = 0                                                        # c0   lanes   0:32
H_OFF = AP.memory_dim                                            # h0   lanes  32:64
X_OFF = 2 * AP.memory_dim                                        # obs  lanes  64:100
G_OFF = X_OFF + AP.fov * AP.fov * AP.num_observation_in_dim      # goal lanes 100:103

_G1 = 128        # padded lane-group width after pool 1 (valid 3*3*8  = 72)
_G2 = 256        # padded lane-group width after pool 2 (valid 3*3*16 = 144)
BIAS_ROWS = 16
BIAS_COLS = 1024


def _round_up(x, m):
    return (x + m - 1) // m * m


# ---------------------------------------------------------------------------
# Host-side weight preprocessing: fold each conv (fixed tiny spatial extent) into a
# dense matrix over the flattened (h, w, c) feature map.  Exact (zeros elsewhere).
# ---------------------------------------------------------------------------
def _conv_as_dense(w, b, *, H, W, pad, in_rows=None, out_cols=None, pool=None, row_off=0):
    """w: (k, k, cin, cout) cross-correlation weights, b: (cout,).

    Returns (M, bias) with M: (in_rows, out_cols).  If `pool` is given, output columns
    are grouped by pool offset (4 groups of out_cols//4 lanes, zero padded) so that
    ReLU+MaxPool2d(pool) == relu(x @ M + bias) followed by a max over the 4 groups.
    `row_off` shifts the input rows (for inputs embedded in a wider packed vector).
    """
    kh, kw, cin, cout = w.shape
    OH = H + 2 * pad - kh + 1
    OW = W + 2 * pad - kw + 1
    if pool is None:
        n_cols = OH * OW * cout if out_cols is None else out_cols

        def col0(oh, ow):
            return (oh * OW + ow) * cout
    else:
        assert out_cols is not None and OH % pool == 0 and OW % pool == 0
        PH, PW = OH // pool, OW // pool
        gstride = out_cols // (pool * pool)
        assert gstride >= PH * PW * cout
        n_cols = out_cols

        def col0(oh, ow):
            g = (oh % pool) * pool + (ow % pool)
            return g * gstride + ((oh // pool) * PW + (ow // pool)) * cout

    n_rows = (row_off + H * W * cin) if in_rows is None else in_rows
    M = np.zeros((n_rows, n_cols), np.float32)
    bias = np.zeros((n_cols,), np.float32)
    for oh in range(OH):
        for ow in range(OW):
            c0 = col0(oh, ow)
            bias[c0:c0 + cout] = b
            for di in range(kh):
                for dj in range(kw):
                    ih, iw = oh + di - pad, ow + dj - pad
                    if 0 <= ih < H and 0 <= iw < W:
                        r0 = row_off + (ih * W + iw) * cin
                        M[r0:r0 + cin, c0:c0 + cout] += w[di, dj]
    return M, bias


def init_raw_params(key):
    """Raw (PyTorch-equivalent) parameters; conv weights stored (k, k, cin, cout)."""
    N = AP.num_observation_hidden_channels
    k = AP.convolution_size
    conv_cfg = [
        (AP.num_observation_in_dim, N // 4, k),
        (N // 4, N // 4, k),
        (N // 4, N // 4, k),
        (N // 4, N // 2, k),
        (N // 2, N // 2, k),
        (N // 2, N // 2, k),
        (N // 2, N - AP.goal_embedding_size, AP.fov),
    ]
    keys = jax.random.split(key, 16)

    def unif(kk, shape, bnd):
        return jax.random.uniform(kk, shape, jnp.float32, -bnd, bnd)

    p = {}
    for idx, (cin, cout, ks) in enumerate(conv_cfg):
        bnd = 1.0 / math.sqrt(cin * ks * ks)
        kw_, kb_ = jax.random.split(keys[idx])
        p[f"conv{idx}_w"] = unif(kw_, (ks, ks, cin, cout), bnd)
        p[f"conv{idx}_b"] = unif(kb_, (cout,), bnd)

    kw_, kb_ = jax.random.split(keys[7])
    bnd = 1.0 / math.sqrt(AP.goal_in_dim)
    p["goal_w"] = unif(kw_, (AP.goal_in_dim, AP.goal_embedding_size), bnd)
    p["goal_b"] = unif(kb_, (AP.goal_embedding_size,), bnd)

    for j, name in enumerate(["mlp1", "mlp2"]):
        kw_, kb_ = jax.random.split(keys[8 + j])
        bnd = 1.0 / math.sqrt(N)
        p[f"{name}_w"] = unif(kw_, (N, N), bnd)
        p[f"{name}_b"] = unif(kb_, (N,), bnd)

    m = AP.memory_dim
    bnd = 1.0 / math.sqrt(m)
    p["lstm_wih"] = unif(keys[10], (N, 4 * m), bnd)       # gate order i, f, g, o
    p["lstm_whh"] = unif(keys[11], (m, 4 * m), bnd)
    p["lstm_bih"] = unif(keys[12], (4 * m,), bnd)
    p["lstm_bhh"] = unif(keys[13], (4 * m,), bnd)
    return p


def prepare_params(raw, conv_dtype=CONV_DTYPE):
    """Build the kernel-ready weight set (dense conv matrices, fused goal/LSTM, bias slab)."""
    N = AP.num_observation_hidden_channels
    m = AP.memory_dim
    gsz = AP.goal_embedding_size
    to_np = lambda a: np.asarray(jax.device_get(a), np.float32)

    conv_specs = [
        dict(H=3, W=3, pad=1, in_rows=IN_W, row_off=X_OFF, out_cols=128),  # 3x3x4  -> 4x4x8   (128)
        dict(H=4, W=4, pad=1, in_rows=128, out_cols=256),                  # 4x4x8  -> 5x5x8   (200->256)
        dict(H=5, W=5, pad=1, in_rows=256, pool=2, out_cols=4 * _G1),      # 5x5x8  -> 6x6x8, pool-grouped
        dict(H=3, W=3, pad=1, in_rows=_G1, out_cols=256),                  # 3x3x8  -> 4x4x16  (256)
        dict(H=4, W=4, pad=1, in_rows=256, out_cols=512),                  # 4x4x16 -> 5x5x16  (400->512)
        dict(H=5, W=5, pad=1, in_rows=512, pool=2, out_cols=4 * _G2),      # 5x5x16 -> 6x6x16, pool-grouped
        dict(H=3, W=3, pad=0, in_rows=_G2, out_cols=N),                    # 3x3x16 -> 1x1x24
    ]
    biases = np.zeros((BIAS_ROWS, BIAS_COLS), np.float32)
    mats = []
    for i, sp in enumerate(conv_specs):
        M, bias = _conv_as_dense(to_np(raw[f"conv{i}_w"]), to_np(raw[f"conv{i}_b"]), **sp)
        mats.append(M)
        biases[i, :bias.shape[0]] = bias

    # conv6 + goal embedding fused into one (384, 32) matrix acting on [pooled(256) | packed_in(128)].
    w6 = np.zeros((_G2 + IN_W, N), np.float32)
    w6[:_G2] = mats[6]
    w6[_G2 + G_OFF:_G2 + G_OFF + AP.goal_in_dim, N - gsz:] = to_np(raw["goal_w"])
    biases[6, N - gsz:N] = to_np(raw["goal_b"])                # lanes 0:24 = conv6 bias (already set)

    biases[7, :N] = to_np(raw["mlp1_b"])
    biases[8, :N] = to_np(raw["mlp2_b"])

    # LSTM: single gate matmul, input = [packed_in(128) | xm(32)], gates at a 128-lane stride.
    wg = np.zeros((IN_W + N, 4 * 128), np.float32)
    wih = to_np(raw["lstm_wih"]).reshape(N, 4, m)
    whh = to_np(raw["lstm_whh"]).reshape(m, 4, m)
    bsum = to_np(raw["lstm_bih"]) + to_np(raw["lstm_bhh"])
    for g in range(4):
        wg[H_OFF:H_OFF + m, g * 128:g * 128 + m] = whh[:, g, :]     # h0 rows of the packed input
        wg[IN_W:IN_W + N, g * 128:g * 128 + m] = wih[:, g, :]       # xm rows (appended after input)
        biases[9, g * 128:g * 128 + m] = bsum[g * m:(g + 1) * m]

    return {
        "conv_w": [jnp.asarray(mats[i], conv_dtype) for i in range(6)],   # bf16 MXU operands
        "w6": jnp.asarray(w6, jnp.float32),                               # tiny: keep f32
        "mlp1_w": jnp.asarray(to_np(raw["mlp1_w"]), jnp.float32),
        "mlp2_w": jnp.asarray(to_np(raw["mlp2_w"]), jnp.float32),
        "lstm_wg": jnp.asarray(wg, jnp.float32),
        "biases": jnp.asarray(biases, jnp.float32),
    }


# ---------------------------------------------------------------------------
# The single fused Pallas kernel (per batch block of `bm` rows)
# ---------------------------------------------------------------------------
def _encoder_kernel(in_ref, w0, w1, w2, w3, w4, w5, w6, m1w, m2w, wg, b_ref, out_ref):
    f32 = jnp.float32
    N = AP.num_observation_hidden_channels
    m = AP.memory_dim

    def bias(row, width):
        return b_ref[row:row + 1, :width]              # (1, width) f32, broadcast over rows

    def mm(a, w_ref):
        return jnp.dot(a.astype(w_ref.dtype), w_ref[...], preferred_element_type=f32)

    def conv_relu(a, w_ref, row, width):
        return jnp.maximum(mm(a, w_ref) + bias(row, width), 0.0)

    def pool4(a):
        # MaxPool2d(2): max over the 4 pool-offset groups (lane-aligned 128-multiples)
        g = a.shape[-1] // 4
        return jnp.maximum(jnp.maximum(a[:, :g], a[:, g:2 * g]),
                           jnp.maximum(a[:, 2 * g:3 * g], a[:, 3 * g:]))

    xin = in_ref[...]                                  # (bm, 128) f32: [c0 | h0 | obs | goal | 0]

    # -------- convolutional stack (all VMEM/vreg resident, bf16 MXU operands) --------
    a = conv_relu(xin, w0, 0, 128)                     # conv0: only the obs rows of w0 are nonzero
    a = conv_relu(a, w1, 1, 256)                       # conv1 (200 padded to 256 lanes)
    a = pool4(conv_relu(a, w2, 2, 4 * _G1))            # conv2 + ReLU + MaxPool2d(2) -> (bm, 128)
    a = conv_relu(a, w3, 3, 256)                       # conv3
    a = conv_relu(a, w4, 4, 512)                       # conv4 (400 padded to 512 lanes)
    a = pool4(conv_relu(a, w5, 5, 4 * _G2))            # conv5 + ReLU + MaxPool2d(2) -> (bm, 256)

    # -------- conv6 + goal embedding (fused matmul; disjoint output lanes 0:24 / 24:32) --------
    feat = conv_relu(jnp.concatenate([a, xin], axis=-1), w6, 6, N)      # (bm, 32)

    # -------- residual MLP: relu(W2 relu(W1 x + b1) + b2 + x) --------
    h1 = jnp.maximum(mm(feat, m1w) + bias(7, N), 0.0)
    xm = jnp.maximum(mm(h1, m2w) + bias(8, N) + feat, 0.0)

    # -------- LSTM cell: ONE gate matmul, gates packed at a 128-lane stride (i, f, g, o) --------
    gates = mm(jnp.concatenate([xin, xm], axis=-1), wg) + bias(9, 4 * 128)   # (bm, 512)
    i_g = jax.nn.sigmoid(gates[:, 0 * 128:0 * 128 + m])
    f_g = jax.nn.sigmoid(gates[:, 1 * 128:1 * 128 + m])
    g_g = jnp.tanh(gates[:, 2 * 128:2 * 128 + m])
    o_g = jax.nn.sigmoid(gates[:, 3 * 128:3 * 128 + m])
    c0 = xin[:, C_OFF:C_OFF + m]
    c_new = f_g * c0 + i_g * g_g
    h_new = o_g * jnp.tanh(c_new)

    # -------- single lane-dense (bm, 128) output: [feat | h_new | c_new | 0] --------
    out_ref[...] = jnp.concatenate([xm, h_new, c_new, jnp.zeros_like(xm)], axis=-1)


# ---------------------------------------------------------------------------
# Forward wrapper (mirrors ObservationEncoder.forward)
# ---------------------------------------------------------------------------
def _pick_block(B, block_b):
    if block_b is not None:
        bm = min(block_b, _round_up(max(B, 1), 8))
    elif B <= 8:
        bm = 8
    else:
        # >= 2 grid steps so ("parallel",) can shard across v7x's two TensorCores while
        # tiles stay large enough to amortize the ~0.35us/step overhead on v5e/v6e.
        # Cap at 512 rows: ~12 MB peak VMEM, within every generation's scoped budget.
        bm = min(512, _round_up((B + 1) // 2, 8))
    return _round_up(bm, 8)


def observation_encoder_forward(params, x, goal, memory, *, block_b=None):
    h0, c0 = memory
    B = x.shape[0]
    N = AP.num_observation_hidden_channels
    cin, fov, m = AP.num_observation_in_dim, AP.fov, AP.memory_dim
    assert x.shape == (B, cin, fov, fov)
    assert goal.shape == (B, AP.goal_in_dim)
    assert h0.shape == (B, m) and c0.shape == (B, m)

    f32 = jnp.float32
    bm = _pick_block(B, block_b)
    b_pad = _round_up(B, bm)

    # One lane-dense packed activation input: [c0 | h0 | obs(36) | goal(3) | 0-pad] = 128 lanes.
    x_flat = jnp.transpose(x, (0, 2, 3, 1)).reshape(B, fov * fov * cin)
    packed = jnp.concatenate(
        [c0.astype(f32), h0.astype(f32), x_flat.astype(f32), goal.astype(f32)], axis=-1)
    packed = jnp.pad(packed, ((0, b_pad - B), (0, IN_W - packed.shape[1])))

    weights = list(params["conv_w"]) + [params["w6"], params["mlp1_w"], params["mlp2_w"],
                                        params["lstm_wg"], params["biases"]]

    def fullspec(shape):
        nd = len(shape)
        return pl.BlockSpec(shape, lambda i, nd=nd: (0,) * nd)

    out = pl.pallas_call(
        _encoder_kernel,
        grid=(b_pad // bm,),
        in_specs=[pl.BlockSpec((bm, IN_W), lambda i: (i, 0))] +
                 [fullspec(w.shape) for w in weights],
        out_specs=pl.BlockSpec((bm, IN_W), lambda i: (i, 0)),
        out_shape=jax.ShapeDtypeStruct((b_pad, IN_W), f32),
        compiler_params=pltpu.CompilerParams(
            dimension_semantics=("parallel",),
            vmem_limit_bytes=32 * 1024 * 1024),
    )(packed, *weights)

    out = out[:B]
    feat = out[:, :N]
    h_new = out[:, N:N + m]
    c_new = out[:, N + m:N + 2 * m]
    return feat, h_new, (h_new, c_new)


# ---------------------------------------------------------------------------
# Plain-JAX f32 reference (true convs / pools on raw params) for validation
# ---------------------------------------------------------------------------
def reference_forward(raw, x, goal, memory):
    f32 = jnp.float32
    h0, c0 = memory
    a = jnp.transpose(x, (0, 2, 3, 1)).astype(f32)

    def conv_relu(a, w, b, pad):
        k = w.shape[0]
        Bt, H, W, C = a.shape
        ap = jnp.pad(a, ((0, 0), (pad, pad), (pad, pad), (0, 0)))
        OH = H + 2 * pad - k + 1
        OW = W + 2 * pad - k + 1
        cols = [ap[:, di:di + OH, dj:dj + OW, :] for di in range(k) for dj in range(k)]
        patches = jnp.concatenate(cols, axis=-1).reshape(Bt * OH * OW, k * k * C)
        y = patches @ w.reshape(k * k * C, -1) + b
        return jnp.maximum(y, 0.0).reshape(Bt, OH, OW, -1)

    def pool(a, k=2):
        Bt, H, W, C = a.shape
        return a.reshape(Bt, H // k, k, W // k, k, C).max(axis=(2, 4))

    a = conv_relu(a, raw["conv0_w"], raw["conv0_b"], 1)
    a = conv_relu(a, raw["conv1_w"], raw["conv1_b"], 1)
    a = pool(conv_relu(a, raw["conv2_w"], raw["conv2_b"], 1))
    a = conv_relu(a, raw["conv3_w"], raw["conv3_b"], 1)
    a = conv_relu(a, raw["conv4_w"], raw["conv4_b"], 1)
    a = pool(conv_relu(a, raw["conv5_w"], raw["conv5_b"], 1))
    a = conv_relu(a, raw["conv6_w"], raw["conv6_b"], 0).reshape(x.shape[0], -1)

    g = jnp.maximum(goal.astype(f32) @ raw["goal_w"] + raw["goal_b"], 0.0)
    xc = jnp.concatenate([a, g], axis=-1)
    h1 = jnp.maximum(xc @ raw["mlp1_w"] + raw["mlp1_b"], 0.0)
    xm = jnp.maximum(h1 @ raw["mlp2_w"] + raw["mlp2_b"] + xc, 0.0)

    m = AP.memory_dim
    gates = xm @ raw["lstm_wih"] + h0.astype(f32) @ raw["lstm_whh"] \
        + raw["lstm_bih"] + raw["lstm_bhh"]
    i = jax.nn.sigmoid(gates[:, :m])
    f = jax.nn.sigmoid(gates[:, m:2 * m])
    gg = jnp.tanh(gates[:, 2 * m:3 * m])
    o = jax.nn.sigmoid(gates[:, 3 * m:])
    c_new = f * c0.astype(f32) + i * gg
    h_new = o * jnp.tanh(c_new)
    return xm, h_new, (h_new, c_new)


# ---------------------------------------------------------------------------
if __name__ == "__main__":
    key = jax.random.PRNGKey(0)
    k_p, k_x, k_g, k_h, k_c = jax.random.split(key, 5)

    raw = init_raw_params(k_p)
    params = prepare_params(raw)

    # Batched workload: many agents per call, tiled so the grid has >=2 "parallel" steps.
    B = 256
    x = jax.random.normal(k_x, (B, AP.num_observation_in_dim, AP.fov, AP.fov), jnp.float32)
    goal = jax.random.normal(k_g, (B, AP.goal_in_dim), jnp.float32)
    h0 = jax.random.normal(k_h, (B, AP.memory_dim), jnp.float32)
    c0 = jax.random.normal(k_c, (B, AP.memory_dim), jnp.float32)

    fwd = jax.jit(observation_encoder_forward)
    feat, hidden, (h_new, c_new) = fwd(params, x, goal, (h0, c0))
    jax.block_until_ready((feat, hidden, h_new, c_new))

    assert feat.shape == (B, AP.num_observation_hidden_channels)
    assert hidden.shape == (B, AP.memory_dim)
    assert h_new.shape == (B, AP.memory_dim) and c_new.shape == (B, AP.memory_dim)
    assert bool(jnp.all(jnp.isfinite(feat))) and bool(jnp.all(jnp.isfinite(hidden)))
    assert bool(jnp.all(jnp.isfinite(c_new)))

    # Validate against the plain-JAX f32 reference (conv matmuls use bf16 operands).
    rfeat, rhid, (_, rc) = reference_forward(raw, x, goal, (h0, c0))
    for got, want, name in ((feat, rfeat, "feat"), (hidden, rhid, "hidden"), (c_new, rc, "c")):
        err = float(jnp.max(jnp.abs(got - want)))
        assert err < 7.5e-2, f"{name} mismatch vs reference: max abs err {err}"

    # Small-batch path (original module example, B=2): bm rounds to 8, single grid step.
    f2, h2, (_, c2) = fwd(params, x[:2], goal[:2], (h0[:2], c0[:2]))
    jax.block_until_ready((f2, h2, c2))
    assert f2.shape == (2, AP.num_observation_hidden_channels)
    assert h2.shape == (2, AP.memory_dim) and c2.shape == (2, AP.memory_dim)
    rf2, rh2, (_, rc2) = reference_forward(raw, x[:2], goal[:2], (h0[:2], c0[:2]))
    assert float(jnp.max(jnp.abs(h2 - rh2))) < 7.5e-2

    print("KERNEL_OK")
</pallas_src>

<mosaic_0001>
module attributes {stable_mosaic.version = 11 : i64} {
  func.func @_encoder_kernel(%arg0: i32, %arg1: memref<128x128xf32, #tpu.memory_space<vmem>>, %arg2: memref<128x128xbf16, #tpu.memory_space<vmem>>, %arg3: memref<128x256xbf16, #tpu.memory_space<vmem>>, %arg4: memref<256x512xbf16, #tpu.memory_space<vmem>>, %arg5: memref<128x256xbf16, #tpu.memory_space<vmem>>, %arg6: memref<256x512xbf16, #tpu.memory_space<vmem>>, %arg7: memref<512x1024xbf16, #tpu.memory_space<vmem>>, %arg8: memref<384x32xf32, #tpu.memory_space<vmem>>, %arg9: memref<32x32xf32, #tpu.memory_space<vmem>>, %arg10: memref<32x32xf32, #tpu.memory_space<vmem>>, %arg11: memref<160x512xf32, #tpu.memory_space<vmem>>, %arg12: memref<16x1024xf32, #tpu.memory_space<vmem>>, %arg13: memref<128x128xf32, #tpu.memory_space<vmem>>) attributes {dimension_semantics = [#tpu.dimension_semantics<parallel>], iteration_bounds = array<i64: 2>, scalar_prefetch = 0 : i64, scratch_operands = 0 : i64, tpu.core_type = #tpu.core_type<tc>, window_params = [{transform_indices = @transform_0, window_bounds = array<i64: 128, 128>}, {pipeline_mode = #tpu.pipeline_mode<synchronous>, transform_indices = @transform_1, window_bounds = array<i64: 128, 128>}, {pipeline_mode = #tpu.pipeline_mode<synchronous>, transform_indices = @transform_2, window_bounds = array<i64: 128, 256>}, {pipeline_mode = #tpu.pipeline_mode<synchronous>, transform_indices = @transform_3, window_bounds = array<i64: 256, 512>}, {pipeline_mode = #tpu.pipeline_mode<synchronous>, transform_indices = @transform_4, window_bounds = array<i64: 128, 256>}, {pipeline_mode = #tpu.pipeline_mode<synchronous>, transform_indices = @transform_5, window_bounds = array<i64: 256, 512>}, {pipeline_mode = #tpu.pipeline_mode<synchronous>, transform_indices = @transform_6, window_bounds = array<i64: 512, 1024>}, {pipeline_mode = #tpu.pipeline_mode<synchronous>, transform_indices = @transform_7, window_bounds = array<i64: 384, 32>}, {pipeline_mode = #tpu.pipeline_mode<synchronous>, transform_indices = @transform_8, window_bounds = array<i64: 32, 32>}, {pipeline_mode = #tpu.pipeline_mode<synchronous>, transform_indices = @transform_9, window_bounds = array<i64: 32, 32>}, {pipeline_mode = #tpu.pipeline_mode<synchronous>, transform_indices = @transform_10, window_bounds = array<i64: 160, 512>}, {pipeline_mode = #tpu.pipeline_mode<synchronous>, transform_indices = @transform_11, window_bounds = array<i64: 16, 1024>}, {transform_indices = @transform_12, window_bounds = array<i64: 128, 128>}]} {
    %c0 = arith.constant 0 : index
    %c0_0 = arith.constant 0 : index
    %0 = vector.load %arg1[%c0, %c0_0] : memref<128x128xf32, #tpu.memory_space<vmem>>, vector<128x128xf32>
    %1 = arith.truncf %0 : vector<128x128xf32> to vector<128x128xbf16>
    %c0_1 = arith.constant 0 : index
    %c0_2 = arith.constant 0 : index
    %2 = vector.load %arg2[%c0_1, %c0_2] : memref<128x128xbf16, #tpu.memory_space<vmem>>, vector<128x128xbf16>
    %cst = arith.constant dense<0.000000e+00> : vector<128x128xf32>
    %3 = tpu.matmul %1, %2, %cst {dimension_numbers = #tpu.dot_dimension_numbers<[1], [0], [0], [1], [0, 0, 1, 1], [], []>} : vector<128x128xbf16>, vector<128x128xbf16>, vector<128x128xf32> -> vector<128x128xf32>
    %c0_3 = arith.constant 0 : index
    %c0_4 = arith.constant 0 : index
    %4 = vector.load %arg12[%c0_3, %c0_4] : memref<16x1024xf32, #tpu.memory_space<vmem>>, vector<1x128xf32>
    %5 = vector.broadcast %4 : vector<1x128xf32> to vector<128x128xf32>
    %6 = arith.addf %3, %5 : vector<128x128xf32>
    %cst_5 = arith.constant 0.000000e+00 : f32
    %7 = vector.broadcast %cst_5 : f32 to vector<128x128xf32>
    %8 = arith.maximumf %6, %7 : vector<128x128xf32>
    %9 = arith.truncf %8 : vector<128x128xf32> to vector<128x128xbf16>
    %c0_6 = arith.constant 0 : index
    %c0_7 = arith.constant 0 : index
    %10 = vector.load %arg3[%c0_6, %c0_7] : memref<128x256xbf16, #tpu.memory_space<vmem>>, vector<128x256xbf16>
    %cst_8 = arith.constant dense<0.000000e+00> : vector<128x256xf32>
    %11 = tpu.matmul %9, %10, %cst_8 {dimension_numbers = #tpu.dot_dimension_numbers<[1], [0], [0], [1], [0, 0, 1, 1], [], []>} : vector<128x128xbf16>, vector<128x256xbf16>, vector<128x256xf32> -> vector<128x256xf32>
    %c1 = arith.constant 1 : index
    %c0_9 = arith.constant 0 : index
    %12 = vector.load %arg12[%c1, %c0_9] : memref<16x1024xf32, #tpu.memory_space<vmem>>, vector<1x256xf32>
    %13 = vector.broadcast %12 : vector<1x256xf32> to vector<128x256xf32>
    %14 = arith.addf %11, %13 : vector<128x256xf32>
    %cst_10 = arith.constant 0.000000e+00 : f32
    %15 = vector.broadcast %cst_10 : f32 to vector<128x256xf32>
    %16 = arith.maximumf %14, %15 : vector<128x256xf32>
    %17 = arith.truncf %16 : vector<128x256xf32> to vector<128x256xbf16>
    %c0_11 = arith.constant 0 : index
    %c0_12 = arith.constant 0 : index
    %18 = vector.load %arg4[%c0_11, %c0_12] : memref<256x512xbf16, #tpu.memory_space<vmem>>, vector<256x512xbf16>
    %cst_13 = arith.constant dense<0.000000e+00> : vector<128x512xf32>
    %19 = tpu.matmul %17, %18, %cst_13 {dimension_numbers = #tpu.dot_dimension_numbers<[1], [0], [0], [1], [0, 0, 1, 1], [], []>} : vector<128x256xbf16>, vector<256x512xbf16>, vector<128x512xf32> -> vector<128x512xf32>
    %c2 = arith.constant 2 : index
    %c0_14 = arith.constant 0 : index
    %20 = vector.load %arg12[%c2, %c0_14] : memref<16x1024xf32, #tpu.memory_space<vmem>>, vector<1x512xf32>
    %21 = vector.broadcast %20 : vector<1x512xf32> to vector<128x512xf32>
    %22 = arith.addf %19, %21 : vector<128x512xf32>
    %cst_15 = arith.constant 0.000000e+00 : f32
    %23 = vector.broadcast %cst_15 : f32 to vector<128x512xf32>
    %24 = arith.maximumf %22, %23 : vector<128x512xf32>
    %25 = vector.extract_strided_slice %24 {offsets = [0, 0], sizes = [128, 128], strides = [1, 1]} : vector<128x512xf32> to vector<128x128xf32>
    %26 = vector.extract_strided_slice %24 {offsets = [0, 128], sizes = [128, 128], strides = [1, 1]} : vector<128x512xf32> to vector<128x128xf32>
    %27 = arith.maximumf %25, %26 : vector<128x128xf32>
    %28 = vector.extract_strided_slice %24 {offsets = [0, 256], sizes = [128, 128], strides = [1, 1]} : vector<128x512xf32> to vector<128x128xf32>
    %29 = vector.extract_strided_slice %24 {offsets = [0, 384], sizes = [128, 128], strides = [1, 1]} : vector<128x512xf32> to vector<128x128xf32>
    %30 = arith.maximumf %28, %29 : vector<128x128xf32>
    %31 = arith.maximumf %27, %30 : vector<128x128xf32>
    %32 = arith.truncf %31 : vector<128x128xf32> to vector<128x128xbf16>
    %c0_16 = arith.constant 0 : index
    %c0_17 = arith.constant 0 : index
    %33 = vector.load %arg5[%c0_16, %c0_17] : memref<128x256xbf16, #tpu.memory_space<vmem>>, vector<128x256xbf16>
    %cst_18 = arith.constant dense<0.000000e+00> : vector<128x256xf32>
    %34 = tpu.matmul %32, %33, %cst_18 {dimension_numbers = #tpu.dot_dimension_numbers<[1], [0], [0], [1], [0, 0, 1, 1], [], []>} : vector<128x128xbf16>, vector<128x256xbf16>, vector<128x256xf32> -> vector<128x256xf32>
    %c3 = arith.constant 3 : index
    %c0_19 = arith.constant 0 : index
    %35 = vector.load %arg12[%c3, %c0_19] : memref<16x1024xf32, #tpu.memory_space<vmem>>, vector<1x256xf32>
    %36 = vector.broadcast %35 : vector<1x256xf32> to vector<128x256xf32>
    %37 = arith.addf %34, %36 : vector<128x256xf32>
    %cst_20 = arith.constant 0.000000e+00 : f32
    %38 = vector.broadcast %cst_20 : f32 to vector<128x256xf32>
    %39 = arith.maximumf %37, %38 : vector<128x256xf32>
    %40 = arith.truncf %39 : vector<128x256xf32> to vector<128x256xbf16>
    %c0_21 = arith.constant 0 : index
    %c0_22 = arith.constant 0 : index
    %41 = vector.load %arg6[%c0_21, %c0_22] : memref<256x512xbf16, #tpu.memory_space<vmem>>, vector<256x512xbf16>
    %cst_23 = arith.constant dense<0.000000e+00> : vector<128x512xf32>
    %42 = tpu.matmul %40, %41, %cst_23 {dimension_numbers = #tpu.dot_dimension_numbers<[1], [0], [0], [1], [0, 0, 1, 1], [], []>} : vector<128x256xbf16>, vector<256x512xbf16>, vector<128x512xf32> -> vector<128x512xf32>
    %c4 = arith.constant 4 : index
    %c0_24 = arith.constant 0 : index
    %43 = vector.load %arg12[%c4, %c0_24] : memref<16x1024xf32, #tpu.memory_space<vmem>>, vector<1x512xf32>
    %44 = vector.broadcast %43 : vector<1x512xf32> to vector<128x512xf32>
    %45 = arith.addf %42, %44 : vector<128x512xf32>
    %cst_25 = arith.constant 0.000000e+00 : f32
    %46 = vector.broadcast %cst_25 : f32 to vector<128x512xf32>
    %47 = arith.maximumf %45, %46 : vector<128x512xf32>
    %48 = arith.truncf %47 : vector<128x512xf32> to vector<128x512xbf16>
    %c0_26 = arith.constant 0 : index
    %c0_27 = arith.constant 0 : index
    %49 = vector.load %arg7[%c0_26, %c0_27] : memref<512x1024xbf16, #tpu.memory_space<vmem>>, vector<512x1024xbf16>
    %cst_28 = arith.constant dense<0.000000e+00> : vector<128x1024xf32>
    %50 = tpu.matmul %48, %49, %cst_28 {dimension_numbers = #tpu.dot_dimension_numbers<[1], [0], [0], [1], [0, 0, 1, 1], [], []>} : vector<128x512xbf16>, vector<512x1024xbf16>, vector<128x1024xf32> -> vector<128x1024xf32>
    %c5 = arith.constant 5 : index
    %c0_29 = arith.constant 0 : index
    %51 = vector.load %arg12[%c5, %c0_29] : memref<16x1024xf32, #tpu.memory_space<vmem>>, vector<1x1024xf32>
    %52 = vector.broadcast %51 : vector<1x1024xf32> to vector<128x1024xf32>
    %53 = arith.addf %50, %52 : vector<128x1024xf32>
    %cst_30 = arith.constant 0.000000e+00 : f32
    %54 = vector.broadcast %cst_30 : f32 to vector<128x1024xf32>
    %55 = arith.maximumf %53, %54 : vector<128x1024xf32>
    %56 = vector.extract_strided_slice %55 {offsets = [0, 0], sizes = [128, 256], strides = [1, 1]} : vector<128x1024xf32> to vector<128x256xf32>
    %57 = vector.extract_strided_slice %55 {offsets = [0, 256], sizes = [128, 256], strides = [1, 1]} : vector<128x1024xf32> to vector<128x256xf32>
    %58 = arith.maximumf %56, %57 : vector<128x256xf32>
    %59 = vector.extract_strided_slice %55 {offsets = [0, 512], sizes = [128, 256], strides = [1, 1]} : vector<128x1024xf32> to vector<128x256xf32>
    %60 = vector.extract_strided_slice %55 {offsets = [0, 768], sizes = [128, 256], strides = [1, 1]} : vector<128x1024xf32> to vector<128x256xf32>
    %61 = arith.maximumf %59, %60 : vector<128x256xf32>
    %62 = arith.maximumf %58, %61 : vector<128x256xf32>
    %63 = tpu.concatenate %62, %0 in 1 : vector<128x256xf32>, vector<128x128xf32> -> vector<128x384xf32>
    %c0_31 = arith.constant 0 : index
    %c0_32 = arith.constant 0 : index
    %64 = vector.load %arg8[%c0_31, %c0_32] : memref<384x32xf32, #tpu.memory_space<vmem>>, vector<384x32xf32>
    %cst_33 = arith.constant dense<0.000000e+00> : vector<128x32xf32>
    %65 = tpu.matmul %63, %64, %cst_33 {dimension_numbers = #tpu.dot_dimension_numbers<[1], [0], [0], [1], [0, 0, 1, 1], [], []>} : vector<128x384xf32>, vector<384x32xf32>, vector<128x32xf32> -> vector<128x32xf32>
    %c6 = arith.constant 6 : index
    %c0_34 = arith.constant 0 : index
    %66 = vector.load %arg12[%c6, %c0_34] : memref<16x1024xf32, #tpu.memory_space<vmem>>, vector<1x32xf32>
    %67 = vector.broadcast %66 : vector<1x32xf32> to vector<128x32xf32>
    %68 = arith.addf %65, %67 : vector<128x32xf32>
    %cst_35 = arith.constant 0.000000e+00 : f32
    %69 = vector.broadcast %cst_35 : f32 to vector<128x32xf32>
    %70 = arith.maximumf %68, %69 : vector<128x32xf32>
    %c0_36 = arith.constant 0 : index
    %c0_37 = arith.constant 0 : index
    %71 = vector.load %arg9[%c0_36, %c0_37] : memref<32x32xf32, #tpu.memory_space<vmem>>, vector<32x32xf32>
    %cst_38 = arith.constant dense<0.000000e+00> : vector<128x32xf32>
    %72 = tpu.matmul %70, %71, %cst_38 {dimension_numbers = #tpu.dot_dimension_numbers<[1], [0], [0], [1], [0, 0, 1, 1], [], []>} : vector<128x32xf32>, vector<32x32xf32>, vector<128x32xf32> -> vector<128x32xf32>
    %c7 = arith.constant 7 : index
    %c0_39 = arith.constant 0 : index
    %73 = vector.load %arg12[%c7, %c0_39] : memref<16x1024xf32, #tpu.memory_space<vmem>>, vector<1x32xf32>
    %74 = vector.broadcast %73 : vector<1x32xf32> to vector<128x32xf32>
    %75 = arith.addf %72, %74 : vector<128x32xf32>
    %cst_40 = arith.constant 0.000000e+00 : f32
    %76 = vector.broadcast %cst_40 : f32 to vector<128x32xf32>
    %77 = arith.maximumf %75, %76 : vector<128x32xf32>
    %c0_41 = arith.constant 0 : index
    %c0_42 = arith.constant 0 : index
    %78 = vector.load %arg10[%c0_41, %c0_42] : memref<32x32xf32, #tpu.memory_space<vmem>>, vector<32x32xf32>
    %cst_43 = arith.constant dense<0.000000e+00> : vector<128x32xf32>
    %79 = tpu.matmul %77, %78, %cst_43 {dimension_numbers = #tpu.dot_dimension_numbers<[1], [0], [0], [1], [0, 0, 1, 1], [], []>} : vector<128x32xf32>, vector<32x32xf32>, vector<128x32xf32> -> vector<128x32xf32>
    %c8 = arith.constant 8 : index
    %c0_44 = arith.constant 0 : index
    %80 = vector.load %arg12[%c8, %c0_44] : memref<16x1024xf32, #tpu.memory_space<vmem>>, vector<1x32xf32>
    %81 = vector.broadcast %80 : vector<1x32xf32> to vector<128x32xf32>
    %82 = arith.addf %79, %81 : vector<128x32xf32>
    %83 = arith.addf %82, %70 : vector<128x32xf32>
    %cst_45 = arith.constant 0.000000e+00 : f32
    %84 = vector.broadcast %cst_45 : f32 to vector<128x32xf32>
    %85 = arith.maximumf %83, %84 : vector<128x32xf32>
    %86 = tpu.concatenate %0, %85 in 1 : vector<128x128xf32>, vector<128x32xf32> -> vector<128x160xf32>
    %c0_46 = arith.constant 0 : index
    %c0_47 = arith.constant 0 : index
    %87 = vector.load %arg11[%c0_46, %c0_47] : memref<160x512xf32, #tpu.memory_space<vmem>>, vector<160x512xf32>
    %cst_48 = arith.constant dense<0.000000e+00> : vector<128x512xf32>
    %88 = tpu.matmul %86, %87, %cst_48 {dimension_numbers = #tpu.dot_dimension_numbers<[1], [0], [0], [1], [0, 0, 1, 1], [], []>} : vector<128x160xf32>, vector<160x512xf32>, vector<128x512xf32> -> vector<128x512xf32>
    %c9 = arith.constant 9 : index
    %c0_49 = arith.constant 0 : index
    %89 = vector.load %arg12[%c9, %c0_49] : memref<16x1024xf32, #tpu.memory_space<vmem>>, vector<1x512xf32>
    %90 = vector.broadcast %89 : vector<1x512xf32> to vector<128x512xf32>
    %91 = arith.addf %88, %90 : vector<128x512xf32>
    %92 = vector.extract_strided_slice %91 {offsets = [0, 0], sizes = [128, 32], strides = [1, 1]} : vector<128x512xf32> to vector<128x32xf32>
    %93 = arith.negf %92 : vector<128x32xf32>
    %94 = math.exp %93 : vector<128x32xf32>
    %cst_50 = arith.constant 1.000000e+00 : f32
    %95 = vector.broadcast %cst_50 : f32 to vector<128x32xf32>
    %96 = arith.addf %95, %94 : vector<128x32xf32>
    %97 = arith.divf %95, %96 : vector<128x32xf32>
    %98 = vector.extract_strided_slice %91 {offsets = [0, 128], sizes = [128, 32], strides = [1, 1]} : vector<128x512xf32> to vector<128x32xf32>
    %99 = arith.negf %98 : vector<128x32xf32>
    %100 = math.exp %99 : vector<128x32xf32>
    %cst_51 = arith.constant 1.000000e+00 : f32
    %101 = vector.broadcast %cst_51 : f32 to vector<128x32xf32>
    %102 = arith.addf %101, %100 : vector<128x32xf32>
    %103 = arith.divf %101, %102 : vector<128x32xf32>
    %104 = vector.extract_strided_slice %91 {offsets = [0, 256], sizes = [128, 32], strides = [1, 1]} : vector<128x512xf32> to vector<128x32xf32>
    %105 = math.tanh %104 : vector<128x32xf32>
    %106 = vector.extract_strided_slice %91 {offsets = [0, 384], sizes = [128, 32], strides = [1, 1]} : vector<128x512xf32> to vector<128x32xf32>
    %107 = arith.negf %106 : vector<128x32xf32>
    %108 = math.exp %107 : vector<128x32xf32>
    %cst_52 = arith.constant 1.000000e+00 : f32
    %109 = vector.broadcast %cst_52 : f32 to vector<128x32xf32>
    %110 = arith.addf %109, %108 : vector<128x32xf32>
    %111 = arith.divf %109, %110 : vector<128x32xf32>
    %112 = vector.extract_strided_slice %0 {offsets = [0, 0], sizes = [128, 32], strides = [1, 1]} : vector<128x128xf32> to vector<128x32xf32>
    %113 = arith.mulf %103, %112 : vector<128x32xf32>
    %114 = arith.mulf %97, %105 : vector<128x32xf32>
    %115 = arith.addf %113, %114 : vector<128x32xf32>
    %116 = math.tanh %115 : vector<128x32xf32>
    %117 = arith.mulf %111, %116 : vector<128x32xf32>
    %cst_53 = arith.constant 0.000000e+00 : f32
    %118 = vector.broadcast %cst_53 : f32 to vector<128x32xf32>
    %119 = tpu.concatenate %85, %117, %115, %118 in 1 : vector<128x32xf32>, vector<128x32xf32>, vector<128x32xf32>, vector<128x32xf32> -> vector<128x128xf32>
    %c0_54 = arith.constant 0 : index
    %c0_55 = arith.constant 0 : index
    %120 = vector.load %arg13[%c0_54, %c0_55] : memref<128x128xf32, #tpu.memory_space<vmem>>, vector<128x128xf32>
    tpu.vector_store %arg13[%c0_54, %c0_55], %119 {strides = array<i32>} : memref<128x128xf32, #tpu.memory_space<vmem>>, vector<128x128xf32>,
    return
  }
  func.func @transform_0(%arg0: i32) -> (i32, i32) {
    %c0_i32 = arith.constant 0 : i32
    %c0_i32_0 = arith.constant 0 : i32
    return %arg0, %c0_i32 : i32, i32
  }
  func.func @transform_1(%arg0: i32) -> (i32, i32) {
    %c0_i32 = arith.constant 0 : i32
    %c0_i32_0 = arith.constant 0 : i32
    %c0_i32_1 = arith.constant 0 : i32
    return %c0_i32, %c0_i32_0 : i32, i32
  }
  func.func @transform_2(%arg0: i32) -> (i32, i32) {
    %c0_i32 = arith.constant 0 : i32
    %c0_i32_0 = arith.constant 0 : i32
    %c0_i32_1 = arith.constant 0 : i32
    return %c0_i32, %c0_i32_0 : i32, i32
  }
  func.func @transform_3(%arg0: i32) -> (i32, i32) {
    %c0_i32 = arith.constant 0 : i32
    %c0_i32_0 = arith.constant 0 : i32
    %c0_i32_1 = arith.constant 0 : i32
    return %c0_i32, %c0_i32_0 : i32, i32
  }
  func.func @transform_4(%arg0: i32) -> (i32, i32) {
    %c0_i32 = arith.constant 0 : i32
    %c0_i32_0 = arith.constant 0 : i32
    %c0_i32_1 = arith.constant 0 : i32
    return %c0_i32, %c0_i32_0 : i32, i32
  }
  func.func @transform_5(%arg0: i32) -> (i32, i32) {
    %c0_i32 = arith.constant 0 : i32
    %c0_i32_0 = arith.constant 0 : i32
    %c0_i32_1 = arith.constant 0 : i32
    return %c0_i32, %c0_i32_0 : i32, i32
  }
  func.func @transform_6(%arg0: i32) -> (i32, i32) {
    %c0_i32 = arith.constant 0 : i32
    %c0_i32_0 = arith.constant 0 : i32
    %c0_i32_1 = arith.constant 0 : i32
    return %c0_i32, %c0_i32_0 : i32, i32
  }
  func.func @transform_7(%arg0: i32) -> (i32, i32) {
    %c0_i32 = arith.constant 0 : i32
    %c0_i32_0 = arith.constant 0 : i32
    %c0_i32_1 = arith.constant 0 : i32
    return %c0_i32, %c0_i32_0 : i32, i32
  }
  func.func @transform_8(%arg0: i32) -> (i32, i32) {
    %c0_i32 = arith.constant 0 : i32
    %c0_i32_0 = arith.constant 0 : i32
    %c0_i32_1 = arith.constant 0 : i32
    return %c0_i32, %c0_i32_0 : i32, i32
  }
  func.func @transform_9(%arg0: i32) -> (i32, i32) {
    %c0_i32 = arith.constant 0 : i32
    %c0_i32_0 = arith.constant 0 : i32
    %c0_i32_1 = arith.constant 0 : i32
    return %c0_i32, %c0_i32_0 : i32, i32
  }
  func.func @transform_10(%arg0: i32) -> (i32, i32) {
    %c0_i32 = arith.constant 0 : i32
    %c0_i32_0 = arith.constant 0 : i32
    %c0_i32_1 = arith.constant 0 : i32
    return %c0_i32, %c0_i32_0 : i32, i32
  }
  func.func @transform_11(%arg0: i32) -> (i32, i32) {
    %c0_i32 = arith.constant 0 : i32
    %c0_i32_0 = arith.constant 0 : i32
    %c0_i32_1 = arith.constant 0 : i32
    return %c0_i32, %c0_i32_0 : i32, i32
  }
  func.func @transform_12(%arg0: i32) -> (i32, i32) {
    %c0_i32 = arith.constant 0 : i32
    %c0_i32_0 = arith.constant 0 : i32
    return %arg0, %c0_i32 : i32, i32
  }
}

</mosaic_0001>

<bundles_post_ra>
// kernel: observation_encoder_forward.1
= control target key start
LH: loop header
LB: loop body
LE: loop exit
PB: predicated region body
PF: predicated region fallthrough
CT: control target
= control target key end

     0   :  { %17 = vsyncpa [#allocation3], 0  ;;  %s12560_s0 = inlined_call_operand.vmem [shape: f32[256,128], index: 0, kind: input, shape index: {}]   ;;  %s12561_s1 = inlined_call_operand.hbm [shape: bf16[128,128], index: 1, kind: input, shape index: {}]   ;;  %s12562_s2 = inlined_call_operand.vmem [shape: bf16[128,256], index: 2, kind: input, shape index: {}]   ;;  %s12563_s3 = inlined_call_operand.hbm [shape: bf16[256,512], index: 3, kind: input, shape index: {}]   ;;  %s12564_s4 = inlined_call_operand.vmem [shape: bf16[128,256], index: 4, kind: input, shape index: {}]   ;;  %s12565_s5 = inlined_call_operand.hbm [shape: bf16[256,512], index: 5, kind: input, shape index: {}]   ;;  %s12566_s6 = inlined_call_operand.vmem [shape: bf16[512,1024], index: 6, kind: input, shape index: {}]   ;;  %s12567_s7 = inlined_call_operand.vmem [shape: f32[384,32], index: 7, kind: input, shape index: {}]   ;;  %s12568_s8 = inlined_call_operand.vmem [shape: f32[32,32], index: 8, kind: input, shape index: {}]   ;;  %s12569_s9 = inlined_call_operand.hbm [shape: f32[32,32], index: 9, kind: input, shape index: {}]   ;;  %s12570_s10 = inlined_call_operand.vmem [shape: f32[160,512], index: 10, kind: input, shape index: {}]   ;;  %s12571_s11 = inlined_call_operand.vmem [shape: f32[16,1024], index: 11, kind: input, shape index: {}]   ;;  %s12572_s12 = inlined_call_operand.vmem [shape: f32[256,128], index: 12, kind: output, shape index: {}]  }
   0x1   :  { %18 = vsyncpa [#allocation5], 0 }
   0x2   :  { %19 = vsyncpa [#allocation8], 0  ;;  %s9087_s21 = smov 0  }
   0x3 LB: > { %s9009_s22 = smov [#allocation4]   ;;  %s7366_s24 = sadd.s32 4294967295, %s9007_s21   ;;  %s9007_s21 = sphi %s9087_s21, %s25_s21  }
   0x4   : > { %s341_s23 = sshll.u32 %s9009_s22, 4  ;;  %p7368_p0 = scmp.ge.s32.totalorder %s9007_s21, 1  ;;  %s342_s23 = int_to_ptr.vmem [resolvable:$true] %s341_s23 }
   0x5   : > { %p313_p1 = scmp.lt.s32.totalorder %s9007_s21, 3  ;;  %p9097_p2 = scmp.eq.s32.totalorder %s7366_s24, 0 }
   0x6   : > { %s9010_s27 = smov [#allocation2]   ;;  %s9011_s30 = smov [#allocation6]  }
   0x7   : > { %p9101_p3 = pnand %p7368_p0, %p313_p1  ;;  %s325_s28 = sshll.u32 %s9010_s27, 4  ;;  %s9107_s28 = int_to_ptr.vmem [resolvable:$true] %s325_s28 }
   0x8   : > { %s9115_s13 = sshll.u32 %s9011_s30, 4  ;;  %s8896_s14 = scalar_lea.vmem %s342_s23, 8192  ;;  %s358_s13 = int_to_ptr.vmem [resolvable:$true] %s9115_s13 }
   0x9   : > { %p8296_p4 = pneg %p9101_p3  ;;  %p8897_p7 = scmp.ne.s32.totalorder %s342_s23, %s8896_s14 }
   0xa   : > { %p8904_p10 = scmp.lt.s32.totalorder %s342_s23, %s342_s23  ;;  %p8905_p11 = scmp.lt.s32.totalorder %s8896_s14, %s8896_s14 }
   0xb   : > { %p9111_p5 = pnand %p9097_p2, %p8296_p4 }
   0xc   : > { %p8906_p12 = por %p8905_p11, %p8904_p10 }
   0xd   : > { %p8887_p6 = pneg %p9111_p5 }
   0xf   : > { %p8899_p8 = pnand %p8897_p7, %p8887_p6 }
  0x11   : > { %p8900_p9 = pneg %p8899_p8 }
  0x13   : > { %p8907_p13 = pnand %p8906_p12, %p8900_p9 }
  0x15   : > { %8910 = shalt.err (!%p8907_p13)
}
  0x16   : > { %s9012_s15 = smov 256   ;;  %s9013_s16 = smov 16  }
  0x17   : > { %8302 = dma.hbm_to_vmem [thread:$0]  (!%p9111_p5), %s12563_s3, 8192, %s342_s23, [#allocation5], %s9012_s15, %s9012_s15, %s9013_s16  }
  0x18   : > { %s8922_s19 = scalar_lea.vmem %s9107_s28, 1024  ;;  %p8930_p7 = scmp.lt.s32.totalorder %s9107_s28, %s9107_s28 }
  0x19   : > { %p8923_p0 = scmp.ne.s32.totalorder %s9107_s28, %s8922_s19  ;;  %p8931_p8 = scmp.lt.s32.totalorder %s8922_s19, %s8922_s19 }
  0x1b   : > { %p8925_p1 = pnand %p8923_p0, %p8887_p6  ;;  %p8932_p9 = por %p8931_p8, %p8930_p7 }
  0x1d   : > { %p8926_p4 = pneg %p8925_p1 }
  0x1f   : > { %p8933_p10 = pnand %p8932_p9, %p8926_p4 }
  0x21   : > { %8936 = shalt.err (!%p8933_p10)
}
  0x22   : > { %s9014_s20 = smov 64   ;;  %s9015_s22 = smov 4  }
  0x23   : > { %8299 = dma.hbm_to_vmem [thread:$0]  (!%p9111_p5), %s12561_s1, 1024, %s9107_s28, [#allocation3], %s9014_s20, %s9014_s20, %s9015_s22  }
  0x24   : > { %s9016_s30 = smov [#allocation7]   ;;  %s8948_s17 = scalar_lea.vmem %s358_s13, 8192 }
  0x25   : > { %s379_s14 = sshll.u32 %s9016_s30, 4  ;;  %p8949_p11 = scmp.ne.s32.totalorder %s358_s13, %s8948_s17  ;;  %s380_s14 = int_to_ptr.vmem [resolvable:$true] %s379_s14 }
  0x26   : > { %p8956_p0 = scmp.lt.s32.totalorder %s358_s13, %s358_s13  ;;  %p8957_p1 = scmp.lt.s32.totalorder %s8948_s17, %s8948_s17 }
  0x27   : > { %p8951_p12 = pnand %p8949_p11, %p8887_p6 }
  0x28   : > { %p8958_p4 = por %p8957_p1, %p8956_p0 }
  0x29   : > { %p8952_p13 = pneg %p8951_p12 }
  0x2b   : > { %p8959_p7 = pnand %p8958_p4, %p8952_p13 }
  0x2d   : > { %8962 = shalt.err (!%p8959_p7)
}
  0x2e   : > { %8305 = dma.hbm_to_vmem [thread:$0]  (!%p9111_p5), %s12565_s5, 8192, %s358_s13, [#allocation5], %s9012_s15, %s9012_s15, %s9013_s16  }
  0x2f   : > { %s8974_s19 = scalar_lea.vmem %s380_s14, 512  ;;  %p8982_p11 = scmp.lt.s32.totalorder %s380_s14, %s380_s14 }
  0x30   : > { %p8975_p8 = scmp.ne.s32.totalorder %s380_s14, %s8974_s19  ;;  %p8983_p12 = scmp.lt.s32.totalorder %s8974_s19, %s8974_s19 }
  0x32   : > { %p8977_p9 = pnand %p8975_p8, %p8887_p6  ;;  %p8984_p13 = por %p8983_p12, %p8982_p11 }
  0x34   : > { %p8978_p10 = pneg %p8977_p9 }
  0x36   : > { %p8985_p0 = pnand %p8984_p13, %p8978_p10 }
  0x38   : > { %8988 = shalt.err (!%p8985_p0)
}
  0x39   : > { %s9017_s20 = smov 128   ;;  %s9018_s22 = smov 8  }
  0x3a   : > { %8308 = dma.hbm_to_vmem [thread:$0]  (!%p9111_p5), %s12569_s9, 512, %s380_s14, [#allocation8], %s9017_s20, %s9017_s20, %s9018_s22  }
  0x3b   : > { %410 = sbr.rel (%p9101_p3) target bundleno = 2611 (0xa33), region = 68 }
  0x40   : > { %8994 = dma.done.wait (%p9097_p2), [#allocation3], 1024  }
  0x41   : > { %8996 = vsyncadd (%p9097_p2), [#allocation3], 4294966272 }
  0x42   : > { %8998 = dma.done.wait (%p9097_p2), [#allocation5], 16384  }
  0x43   : > { %9000 = vsyncadd (%p9097_p2), [#allocation5], 4294950912 }
  0x44   : > { %9002 = dma.done.wait (%p9097_p2), [#allocation8], 512  }
  0x45   : > { %9004 = vsyncadd (%p9097_p2), [#allocation8], 4294966784  ;;  %s7379_s26 = sshll.u32 %s7366_s24, 4  ;;  %v8338_v0 = vld [vmem:[#allocation2 + $0x38] sm:$0xff]   ;;  %v8339_v1 = vld [vmem:[#allocation2 + $0x30] sm:$0xff]   ;;  %v9019_v48 = vmov 0  }
  0x46   : > { %p465_p3 = scmp.lt.s32.totalorder %s7379_s26, 31  ;;  %8096 = vmatprep.subr.bf16.mxu0 %v8338_v0  ;;  %v8340_v2 = vld [vmem:[#allocation2 + $0x28] sm:$0xff]   ;;  %v8341_v3 = vld [vmem:[#allocation2 + $0x20] sm:$0xff]   ;;  %v8342_v7 = vld [vmem:[#allocation2 + $0x18] sm:$0xff]   ;;  %828 = vmatprep.mubr.bf16.mxu1 %v9019_v48  ;;  %vm5778_vm0 = vcmask 261120   ;;  %s9020_s30 = smov 64  }
  0x47   : > { %8097 = vmatpush3.bf16.msra.mxu0 %v8338_v0  ;;  %v8346_v8 = vld [vmem:[%s12562_s2 + $0x74] ss:$8 sps:$4 sm:$0xff]   ;;  %v8348_v9 = vld [vmem:[%s12562_s2 + $0x70] ss:$8 sps:$4 sm:$0xff]   ;;  %v8349_v10 = vld [vmem:[%s12562_s2 + $0x64] ss:$8 sps:$4 sm:$0xff]  }
  0x48   : > { %s12758_s26 = smov (!%p465_p3, %s7379_s26), 31  ;;  %8098 = vmatprep.subr.bf16.mxu0 %v8339_v1  ;;  %v8343_v11 = vld [vmem:[#allocation2 + $0x10] sm:$0xff]   ;;  %796 = vmatprep.subr.bf16.mxu1 %v8346_v8  ;;  %v8351_v12 = vld [vmem:[%s12562_s2 + $0x60] ss:$8 sps:$4 sm:$0xff]   ;;  %v8355_v16 = vld [vmem:[%s12562_s2 + $0x44] ss:$8 sps:$4 sm:$0xff]  }
  0x49   : > { %s7380_s29 = sshll.u32 %s12758_s26, 3  ;;  %797 = vmatpush1.bf16.msra.mxu1 %v8348_v9  ;;  %v8352_v13 = vld [vmem:[%s12562_s2 + $0x54] ss:$8 sps:$4 sm:$0xff]   ;;  %v8344_v14 = vld [vmem:[#allocation2 + $0x8] sm:$0xff]   ;;  %v8354_v15 = vld [vmem:[%s12562_s2 + $0x50] ss:$8 sps:$4 sm:$0xff]  }
  0x4a   : > { %s9187_s25 = scalar_lea.vmem %s12560_s0, %s7380_s29  ;;  %798 = vmatprep.subr.bf16.mxu1 %v8349_v10  ;;  %v8345_v17 = vld [vmem:[#allocation2] sm:$0xff]   ;;  %v8358_v19 = vld [vmem:[%s12562_s2 + $0x34] ss:$8 sps:$4 sm:$0xff]   ;;  %v8360_v24 = vld [vmem:[%s12562_s2 + $0x30] ss:$8 sps:$4 sm:$0xff]   ;;  %s9021_s14 = smov 32  }
  0x4b   : > { %8099 = vmatpush3.bf16.msra.mxu0 %v8339_v1  ;;  %v477_v4 = vld [vmem:[%s9187_s25] sm:$0xff]  ;;  %v478_v5 = vld [vmem:[%s9187_s25 + $0x8] sm:$0xff]  ;;  %v479_v20 = vld [vmem:[%s9187_s25 + $0x10] sm:$0xff]  ;;  %vm7219_vm1 = vcmask 523264   ;;  %vm7236_vm2 = vcmask 785408   ;;  %s12475_s28 = scalar_lea.vmem %s12572_s12, %s7380_s29 }
  0x4c   : > { %8100 = vmatprep.subr.bf16.mxu0 %v8340_v2  ;;  %v493_v6 = vpack.c.bf16 %v478_v5, %v477_v4  ;;  %v8357_v18 = vld [vmem:[%s12562_s2 + $0x40] ss:$8 sps:$4 sm:$0xff]   ;;  %v480_v21 = vld [vmem:[%s9187_s25 + $0x18] sm:$0xff]  ;;  %v483_v27 = vld [vmem:[%s9187_s25 + $0x30] sm:$0xff] }
  0x4d   : > { %799 = vmatpush1.bf16.msra.mxu1 %v8351_v12  ;;  %v481_v22 = vld [vmem:[%s9187_s25 + $0x20] sm:$0xff]  ;;  %v482_v23 = vld [vmem:[%s9187_s25 + $0x28] sm:$0xff]  ;;  %v494_v25 = vpack.c.bf16 %v480_v21, %v479_v20  ;;  %v484_v28 = vld [vmem:[%s9187_s25 + $0x38] sm:$0xff] }
  0x4e   : > { %8112 = vmatprep.mubr.bf16.mxu0 %v493_v6  ;;  %800 = vmatprep.subr.bf16.mxu1 %v8352_v13  ;;  %v495_v26 = vpack.c.bf16 %v482_v23, %v481_v22  ;;  %v485_v29 = vld [vmem:[%s9187_s25 + $0x40] sm:$0xff]  ;;  %v486_v30 = vld [vmem:[%s9187_s25 + $0x48] sm:$0xff]  ;;  %v496_v31 = vpack.c.bf16 %v484_v28, %v483_v27  ;;  %v487_v33 = vld [vmem:[%s9187_s25 + $0x50] sm:$0xff] }
  0x4f   : > { %8101 = vmatpush3.bf16.msra.mxu0 %v8340_v2  ;;  %v497_v32 = vpack.c.bf16 %v486_v30, %v485_v29  ;;  %v488_v34 = vld [vmem:[%s9187_s25 + $0x58] sm:$0xff]  ;;  %v489_v35 = vld [vmem:[%s9187_s25 + $0x60] sm:$0xff]  ;;  %v490_v36 = vld [vmem:[%s9187_s25 + $0x68] sm:$0xff] }
  0x50   : > { %8102 = vmatprep.subr.bf16.mxu0 %v8341_v3  ;;  %v498_v37 = vpack.c.bf16 %v488_v34, %v487_v33  ;;  %v499_v38 = vpack.c.bf16 %v490_v36, %v489_v35  ;;  %v491_v39 = vld [vmem:[%s9187_s25 + $0x70] sm:$0xff]  ;;  %v492_v40 = vld [vmem:[%s9187_s25 + $0x78] sm:$0xff]  ;;  %v8361_v42 = vld [vmem:[%s12562_s2 + $0x24] ss:$8 sps:$4 sm:$0xff]  }
  0x51   : > { %801 = vmatpush1.bf16.msra.mxu1 %v8354_v15  ;;  %v500_v41 = vpack.c.bf16 %v492_v40, %v491_v39  ;;  %v8363_v43 = vld [vmem:[%s12562_s2 + $0x20] ss:$8 sps:$4 sm:$0xff]   ;;  %v8364_v44 = vld [vmem:[%s12562_s2 + $0x14] ss:$8 sps:$4 sm:$0xff]   ;;  %v8366_v45 = vld [vmem:[%s12562_s2 + $0x10] ss:$8 sps:$4 sm:$0xff]  }
  0x52   : > { %802 = vmatprep.subr.bf16.mxu1 %v8355_v16  ;;  %v8367_v46 = vld [vmem:[%s12562_s2 + $0x4] ss:$8 sps:$4 sm:$0xff]   ;;  %v8369_v47 = vld [vmem:[%s12562_s2] ss:$8 sps:$4 sm:$0xff]  }
  0x53   : > { %8103 = vmatpush3.bf16.msra.mxu0 %v8341_v3  ;;  %v8372_v49 = vld [vmem:[#allocation4 + $0xec] ss:$16 sps:$4 sm:$0xff]   ;;  %v8373_v50 = vld [vmem:[#allocation4 + $0xe0] ss:$16 sps:$4 sm:$0xff]   ;;  %v8375_v51 = vld [vmem:[#allocation4 + $0xe4] ss:$16 sps:$4 sm:$0xff]  }
  0x54   : > { %8104 = vmatprep.subr.bf16.mxu0 %v8342_v7  ;;  %v8381_v52 = vld [vmem:[#allocation4 + $0xc4] ss:$16 sps:$4 sm:$0xff]   ;;  %v8379_v53 = vld [vmem:[#allocation4 + $0xc0] ss:$16 sps:$4 sm:$0xff]   ;;  %v8370_v23 = vld [vmem:[#allocation4 + $0xe8] ss:$16 sps:$4 sm:$0xff]  }
  0x55   : > { %803 = vmatpush1.bf16.msra.mxu1 %v8357_v18  ;;  %v8387_v54 = vld [vmem:[#allocation4 + $0xa4] ss:$16 sps:$4 sm:$0xff]   ;;  %v8385_v55 = vld [vmem:[#allocation4 + $0xa0] ss:$16 sps:$4 sm:$0xff]   ;;  %v8376_v29 = vld [vmem:[#allocation4 + $0xc8] ss:$16 sps:$4 sm:$0xff]  }
  0x56   : > { %804 = vmatprep.subr.bf16.mxu1 %v8358_v19  ;;  %v8393_v56 = vld [vmem:[#allocation4 + $0x84] ss:$16 sps:$4 sm:$0xff]   ;;  %v8391_v57 = vld [vmem:[#allocation4 + $0x80] ss:$16 sps:$4 sm:$0xff]   ;;  %v8382_v34 = vld [vmem:[#allocation4 + $0xa8] ss:$16 sps:$4 sm:$0xff]  }
  0x57   : > { %8105 = vmatpush3.bf16.msra.mxu0 %v8342_v7  ;;  %v8399_v58 = vld [vmem:[#allocation4 + $0x64] ss:$16 sps:$4 sm:$0xff]   ;;  %v8397_v59 = vld [vmem:[#allocation4 + $0x60] ss:$16 sps:$4 sm:$0xff]   ;;  %v8388_v40 = vld [vmem:[#allocation4 + $0x88] ss:$16 sps:$4 sm:$0xff]  }
  0x58   : > { %8106 = vmatprep.subr.bf16.mxu0 %v8343_v11  ;;  %v8405_v60 = vld [vmem:[#allocation4 + $0x44] ss:$16 sps:$4 sm:$0xff]   ;;  %v8403_v61 = vld [vmem:[#allocation4 + $0x40] ss:$16 sps:$4 sm:$0xff]  }
  0x59   : > { %805 = vmatpush1.bf16.msra.mxu1 %v8360_v24  ;;  %v8411_v62 = vld [vmem:[#allocation4 + $0x24] ss:$16 sps:$4 sm:$0xff]   ;;  %v8409_v63 = vld [vmem:[#allocation4 + $0x20] ss:$16 sps:$4 sm:$0xff]  }
  0x5a   : > { %806 = vmatprep.subr.bf16.mxu1 %v8361_v42  ;;  %v8417_v0 = vld [vmem:[#allocation4 + $0x4] ss:$16 sps:$4 sm:$0xff]   ;;  %v8415_v1 = vld [vmem:[#allocation4] ss:$16 sps:$4 sm:$0xff]  }
  0x5b   : > { %8107 = vmatpush3.bf16.msra.mxu0 %v8343_v11  ;;  %v8423_v2 = vld [vmem:[#allocation4 + $0x1e4] ss:$16 sps:$4 sm:$0xff]   ;;  %v8421_v3 = vld [vmem:[#allocation4 + $0x1e0] ss:$16 sps:$4 sm:$0xff]  }
  0x5c   : > { %8108 = vmatprep.subr.bf16.mxu0 %v8344_v14  ;;  %v8429_v4 = vld [vmem:[#allocation4 + $0x1c4] ss:$16 sps:$4 sm:$0xff]   ;;  %v8427_v5 = vld [vmem:[#allocation4 + $0x1c0] ss:$16 sps:$4 sm:$0xff]  }
  0x5d   : > { %807 = vmatpush1.bf16.msra.mxu1 %v8363_v43  ;;  %v8435_v6 = vld [vmem:[#allocation4 + $0x1a4] ss:$16 sps:$4 sm:$0xff]   ;;  %v8433_v7 = vld [vmem:[#allocation4 + $0x1a0] ss:$16 sps:$4 sm:$0xff]   ;;  %v8396_v43 = vld [vmem:[#allocation4 + $0x6c] ss:$16 sps:$4 sm:$0xff]  }
  0x5e   : > { %808 = vmatprep.subr.bf16.mxu1 %v8364_v44  ;;  %v8441_v8 = vld [vmem:[#allocation4 + $0x184] ss:$16 sps:$4 sm:$0xff]   ;;  %v8439_v9 = vld [vmem:[#allocation4 + $0x180] ss:$16 sps:$4 sm:$0xff]  }
  0x5f   : > { %8109 = vmatpush3.bf16.msra.mxu0 %v8344_v14  ;;  %v8447_v10 = vld [vmem:[#allocation4 + $0x164] ss:$16 sps:$4 sm:$0xff]   ;;  %v8445_v11 = vld [vmem:[#allocation4 + $0x160] ss:$16 sps:$4 sm:$0xff]  }
  0x60   : > { %8110 = vmatprep.subr.bf16.mxu0 %v8345_v17  ;;  %v9257_v14 = vld [vmem:[%s12571_s11] ss:$0 sm:$0xff] }
  0x61   : > { %809 = vmatpush1.bf16.msra.mxu1 %v8366_v45  ;;  %v8394_v45 = vld [vmem:[#allocation4 + $0x68] ss:$16 sps:$4 sm:$0xff]  }
  0x62   : > { %810 = vmatprep.subr.bf16.mxu1 %v8367_v46 }
  0x63   : > { %8111 = vmatpush3.bf16.msra.mxu0 %v8345_v17 }
  0x64   : > { %1364 = vmatprep.subr.bf16.mxu0 %v8375_v51 }
  0x65   : > { %811 = vmatpush1.bf16.msra.mxu1 %v8369_v47 }
  0x66   : > { %8113 = vmatmul.mubr.bf16.vlgmr.msra.gmra.mxu0 %v494_v25  ;;  %1477 = vmatprep.subr.bf16.mxu1 %v8372_v49 }
  0x67   : > { %8116 = vmatprep.mubr.bf16.mxu0 %v495_v26  ;;  %1365 = vmatpush1.bf16.msra.mxu0 %v8373_v50  ;;  %v8378_v26 = vld [vmem:[#allocation4 + $0xcc] ss:$16 sps:$4 sm:$0xff]  }
  0x68   : > { %1366 = vmatprep.subr.bf16.mxu0 %v8381_v52  ;;  %v8402_v50 = vld [vmem:[#allocation4 + $0x4c] ss:$16 sps:$4 sm:$0xff]   ;;  %v8400_v52 = vld [vmem:[#allocation4 + $0x48] ss:$16 sps:$4 sm:$0xff]  }
  0x6b   : > { %1367 = vmatpush1.bf16.msra.mxu0 %v8379_v53 }
  0x6c   : > { %1368 = vmatprep.subr.bf16.mxu0 %v8387_v54 }
  0x6e   : > { %8117 = vmatmul.mubr.bf16.gmra.mxu0 %v496_v31  ;;  %v8384_v31 = vld [vmem:[#allocation4 + $0xac] ss:$16 sps:$4 sm:$0xff]  }
  0x6f   : > { %8120 = vmatprep.mubr.bf16.mxu0 %v497_v32  ;;  %1369 = vmatpush1.bf16.msra.mxu0 %v8385_v55  ;;  %v8408_v55 = vld [vmem:[#allocation4 + $0x2c] ss:$16 sps:$4 sm:$0xff]  }
  0x70   : > { %1370 = vmatprep.subr.bf16.mxu0 %v8393_v56 }
  0x73   : > { %1371 = vmatpush1.bf16.msra.mxu0 %v8391_v57  ;;  %v8406_v57 = vld [vmem:[#allocation4 + $0x28] ss:$16 sps:$4 sm:$0xff]  }
  0x74   : > { %1372 = vmatprep.subr.bf16.mxu0 %v8399_v58 }
  0x76   : > { %8121 = vmatmul.mubr.bf16.gmra.mxu0 %v498_v37 }
  0x77   : > { %8124 = vmatprep.mubr.bf16.mxu0 %v499_v38  ;;  %1373 = vmatpush1.bf16.msra.mxu0 %v8397_v59  ;;  %v8390_v38 = vld [vmem:[#allocation4 + $0x8c] ss:$16 sps:$4 sm:$0xff]  }
  0x78   : > { %1374 = vmatprep.subr.bf16.mxu0 %v8405_v60 }
  0x7b   : > { %1375 = vmatpush1.bf16.msra.mxu0 %v8403_v61  ;;  %v8414_v61 = vld [vmem:[#allocation4 + $0xc] ss:$16 sps:$4 sm:$0xff]  }
  0x7c   : > { %1376 = vmatprep.subr.bf16.mxu0 %v8411_v62 }
  0x7e   : > { %8125 = vmatmul.mubr.bf16.gmra.mxu0 %v500_v41 }
  0x7f   : > { %1377 = vmatpush1.bf16.msra.mxu0 %v8409_v63  ;;  %v8412_v63 = vld [vmem:[#allocation4 + $0x8] ss:$16 sps:$4 sm:$0xff]  }
  0x80   : > { %1378 = vmatprep.subr.bf16.mxu0 %v8417_v0 }
  0x83   : > { %1379 = vmatpush1.bf16.msra.mxu0 %v8415_v1 }
  0x84   : > { %1380 = vmatprep.subr.bf16.mxu0 %v8423_v2  ;;  %v8420_v2 = vld [vmem:[#allocation4 + $0x1ec] ss:$16 sps:$4 sm:$0xff]  }
  0x87   : > { %1381 = vmatpush2.bf16.msra.mxu0 %v8421_v3 }
  0x88   : > { %1382 = vmatprep.subr.bf16.mxu0 %v8429_v4  ;;  %v8418_v4 = vld [vmem:[#allocation4 + $0x1e8] ss:$16 sps:$4 sm:$0xff]  }
  0x8b   : > { %1383 = vmatpush2.bf16.msra.mxu0 %v8427_v5 }
  0x8c   : > { %1384 = vmatprep.subr.bf16.mxu0 %v8435_v6 }
  0x8f   : > { %1385 = vmatpush2.bf16.msra.mxu0 %v8433_v7 }
  0x90   : > { %1386 = vmatprep.subr.bf16.mxu0 %v8441_v8  ;;  %v8426_v8 = vld [vmem:[#allocation4 + $0x1cc] ss:$16 sps:$4 sm:$0xff]  }
  0x93   : > { %1387 = vmatpush2.bf16.msra.mxu0 %v8439_v9 }
  0x94   : > { %1388 = vmatprep.subr.bf16.mxu0 %v8447_v10  ;;  %v8424_v10 = vld [vmem:[#allocation4 + $0x1c8] ss:$16 sps:$4 sm:$0xff]  }
  0x97   : > { %1389 = vmatpush2.bf16.msra.mxu0 %v8445_v11 }
 0x126   : > { %v8114_v12 = vpop.f32.mrf.mxu0 }
 0x127   : > { %v609_v28 = vadd.f32 %v8114_v12, %v9257_v14 }
 0x128   : > { %v600_v13 = vpop.f32.mrf.mxu0 }
 0x129   : > { %v601_v16 = vadd.f32 %v600_v13, %v9257_v14  ;;  %v665_v33 = vmax.f32 %v609_v28, 0.0  ;;  %v8432_v13 = vld [vmem:[#allocation4 + $0x1ac] ss:$16 sps:$4 sm:$0xff]  }
 0x12a   : > { %v8115_v15 = vpop.f32.mrf.mxu0 }
 0x12b   : > { %v663_v20 = vmax.f32 %v601_v16, 0.0  ;;  %v612_v24 = vadd.f32 %v8115_v15, %v9257_v14  ;;  %v8430_v16 = vld [vmem:[#allocation4 + $0x1a8] ss:$16 sps:$4 sm:$0xff]  }
 0x12c   : > { %v603_v17 = vpop.f32.mrf.mxu0 }
 0x12d   : > { %v604_v18 = vadd.f32 %v603_v17, %v9257_v14  ;;  %v666_v30 = vmax.f32 %v612_v24, 0.0  ;;  %v8444_v24 = vld [vmem:[#allocation4 + $0x16c] ss:$16 sps:$4 sm:$0xff]  }
 0x12e   : > { %v8118_v19 = vpop.f32.mrf.mxu0 }
 0x12f   : > { %v664_v21 = vmax.f32 %v604_v18, 0.0  ;;  %v680_v35 = vpack.c.bf16 %v666_v30, %v665_v33  ;;  %v625_v46 = vadd.f32 %v8118_v19, %v9257_v14  ;;  %v8453_v33 = vld [vmem:[#allocation4 + $0x144] ss:$16 sps:$4 sm:$0xff]  }
 0x130   : > { %v616_v22 = vpop.f32.mrf.mxu0  ;;  %1390 = vmatprep.subr.bf16.mxu0 %v8453_v33 }
 0x131   : > { %v679_v25 = vpack.c.bf16 %v664_v21, %v663_v20  ;;  %v617_v36 = vadd.f32 %v616_v22, %v9257_v14  ;;  %v669_v53 = vmax.f32 %v625_v46, 0.0  ;;  %v8438_v20 = vld [vmem:[#allocation4 + $0x18c] ss:$16 sps:$4 sm:$0xff]   ;;  %v8436_v21 = vld [vmem:[#allocation4 + $0x188] ss:$16 sps:$4 sm:$0xff]  }
 0x132   : > { %v8119_v27 = vpop.f32.mrf.mxu0 }
 0x133   : > { %829 = vmatmul.mubr.bf16.vlgmr.msra.gmra.mxu1 %v679_v25  ;;  %v667_v41 = vmax.f32 %v617_v36, 0.0  ;;  %v628_v47 = vadd.f32 %v8119_v27, %v9257_v14  ;;  %v8442_v25 = vld [vmem:[#allocation4 + $0x168] ss:$16 sps:$4 sm:$0xff]   ;;  %v8456_v36 = vld [vmem:[#allocation4 + $0x12c] ss:$16 sps:$4 sm:$0xff]  }
 0x134   : > { %838 = vmatprep.mubr.bf16.mxu1 %v9019_v48  ;;  %1478 = vmatpush1.bf16.msra.mxu1 %v8370_v23  ;;  %v619_v32 = vpop.f32.mrf.mxu0 }
 0x135   : > { %1479 = vmatprep.subr.bf16.mxu1 %v8378_v26  ;;  %v620_v37 = vadd.f32 %v619_v32, %v9257_v14  ;;  %v670_v54 = vmax.f32 %v628_v47, 0.0  ;;  %v8450_v32 = vld [vmem:[#allocation4 + $0x14c] ss:$16 sps:$4 sm:$0xff]  }
 0x136   : > { %v8122_v39 = vpop.f32.mrf.mxu0 }
 0x137   : > { %v668_v42 = vmax.f32 %v620_v37, 0.0  ;;  %v682_v58 = vpack.c.bf16 %v670_v54, %v669_v53  ;;  %v641_v5 = vadd.f32 %v8122_v39, %v9257_v14  ;;  %v8454_v37 = vld [vmem:[#allocation4 + $0x128] ss:$16 sps:$4 sm:$0xff]   ;;  %v8462_v39 = vld [vmem:[#allocation4 + $0x10c] ss:$16 sps:$4 sm:$0xff]  }
 0x138   : > { %1480 = vmatpush1.bf16.msra.mxu1 %v8376_v29  ;;  %v632_v44 = vpop.f32.mrf.mxu0 }
 0x139   : > { %1481 = vmatprep.subr.bf16.mxu1 %v8384_v31  ;;  %v681_v49 = vpack.c.bf16 %v668_v42, %v667_v41  ;;  %v633_v59 = vadd.f32 %v632_v44, %v9257_v14  ;;  %v673_v11 = vmax.f32 %v641_v5, 0.0  ;;  %v8460_v41 = vld [vmem:[#allocation4 + $0x108] ss:$16 sps:$4 sm:$0xff]   ;;  %v8463_v42 = vld [vmem:[#allocation4 + $0x100] ss:$16 sps:$4 sm:$0xff]   ;;  %v706_v44 = vlaneseq }
 0x13a   : > { %v8123_v51 = vpop.f32.mrf.mxu0 }
 0x13b   : > { %839 = vmatmul.mubr.bf16.gmra.mxu1 %v680_v35  ;;  %v671_v0 = vmax.f32 %v633_v59, 0.0  ;;  %v644_v6 = vadd.f32 %v8123_v51, %v9257_v14  ;;  %v8451_v35 = vld [vmem:[#allocation4 + $0x140] ss:$16 sps:$4 sm:$0xff]  }
 0x13c   : > { %848 = vmatprep.mubr.bf16.mxu1 %v9019_v48  ;;  %1482 = vmatpush1.bf16.msra.mxu1 %v8382_v34  ;;  %v635_v56 = vpop.f32.mrf.mxu0  ;;  %v8448_v34 = vld [vmem:[#allocation4 + $0x148] ss:$16 sps:$4 sm:$0xff]  }
 0x13d   : > { %1483 = vmatprep.subr.bf16.mxu1 %v8390_v38  ;;  %v636_v60 = vadd.f32 %v635_v56, %v9257_v14  ;;  %v674_v12 = vmax.f32 %v644_v6, 0.0  ;;  %1391 = vmatpush2.bf16.msra.mxu0 %v8451_v35  ;;  %v8457_v38 = vld [vmem:[#allocation4 + $0x120] ss:$16 sps:$4 sm:$0xff]   ;;  %v8471_v6 = vld [vmem:[%s12564_s4 + $0x64] ss:$8 sps:$4 sm:$0xff]  }
 0x13e   : > { %v8126_v62 = vpop.f32.mrf.mxu0 }
 0x13f   : > { %v672_v1 = vmax.f32 %v636_v60, 0.0  ;;  %v684_v17 = vpack.c.bf16 %v674_v12, %v673_v11  ;;  %v657_v26 = vadd.f32 %v8126_v62, %v9257_v14  ;;  %v8469_v12 = vld [vmem:[%s12564_s4 + $0x60] ss:$8 sps:$4 sm:$0xff]  }
 0x140   : > { %1484 = vmatpush1.bf16.msra.mxu1 %v8388_v40  ;;  %v648_v3 = vpop.f32.mrf.mxu0  ;;  %v8465_v40 = vld [vmem:[#allocation4 + $0x104] ss:$16 sps:$4 sm:$0xff]  }
 0x141   : > { %1485 = vmatprep.subr.bf16.mxu1 %v8396_v43  ;;  %v683_v7 = vpack.c.bf16 %v672_v1, %v671_v0  ;;  %v649_v18 = vadd.f32 %v648_v3, %v9257_v14  ;;  %v677_v29 = vmax.f32 %v657_v26, 0.0  ;;  %v8468_v43 = vld [vmem:[%s12564_s4 + $0x74] ss:$8 sps:$4 sm:$0xff]   ;;  %v8466_v3 = vld [vmem:[%s12564_s4 + $0x70] ss:$8 sps:$4 sm:$0xff]  }
 0x142   : > { %v8127_v9 = vpop.f32.mrf.mxu0 }
 0x143   : > { %849 = vmatmul.mubr.bf16.gmra.mxu1 %v681_v49  ;;  %v675_v22 = vmax.f32 %v649_v18, 0.0  ;;  %v660_v27 = vadd.f32 %v8127_v9, %v9257_v14  ;;  %v7391_v49 = vld [vmem:[%s12571_s11 + $0x1] ss:$8 sm:$0x3] }
 0x144   : > { %858 = vmatprep.mubr.bf16.mxu1 %v9019_v48  ;;  %1486 = vmatpush1.bf16.msra.mxu1 %v8394_v45  ;;  %v651_v15 = vpop.f32.mrf.mxu0  ;;  %v9285_v45 = vshrl.u32 %v706_v44, 7 }
 0x145   : > { %1487 = vmatprep.subr.bf16.mxu1 %v8402_v50  ;;  %v652_v19 = vadd.f32 %v651_v15, %v9257_v14  ;;  %v678_v30 = vmax.f32 %v660_v27, 0.0  ;;  %v8459_v14 = vld [vmem:[#allocation4 + $0x124] ss:$16 sps:$4 sm:$0xff]  }
 0x146   : > { %1392 = vmatprep.subr.bf16.mxu0 %v8459_v14  ;;  %12594 = vst [vmem:[#allocation12_spill] sm:$0xff] %v9285_v45  ;;  %v9288_v46 = vsub.s32 1, %v9285_v45  ;;  %v9291_v47 = vsub.s32 0, %v9285_v45 }
 0x147   : > { %v676_v23 = vmax.f32 %v652_v19, 0.0  ;;  %v686_v31 = vpack.c.bf16 %v678_v30, %v677_v29  ;;  %1393 = vmatpush2.bf16.msra.mxu0 %v8457_v38 }
 0x148   : > { %1488 = vmatpush1.bf16.msra.mxu1 %v8400_v52  ;;  %1394 = vmatprep.subr.bf16.mxu0 %v8465_v40  ;;  %12595 = vst [vmem:[#allocation13_spill] sm:$0xff] %v9288_v46  ;;  %12596 = vst [vmem:[#allocation14_spill] sm:$0xff] %v9291_v47  ;;  %v9297_v51 = vrot.slane %v7391_v49, %v9288_v46  ;;  %v9300_v52 = vrot.slane %v7391_v49, %v9291_v47 }
 0x149   : > { %1489 = vmatprep.subr.bf16.mxu1 %v8408_v55  ;;  %v685_v28 = vpack.c.bf16 %v676_v23, %v675_v22  ;;  %v8472_v22 = vld [vmem:[%s12564_s4 + $0x50] ss:$8 sps:$4 sm:$0xff]  }
 0x14b   : > { %859 = vmatmul.mubr.bf16.gmra.mxu1 %v682_v58  ;;  %1395 = vmatpush2.bf16.msra.mxu0 %v8463_v42  ;;  %v8483_v42 = vld [vmem:[%s12564_s4 + $0x24] ss:$8 sps:$4 sm:$0xff]  }
 0x14c   : > { %868 = vmatprep.mubr.bf16.mxu1 %v9019_v48  ;;  %1490 = vmatpush1.bf16.msra.mxu1 %v8406_v57 }
 0x14d   : > { %1491 = vmatprep.subr.bf16.mxu1 %v8414_v61  ;;  %1819 = vmatprep.subr.bf16.mxu0 %v8468_v43 }
 0x150   : > { %1492 = vmatpush1.bf16.msra.mxu1 %v8412_v63 }
 0x151   : > { %1493 = vmatprep.subr.bf16.mxu1 %v8420_v2 }
 0x153   : > { %869 = vmatmul.mubr.bf16.gmra.mxu1 %v683_v7 }
 0x154   : > { %878 = vmatprep.mubr.bf16.mxu1 %v9019_v48  ;;  %1494 = vmatpush2.bf16.msra.mxu1 %v8418_v4 }
 0x155   : > { %1495 = vmatprep.subr.bf16.mxu1 %v8426_v8 }
 0x158   : > { %1496 = vmatpush2.bf16.msra.mxu1 %v8424_v10 }
 0x159   : > { %1497 = vmatprep.subr.bf16.mxu1 %v8432_v13 }
 0x15b   : > { %879 = vmatmul.mubr.bf16.gmra.mxu1 %v684_v17 }
 0x15c   : > { %888 = vmatprep.mubr.bf16.mxu1 %v9019_v48  ;;  %1498 = vmatpush2.bf16.msra.mxu1 %v8430_v16  ;;  %v8474_v16 = vld [vmem:[%s12564_s4 + $0x54] ss:$8 sps:$4 sm:$0xff]  }
 0x15d   : > { %1499 = vmatprep.subr.bf16.mxu1 %v8438_v20 }
 0x160   : > { %1500 = vmatpush2.bf16.msra.mxu1 %v8436_v21 }
 0x161   : > { %1501 = vmatprep.subr.bf16.mxu1 %v8444_v24 }
 0x163   : > { %889 = vmatmul.mubr.bf16.gmra.mxu1 %v685_v28 }
 0x164   : > { %898 = vmatprep.mubr.bf16.mxu1 %v9019_v48  ;;  %1502 = vmatpush2.bf16.msra.mxu1 %v8442_v25  ;;  %v8477_v25 = vld [vmem:[%s12564_s4 + $0x44] ss:$8 sps:$4 sm:$0xff]  }
 0x165   : > { %1503 = vmatprep.subr.bf16.mxu1 %v8450_v32 }
 0x168   : > { %1504 = vmatpush2.bf16.msra.mxu1 %v8448_v34  ;;  %v8480_v34 = vld [vmem:[%s12564_s4 + $0x34] ss:$8 sps:$4 sm:$0xff]  }
 0x169   : > { %1505 = vmatprep.subr.bf16.mxu1 %v8456_v36 }
 0x16b   : > { %899 = vmatmul.mubr.bf16.gmra.mxu1 %v686_v31  ;;  %v8475_v31 = vld [vmem:[%s12564_s4 + $0x40] ss:$8 sps:$4 sm:$0xff]  }
 0x16c   : > { %1506 = vmatpush2.bf16.msra.mxu1 %v8454_v37 }
 0x16d   : > { %1507 = vmatprep.subr.bf16.mxu1 %v8462_v39  ;;  %v8478_v39 = vld [vmem:[%s12564_s4 + $0x30] ss:$8 sps:$4 sm:$0xff]  }
 0x170   : > { %1508 = vmatpush2.bf16.msra.mxu1 %v8460_v41 }
 0x1f3   : > { %v830_v50 = vpop.f32.mrf.mxu1 }
 0x1f4   : > { %v831_v57 = vadd.f32 %v830_v50, %v9300_v52 }
 0x1f5   : > { %v832_v53 = vpop.f32.mrf.mxu1 }
 0x1f6   : > { %v833_v55 = vadd.f32 %v832_v53, %v9297_v51  ;;  %v909_v0 = vmax.f32 %v831_v57, 0.0 }
 0x1f7   : > { %v834_v54 = vpop.f32.mrf.mxu1 }
 0x1f8   : > { %v835_v56 = vadd.f32 %v834_v54, %v9300_v52  ;;  %v910_v62 = vmax.f32 %v833_v55, 0.0  ;;  %v8481_v54 = vld [vmem:[%s12564_s4 + $0x20] ss:$8 sps:$4 sm:$0xff]  }
 0x1f9   : > { %v836_v58 = vpop.f32.mrf.mxu1 }
 0x1fa   : > { %v837_v59 = vadd.f32 %v836_v58, %v9297_v51  ;;  %v911_v60 = vmax.f32 %v835_v56, 0.0 }
 0x1fb   : > { %v840_v61 = vpop.f32.mrf.mxu1 }
 0x1fc   : > { %v912_v63 = vmax.f32 %v837_v59, 0.0  ;;  %v941_v4 = vpack.c.bf16 %v911_v60, %v909_v0  ;;  %v841_v9 = vadd.f32 %v840_v61, %v9300_v52 }
 0x1fd   : > { %v842_v1 = vpop.f32.mrf.mxu1 }
 0x1fe   : > { %v942_v2 = vpack.c.bf16 %v912_v63, %v910_v62  ;;  %v843_v7 = vadd.f32 %v842_v1, %v9297_v51  ;;  %v913_v19 = vmax.f32 %v841_v9, 0.0 }
 0x1ff   : > { %v844_v5 = vpop.f32.mrf.mxu1 }
 0x200   : > { %v845_v8 = vadd.f32 %v844_v5, %v9300_v52  ;;  %1396 = vmatprep.mubr.bf16.mxu0 %v942_v2  ;;  %1509 = vmatprep.mubr.bf16.mxu1 %v942_v2  ;;  %v914_v17 = vmax.f32 %v843_v7, 0.0 }
 0x201   : > { %v846_v10 = vpop.f32.mrf.mxu1  ;;  %1397 = vmatmul.mubr.bf16.vlgmr.msra.gmra.mxu0 %v941_v4  ;;  %1510 = vmatmul.mubr.bf16.vlgmr.msra.gmra.mxu1 %v941_v4 }
 0x202   : > { %v847_v11 = vadd.f32 %v846_v10, %v9297_v51  ;;  %1820 = vmatpush1.bf16.msra.mxu0 %v8466_v3  ;;  %v915_v13 = vmax.f32 %v845_v8, 0.0 }
 0x203   : > { %v850_v15 = vpop.f32.mrf.mxu1  ;;  %1821 = vmatprep.subr.bf16.mxu0 %v8471_v6 }
 0x204   : > { %v916_v18 = vmax.f32 %v847_v11, 0.0  ;;  %v943_v23 = vpack.c.bf16 %v915_v13, %v913_v19  ;;  %v851_v28 = vadd.f32 %v850_v15, %v9300_v52 }
 0x205   : > { %v852_v20 = vpop.f32.mrf.mxu1 }
 0x206   : > { %v944_v21 = vpack.c.bf16 %v916_v18, %v914_v17  ;;  %1822 = vmatpush1.bf16.msra.mxu0 %v8469_v12  ;;  %v853_v26 = vadd.f32 %v852_v20, %v9297_v51  ;;  %v917_v14 = vmax.f32 %v851_v28, 0.0 }
 0x207   : > { %v854_v24 = vpop.f32.mrf.mxu1  ;;  %1823 = vmatprep.subr.bf16.mxu0 %v8474_v16 }
 0x208   : > { %v855_v27 = vadd.f32 %v854_v24, %v9300_v52  ;;  %1406 = vmatprep.mubr.bf16.mxu0 %v944_v21  ;;  %1519 = vmatprep.mubr.bf16.mxu1 %v944_v21  ;;  %v918_v35 = vmax.f32 %v853_v26, 0.0 }
 0x209   : > { %v856_v29 = vpop.f32.mrf.mxu1  ;;  %1407 = vmatmul.mubr.bf16.gmra.mxu0 %v943_v23  ;;  %1520 = vmatmul.mubr.bf16.gmra.mxu1 %v943_v23 }
 0x20a   : > { %v857_v30 = vadd.f32 %v856_v29, %v9297_v51  ;;  %1824 = vmatpush1.bf16.msra.mxu0 %v8472_v22  ;;  %v919_v32 = vmax.f32 %v855_v27, 0.0 }
 0x20b   : > { %v860_v33 = vpop.f32.mrf.mxu1  ;;  %1825 = vmatprep.subr.bf16.mxu0 %v8477_v25 }
 0x20c   : > { %v920_v36 = vmax.f32 %v857_v30, 0.0  ;;  %v945_v40 = vpack.c.bf16 %v919_v32, %v917_v14  ;;  %v861_v49 = vadd.f32 %v860_v33, %v9300_v52 }
 0x20d   : > { %v862_v37 = vpop.f32.mrf.mxu1 }
 0x20e   : > { %v946_v38 = vpack.c.bf16 %v920_v36, %v918_v35  ;;  %1826 = vmatpush1.bf16.msra.mxu0 %v8475_v31  ;;  %v863_v43 = vadd.f32 %v862_v37, %v9297_v51  ;;  %v921_v59 = vmax.f32 %v861_v49, 0.0 }
 0x20f   : > { %v864_v41 = vpop.f32.mrf.mxu1  ;;  %1827 = vmatprep.subr.bf16.mxu0 %v8480_v34 }
 0x210   : > { %v865_v44 = vadd.f32 %v864_v41, %v9300_v52  ;;  %1416 = vmatprep.mubr.bf16.mxu0 %v946_v38  ;;  %1529 = vmatprep.mubr.bf16.mxu1 %v946_v38  ;;  %v922_v57 = vmax.f32 %v863_v43, 0.0 }
 0x211   : > { %v866_v50 = vpop.f32.mrf.mxu1  ;;  %1417 = vmatmul.mubr.bf16.gmra.mxu0 %v945_v40  ;;  %1530 = vmatmul.mubr.bf16.gmra.mxu1 %v945_v40 }
 0x212   : > { %v867_v53 = vadd.f32 %v866_v50, %v9297_v51  ;;  %1828 = vmatpush1.bf16.msra.mxu0 %v8478_v39  ;;  %v923_v55 = vmax.f32 %v865_v44, 0.0 }
 0x213   : > { %v870_v56 = vpop.f32.mrf.mxu1  ;;  %1829 = vmatprep.subr.bf16.mxu0 %v8483_v42 }
 0x214   : > { %v924_v58 = vmax.f32 %v867_v53, 0.0  ;;  %v947_v62 = vpack.c.bf16 %v923_v55, %v921_v59  ;;  %v871_v2 = vadd.f32 %v870_v56, %v9300_v52  ;;  %v8489_v59 = vld [vmem:[%s12564_s4 + $0x4] ss:$8 sps:$4 sm:$0xff]  }
 0x215   : > { %v872_v60 = vpop.f32.mrf.mxu1 }
 0x216   : > { %v948_v61 = vpack.c.bf16 %v924_v58, %v922_v57  ;;  %1830 = vmatpush1.bf16.msra.mxu0 %v8481_v54  ;;  %v873_v0 = vadd.f32 %v872_v60, %v9297_v51  ;;  %v925_v9 = vmax.f32 %v871_v2, 0.0  ;;  %v8487_v60 = vld [vmem:[%s12564_s4] ss:$8 sps:$4 sm:$0xff]   ;;  %v8504_v2 = vld [vmem:[#allocation6 + $0xa4] ss:$16 sps:$4 sm:$0xff]  }
 0x217   : > { %v874_v63 = vpop.f32.mrf.mxu1 }
 0x218   : > { %v875_v1 = vadd.f32 %v874_v63, %v9300_v52  ;;  %1426 = vmatprep.mubr.bf16.mxu0 %v948_v61  ;;  %1539 = vmatprep.mubr.bf16.mxu1 %v948_v61  ;;  %v926_v7 = vmax.f32 %v873_v0, 0.0  ;;  %v8490_v61 = vld [vmem:[#allocation6 + $0xe0] ss:$16 sps:$4 sm:$0xff]   ;;  %v8495_v63 = vld [vmem:[#allocation6 + $0xec] ss:$16 sps:$4 sm:$0xff]  }
 0x219   : > { %v876_v3 = vpop.f32.mrf.mxu1  ;;  %1427 = vmatmul.mubr.bf16.gmra.mxu0 %v947_v62  ;;  %1540 = vmatmul.mubr.bf16.gmra.mxu1 %v947_v62  ;;  %v8492_v62 = vld [vmem:[#allocation6 + $0xe4] ss:$16 sps:$4 sm:$0xff]  }
 0x21a   : > { %v877_v4 = vadd.f32 %v876_v3, %v9297_v51  ;;  %v927_v5 = vmax.f32 %v875_v1, 0.0  ;;  %v8498_v0 = vld [vmem:[#allocation6 + $0xc4] ss:$16 sps:$4 sm:$0xff]   ;;  %2387 = vmatprep.subr.bf16.mxu1 %v8492_v62  ;;  %v8496_v1 = vld [vmem:[#allocation6 + $0xc0] ss:$16 sps:$4 sm:$0xff]  }
 0x21b   : > { %v880_v6 = vpop.f32.mrf.mxu1  ;;  %2388 = vmatpush1.bf16.msra.mxu1 %v8490_v61  ;;  %v8502_v3 = vld [vmem:[#allocation6 + $0xa0] ss:$16 sps:$4 sm:$0xff]  }
 0x21c   : > { %v928_v8 = vmax.f32 %v877_v4, 0.0  ;;  %v949_v12 = vpack.c.bf16 %v927_v5, %v925_v9  ;;  %v881_v17 = vadd.f32 %v880_v6, %v9300_v52  ;;  %2389 = vmatprep.subr.bf16.mxu1 %v8498_v0  ;;  %v8510_v4 = vld [vmem:[#allocation6 + $0x84] ss:$16 sps:$4 sm:$0xff]   ;;  %v8508_v5 = vld [vmem:[#allocation6 + $0x80] ss:$16 sps:$4 sm:$0xff]  }
 0x21d   : > { %v882_v10 = vpop.f32.mrf.mxu1  ;;  %v8516_v6 = vld [vmem:[#allocation6 + $0x64] ss:$16 sps:$4 sm:$0xff]   ;;  %v8520_v9 = vld [vmem:[#allocation6 + $0x40] ss:$16 sps:$4 sm:$0xff]  }
 0x21e   : > { %v950_v11 = vpack.c.bf16 %v928_v8, %v926_v7  ;;  %v883_v15 = vadd.f32 %v882_v10, %v9297_v51  ;;  %v929_v24 = vmax.f32 %v881_v17, 0.0  ;;  %v8514_v7 = vld [vmem:[#allocation6 + $0x60] ss:$16 sps:$4 sm:$0xff]   ;;  %v8522_v8 = vld [vmem:[#allocation6 + $0x44] ss:$16 sps:$4 sm:$0xff]  }
 0x21f   : > { %v884_v13 = vpop.f32.mrf.mxu1  ;;  %2390 = vmatpush1.bf16.msra.mxu1 %v8496_v1  ;;  %v8528_v10 = vld [vmem:[#allocation6 + $0x24] ss:$16 sps:$4 sm:$0xff]  }
 0x220   : > { %v885_v16 = vadd.f32 %v884_v13, %v9300_v52  ;;  %1436 = vmatprep.mubr.bf16.mxu0 %v950_v11  ;;  %1549 = vmatprep.mubr.bf16.mxu1 %v950_v11  ;;  %v930_v22 = vmax.f32 %v883_v15, 0.0  ;;  %v8526_v11 = vld [vmem:[#allocation6 + $0x20] ss:$16 sps:$4 sm:$0xff]   ;;  %v8540_v15 = vld [vmem:[#allocation6 + $0x1e4] ss:$16 sps:$4 sm:$0xff]  }
 0x221   : > { %v886_v18 = vpop.f32.mrf.mxu1  ;;  %1437 = vmatmul.mubr.bf16.gmra.mxu0 %v949_v12  ;;  %1550 = vmatmul.mubr.bf16.gmra.mxu1 %v949_v12  ;;  %v8534_v12 = vld [vmem:[#allocation6 + $0x4] ss:$16 sps:$4 sm:$0xff]   ;;  %v8532_v13 = vld [vmem:[#allocation6] ss:$16 sps:$4 sm:$0xff]  }
 0x222   : > { %v887_v19 = vadd.f32 %v886_v18, %v9297_v51  ;;  %v931_v20 = vmax.f32 %v885_v16, 0.0  ;;  %2391 = vmatprep.subr.bf16.mxu1 %v8504_v2  ;;  %v8538_v16 = vld [vmem:[#allocation6 + $0x1e0] ss:$16 sps:$4 sm:$0xff]   ;;  %v8546_v17 = vld [vmem:[#allocation6 + $0x1c4] ss:$16 sps:$4 sm:$0xff]  }
 0x223   : > { %v890_v21 = vpop.f32.mrf.mxu1  ;;  %2392 = vmatpush1.bf16.msra.mxu1 %v8502_v3  ;;  %v8544_v18 = vld [vmem:[#allocation6 + $0x1c0] ss:$16 sps:$4 sm:$0xff]  }
 0x224   : > { %v932_v23 = vmax.f32 %v887_v19, 0.0  ;;  %v951_v27 = vpack.c.bf16 %v931_v20, %v929_v24  ;;  %v891_v31 = vadd.f32 %v890_v21, %v9300_v52  ;;  %2393 = vmatprep.subr.bf16.mxu1 %v8510_v4  ;;  %v8552_v19 = vld [vmem:[#allocation6 + $0x1a4] ss:$16 sps:$4 sm:$0xff]   ;;  %v8550_v20 = vld [vmem:[#allocation6 + $0x1a0] ss:$16 sps:$4 sm:$0xff]  }
 0x225   : > { %v892_v25 = vpop.f32.mrf.mxu1  ;;  %v8558_v21 = vld [vmem:[#allocation6 + $0x184] ss:$16 sps:$4 sm:$0xff]   ;;  %v8562_v24 = vld [vmem:[#allocation6 + $0x160] ss:$16 sps:$4 sm:$0xff]  }
 0x226   : > { %v952_v26 = vpack.c.bf16 %v932_v23, %v930_v22  ;;  %v893_v29 = vadd.f32 %v892_v25, %v9297_v51  ;;  %v933_v37 = vmax.f32 %v891_v31, 0.0  ;;  %v8556_v22 = vld [vmem:[#allocation6 + $0x180] ss:$16 sps:$4 sm:$0xff]   ;;  %v8564_v23 = vld [vmem:[#allocation6 + $0x164] ss:$16 sps:$4 sm:$0xff]   ;;  %v9381_v25 = vsub.s32 2, %v9285_v45 }
 0x227   : > { %v894_v28 = vpop.f32.mrf.mxu1  ;;  %2394 = vmatpush1.bf16.msra.mxu1 %v8508_v5 }
 0x228   : > { %v895_v30 = vadd.f32 %v894_v28, %v9300_v52  ;;  %1446 = vmatprep.mubr.bf16.mxu0 %v952_v26  ;;  %1559 = vmatprep.mubr.bf16.mxu1 %v952_v26  ;;  %v934_v36 = vmax.f32 %v893_v29, 0.0  ;;  %12597 = vst [vmem:[#allocation15_spill] sm:$0xff] %v9381_v25  ;;  %v9384_v26 = vsub.s32 3, %v9285_v45 }
 0x229   : > { %v896_v32 = vpop.f32.mrf.mxu1  ;;  %1447 = vmatmul.mubr.bf16.gmra.mxu0 %v951_v27  ;;  %1560 = vmatmul.mubr.bf16.gmra.mxu1 %v951_v27  ;;  %v7408_v27 = vld [vmem:[%s12571_s11 + $0x2] ss:$8 sm:$0xf] }
 0x22a   : > { %v897_v33 = vadd.f32 %v896_v32, %v9297_v51  ;;  %v935_v34 = vmax.f32 %v895_v30, 0.0  ;;  %2395 = vmatprep.subr.bf16.mxu1 %v8516_v6  ;;  %12598 = vst [vmem:[#allocation16_spill] sm:$0xff] %v9384_v26  ;;  %v9390_v28 = vrot.slane %v7408_v27, %v9291_v47  ;;  %v9393_v29 = vrot.slane %v7408_v27, %v9381_v25 }
 0x22b   : > { %v900_v35 = vpop.f32.mrf.mxu1  ;;  %2396 = vmatpush1.bf16.msra.mxu1 %v8514_v7  ;;  %v9396_v30 = vrot.slane %v7408_v27, %v9288_v46  ;;  %v9399_v31 = vrot.slane %v7408_v27, %v9384_v26 }
 0x22c   : > { %v936_v14 = vmax.f32 %v897_v33, 0.0  ;;  %v953_v40 = vpack.c.bf16 %v935_v34, %v933_v37  ;;  %v901_v44 = vadd.f32 %v900_v35, %v9300_v52  ;;  %2397 = vmatprep.subr.bf16.mxu1 %v8522_v8 }
 0x22d   : > { %v902_v38 = vpop.f32.mrf.mxu1 }
 0x22e   : > { %v954_v39 = vpack.c.bf16 %v936_v14, %v934_v36  ;;  %v903_v42 = vadd.f32 %v902_v38, %v9297_v51  ;;  %v937_v56 = vmax.f32 %v901_v44, 0.0 }
 0x22f   : > { %v904_v41 = vpop.f32.mrf.mxu1  ;;  %2398 = vmatpush1.bf16.msra.mxu1 %v8520_v9 }
 0x230   : > { %v905_v43 = vadd.f32 %v904_v41, %v9300_v52  ;;  %1456 = vmatprep.mubr.bf16.mxu0 %v954_v39  ;;  %1569 = vmatprep.mubr.bf16.mxu1 %v954_v39  ;;  %v938_v54 = vmax.f32 %v903_v42, 0.0  ;;  %v8484_v52 = vld [vmem:[%s12564_s4 + $0x10] ss:$8 sps:$4 sm:$0xff]  }
 0x231   : > { %v906_v49 = vpop.f32.mrf.mxu1  ;;  %1457 = vmatmul.mubr.bf16.gmra.mxu0 %v953_v40  ;;  %1570 = vmatmul.mubr.bf16.gmra.mxu1 %v953_v40 }
 0x232   : > { %v907_v50 = vadd.f32 %v906_v49, %v9297_v51  ;;  %v939_v53 = vmax.f32 %v905_v43, 0.0  ;;  %v8486_v51 = vld [vmem:[%s12564_s4 + $0x14] ss:$8 sps:$4 sm:$0xff]   ;;  %2399 = vmatprep.subr.bf16.mxu1 %v8528_v10 }
 0x233   : > { %1831 = vmatprep.subr.bf16.mxu0 %v8486_v51  ;;  %2400 = vmatpush1.bf16.msra.mxu1 %v8526_v11 }
 0x234   : > { %v940_v55 = vmax.f32 %v907_v50, 0.0  ;;  %v955_v58 = vpack.c.bf16 %v939_v53, %v937_v56  ;;  %1832 = vmatpush1.bf16.msra.mxu0 %v8484_v52  ;;  %2401 = vmatprep.subr.bf16.mxu1 %v8534_v12 }
 0x235   : > { %1833 = vmatprep.subr.bf16.mxu0 %v8489_v59 }
 0x236   : > { %v956_v57 = vpack.c.bf16 %v940_v55, %v938_v54 }
 0x237   : > { %2402 = vmatpush1.bf16.msra.mxu1 %v8532_v13 }
 0x238   : > { %1466 = vmatprep.mubr.bf16.mxu0 %v956_v57  ;;  %1579 = vmatprep.mubr.bf16.mxu1 %v956_v57 }
 0x239   : > { %1467 = vmatmul.mubr.bf16.gmra.mxu0 %v955_v58  ;;  %1580 = vmatmul.mubr.bf16.gmra.mxu1 %v955_v58 }
 0x23a   : > { %1851 = vmatprep.mubr.bf16.mxu0 %v9019_v48  ;;  %1834 = vmatpush1.bf16.msra.mxu0 %v8487_v60 }
 0x23b   : > { %2500 = vmatprep.subr.bf16.mxu0 %v8495_v63  ;;  %2403 = vmatprep.subr.bf16.mxu1 %v8540_v15 }
 0x23c   : > { %2404 = vmatpush2.bf16.msra.mxu1 %v8538_v16 }
 0x23d   : > { %2405 = vmatprep.subr.bf16.mxu1 %v8546_v17 }
 0x240   : > { %2406 = vmatpush2.bf16.msra.mxu1 %v8544_v18 }
 0x241   : > { %2407 = vmatprep.subr.bf16.mxu1 %v8552_v19 }
 0x244   : > { %2408 = vmatpush2.bf16.msra.mxu1 %v8550_v20  ;;  %v8493_v20 = vld [vmem:[#allocation6 + $0xe8] ss:$16 sps:$4 sm:$0xff]  }
 0x245   : > { %2409 = vmatprep.subr.bf16.mxu1 %v8558_v21 }
 0x248   : > { %2410 = vmatpush2.bf16.msra.mxu1 %v8556_v22 }
 0x249   : > { %2411 = vmatprep.subr.bf16.mxu1 %v8564_v23 }
 0x24c   : > { %2412 = vmatpush2.bf16.msra.mxu1 %v8562_v24 }
 0x2c1   : > { %v1398_v32 = vpop.f32.mrf.mxu0  ;;  %v1511_v33 = vpop.f32.mrf.mxu1 }
 0x2c2   : > { %v1399_v36 = vadd.f32 %v1398_v32, %v9390_v28  ;;  %v1512_v14 = vadd.f32 %v1511_v33, %v9393_v29  ;;  %v8501_v32 = vld [vmem:[#allocation6 + $0xcc] ss:$16 sps:$4 sm:$0xff]  }
 0x2c3   : > { %v1400_v34 = vpop.f32.mrf.mxu0  ;;  %v1513_v35 = vpop.f32.mrf.mxu1 }
 0x2c4   : > { %v1401_v37 = vadd.f32 %v1400_v34, %v9396_v30  ;;  %v1514_v38 = vadd.f32 %v1513_v35, %v9399_v31  ;;  %v1590_v53 = vmax.f32 %v1399_v36, 0.0  ;;  %v1592_v54 = vmax.f32 %v1512_v14, 0.0 }
 0x2c5   : > { %v1402_v39 = vpop.f32.mrf.mxu0  ;;  %v1515_v40 = vpop.f32.mrf.mxu1 }
 0x2c6   : > { %v1591_v41 = vmax.f32 %v1401_v37, 0.0  ;;  %v1593_v42 = vmax.f32 %v1514_v38, 0.0  ;;  %v1403_v43 = vadd.f32 %v1402_v39, %v9390_v28  ;;  %v1516_v44 = vadd.f32 %v1515_v40, %v9393_v29 }
 0x2c7   : > { %v1404_v49 = vpop.f32.mrf.mxu0  ;;  %v1517_v50 = vpop.f32.mrf.mxu1 }
 0x2c8   : > { %v1405_v55 = vadd.f32 %v1404_v49, %v9396_v30  ;;  %v1518_v56 = vadd.f32 %v1517_v50, %v9399_v31  ;;  %v1654_v52 = vmax.f32 %v1590_v53, %v1591_v41  ;;  %v1670_v51 = vmax.f32 %v1592_v54, %v1593_v42 }
 0x2c9   : > { %v1408_v57 = vpop.f32.mrf.mxu0  ;;  %v1521_v58 = vpop.f32.mrf.mxu1  ;;  %v1594_v59 = vmax.f32 %v1403_v43, 0.0  ;;  %v1596_v60 = vmax.f32 %v1516_v44, 0.0  ;;  %v8499_v44 = vld [vmem:[#allocation6 + $0xc8] ss:$16 sps:$4 sm:$0xff]  }
 0x2ca   : > { %v1595_v61 = vmax.f32 %v1405_v55, 0.0  ;;  %v1597_v62 = vmax.f32 %v1518_v56, 0.0  ;;  %v1409_v1 = vadd.f32 %v1408_v57, %v9390_v28  ;;  %v1522_v2 = vadd.f32 %v1521_v58, %v9393_v29  ;;  %v8507_v55 = vld [vmem:[#allocation6 + $0xac] ss:$16 sps:$4 sm:$0xff]  }
 0x2cb   : > { %v1410_v63 = vpop.f32.mrf.mxu0  ;;  %v1523_v0 = vpop.f32.mrf.mxu1  ;;  %v1686_v12 = vmax.f32 %v1654_v52, %v1670_v51 }
 0x2cc   : > { %v1411_v3 = vadd.f32 %v1410_v63, %v9396_v30  ;;  %v1524_v4 = vadd.f32 %v1523_v0, %v9399_v31  ;;  %v1655_v5 = vmax.f32 %v1594_v59, %v1595_v61  ;;  %v1671_v6 = vmax.f32 %v1596_v60, %v1597_v62  ;;  %v8505_v0 = vld [vmem:[#allocation6 + $0xa8] ss:$16 sps:$4 sm:$0xff]  }
 0x2cd   : > { %v1412_v7 = vpop.f32.mrf.mxu0  ;;  %v1525_v8 = vpop.f32.mrf.mxu1  ;;  %v1598_v18 = vmax.f32 %v1409_v1, 0.0  ;;  %v1600_v19 = vmax.f32 %v1522_v2, 0.0 }
 0x2ce   : > { %v1599_v9 = vmax.f32 %v1411_v3, 0.0  ;;  %v1601_v10 = vmax.f32 %v1524_v4, 0.0  ;;  %v1413_v11 = vadd.f32 %v1412_v7, %v9390_v28  ;;  %v1687_v13 = vmax.f32 %v1655_v5, %v1671_v6  ;;  %v8513_v6 = vld [vmem:[#allocation6 + $0x8c] ss:$16 sps:$4 sm:$0xff]  }
 0x2cf   : > { %v1526_v15 = vadd.f32 %v1525_v8, %v9393_v29  ;;  %v1414_v16 = vpop.f32.mrf.mxu0  ;;  %v1527_v17 = vpop.f32.mrf.mxu1 }
 0x2d0   : > { %v1702_v21 = vpack.c.bf16 %v1687_v13, %v1686_v12  ;;  %v1415_v22 = vadd.f32 %v1414_v16, %v9396_v30  ;;  %v1528_v23 = vadd.f32 %v1527_v17, %v9399_v31  ;;  %v1656_v33 = vmax.f32 %v1598_v18, %v1599_v9 }
 0x2d1   : > { %v1418_v24 = vpop.f32.mrf.mxu0  ;;  %v1531_v27 = vpop.f32.mrf.mxu1  ;;  %v1672_v34 = vmax.f32 %v1600_v19, %v1601_v10  ;;  %v1602_v35 = vmax.f32 %v1413_v11, 0.0  ;;  %v1604_v36 = vmax.f32 %v1526_v15, 0.0 }
 0x2d2   : > { %v1603_v14 = vmax.f32 %v1415_v22, 0.0  ;;  %v1605_v37 = vmax.f32 %v1528_v23, 0.0  ;;  %v1419_v38 = vadd.f32 %v1418_v24, %v9390_v28  ;;  %1852 = vmatmul.mubr.bf16.vlgmr.msra.gmra.mxu0 %v1702_v21  ;;  %v1532_v41 = vadd.f32 %v1531_v27, %v9393_v29  ;;  %v8519_v27 = vld [vmem:[#allocation6 + $0x6c] ss:$16 sps:$4 sm:$0xff]  }
 0x2d3   : > { %v1420_v39 = vpop.f32.mrf.mxu0  ;;  %v1533_v40 = vpop.f32.mrf.mxu1  ;;  %1861 = vmatprep.mubr.bf16.mxu0 %v9019_v48  ;;  %2501 = vmatpush1.bf16.msra.mxu0 %v8493_v20  ;;  %v1688_v52 = vmax.f32 %v1656_v33, %v1672_v34  ;;  %v8511_v20 = vld [vmem:[#allocation6 + $0x88] ss:$16 sps:$4 sm:$0xff]  }
 0x2d4   : > { %v1421_v42 = vadd.f32 %v1420_v39, %v9396_v30  ;;  %v1534_v43 = vadd.f32 %v1533_v40, %v9399_v31  ;;  %v1657_v49 = vmax.f32 %v1602_v35, %v1603_v14  ;;  %v1673_v50 = vmax.f32 %v1604_v36, %v1605_v37  ;;  %2502 = vmatprep.subr.bf16.mxu0 %v8501_v32 }
 0x2d5   : > { %v1422_v53 = vpop.f32.mrf.mxu0  ;;  %v1535_v54 = vpop.f32.mrf.mxu1  ;;  %v1606_v62 = vmax.f32 %v1419_v38, 0.0  ;;  %v1608_v63 = vmax.f32 %v1532_v41, 0.0  ;;  %v8517_v41 = vld [vmem:[#allocation6 + $0x68] ss:$16 sps:$4 sm:$0xff]  }
 0x2d6   : > { %v1607_v56 = vmax.f32 %v1421_v42, 0.0  ;;  %v1609_v57 = vmax.f32 %v1534_v43, 0.0  ;;  %v1423_v58 = vadd.f32 %v1422_v53, %v9390_v28  ;;  %v1536_v51 = vadd.f32 %v1535_v54, %v9393_v29  ;;  %v8525_v53 = vld [vmem:[#allocation6 + $0x4c] ss:$16 sps:$4 sm:$0xff]  }
 0x2d7   : > { %v1424_v59 = vpop.f32.mrf.mxu0  ;;  %v1537_v60 = vpop.f32.mrf.mxu1  ;;  %v1689_v61 = vmax.f32 %v1657_v49, %v1673_v50  ;;  %2503 = vmatpush1.bf16.msra.mxu0 %v8499_v44 }
 0x2d8   : > { %v1425_v1 = vadd.f32 %v1424_v59, %v9396_v30  ;;  %v1538_v2 = vadd.f32 %v1537_v60, %v9399_v31  ;;  %2504 = vmatprep.subr.bf16.mxu0 %v8507_v55  ;;  %v1658_v7 = vmax.f32 %v1606_v62, %v1607_v56  ;;  %v1674_v8 = vmax.f32 %v1608_v63, %v1609_v57 }
 0x2d9   : > { %v1428_v3 = vpop.f32.mrf.mxu0  ;;  %v1541_v4 = vpop.f32.mrf.mxu1  ;;  %v1703_v5 = vpack.c.bf16 %v1689_v61, %v1688_v52  ;;  %v1610_v9 = vmax.f32 %v1423_v58, 0.0  ;;  %v1612_v10 = vmax.f32 %v1536_v51, 0.0 }
 0x2da   : > { %v1611_v11 = vmax.f32 %v1425_v1, 0.0  ;;  %v1613_v12 = vmax.f32 %v1538_v2, 0.0  ;;  %v1429_v13 = vadd.f32 %v1428_v3, %v9390_v28  ;;  %v1542_v17 = vadd.f32 %v1541_v4, %v9393_v29 }
 0x2db   : > { %1862 = vmatmul.mubr.bf16.gmra.mxu0 %v1703_v5  ;;  %v1430_v15 = vpop.f32.mrf.mxu0  ;;  %v1543_v16 = vpop.f32.mrf.mxu1  ;;  %v1690_v35 = vmax.f32 %v1658_v7, %v1674_v8  ;;  %v8531_v5 = vld [vmem:[#allocation6 + $0x2c] ss:$16 sps:$4 sm:$0xff]  }
 0x2dc   : > { %v1431_v18 = vadd.f32 %v1430_v15, %v9396_v30  ;;  %v1544_v19 = vadd.f32 %v1543_v16, %v9399_v31  ;;  %1871 = vmatprep.mubr.bf16.mxu0 %v9019_v48  ;;  %2505 = vmatpush1.bf16.msra.mxu0 %v8505_v0  ;;  %v1659_v21 = vmax.f32 %v1610_v9, %v1611_v11  ;;  %v1614_v39 = vmax.f32 %v1429_v13, 0.0  ;;  %v8523_v0 = vld [vmem:[#allocation6 + $0x48] ss:$16 sps:$4 sm:$0xff]  }
 0x2dd   : > { %v1675_v22 = vmax.f32 %v1612_v10, %v1613_v12  ;;  %v1432_v23 = vpop.f32.mrf.mxu0  ;;  %v1545_v24 = vpop.f32.mrf.mxu1  ;;  %2506 = vmatprep.subr.bf16.mxu0 %v8513_v6  ;;  %v1616_v40 = vmax.f32 %v1542_v17, 0.0  ;;  %v8529_v17 = vld [vmem:[#allocation6 + $0x28] ss:$16 sps:$4 sm:$0xff]  }
 0x2de   : > { %v1615_v32 = vmax.f32 %v1431_v18, 0.0  ;;  %v1617_v33 = vmax.f32 %v1544_v19, 0.0  ;;  %v1433_v34 = vadd.f32 %v1432_v23, %v9390_v28  ;;  %v1546_v36 = vadd.f32 %v1545_v24, %v9393_v29  ;;  %v8537_v23 = vld [vmem:[#allocation6 + $0xc] ss:$16 sps:$4 sm:$0xff]  }
 0x2df   : > { %v1434_v14 = vpop.f32.mrf.mxu0  ;;  %v1547_v37 = vpop.f32.mrf.mxu1  ;;  %v1691_v38 = vmax.f32 %v1659_v21, %v1675_v22 }
 0x2e0   : > { %2507 = vmatpush1.bf16.msra.mxu0 %v8511_v20  ;;  %v1435_v42 = vadd.f32 %v1434_v14, %v9396_v30  ;;  %v1548_v43 = vadd.f32 %v1547_v37, %v9399_v31  ;;  %v1660_v54 = vmax.f32 %v1614_v39, %v1615_v32  ;;  %v1676_v55 = vmax.f32 %v1616_v40, %v1617_v33 }
 0x2e1   : > { %v1438_v44 = vpop.f32.mrf.mxu0  ;;  %v1551_v49 = vpop.f32.mrf.mxu1  ;;  %v1704_v50 = vpack.c.bf16 %v1691_v38, %v1690_v35  ;;  %2508 = vmatprep.subr.bf16.mxu0 %v8519_v27  ;;  %v1618_v56 = vmax.f32 %v1433_v34, 0.0  ;;  %v1620_v57 = vmax.f32 %v1546_v36, 0.0 }
 0x2e2   : > { %v1619_v58 = vmax.f32 %v1435_v42, 0.0  ;;  %v1621_v52 = vmax.f32 %v1548_v43, 0.0  ;;  %v1439_v51 = vadd.f32 %v1438_v44, %v9390_v28  ;;  %v1552_v61 = vadd.f32 %v1551_v49, %v9393_v29 }
 0x2e3   : > { %1872 = vmatmul.mubr.bf16.gmra.mxu0 %v1704_v50  ;;  %v1440_v59 = vpop.f32.mrf.mxu0  ;;  %v1553_v60 = vpop.f32.mrf.mxu1  ;;  %v1692_v9 = vmax.f32 %v1660_v54, %v1676_v55  ;;  %v8543_v50 = vld [vmem:[#allocation6 + $0x1ec] ss:$16 sps:$4 sm:$0xff]  }
 0x2e4   : > { %v1441_v62 = vadd.f32 %v1440_v59, %v9396_v30  ;;  %v1554_v63 = vadd.f32 %v1553_v60, %v9399_v31  ;;  %1881 = vmatprep.mubr.bf16.mxu0 %v9019_v48  ;;  %2509 = vmatpush1.bf16.msra.mxu0 %v8517_v41  ;;  %v1661_v1 = vmax.f32 %v1618_v56, %v1619_v58  ;;  %v1622_v15 = vmax.f32 %v1439_v51, 0.0  ;;  %v8535_v41 = vld [vmem:[#allocation6 + $0x8] ss:$16 sps:$4 sm:$0xff]  }
 0x2e5   : > { %v1677_v2 = vmax.f32 %v1620_v57, %v1621_v52  ;;  %v1442_v3 = vpop.f32.mrf.mxu0  ;;  %v1555_v4 = vpop.f32.mrf.mxu1  ;;  %2510 = vmatprep.subr.bf16.mxu0 %v8525_v53  ;;  %v1624_v16 = vmax.f32 %v1552_v61, 0.0  ;;  %v8541_v61 = vld [vmem:[#allocation6 + $0x1e8] ss:$16 sps:$4 sm:$0xff]  }
 0x2e6   : > { %v1623_v6 = vmax.f32 %v1441_v62, 0.0  ;;  %v1625_v7 = vmax.f32 %v1554_v63, 0.0  ;;  %v1443_v8 = vadd.f32 %v1442_v3, %v9390_v28  ;;  %v1556_v10 = vadd.f32 %v1555_v4, %v9393_v29  ;;  %v8549_v3 = vld [vmem:[#allocation6 + $0x1cc] ss:$16 sps:$4 sm:$0xff]  }
 0x2e7   : > { %v1444_v11 = vpop.f32.mrf.mxu0  ;;  %v1557_v12 = vpop.f32.mrf.mxu1  ;;  %v1693_v13 = vmax.f32 %v1661_v1, %v1677_v2 }
 0x2e8   : > { %2511 = vmatpush1.bf16.msra.mxu0 %v8523_v0  ;;  %v1445_v18 = vadd.f32 %v1444_v11, %v9396_v30  ;;  %v1558_v19 = vadd.f32 %v1557_v12, %v9399_v31  ;;  %v1662_v24 = vmax.f32 %v1622_v15, %v1623_v6  ;;  %v1678_v27 = vmax.f32 %v1624_v16, %v1625_v7 }
 0x2e9   : > { %v1448_v20 = vpop.f32.mrf.mxu0  ;;  %v1561_v21 = vpop.f32.mrf.mxu1  ;;  %v1705_v22 = vpack.c.bf16 %v1693_v13, %v1692_v9  ;;  %2512 = vmatprep.subr.bf16.mxu0 %v8531_v5  ;;  %v1626_v32 = vmax.f32 %v1443_v8, 0.0  ;;  %v1628_v33 = vmax.f32 %v1556_v10, 0.0 }
 0x2ea   : > { %v1627_v34 = vmax.f32 %v1445_v18, 0.0  ;;  %v1629_v35 = vmax.f32 %v1558_v19, 0.0  ;;  %v1449_v36 = vadd.f32 %v1448_v20, %v9390_v28  ;;  %v1562_v38 = vadd.f32 %v1561_v21, %v9393_v29 }
 0x2eb   : > { %1882 = vmatmul.mubr.bf16.gmra.mxu0 %v1705_v22  ;;  %v1450_v14 = vpop.f32.mrf.mxu0  ;;  %v1563_v37 = vpop.f32.mrf.mxu1  ;;  %v1694_v56 = vmax.f32 %v1662_v24, %v1678_v27  ;;  %v8555_v22 = vld [vmem:[#allocation6 + $0x1ac] ss:$16 sps:$4 sm:$0xff]  }
 0x2ec   : > { %v1451_v39 = vadd.f32 %v1450_v14, %v9396_v30  ;;  %v1564_v40 = vadd.f32 %v1563_v37, %v9399_v31  ;;  %1891 = vmatprep.mubr.bf16.mxu0 %v9019_v48  ;;  %2513 = vmatpush1.bf16.msra.mxu0 %v8529_v17  ;;  %v1663_v42 = vmax.f32 %v1626_v32, %v1627_v34  ;;  %v1630_v59 = vmax.f32 %v1449_v36, 0.0  ;;  %v8547_v17 = vld [vmem:[#allocation6 + $0x1c8] ss:$16 sps:$4 sm:$0xff]  }
 0x2ed   : > { %v1679_v43 = vmax.f32 %v1628_v33, %v1629_v35  ;;  %v1452_v44 = vpop.f32.mrf.mxu0  ;;  %v1565_v49 = vpop.f32.mrf.mxu1  ;;  %2514 = vmatprep.subr.bf16.mxu0 %v8537_v23  ;;  %v1632_v60 = vmax.f32 %v1562_v38, 0.0  ;;  %v8553_v38 = vld [vmem:[#allocation6 + $0x1a8] ss:$16 sps:$4 sm:$0xff]  }
 0x2ee   : > { %v1631_v53 = vmax.f32 %v1451_v39, 0.0  ;;  %v1633_v54 = vmax.f32 %v1564_v40, 0.0  ;;  %v1453_v55 = vadd.f32 %v1452_v44, %v9390_v28  ;;  %v1566_v57 = vadd.f32 %v1565_v49, %v9393_v29  ;;  %v8561_v44 = vld [vmem:[#allocation6 + $0x18c] ss:$16 sps:$4 sm:$0xff]  }
 0x2ef   : > { %v1454_v58 = vpop.f32.mrf.mxu0  ;;  %v1567_v52 = vpop.f32.mrf.mxu1  ;;  %v1695_v51 = vmax.f32 %v1663_v42, %v1679_v43 }
 0x2f0   : > { %2515 = vmatpush1.bf16.msra.mxu0 %v8535_v41  ;;  %v1455_v62 = vadd.f32 %v1454_v58, %v9396_v30  ;;  %v1568_v63 = vadd.f32 %v1567_v52, %v9399_v31  ;;  %v1664_v4 = vmax.f32 %v1630_v59, %v1631_v53  ;;  %v1680_v5 = vmax.f32 %v1632_v60, %v1633_v54 }
 0x2f1   : > { %v1458_v0 = vpop.f32.mrf.mxu0  ;;  %v1571_v1 = vpop.f32.mrf.mxu1  ;;  %v1706_v2 = vpack.c.bf16 %v1695_v51, %v1694_v56  ;;  %2516 = vmatprep.subr.bf16.mxu0 %v8543_v50  ;;  %v1634_v6 = vmax.f32 %v1453_v55, 0.0  ;;  %v1636_v7 = vmax.f32 %v1566_v57, 0.0 }
 0x2f2   : > { %v1635_v8 = vmax.f32 %v1455_v62, 0.0  ;;  %v1637_v9 = vmax.f32 %v1568_v63, 0.0  ;;  %v1459_v10 = vadd.f32 %v1458_v0, %v9390_v28  ;;  %v1572_v13 = vadd.f32 %v1571_v1, %v9393_v29 }
 0x2f3   : > { %1892 = vmatmul.mubr.bf16.gmra.mxu0 %v1706_v2  ;;  %v1460_v11 = vpop.f32.mrf.mxu0  ;;  %v1573_v12 = vpop.f32.mrf.mxu1  ;;  %v1696_v32 = vmax.f32 %v1664_v4, %v1680_v5  ;;  %v8567_v2 = vld [vmem:[#allocation6 + $0x16c] ss:$16 sps:$4 sm:$0xff]  }
 0x2f4   : > { %v1461_v15 = vadd.f32 %v1460_v11, %v9396_v30  ;;  %v1574_v16 = vadd.f32 %v1573_v12, %v9399_v31  ;;  %1901 = vmatprep.mubr.bf16.mxu0 %v9019_v48  ;;  %2517 = vmatpush2.bf16.msra.mxu0 %v8541_v61  ;;  %v1665_v18 = vmax.f32 %v1634_v6, %v1635_v8  ;;  %v1638_v14 = vmax.f32 %v1459_v10, 0.0  ;;  %v8559_v61 = vld [vmem:[#allocation6 + $0x188] ss:$16 sps:$4 sm:$0xff]  }
 0x2f5   : > { %v1681_v19 = vmax.f32 %v1636_v7, %v1637_v9  ;;  %v1462_v20 = vpop.f32.mrf.mxu0  ;;  %v1575_v21 = vpop.f32.mrf.mxu1  ;;  %2518 = vmatprep.subr.bf16.mxu0 %v8549_v3  ;;  %v1640_v37 = vmax.f32 %v1572_v13, 0.0  ;;  %v8565_v13 = vld [vmem:[#allocation6 + $0x168] ss:$16 sps:$4 sm:$0xff]  }
 0x2f6   : > { %v1639_v23 = vmax.f32 %v1461_v15, 0.0  ;;  %v1641_v24 = vmax.f32 %v1574_v16, 0.0  ;;  %v1463_v27 = vadd.f32 %v1462_v20, %v9390_v28  ;;  %v1576_v33 = vadd.f32 %v1575_v21, %v9393_v29 }
 0x2f7   : > { %v1464_v34 = vpop.f32.mrf.mxu0  ;;  %v1577_v35 = vpop.f32.mrf.mxu1  ;;  %v1697_v36 = vmax.f32 %v1665_v18, %v1681_v19 }
 0x2f8   : > { %2519 = vmatpush2.bf16.msra.mxu0 %v8547_v17  ;;  %v1465_v39 = vadd.f32 %v1464_v34, %v9396_v30  ;;  %v1578_v40 = vadd.f32 %v1577_v35, %v9399_v31  ;;  %v1666_v49 = vmax.f32 %v1638_v14, %v1639_v23  ;;  %v1682_v50 = vmax.f32 %v1640_v37, %v1641_v24  ;;  %v8571_v34 = vld [vmem:[#allocation6 + $0x148] ss:$16 sps:$4 sm:$0xff]   ;;  %v8576_v35 = vld [vmem:[#allocation6 + $0x124] ss:$16 sps:$4 sm:$0xff]   ;;  %v8574_v14 = vld [vmem:[#allocation6 + $0x120] ss:$16 sps:$4 sm:$0xff]  }
 0x2f9   : > { %v1468_v41 = vpop.f32.mrf.mxu0  ;;  %v1581_v42 = vpop.f32.mrf.mxu1  ;;  %v1707_v43 = vpack.c.bf16 %v1697_v36, %v1696_v32  ;;  %2520 = vmatprep.subr.bf16.mxu0 %v8555_v22  ;;  %v1642_v53 = vmax.f32 %v1463_v27, 0.0  ;;  %v1644_v54 = vmax.f32 %v1576_v33, 0.0  ;;  %v8568_v33 = vld [vmem:[#allocation6 + $0x140] ss:$16 sps:$4 sm:$0xff]   ;;  %v8579_v36 = vld [vmem:[#allocation6 + $0x12c] ss:$16 sps:$4 sm:$0xff]  }
 0x2fa   : > { %v1643_v55 = vmax.f32 %v1465_v39, 0.0  ;;  %v1645_v56 = vmax.f32 %v1578_v40, 0.0  ;;  %v1469_v57 = vadd.f32 %v1468_v41, %v9390_v28  ;;  %v1582_v51 = vadd.f32 %v1581_v42, %v9393_v29  ;;  %v8577_v37 = vld [vmem:[#allocation6 + $0x128] ss:$16 sps:$4 sm:$0xff]   ;;  %v8580_v39 = vld [vmem:[#allocation6 + $0x100] ss:$16 sps:$4 sm:$0xff]  }
 0x2fb   : > { %1902 = vmatmul.mubr.bf16.gmra.mxu0 %v1707_v43  ;;  %v1470_v58 = vpop.f32.mrf.mxu0  ;;  %v1583_v52 = vpop.f32.mrf.mxu1  ;;  %v1698_v5 = vmax.f32 %v1666_v49, %v1682_v50  ;;  %v8583_v40 = vld [vmem:[#allocation6 + $0x108] ss:$16 sps:$4 sm:$0xff]   ;;  %v2765_v41 = vld [vmem:[%s12566_s6 + $0x1c0] sm:$0xff] }
 0x2fc   : > { %v1471_v59 = vadd.f32 %v1470_v58, %v9396_v30  ;;  %v1584_v60 = vadd.f32 %v1583_v52, %v9399_v31  ;;  %1911 = vmatprep.mubr.bf16.mxu0 %v9019_v48  ;;  %2521 = vmatpush2.bf16.msra.mxu0 %v8553_v38  ;;  %v1667_v62 = vmax.f32 %v1642_v53, %v1643_v55  ;;  %v1646_v11 = vmax.f32 %v1469_v57, 0.0  ;;  %v8585_v38 = vld [vmem:[#allocation6 + $0x10c] ss:$16 sps:$4 sm:$0xff]   ;;  %v2769_v42 = vld [vmem:[%s12566_s6 + $0x1e0] sm:$0xff] }
 0x2fd   : > { %v1683_v63 = vmax.f32 %v1644_v54, %v1645_v56  ;;  %v1472_v0 = vpop.f32.mrf.mxu0  ;;  %v1585_v1 = vpop.f32.mrf.mxu1  ;;  %2522 = vmatprep.subr.bf16.mxu0 %v8561_v44  ;;  %v1648_v12 = vmax.f32 %v1582_v51, 0.0  ;;  %v2893_v43 = vld [vmem:[%s12566_s6 + $0x5c0] sm:$0xff]  ;;  %v7613_v44 = vcombine.low %v2765_v41, %v2769_v42  ;;  %v7614_v49 = vcombine.high %v2765_v41, %v2769_v42 }
 0x2fe   : > { %v1647_v3 = vmax.f32 %v1471_v59, 0.0  ;;  %v1649_v4 = vmax.f32 %v1584_v60, 0.0  ;;  %v1473_v6 = vadd.f32 %v1472_v0, %v9390_v28  ;;  %v1586_v7 = vadd.f32 %v1585_v1, %v9393_v29  ;;  %v2897_v50 = vld [vmem:[%s12566_s6 + $0x5e0] sm:$0xff] }
 0x2ff   : > { %v1474_v8 = vpop.f32.mrf.mxu0  ;;  %v1587_v9 = vpop.f32.mrf.mxu1  ;;  %v1699_v10 = vmax.f32 %v1667_v62, %v1683_v63  ;;  %v7741_v53 = vcombine.low %v2893_v43, %v2897_v50  ;;  %v7742_v54 = vcombine.high %v2893_v43, %v2897_v50  ;;  %v7473_v55 = vld [vmem:[%s12571_s11 + $0x3] ss:$8 sm:$0x3] }
 0x300   : > { %2523 = vmatpush2.bf16.msra.mxu0 %v8559_v61  ;;  %v1475_v15 = vadd.f32 %v1474_v8, %v9396_v30  ;;  %v1588_v16 = vadd.f32 %v1587_v9, %v9399_v31  ;;  %v1668_v18 = vmax.f32 %v1646_v11, %v1647_v3  ;;  %v1684_v19 = vmax.f32 %v1648_v12, %v1649_v4  ;;  %v8570_v30 = vld [vmem:[#allocation6 + $0x144] ss:$16 sps:$4 sm:$0xff]   ;;  %v8573_v31 = vld [vmem:[#allocation6 + $0x14c] ss:$16 sps:$4 sm:$0xff]  }
 0x301   : > { %v1708_v17 = vpack.c.bf16 %v1699_v10, %v1698_v5  ;;  %2524 = vmatprep.subr.bf16.mxu0 %v8567_v2  ;;  %v1650_v20 = vmax.f32 %v1473_v6, 0.0  ;;  %v1652_v21 = vmax.f32 %v1586_v7, 0.0  ;;  %2413 = vmatprep.subr.bf16.mxu1 %v8570_v30  ;;  %v9488_v57 = vrot.slane %v7473_v55, %v9288_v46  ;;  %v2757_v2 = vld [vmem:[%s12566_s6 + $0x180] sm:$0xff] }
 0x302   : > { %v1651_v28 = vmax.f32 %v1475_v15, 0.0  ;;  %v1653_v22 = vmax.f32 %v1588_v16, 0.0  ;;  %v1700_v24 = vmax.f32 %v1668_v18, %v1684_v19  ;;  %2414 = vmatpush2.bf16.msra.mxu1 %v8568_v33  ;;  %v9491_v58 = vrot.slane %v7473_v55, %v9291_v47  ;;  %v2761_v5 = vld [vmem:[%s12566_s6 + $0x1a0] sm:$0xff] }
 0x303   : > { %1912 = vmatmul.mubr.bf16.gmra.mxu0 %v1708_v17  ;;  %2415 = vmatprep.subr.bf16.mxu1 %v8576_v35  ;;  %v2885_v6 = vld [vmem:[%s12566_s6 + $0x580] sm:$0xff] }
 0x304   : > { %1921 = vmatprep.mubr.bf16.mxu0 %v9019_v48  ;;  %2525 = vmatpush2.bf16.msra.mxu0 %v8565_v13  ;;  %v1669_v29 = vmax.f32 %v1650_v20, %v1651_v28  ;;  %v1685_v23 = vmax.f32 %v1652_v21, %v1653_v22  ;;  %v8582_v48 = vld [vmem:[#allocation6 + $0x104] ss:$16 sps:$4 sm:$0xff]   ;;  %v7606_v13 = vcombine.high %v2757_v2, %v2761_v5 }
 0x305   : > { %2526 = vmatprep.subr.bf16.mxu0 %v8573_v31  ;;  %v2889_v7 = vld [vmem:[%s12566_s6 + $0x5a0] sm:$0xff] }
 0x306   : > { %v1701_v27 = vmax.f32 %v1669_v29, %v1685_v23  ;;  %2416 = vmatpush2.bf16.msra.mxu1 %v8574_v14  ;;  %v7734_v15 = vcombine.high %v2885_v6, %v2889_v7  ;;  %v2749_v16 = vld [vmem:[%s12566_s6 + $0x140] sm:$0xff]  ;;  %v7605_v23 = vcombine.low %v2757_v2, %v2761_v5 }
 0x307   : > { %2417 = vmatprep.subr.bf16.mxu1 %v8582_v48  ;;  %v2753_v19 = vld [vmem:[%s12566_s6 + $0x160] sm:$0xff] }
 0x308   : > { %v1709_v32 = vpack.c.bf16 %v1701_v27, %v1700_v24  ;;  %2527 = vmatpush2.bf16.msra.mxu0 %v8571_v34  ;;  %v2877_v20 = vld [vmem:[%s12566_s6 + $0x540] sm:$0xff]  ;;  %v7733_v24 = vcombine.low %v2885_v6, %v2889_v7  ;;  %v7598_v30 = vcombine.high %v2749_v16, %v2753_v19 }
 0x309   : > { %2528 = vmatprep.subr.bf16.mxu0 %v8579_v36  ;;  %v2881_v21 = vld [vmem:[%s12566_s6 + $0x560] sm:$0xff] }
 0x30a   : > { %2418 = vmatpush2.bf16.msra.mxu1 %v8580_v39  ;;  %v7726_v31 = vcombine.high %v2877_v20, %v2881_v21  ;;  %v2741_v33 = vld [vmem:[%s12566_s6 + $0x100] sm:$0xff]  ;;  %v7725_v41 = vcombine.low %v2877_v20, %v2881_v21 }
 0x30b   : > { %1922 = vmatmul.mubr.bf16.gmra.mxu0 %v1709_v32  ;;  %4290 = vmatprep.subr.bf16.mxu1 %v7614_v49  ;;  %v2745_v36 = vld [vmem:[%s12566_s6 + $0x120] sm:$0xff] }
 0x30c   : > { %2529 = vmatpush2.bf16.msra.mxu0 %v8577_v37  ;;  %v2869_v14 = vld [vmem:[%s12566_s6 + $0x500] sm:$0xff] }
 0x30d   : > { %2530 = vmatprep.subr.bf16.mxu0 %v8585_v38  ;;  %v2873_v37 = vld [vmem:[%s12566_s6 + $0x520] sm:$0xff] }
 0x30e   : > { %v7718_v49 = vcombine.high %v2869_v14, %v2873_v37  ;;  %v2733_v50 = vld [vmem:[%s12566_s6 + $0xc0] sm:$0xff] }
 0x30f   : > { %v2737_v55 = vld [vmem:[%s12566_s6 + $0xe0] sm:$0xff] }
 0x310   : > { %2531 = vmatpush2.bf16.msra.mxu0 %v8583_v40  ;;  %v7597_v40 = vcombine.low %v2749_v16, %v2753_v19  ;;  %v2729_v6 = vld [vmem:[%s12566_s6 + $0xa0] sm:$0xff] }
 0x311   : > { %4403 = vmatprep.subr.bf16.mxu0 %v7742_v54  ;;  %v2853_v7 = vld [vmem:[%s12566_s6 + $0x480] sm:$0xff] }
 0x312   : > { %v2717_v19 = vld [vmem:[%s12566_s6 + $0x40] sm:$0xff] }
 0x392   : > { %v1853_v56 = vpop.f32.mrf.mxu0 }
 0x393   : > { %v1854_v61 = vadd.f32 %v1853_v56, %v9491_v58  ;;  %v2861_v56 = vld [vmem:[%s12566_s6 + $0x4c0] sm:$0xff] }
 0x394   : > { %v1855_v52 = vpop.f32.mrf.mxu0 }
 0x395   : > { %v1856_v59 = vadd.f32 %v1855_v52, %v9488_v57  ;;  %v1932_v8 = vmax.f32 %v1854_v61, 0.0  ;;  %v2865_v52 = vld [vmem:[%s12566_s6 + $0x4e0] sm:$0xff]  ;;  %v7589_v61 = vcombine.low %v2741_v33, %v2745_v36 }
 0x396   : > { %v1857_v51 = vpop.f32.mrf.mxu0  ;;  %v7710_v2 = vcombine.high %v2861_v56, %v2865_v52 }
 0x397   : > { %v1858_v60 = vadd.f32 %v1857_v51, %v9491_v58  ;;  %v1933_v3 = vmax.f32 %v1856_v59, 0.0 }
 0x398   : > { %v1859_v62 = vpop.f32.mrf.mxu0 }
 0x399   : > { %v1860_v63 = vadd.f32 %v1859_v62, %v9488_v57  ;;  %v1934_v0 = vmax.f32 %v1858_v60, 0.0  ;;  %v7717_v62 = vcombine.low %v2869_v14, %v2873_v37 }
 0x39b   : > { %v1863_v1 = vpop.f32.mrf.mxu0  ;;  %v1935_v4 = vmax.f32 %v1860_v63, 0.0  ;;  %v1964_v11 = vpack.c.bf16 %v1934_v0, %v1932_v8  ;;  %v2857_v8 = vld [vmem:[%s12566_s6 + $0x4a0] sm:$0xff] }
 0x39c   : > { %v1864_v28 = vadd.f32 %v1863_v1, %v9491_v58  ;;  %v7582_v1 = vcombine.high %v2733_v50, %v2737_v55 }
 0x39d   : > { %v1865_v9 = vpop.f32.mrf.mxu0  ;;  %v1965_v10 = vpack.c.bf16 %v1935_v4, %v1933_v3  ;;  %v2725_v3 = vld [vmem:[%s12566_s6 + $0x80] sm:$0xff] }
 0x39e   : > { %v1866_v17 = vadd.f32 %v1865_v9, %v9488_v57  ;;  %v1936_v48 = vmax.f32 %v1864_v28, 0.0  ;;  %v2721_v28 = vld [vmem:[%s12566_s6 + $0x60] sm:$0xff] }
 0x39f   : > { %v1867_v12 = vpop.f32.mrf.mxu0  ;;  %2419 = vmatprep.mubr.bf16.mxu1 %v1965_v10  ;;  %2532 = vmatprep.mubr.bf16.mxu0 %v1965_v10 }
 0x3a0   : > { %v1868_v18 = vadd.f32 %v1867_v12, %v9491_v58  ;;  %2420 = vmatmul.mubr.bf16.vlgmr.msra.gmra.mxu1 %v1964_v11  ;;  %2533 = vmatmul.mubr.bf16.vlgmr.msra.gmra.mxu0 %v1964_v11  ;;  %v1937_v34 = vmax.f32 %v1866_v17, 0.0  ;;  %v7581_v12 = vcombine.low %v2733_v50, %v2737_v55  ;;  %v7574_v17 = vcombine.high %v2725_v3, %v2729_v6  ;;  %v2829_v55 = vld [vmem:[%s12566_s6 + $0x3c0] sm:$0xff] }
 0x3a1   : > { %v1869_v22 = vpop.f32.mrf.mxu0  ;;  %4291 = vmatpush1.bf16.msra.mxu1 %v7613_v44  ;;  %4404 = vmatpush1.bf16.msra.mxu0 %v7741_v53  ;;  %v7590_v44 = vcombine.high %v2741_v33, %v2745_v36  ;;  %v2709_v36 = vld [vmem:[%s12566_s6] sm:$0xff] }
 0x3a2   : > { %v1870_v29 = vadd.f32 %v1869_v22, %v9488_v57  ;;  %v1938_v27 = vmax.f32 %v1868_v18, 0.0  ;;  %4292 = vmatprep.subr.bf16.mxu1 %v7606_v13  ;;  %4405 = vmatprep.subr.bf16.mxu0 %v7734_v15  ;;  %v7709_v13 = vcombine.low %v2861_v56, %v2865_v52  ;;  %v7702_v18 = vcombine.high %v2853_v7, %v2857_v8  ;;  %v2845_v22 = vld [vmem:[%s12566_s6 + $0x440] sm:$0xff] }
 0x3a3   : > { %v1873_v32 = vpop.f32.mrf.mxu0 }
 0x3a4   : > { %v1939_v35 = vmax.f32 %v1870_v29, 0.0  ;;  %v1966_v42 = vpack.c.bf16 %v1938_v27, %v1936_v48  ;;  %v1874_v51 = vadd.f32 %v1873_v32, %v9491_v58  ;;  %v2849_v29 = vld [vmem:[%s12566_s6 + $0x460] sm:$0xff]  ;;  %v7573_v32 = vcombine.low %v2725_v3, %v2729_v6 }
 0x3a5   : > { %v1875_v38 = vpop.f32.mrf.mxu0  ;;  %4293 = vmatpush1.bf16.msra.mxu1 %v7605_v23  ;;  %4406 = vmatpush1.bf16.msra.mxu0 %v7733_v24  ;;  %v2713_v48 = vld [vmem:[%s12566_s6 + $0x20] sm:$0xff] }
 0x3a6   : > { %v1967_v39 = vpack.c.bf16 %v1939_v35, %v1937_v34  ;;  %4294 = vmatprep.subr.bf16.mxu1 %v7598_v30  ;;  %4407 = vmatprep.subr.bf16.mxu0 %v7726_v31  ;;  %v1876_v53 = vadd.f32 %v1875_v38, %v9488_v57  ;;  %v1940_v9 = vmax.f32 %v1874_v51, 0.0  ;;  %v7701_v30 = vcombine.low %v2853_v7, %v2857_v8  ;;  %v2837_v38 = vld [vmem:[%s12566_s6 + $0x400] sm:$0xff] }
 0x3a7   : > { %v1877_v43 = vpop.f32.mrf.mxu0  ;;  %v7566_v34 = vcombine.high %v2717_v19, %v2721_v28  ;;  %v7694_v35 = vcombine.high %v2845_v22, %v2849_v29  ;;  %v2833_v51 = vld [vmem:[%s12566_s6 + $0x3e0] sm:$0xff] }
 0x3a8   : > { %v1878_v54 = vadd.f32 %v1877_v43, %v9491_v58  ;;  %2429 = vmatprep.mubr.bf16.mxu1 %v1967_v39  ;;  %2542 = vmatprep.mubr.bf16.mxu0 %v1967_v39  ;;  %v1941_v4 = vmax.f32 %v1876_v53, 0.0  ;;  %v2841_v39 = vld [vmem:[%s12566_s6 + $0x420] sm:$0xff]  ;;  %v7565_v43 = vcombine.low %v2717_v19, %v2721_v28  ;;  %v7558_v53 = vcombine.high %v2709_v36, %v2713_v48 }
 0x3a9   : > { %v1879_v59 = vpop.f32.mrf.mxu0  ;;  %2430 = vmatmul.mubr.bf16.gmra.mxu1 %v1966_v42  ;;  %2543 = vmatmul.mubr.bf16.gmra.mxu0 %v1966_v42  ;;  %v2821_v6 = vld [vmem:[%s12566_s6 + $0x380] sm:$0xff] }
 0x3aa   : > { %v1880_v60 = vadd.f32 %v1879_v59, %v9488_v57  ;;  %4295 = vmatpush1.bf16.msra.mxu1 %v7597_v40  ;;  %4408 = vmatpush1.bf16.msra.mxu0 %v7725_v41  ;;  %v1942_v63 = vmax.f32 %v1878_v54, 0.0  ;;  %v7686_v54 = vcombine.high %v2837_v38, %v2841_v39  ;;  %v2957_v59 = vld [vmem:[%s12566_s6 + $0x7c0] sm:$0xff] }
 0x3ab   : > { %v1883_v0 = vpop.f32.mrf.mxu0  ;;  %4296 = vmatprep.subr.bf16.mxu1 %v7590_v44  ;;  %4409 = vmatprep.subr.bf16.mxu0 %v7718_v49  ;;  %v7693_v44 = vcombine.low %v2845_v22, %v2849_v29  ;;  %v2813_v28 = vld [vmem:[%s12566_s6 + $0x340] sm:$0xff] }
 0x3ac   : > { %v1943_v5 = vmax.f32 %v1880_v60, 0.0  ;;  %v1968_v15 = vpack.c.bf16 %v1942_v63, %v1940_v9  ;;  %v1884_v23 = vadd.f32 %v1883_v0, %v9491_v58  ;;  %v2961_v60 = vld [vmem:[%s12566_s6 + $0x7e0] sm:$0xff]  ;;  %v7557_v0 = vcombine.low %v2709_v36, %v2713_v48 }
 0x3ad   : > { %v1885_v10 = vpop.f32.mrf.mxu0  ;;  %v2825_v9 = vld [vmem:[%s12566_s6 + $0x3a0] sm:$0xff] }
 0x3ae   : > { %v1969_v11 = vpack.c.bf16 %v1943_v5, %v1941_v4  ;;  %4297 = vmatpush1.bf16.msra.mxu1 %v7589_v61  ;;  %4410 = vmatpush1.bf16.msra.mxu0 %v7717_v62  ;;  %v1886_v20 = vadd.f32 %v1885_v10, %v9488_v57  ;;  %v1944_v40 = vmax.f32 %v1884_v23, 0.0  ;;  %v7678_v4 = vcombine.high %v2829_v55, %v2833_v51  ;;  %v2949_v10 = vld [vmem:[%s12566_s6 + $0x780] sm:$0xff] }
 0x3af   : > { %v1887_v16 = vpop.f32.mrf.mxu0  ;;  %4298 = vmatprep.subr.bf16.mxu1 %v7582_v1  ;;  %4411 = vmatprep.subr.bf16.mxu0 %v7710_v2  ;;  %v7685_v1 = vcombine.low %v2837_v38, %v2841_v39  ;;  %v7806_v5 = vcombine.high %v2957_v59, %v2961_v60  ;;  %v2817_v23 = vld [vmem:[%s12566_s6 + $0x360] sm:$0xff] }
 0x3b0   : > { %v1888_v21 = vadd.f32 %v1887_v16, %v9491_v58  ;;  %2439 = vmatprep.mubr.bf16.mxu1 %v1969_v11  ;;  %2552 = vmatprep.mubr.bf16.mxu0 %v1969_v11  ;;  %v1945_v14 = vmax.f32 %v1886_v20, 0.0  ;;  %v2953_v11 = vld [vmem:[%s12566_s6 + $0x7a0] sm:$0xff]  ;;  %v7677_v16 = vcombine.low %v2829_v55, %v2833_v51  ;;  %v7670_v20 = vcombine.high %v2821_v6, %v2825_v9 }
 0x3b1   : > { %v1889_v24 = vpop.f32.mrf.mxu0  ;;  %2440 = vmatmul.mubr.bf16.gmra.mxu1 %v1968_v15  ;;  %2553 = vmatmul.mubr.bf16.gmra.mxu0 %v1968_v15  ;;  %v2805_v48 = vld [vmem:[%s12566_s6 + $0x300] sm:$0xff] }
 0x3b2   : > { %v1890_v27 = vadd.f32 %v1889_v24, %v9488_v57  ;;  %4299 = vmatpush1.bf16.msra.mxu1 %v7581_v12  ;;  %4412 = vmatpush1.bf16.msra.mxu0 %v7709_v13  ;;  %v1946_v31 = vmax.f32 %v1888_v21, 0.0  ;;  %v7798_v21 = vcombine.high %v2949_v10, %v2953_v11  ;;  %v2941_v24 = vld [vmem:[%s12566_s6 + $0x740] sm:$0xff] }
 0x3b3   : > { %v1893_v33 = vpop.f32.mrf.mxu0  ;;  %4300 = vmatprep.subr.bf16.mxu1 %v7574_v17  ;;  %4413 = vmatprep.subr.bf16.mxu0 %v7702_v18  ;;  %v7805_v17 = vcombine.low %v2957_v59, %v2961_v60  ;;  %v2797_v51 = vld [vmem:[%s12566_s6 + $0x2c0] sm:$0xff] }
 0x3b4   : > { %v1947_v37 = vmax.f32 %v1890_v27, 0.0  ;;  %v1970_v49 = vpack.c.bf16 %v1946_v31, %v1944_v40  ;;  %v1894_v61 = vadd.f32 %v1893_v33, %v9491_v58  ;;  %v2945_v27 = vld [vmem:[%s12566_s6 + $0x760] sm:$0xff]  ;;  %v7669_v33 = vcombine.low %v2821_v6, %v2825_v9 }
 0x3b5   : > { %v1895_v41 = vpop.f32.mrf.mxu0  ;;  %v2809_v40 = vld [vmem:[%s12566_s6 + $0x320] sm:$0xff] }
 0x3b6   : > { %v1971_v42 = vpack.c.bf16 %v1947_v37, %v1945_v14  ;;  %4301 = vmatpush1.bf16.msra.mxu1 %v7573_v32  ;;  %4414 = vmatpush1.bf16.msra.mxu0 %v7701_v30  ;;  %v1896_v56 = vadd.f32 %v1895_v41, %v9488_v57  ;;  %v1948_v12 = vmax.f32 %v1894_v61, 0.0  ;;  %v7662_v14 = vcombine.high %v2813_v28, %v2817_v23  ;;  %v2933_v41 = vld [vmem:[%s12566_s6 + $0x700] sm:$0xff] }
 0x3b7   : > { %v1897_v50 = vpop.f32.mrf.mxu0  ;;  %4302 = vmatprep.subr.bf16.mxu1 %v7566_v34  ;;  %4415 = vmatprep.subr.bf16.mxu0 %v7694_v35  ;;  %v7797_v34 = vcombine.low %v2949_v10, %v2953_v11  ;;  %v7790_v37 = vcombine.high %v2941_v24, %v2945_v27  ;;  %v2801_v61 = vld [vmem:[%s12566_s6 + $0x2e0] sm:$0xff] }
 0x3b8   : > { %v1898_v52 = vadd.f32 %v1897_v50, %v9491_v58  ;;  %2449 = vmatprep.mubr.bf16.mxu1 %v1971_v42  ;;  %2562 = vmatprep.mubr.bf16.mxu0 %v1971_v42  ;;  %v1949_v7 = vmax.f32 %v1896_v56, 0.0  ;;  %v2937_v42 = vld [vmem:[%s12566_s6 + $0x720] sm:$0xff]  ;;  %v7661_v50 = vcombine.low %v2813_v28, %v2817_v23  ;;  %v7654_v56 = vcombine.high %v2805_v48, %v2809_v40 }
 0x3b9   : > { %v1899_v62 = vpop.f32.mrf.mxu0  ;;  %2450 = vmatmul.mubr.bf16.gmra.mxu1 %v1970_v49  ;;  %2563 = vmatmul.mubr.bf16.gmra.mxu0 %v1970_v49 }
 0x3ba   : > { %v1900_v63 = vadd.f32 %v1899_v62, %v9488_v57  ;;  %4303 = vmatpush1.bf16.msra.mxu1 %v7565_v43  ;;  %4416 = vmatpush1.bf16.msra.mxu0 %v7693_v44  ;;  %v1950_v2 = vmax.f32 %v1898_v52, 0.0  ;;  %v7782_v52 = vcombine.high %v2933_v41, %v2937_v42  ;;  %v2925_v62 = vld [vmem:[%s12566_s6 + $0x6c0] sm:$0xff] }
 0x3bb   : > { %v1903_v3 = vpop.f32.mrf.mxu0  ;;  %4304 = vmatprep.subr.bf16.mxu1 %v7558_v53  ;;  %4417 = vmatprep.subr.bf16.mxu0 %v7686_v54  ;;  %v7789_v53 = vcombine.low %v2941_v24, %v2945_v27 }
 0x3bc   : > { %v1951_v8 = vmax.f32 %v1900_v63, 0.0  ;;  %v1972_v18 = vpack.c.bf16 %v1950_v2, %v1948_v12  ;;  %v1904_v32 = vadd.f32 %v1903_v3, %v9491_v58  ;;  %v2929_v63 = vld [vmem:[%s12566_s6 + $0x6e0] sm:$0xff]  ;;  %v7653_v3 = vcombine.low %v2805_v48, %v2809_v40 }
 0x3bd   : > { %v1905_v13 = vpop.f32.mrf.mxu0  ;;  %v2785_v48 = vld [vmem:[%s12566_s6 + $0x260] sm:$0xff] }
 0x3be   : > { %v1973_v15 = vpack.c.bf16 %v1951_v8, %v1949_v7  ;;  %4305 = vmatpush1.bf16.msra.mxu1 %v7557_v0  ;;  %4418 = vmatpush1.bf16.msra.mxu0 %v7685_v1  ;;  %v1906_v22 = vadd.f32 %v1905_v13, %v9488_v57  ;;  %v1952_v43 = vmax.f32 %v1904_v32, 0.0  ;;  %v7646_v7 = vcombine.high %v2797_v51, %v2801_v61  ;;  %v2913_v40 = vld [vmem:[%s12566_s6 + $0x660] sm:$0xff] }
 0x3bf   : > { %v1907_v19 = vpop.f32.mrf.mxu0  ;;  %4306 = vmatprep.subr.bf16.mxu1 %v7678_v4  ;;  %4419 = vmatprep.subr.bf16.mxu0 %v7806_v5  ;;  %v7781_v4 = vcombine.low %v2933_v41, %v2937_v42  ;;  %v7774_v8 = vcombine.high %v2925_v62, %v2929_v63 }
 0x3c0   : > { %v1908_v29 = vadd.f32 %v1907_v19, %v9491_v58  ;;  %2459 = vmatprep.mubr.bf16.mxu1 %v1973_v15  ;;  %2572 = vmatprep.mubr.bf16.mxu0 %v1973_v15  ;;  %v1953_v38 = vmax.f32 %v1906_v22, 0.0  ;;  %v7645_v15 = vcombine.low %v2797_v51, %v2801_v61  ;;  %v9708_v51 = vld [vmem:[%s12566_s6 + $0x1c8] sm:$0xff] }
 0x3c1   : > { %v1909_v30 = vpop.f32.mrf.mxu0  ;;  %2460 = vmatmul.mubr.bf16.gmra.mxu1 %v1972_v18  ;;  %2573 = vmatmul.mubr.bf16.gmra.mxu0 %v1972_v18 }
 0x3c2   : > { %v1910_v31 = vadd.f32 %v1909_v30, %v9488_v57  ;;  %4307 = vmatpush2.bf16.msra.mxu1 %v7677_v16  ;;  %4420 = vmatpush2.bf16.msra.mxu0 %v7805_v17  ;;  %v1954_v35 = vmax.f32 %v1908_v29, 0.0  ;;  %v7773_v16 = vcombine.low %v2925_v62, %v2929_v63  ;;  %v9725_v62 = vld [vmem:[%s12566_s6 + $0x5e8] sm:$0xff] }
 0x3c3   : > { %v1913_v36 = vpop.f32.mrf.mxu0  ;;  %4308 = vmatprep.subr.bf16.mxu1 %v7670_v20  ;;  %4421 = vmatprep.subr.bf16.mxu0 %v7798_v21 }
 0x3c4   : > { %v1955_v39 = vmax.f32 %v1910_v31, 0.0  ;;  %v1974_v54 = vpack.c.bf16 %v1954_v35, %v1952_v43  ;;  %v1914_v0 = vadd.f32 %v1913_v36, %v9491_v58  ;;  %v2917_v31 = vld [vmem:[%s12566_s6 + $0x680] sm:$0xff] }
 0x3c5   : > { %v1915_v44 = vpop.f32.mrf.mxu0 }
 0x3c6   : > { %v1975_v49 = vpack.c.bf16 %v1955_v39, %v1953_v38  ;;  %4309 = vmatpush2.bf16.msra.mxu1 %v7669_v33  ;;  %4422 = vmatpush2.bf16.msra.mxu0 %v7797_v34  ;;  %v1916_v59 = vadd.f32 %v1915_v44, %v9488_v57  ;;  %v1956_v11 = vmax.f32 %v1914_v0, 0.0  ;;  %v2921_v34 = vld [vmem:[%s12566_s6 + $0x6a0] sm:$0xff] }
 0x3c7   : > { %v1917_v55 = vpop.f32.mrf.mxu0  ;;  %4310 = vmatprep.subr.bf16.mxu1 %v7662_v14  ;;  %4423 = vmatprep.subr.bf16.mxu0 %v7790_v37  ;;  %v7765_v36 = vcombine.low %v2917_v31, %v2921_v34  ;;  %v7766_v14 = vcombine.high %v2917_v31, %v2921_v34  ;;  %v2781_v37 = vld [vmem:[%s12566_s6 + $0x240] sm:$0xff]  ;;  %v9769_v34 = vld [vmem:[%s12566_s6 + $0x588] sm:$0xff] }
 0x3c8   : > { %v1918_v60 = vadd.f32 %v1917_v55, %v9491_v58  ;;  %2469 = vmatprep.mubr.bf16.mxu1 %v1975_v49  ;;  %2582 = vmatprep.mubr.bf16.mxu0 %v1975_v49  ;;  %v1957_v9 = vmax.f32 %v1916_v59, 0.0  ;;  %v2909_v38 = vld [vmem:[%s12566_s6 + $0x640] sm:$0xff]  ;;  %v7630_v39 = vcombine.high %v2781_v37, %v2785_v48  ;;  %v7629_v41 = vcombine.low %v2781_v37, %v2785_v48  ;;  %v9713_v59 = vld [vmem:[%s12566_s6 + $0x1e8] sm:$0xff] }
 0x3c9   : > { %v1919_v1 = vpop.f32.mrf.mxu0  ;;  %2470 = vmatmul.mubr.bf16.gmra.mxu1 %v1974_v54  ;;  %2583 = vmatmul.mubr.bf16.gmra.mxu0 %v1974_v54  ;;  %v7757_v42 = vcombine.low %v2909_v38, %v2913_v40  ;;  %v7758_v43 = vcombine.high %v2909_v38, %v2913_v40  ;;  %v2773_v44 = vld [vmem:[%s12566_s6 + $0x200] sm:$0xff]  ;;  %v7616_v61 = vcombine.high %v9708_v51, %v9713_v59 }
 0x3ca   : > { %v1920_v2 = vadd.f32 %v1919_v1, %v9488_v57  ;;  %4311 = vmatpush2.bf16.msra.mxu1 %v7661_v50  ;;  %4424 = vmatpush2.bf16.msra.mxu0 %v7789_v53  ;;  %v1958_v5 = vmax.f32 %v1918_v60, 0.0  ;;  %v2777_v49 = vld [vmem:[%s12566_s6 + $0x220] sm:$0xff]  ;;  %v9718_v60 = vld [vmem:[%s12566_s6 + $0x5c8] sm:$0xff]  ;;  %v7615_v63 = vcombine.low %v9708_v51, %v9713_v59 }
 0x3cb   : > { %v1923_v6 = vpop.f32.mrf.mxu0  ;;  %4312 = vmatprep.subr.bf16.mxu1 %v7654_v56  ;;  %4425 = vmatprep.subr.bf16.mxu0 %v7782_v52  ;;  %v2901_v50 = vld [vmem:[%s12566_s6 + $0x600] sm:$0xff]  ;;  %v7622_v53 = vcombine.high %v2773_v44, %v2777_v49  ;;  %v7621_v55 = vcombine.low %v2773_v44, %v2777_v49  ;;  %v7743_v0 = vcombine.low %v9718_v60, %v9725_v62  ;;  %v9829_v51 = vld [vmem:[%s12566_s6 + $0x108] sm:$0xff] }
 0x3cc   : > { %v1959_v10 = vmax.f32 %v1920_v2, 0.0  ;;  %v1976_v17 = vpack.c.bf16 %v1958_v5, %v1956_v11  ;;  %v1924_v21 = vadd.f32 %v1923_v6, %v9491_v58  ;;  %v2905_v54 = vld [vmem:[%s12566_s6 + $0x620] sm:$0xff]  ;;  %v7744_v1 = vcombine.high %v9718_v60, %v9725_v62 }
 0x3cd   : > { %v1925_v12 = vpop.f32.mrf.mxu0  ;;  %v7749_v56 = vcombine.low %v2901_v50, %v2905_v54  ;;  %v7750_v52 = vcombine.high %v2901_v50, %v2905_v54  ;;  %v7490_v2 = vld [vmem:[%s12571_s11 + $0x4] ss:$8 sm:$0xf] }
 0x3ce   : > { %v1977_v13 = vpack.c.bf16 %v1959_v10, %v1957_v9  ;;  %4313 = vmatpush2.bf16.msra.mxu1 %v7653_v3  ;;  %4426 = vmatpush2.bf16.msra.mxu0 %v7781_v4  ;;  %v1926_v19 = vadd.f32 %v1925_v12, %v9488_v57  ;;  %v1960_v27 = vmax.f32 %v1924_v21, 0.0  ;;  %v9737_v5 = vrot.slane %v7490_v2, %v9288_v46 }
 0x3cf   : > { %v1927_v18 = vpop.f32.mrf.mxu0  ;;  %4314 = vmatprep.subr.bf16.mxu1 %v7646_v7  ;;  %4427 = vmatprep.subr.bf16.mxu0 %v7774_v8  ;;  %v9740_v6 = vrot.slane %v7490_v2, %v9384_v26  ;;  %v9743_v7 = vrot.slane %v7490_v2, %v9291_v47  ;;  %v9746_v8 = vrot.slane %v7490_v2, %v9381_v25 }
 0x3d0   : > { %v1928_v20 = vadd.f32 %v1927_v18, %v9491_v58  ;;  %2479 = vmatprep.mubr.bf16.mxu1 %v1977_v13  ;;  %2592 = vmatprep.mubr.bf16.mxu0 %v1977_v13  ;;  %v1961_v23 = vmax.f32 %v1926_v19, 0.0  ;;  %v2789_v58 = vld [vmem:[%s12566_s6 + $0x280] sm:$0xff] }
 0x3d1   : > { %v1929_v28 = vpop.f32.mrf.mxu0  ;;  %2480 = vmatmul.mubr.bf16.gmra.mxu1 %v1976_v17  ;;  %2593 = vmatmul.mubr.bf16.gmra.mxu0 %v1976_v17 }
 0x3d2   : > { %v1930_v22 = vadd.f32 %v1929_v28, %v9488_v57  ;;  %4315 = vmatpush2.bf16.msra.mxu1 %v7645_v15  ;;  %4428 = vmatpush2.bf16.msra.mxu0 %v7773_v16  ;;  %v1962_v29 = vmax.f32 %v1928_v20, 0.0  ;;  %v2793_v57 = vld [vmem:[%s12566_s6 + $0x2a0] sm:$0xff] }
 0x3d3   : > { %v7638_v33 = vcombine.high %v2789_v58, %v2793_v57  ;;  %v7637_v35 = vcombine.low %v2789_v58, %v2793_v57  ;;  %4429 = vmatprep.subr.bf16.mxu0 %v7766_v14 }
 0x3d4   : > { %v1963_v24 = vmax.f32 %v1930_v22, 0.0  ;;  %v1978_v30 = vpack.c.bf16 %v1962_v29, %v1960_v27 }
 0x3d5   : > { %4316 = vmatprep.subr.bf16.mxu1 %v7638_v33 }
 0x3d6   : > { %v1979_v32 = vpack.c.bf16 %v1963_v24, %v1961_v23  ;;  %4317 = vmatpush2.bf16.msra.mxu1 %v7637_v35  ;;  %4430 = vmatpush2.bf16.msra.mxu0 %v7765_v36  ;;  %v9774_v35 = vld [vmem:[%s12566_s6 + $0x5a8] sm:$0xff] }
 0x3d7   : > { %4318 = vmatprep.subr.bf16.mxu1 %v7630_v39  ;;  %4431 = vmatprep.subr.bf16.mxu0 %v7758_v43  ;;  %v7736_v50 = vcombine.high %v9769_v34, %v9774_v35 }
 0x3d8   : > { %2489 = vmatprep.mubr.bf16.mxu1 %v1979_v32  ;;  %2602 = vmatprep.mubr.bf16.mxu0 %v1979_v32  ;;  %v9759_v32 = vld [vmem:[%s12566_s6 + $0x188] sm:$0xff] }
 0x3d9   : > { %2490 = vmatmul.mubr.bf16.gmra.mxu1 %v1978_v30  ;;  %2603 = vmatmul.mubr.bf16.gmra.mxu0 %v1978_v30  ;;  %v9764_v30 = vld [vmem:[%s12566_s6 + $0x1a8] sm:$0xff] }
 0x3da   : > { %4319 = vmatpush2.bf16.msra.mxu1 %v7629_v41  ;;  %4432 = vmatpush2.bf16.msra.mxu0 %v7757_v42  ;;  %v7608_v40 = vcombine.high %v9759_v32, %v9764_v30 }
 0x3db   : > { %4320 = vmatprep.subr.bf16.mxu1 %v7622_v53  ;;  %4433 = vmatprep.subr.bf16.mxu0 %v7750_v52  ;;  %v9802_v52 = vld [vmem:[%s12566_s6 + $0x168] sm:$0xff] }
 0x3de   : > { %4321 = vmatpush2.bf16.msra.mxu1 %v7621_v55  ;;  %4434 = vmatpush2.bf16.msra.mxu0 %v7749_v56  ;;  %v9797_v56 = vld [vmem:[%s12566_s6 + $0x148] sm:$0xff] }
 0x3df   : > { %4516 = vmatprep.subr.bf16.mxu1 %v7616_v61  ;;  %4629 = vmatprep.subr.bf16.mxu0 %v7744_v1 }
 0x460   : > { %v2421_v3 = vpop.f32.mrf.mxu1  ;;  %v2534_v4 = vpop.f32.mrf.mxu0 }
 0x461   : > { %v2422_v18 = vadd.f32 %v2421_v3, %v9743_v7  ;;  %v2535_v19 = vadd.f32 %v2534_v4, %v9746_v8  ;;  %v7607_v4 = vcombine.low %v9759_v32, %v9764_v30 }
 0x462   : > { %v2423_v9 = vpop.f32.mrf.mxu1  ;;  %v2536_v10 = vpop.f32.mrf.mxu0 }
 0x463   : > { %v2424_v13 = vadd.f32 %v2423_v9, %v9737_v5  ;;  %v2537_v15 = vadd.f32 %v2536_v10, %v9740_v6  ;;  %v2613_v36 = vmax.f32 %v2422_v18, 0.0  ;;  %v2615_v14 = vmax.f32 %v2535_v19, 0.0  ;;  %v9848_v18 = vld [vmem:[%s12566_s6 + $0x528] sm:$0xff] }
 0x464   : > { %v2425_v11 = vpop.f32.mrf.mxu1  ;;  %v2538_v12 = vpop.f32.mrf.mxu0 }
 0x465   : > { %v2426_v16 = vadd.f32 %v2425_v11, %v9743_v7  ;;  %v2539_v17 = vadd.f32 %v2538_v12, %v9746_v8  ;;  %v2614_v58 = vmax.f32 %v2424_v13, 0.0  ;;  %v2616_v57 = vmax.f32 %v2537_v15, 0.0  ;;  %v2878_v12 = vld [vmem:[%s12566_s6 + $0x548] sm:$0xff] }
 0x466   : > { %v2427_v20 = vpop.f32.mrf.mxu1  ;;  %v2540_v21 = vpop.f32.mrf.mxu0  ;;  %v7735_v11 = vcombine.low %v9769_v34, %v9774_v35  ;;  %v2882_v13 = vld [vmem:[%s12566_s6 + $0x568] sm:$0xff]  ;;  %v7600_v15 = vcombine.high %v9797_v56, %v9802_v52 }
 0x467   : > { %v2428_v28 = vadd.f32 %v2427_v20, %v9737_v5  ;;  %v2541_v22 = vadd.f32 %v2540_v21, %v9740_v6  ;;  %v2617_v29 = vmax.f32 %v2426_v16, 0.0  ;;  %v2619_v23 = vmax.f32 %v2539_v17, 0.0  ;;  %v9838_v16 = vld [vmem:[%s12566_s6 + $0x128] sm:$0xff] }
 0x468   : > { %v9843_v17 = vld [vmem:[%s12566_s6 + $0x508] sm:$0xff]  ;;  %v7728_v32 = vcombine.high %v2878_v12, %v2882_v13 }
 0x469   : > { %v2431_v24 = vpop.f32.mrf.mxu1  ;;  %v2544_v27 = vpop.f32.mrf.mxu0  ;;  %v2618_v31 = vmax.f32 %v2428_v28, 0.0  ;;  %v2620_v33 = vmax.f32 %v2541_v22, 0.0  ;;  %v9782_v41 = vpack.c.bf16 %v2617_v29, %v2613_v36  ;;  %v9784_v42 = vpack.c.bf16 %v2619_v23, %v2615_v14 }
 0x46a   : > { %v2432_v61 = vadd.f32 %v2431_v24, %v9743_v7  ;;  %v2545_v1 = vadd.f32 %v2544_v27, %v9746_v8  ;;  %v7727_v27 = vcombine.low %v2878_v12, %v2882_v13 }
 0x46b   : > { %v2433_v37 = vpop.f32.mrf.mxu1  ;;  %v2546_v48 = vpop.f32.mrf.mxu0  ;;  %v9776_v38 = vpack.c.bf16 %v2618_v31, %v2614_v58  ;;  %v9778_v39 = vpack.c.bf16 %v2620_v33, %v2616_v57  ;;  %v7592_v57 = vcombine.high %v9829_v51, %v9838_v16  ;;  %v7720_v31 = vcombine.high %v9843_v17, %v9848_v18 }
 0x46c   : > { %v2434_v43 = vadd.f32 %v2433_v37, %v9737_v5  ;;  %v2547_v53 = vadd.f32 %v2546_v48, %v9740_v6  ;;  %v2621_v22 = vmax.f32 %v2432_v61, 0.0  ;;  %v2623_v29 = vmax.f32 %v2545_v1, 0.0  ;;  %v2862_v1 = vld [vmem:[%s12566_s6 + $0x4c8] sm:$0xff] }
 0x46d   : > { %v2435_v44 = vpop.f32.mrf.mxu1  ;;  %v2548_v49 = vpop.f32.mrf.mxu0  ;;  %4322 = vmatprep.mubr.bf16.mxu1 %v9776_v38  ;;  %4435 = vmatprep.mubr.bf16.mxu0 %v9778_v39  ;;  %v7719_v61 = vcombine.low %v9843_v17, %v9848_v18 }
 0x46e   : > { %v2436_v54 = vadd.f32 %v2435_v44, %v9743_v7  ;;  %v2549_v55 = vadd.f32 %v2548_v49, %v9746_v8  ;;  %4323 = vmatmul.mubr.bf16.vlgmr.msra.gmra.mxu1 %v9782_v41  ;;  %4436 = vmatmul.mubr.bf16.vlgmr.msra.gmra.mxu0 %v9784_v42  ;;  %v2622_v19 = vmax.f32 %v2434_v43, 0.0  ;;  %v2624_v20 = vmax.f32 %v2547_v53, 0.0  ;;  %v9871_v43 = vld [vmem:[%s12566_s6 + $0xc8] sm:$0xff] }
 0x46f   : > { %v2437_v2 = vpop.f32.mrf.mxu1  ;;  %v2550_v3 = vpop.f32.mrf.mxu0  ;;  %4517 = vmatpush1.bf16.msra.mxu1 %v7615_v63  ;;  %4630 = vmatpush1.bf16.msra.mxu0 %v7743_v0  ;;  %v7599_v0 = vcombine.low %v9797_v56, %v9802_v52  ;;  %v9876_v44 = vld [vmem:[%s12566_s6 + $0xe8] sm:$0xff] }
 0x470   : > { %v2438_v9 = vadd.f32 %v2437_v2, %v9737_v5  ;;  %v2551_v10 = vadd.f32 %v2550_v3, %v9740_v6  ;;  %v2625_v59 = vmax.f32 %v2436_v54, 0.0  ;;  %v2627_v63 = vmax.f32 %v2549_v55, 0.0  ;;  %4518 = vmatprep.subr.bf16.mxu1 %v7608_v40  ;;  %4631 = vmatprep.subr.bf16.mxu0 %v7736_v50  ;;  %v2866_v2 = vld [vmem:[%s12566_s6 + $0x4e8] sm:$0xff] }
 0x471   : > { %v2441_v60 = vpop.f32.mrf.mxu1  ;;  %v2554_v62 = vpop.f32.mrf.mxu0  ;;  %v7591_v55 = vcombine.low %v9829_v51, %v9838_v16  ;;  %v9897_v3 = vld [vmem:[%s12566_s6 + $0x88] sm:$0xff]  ;;  %v7583_v12 = vcombine.low %v9871_v43, %v9876_v44  ;;  %v7584_v13 = vcombine.high %v9871_v43, %v9876_v44 }
 0x472   : > { %v2626_v21 = vmax.f32 %v2438_v9, 0.0  ;;  %v2628_v28 = vmax.f32 %v2551_v10, 0.0  ;;  %v9858_v33 = vpack.c.bf16 %v2625_v59, %v2621_v22  ;;  %v9860_v34 = vpack.c.bf16 %v2627_v63, %v2623_v29  ;;  %v9906_v51 = vld [vmem:[%s12566_s6 + $0xa8] sm:$0xff] }
 0x473   : > { %v2443_v23 = vpop.f32.mrf.mxu1  ;;  %v2556_v24 = vpop.f32.mrf.mxu0  ;;  %4519 = vmatpush1.bf16.msra.mxu1 %v7607_v4  ;;  %4632 = vmatpush1.bf16.msra.mxu0 %v7735_v11  ;;  %v2442_v49 = vadd.f32 %v2441_v60, %v9743_v7  ;;  %v2555_v50 = vadd.f32 %v2554_v62, %v9746_v8  ;;  %v9911_v59 = vld [vmem:[%s12566_s6 + $0x488] sm:$0xff]  ;;  %v7576_v29 = vcombine.high %v9897_v3, %v9906_v51 }
 0x474   : > { %v9850_v30 = vpack.c.bf16 %v2626_v21, %v2622_v19  ;;  %v9852_v58 = vpack.c.bf16 %v2628_v28, %v2624_v20  ;;  %v2444_v35 = vadd.f32 %v2443_v23, %v9737_v5  ;;  %4520 = vmatprep.subr.bf16.mxu1 %v7600_v15  ;;  %v2557_v37 = vadd.f32 %v2556_v24, %v9740_v6  ;;  %v9916_v63 = vld [vmem:[%s12566_s6 + $0x4a8] sm:$0xff] }
 0x475   : > { %v2445_v36 = vpop.f32.mrf.mxu1  ;;  %v2558_v14 = vpop.f32.mrf.mxu0  ;;  %4633 = vmatprep.subr.bf16.mxu0 %v7728_v32  ;;  %v2629_v16 = vmax.f32 %v2442_v49, 0.0  ;;  %v2631_v17 = vmax.f32 %v2555_v50, 0.0  ;;  %v7711_v20 = vcombine.low %v2862_v1, %v2866_v2  ;;  %v7712_v21 = vcombine.high %v2862_v1, %v2866_v2 }
 0x476   : > { %v2446_v48 = vadd.f32 %v2445_v36, %v9743_v7  ;;  %v2559_v40 = vadd.f32 %v2558_v14, %v9746_v8  ;;  %4332 = vmatprep.mubr.bf16.mxu1 %v9850_v30  ;;  %4445 = vmatprep.mubr.bf16.mxu0 %v9852_v58  ;;  %v2630_v60 = vmax.f32 %v2444_v35, 0.0  ;;  %v2632_v62 = vmax.f32 %v2557_v37, 0.0  ;;  %v9939_v37 = vld [vmem:[%s12566_s6 + $0x48] sm:$0xff] }
 0x477   : > { %v2447_v53 = vpop.f32.mrf.mxu1  ;;  %v2560_v54 = vpop.f32.mrf.mxu0  ;;  %4333 = vmatmul.mubr.bf16.gmra.mxu1 %v9858_v33  ;;  %4446 = vmatmul.mubr.bf16.gmra.mxu0 %v9860_v34  ;;  %v7704_v23 = vcombine.high %v9911_v59, %v9916_v63  ;;  %v7575_v50 = vcombine.low %v9897_v3, %v9906_v51 }
 0x478   : > { %v2448_v56 = vadd.f32 %v2447_v53, %v9737_v5  ;;  %v2561_v52 = vadd.f32 %v2560_v54, %v9740_v6  ;;  %4521 = vmatpush1.bf16.msra.mxu1 %v7599_v0  ;;  %v2633_v4 = vmax.f32 %v2446_v48, 0.0  ;;  %v2635_v9 = vmax.f32 %v2559_v40, 0.0  ;;  %4634 = vmatpush1.bf16.msra.mxu0 %v7727_v27  ;;  %v9944_v48 = vld [vmem:[%s12566_s6 + $0x68] sm:$0xff] }
 0x479   : > { %v2451_v10 = vpop.f32.mrf.mxu1  ;;  %v2564_v11 = vpop.f32.mrf.mxu0  ;;  %4522 = vmatprep.subr.bf16.mxu1 %v7592_v57  ;;  %4635 = vmatprep.subr.bf16.mxu0 %v7720_v31 }
 0x47a   : > { %v2634_v0 = vmax.f32 %v2448_v56, 0.0  ;;  %v2636_v15 = vmax.f32 %v2561_v52, 0.0  ;;  %v9926_v24 = vpack.c.bf16 %v2633_v4, %v2629_v16  ;;  %v9928_v27 = vpack.c.bf16 %v2635_v9, %v2631_v17  ;;  %v2846_v56 = vld [vmem:[%s12566_s6 + $0x448] sm:$0xff] }
 0x47b   : > { %v2453_v18 = vpop.f32.mrf.mxu1  ;;  %v2566_v19 = vpop.f32.mrf.mxu0  ;;  %v2452_v40 = vadd.f32 %v2451_v10, %v9743_v7  ;;  %v2565_v43 = vadd.f32 %v2564_v11, %v9746_v8  ;;  %v2850_v52 = vld [vmem:[%s12566_s6 + $0x468] sm:$0xff]  ;;  %v7567_v9 = vcombine.low %v9939_v37, %v9944_v48  ;;  %v7568_v10 = vcombine.high %v9939_v37, %v9944_v48 }
 0x47c   : > { %v9918_v28 = vpack.c.bf16 %v2634_v0, %v2630_v60  ;;  %v9920_v22 = vpack.c.bf16 %v2636_v15, %v2632_v62  ;;  %4523 = vmatpush1.bf16.msra.mxu1 %v7591_v55  ;;  %v2454_v32 = vadd.f32 %v2453_v18, %v9737_v5  ;;  %4636 = vmatpush1.bf16.msra.mxu0 %v7719_v61  ;;  %v9965_v61 = vld [vmem:[%s12566_s6 + $0x8] sm:$0xff] }
 0x47d   : > { %v2455_v57 = vpop.f32.mrf.mxu1  ;;  %v2568_v31 = vpop.f32.mrf.mxu0  ;;  %4524 = vmatprep.subr.bf16.mxu1 %v7584_v13  ;;  %v2567_v35 = vadd.f32 %v2566_v19, %v9740_v6  ;;  %4637 = vmatprep.subr.bf16.mxu0 %v7712_v21  ;;  %v7703_v55 = vcombine.low %v9911_v59, %v9916_v63  ;;  %v9974_v11 = vld [vmem:[%s12566_s6 + $0x28] sm:$0xff]  ;;  %v2637_v62 = vmax.f32 %v2452_v40, 0.0  ;;  %v2639_v0 = vmax.f32 %v2565_v43, 0.0 }
 0x47e   : > { %v2456_v36 = vadd.f32 %v2455_v57, %v9743_v7  ;;  %v2569_v14 = vadd.f32 %v2568_v31, %v9746_v8  ;;  %4342 = vmatprep.mubr.bf16.mxu1 %v9918_v28  ;;  %4455 = vmatprep.mubr.bf16.mxu0 %v9920_v22  ;;  %v9984_v13 = vld [vmem:[%s12566_s6 + $0x428] sm:$0xff]  ;;  %v2638_v51 = vmax.f32 %v2454_v32, 0.0  ;;  %v7695_v17 = vcombine.low %v2846_v56, %v2850_v52 }
 0x47f   : > { %v2457_v44 = vpop.f32.mrf.mxu1  ;;  %v2570_v49 = vpop.f32.mrf.mxu0  ;;  %4343 = vmatmul.mubr.bf16.gmra.mxu1 %v9926_v24  ;;  %4456 = vmatmul.mubr.bf16.gmra.mxu0 %v9928_v27  ;;  %v2640_v59 = vmax.f32 %v2567_v35, 0.0  ;;  %v7696_v18 = vcombine.high %v2846_v56, %v2850_v52  ;;  %v7560_v21 = vcombine.high %v9965_v61, %v9974_v11  ;;  %v10007_v48 = vld [vmem:[%s12566_s6 + $0x3c8] sm:$0xff] }
 0x480   : > { %v2458_v53 = vadd.f32 %v2457_v44, %v9737_v5  ;;  %v2571_v54 = vadd.f32 %v2570_v49, %v9740_v6  ;;  %4525 = vmatpush1.bf16.msra.mxu1 %v7583_v12  ;;  %v2641_v1 = vmax.f32 %v2456_v36, 0.0  ;;  %v2643_v2 = vmax.f32 %v2569_v14, 0.0  ;;  %4638 = vmatpush1.bf16.msra.mxu0 %v7711_v20  ;;  %v9979_v12 = vld [vmem:[%s12566_s6 + $0x408] sm:$0xff] }
 0x481   : > { %v2461_v3 = vpop.f32.mrf.mxu1  ;;  %v2574_v4 = vpop.f32.mrf.mxu0  ;;  %4526 = vmatprep.subr.bf16.mxu1 %v7576_v29  ;;  %4639 = vmatprep.subr.bf16.mxu0 %v7704_v23  ;;  %v7688_v29 = vcombine.high %v9979_v12, %v9984_v13  ;;  %v10012_v40 = vld [vmem:[%s12566_s6 + $0x3e8] sm:$0xff]  ;;  %v7687_v56 = vcombine.low %v9979_v12, %v9984_v13 }
 0x482   : > { %v2642_v63 = vmax.f32 %v2458_v53, 0.0  ;;  %v2644_v60 = vmax.f32 %v2571_v54, 0.0  ;;  %v9994_v32 = vpack.c.bf16 %v2641_v1, %v2637_v62  ;;  %v9996_v23 = vpack.c.bf16 %v2643_v2, %v2639_v0  ;;  %v2958_v52 = vld [vmem:[%s12566_s6 + $0x7c8] sm:$0xff] }
 0x483   : > { %v2463_v15 = vpop.f32.mrf.mxu1  ;;  %v2576_v16 = vpop.f32.mrf.mxu0  ;;  %v2462_v43 = vadd.f32 %v2461_v3, %v9743_v7  ;;  %v2575_v44 = vadd.f32 %v2574_v4, %v9746_v8  ;;  %v7559_v53 = vcombine.low %v9965_v61, %v9974_v11  ;;  %v2962_v1 = vld [vmem:[%s12566_s6 + $0x7e8] sm:$0xff]  ;;  %v7680_v11 = vcombine.high %v10007_v48, %v10012_v40 }
 0x484   : > { %v9986_v19 = vpack.c.bf16 %v2642_v63, %v2638_v51  ;;  %v9988_v20 = vpack.c.bf16 %v2644_v60, %v2640_v59  ;;  %4527 = vmatpush1.bf16.msra.mxu1 %v7575_v50  ;;  %v2464_v57 = vadd.f32 %v2463_v15, %v9737_v5  ;;  %4640 = vmatpush1.bf16.msra.mxu0 %v7703_v55  ;;  %v10033_v61 = vld [vmem:[%s12566_s6 + $0x388] sm:$0xff] }
 0x485   : > { %v2465_v31 = vpop.f32.mrf.mxu1  ;;  %v2578_v35 = vpop.f32.mrf.mxu0  ;;  %4528 = vmatprep.subr.bf16.mxu1 %v7568_v10  ;;  %v2577_v36 = vadd.f32 %v2576_v16, %v9740_v6  ;;  %4641 = vmatprep.subr.bf16.mxu0 %v7696_v18  ;;  %v7679_v10 = vcombine.low %v10007_v48, %v10012_v40  ;;  %v10042_v12 = vld [vmem:[%s12566_s6 + $0x3a8] sm:$0xff]  ;;  %v2645_v0 = vmax.f32 %v2462_v43, 0.0  ;;  %v2647_v15 = vmax.f32 %v2575_v44, 0.0 }
 0x486   : > { %v2466_v14 = vadd.f32 %v2465_v31, %v9743_v7  ;;  %v2579_v37 = vadd.f32 %v2578_v35, %v9746_v8  ;;  %4352 = vmatprep.mubr.bf16.mxu1 %v9986_v19  ;;  %4465 = vmatprep.mubr.bf16.mxu0 %v9988_v20  ;;  %v10047_v13 = vld [vmem:[%s12566_s6 + $0x788] sm:$0xff]  ;;  %v2646_v59 = vmax.f32 %v2464_v57, 0.0  ;;  %v7807_v18 = vcombine.low %v2958_v52, %v2962_v1 }
 0x487   : > { %v2467_v49 = vpop.f32.mrf.mxu1  ;;  %v2580_v50 = vpop.f32.mrf.mxu0  ;;  %4353 = vmatmul.mubr.bf16.gmra.mxu1 %v9994_v32  ;;  %4466 = vmatmul.mubr.bf16.gmra.mxu0 %v9996_v23  ;;  %v10052_v51 = vld [vmem:[%s12566_s6 + $0x7a8] sm:$0xff]  ;;  %v2648_v63 = vmax.f32 %v2577_v36, 0.0 }
 0x488   : > { %v2468_v54 = vadd.f32 %v2467_v49, %v9737_v5  ;;  %v2581_v55 = vadd.f32 %v2580_v50, %v9740_v6  ;;  %4529 = vmatpush1.bf16.msra.mxu1 %v7567_v9  ;;  %v2649_v2 = vmax.f32 %v2466_v14, 0.0  ;;  %v2651_v3 = vmax.f32 %v2579_v37, 0.0  ;;  %4642 = vmatpush1.bf16.msra.mxu0 %v7695_v17  ;;  %v10075_v50 = vld [vmem:[%s12566_s6 + $0x348] sm:$0xff] }
 0x489   : > { %v2471_v4 = vpop.f32.mrf.mxu1  ;;  %v2584_v9 = vpop.f32.mrf.mxu0  ;;  %4530 = vmatprep.subr.bf16.mxu1 %v7560_v21  ;;  %4643 = vmatprep.subr.bf16.mxu0 %v7688_v29  ;;  %v7808_v21 = vcombine.high %v2958_v52, %v2962_v1  ;;  %v7672_v14 = vcombine.high %v10033_v61, %v10042_v12  ;;  %v7800_v57 = vcombine.high %v10047_v13, %v10052_v51 }
 0x48a   : > { %v2650_v60 = vmax.f32 %v2468_v54, 0.0  ;;  %v2652_v62 = vmax.f32 %v2581_v55, 0.0  ;;  %v10062_v36 = vpack.c.bf16 %v2649_v2, %v2645_v0  ;;  %v10064_v29 = vpack.c.bf16 %v2651_v3, %v2647_v15  ;;  %v10120_v0 = vld [vmem:[%s12566_s6 + $0x728] sm:$0xff] }
 0x48b   : > { %v2473_v16 = vpop.f32.mrf.mxu1  ;;  %v2586_v17 = vpop.f32.mrf.mxu0  ;;  %v2472_v54 = vadd.f32 %v2471_v4, %v9743_v7  ;;  %v2585_v55 = vadd.f32 %v2584_v9, %v9746_v8  ;;  %v7671_v1 = vcombine.low %v10033_v61, %v10042_v12  ;;  %v7799_v4 = vcombine.low %v10047_v13, %v10052_v51  ;;  %v2942_v9 = vld [vmem:[%s12566_s6 + $0x748] sm:$0xff] }
 0x48c   : > { %v10054_v31 = vpack.c.bf16 %v2650_v60, %v2646_v59  ;;  %v10056_v35 = vpack.c.bf16 %v2652_v62, %v2648_v63  ;;  %4531 = vmatpush1.bf16.msra.mxu1 %v7559_v53  ;;  %v2474_v37 = vadd.f32 %v2473_v16, %v9737_v5  ;;  %4644 = vmatpush1.bf16.msra.mxu0 %v7687_v56  ;;  %v10080_v53 = vld [vmem:[%s12566_s6 + $0x368] sm:$0xff] }
 0x48d   : > { %v2475_v48 = vpop.f32.mrf.mxu1  ;;  %v2588_v40 = vpop.f32.mrf.mxu0  ;;  %4532 = vmatprep.subr.bf16.mxu1 %v7680_v11  ;;  %v2587_v43 = vadd.f32 %v2586_v17, %v9740_v6  ;;  %4645 = vmatprep.subr.bf16.mxu0 %v7808_v21  ;;  %v2946_v11 = vld [vmem:[%s12566_s6 + $0x768] sm:$0xff]  ;;  %v7663_v13 = vcombine.low %v10075_v50, %v10080_v53  ;;  %v7664_v51 = vcombine.high %v10075_v50, %v10080_v53  ;;  %v2653_v21 = vmax.f32 %v2472_v54, 0.0 }
 0x48e   : > { %v2476_v44 = vadd.f32 %v2475_v48, %v9743_v7  ;;  %v2589_v49 = vadd.f32 %v2588_v40, %v9746_v8  ;;  %4362 = vmatprep.mubr.bf16.mxu1 %v10054_v31  ;;  %4475 = vmatprep.mubr.bf16.mxu0 %v10056_v35  ;;  %v10101_v61 = vld [vmem:[%s12566_s6 + $0x308] sm:$0xff]  ;;  %v2654_v15 = vmax.f32 %v2474_v37, 0.0 }
 0x48f   : > { %v2477_v56 = vpop.f32.mrf.mxu1  ;;  %v2590_v52 = vpop.f32.mrf.mxu0  ;;  %4363 = vmatmul.mubr.bf16.gmra.mxu1 %v10062_v36  ;;  %4476 = vmatmul.mubr.bf16.gmra.mxu0 %v10064_v29  ;;  %v10110_v60 = vld [vmem:[%s12566_s6 + $0x328] sm:$0xff]  ;;  %v2656_v16 = vmax.f32 %v2587_v43, 0.0 }
 0x490   : > { %v2478_v2 = vadd.f32 %v2477_v56, %v9737_v5  ;;  %v2591_v3 = vadd.f32 %v2590_v52, %v9740_v6  ;;  %4533 = vmatpush2.bf16.msra.mxu1 %v7679_v10  ;;  %v2657_v12 = vmax.f32 %v2476_v44, 0.0  ;;  %v2659_v59 = vmax.f32 %v2589_v49, 0.0  ;;  %4646 = vmatpush2.bf16.msra.mxu0 %v7807_v18  ;;  %v10115_v62 = vld [vmem:[%s12566_s6 + $0x708] sm:$0xff] }
 0x491   : > { %v2481_v10 = vpop.f32.mrf.mxu1  ;;  %v2594_v63 = vpop.f32.mrf.mxu0  ;;  %4534 = vmatprep.subr.bf16.mxu1 %v7672_v14  ;;  %4647 = vmatprep.subr.bf16.mxu0 %v7800_v57  ;;  %v2655_v14 = vmax.f32 %v2585_v55, 0.0  ;;  %v7791_v44 = vcombine.low %v2942_v9, %v2946_v11  ;;  %v7792_v49 = vcombine.high %v2942_v9, %v2946_v11  ;;  %v7656_v56 = vcombine.high %v10101_v61, %v10110_v60  ;;  %v10143_v9 = vld [vmem:[%s12566_s6 + $0x2c8] sm:$0xff] }
 0x492   : > { %v2658_v17 = vmax.f32 %v2478_v2, 0.0  ;;  %v2660_v18 = vmax.f32 %v2591_v3, 0.0  ;;  %v7784_v37 = vcombine.high %v10115_v62, %v10120_v0  ;;  %v10130_v43 = vpack.c.bf16 %v2657_v12, %v2653_v21 }
 0x493   : > { %v2483_v48 = vpop.f32.mrf.mxu1  ;;  %v2596_v40 = vpop.f32.mrf.mxu0  ;;  %v10132_v57 = vpack.c.bf16 %v2659_v59, %v2655_v14  ;;  %v2482_v11 = vadd.f32 %v2481_v10, %v9743_v7  ;;  %v2595_v12 = vadd.f32 %v2594_v63, %v9746_v8  ;;  %v7783_v10 = vcombine.low %v10115_v62, %v10120_v0  ;;  %v2926_v63 = vld [vmem:[%s12566_s6 + $0x6c8] sm:$0xff] }
 0x494   : > { %v10122_v50 = vpack.c.bf16 %v2658_v17, %v2654_v15  ;;  %v10124_v53 = vpack.c.bf16 %v2660_v18, %v2656_v16  ;;  %4535 = vmatpush2.bf16.msra.mxu1 %v7671_v1  ;;  %v2484_v54 = vadd.f32 %v2483_v48, %v9737_v5  ;;  %4648 = vmatpush2.bf16.msra.mxu0 %v7799_v4  ;;  %v10148_v4 = vld [vmem:[%s12566_s6 + $0x2e8] sm:$0xff] }
 0x495   : > { %v2485_v55 = vpop.f32.mrf.mxu1  ;;  %v2598_v52 = vpop.f32.mrf.mxu0  ;;  %4536 = vmatprep.subr.bf16.mxu1 %v7664_v51  ;;  %v2597_v2 = vadd.f32 %v2596_v40, %v9740_v6  ;;  %v7655_v15 = vcombine.low %v10101_v61, %v10110_v60  ;;  %4649 = vmatprep.subr.bf16.mxu0 %v7792_v49  ;;  %v2930_v18 = vld [vmem:[%s12566_s6 + $0x6e8] sm:$0xff]  ;;  %v7647_v62 = vcombine.low %v10143_v9, %v10148_v4 }
 0x496   : > { %v2486_v1 = vadd.f32 %v2485_v55, %v9743_v7  ;;  %v2599_v3 = vadd.f32 %v2598_v52, %v9746_v8  ;;  %4372 = vmatprep.mubr.bf16.mxu1 %v10122_v50  ;;  %4485 = vmatprep.mubr.bf16.mxu0 %v10124_v53  ;;  %v10169_v61 = vld [vmem:[%s12566_s6 + $0x288] sm:$0xff]  ;;  %v7648_v0 = vcombine.high %v10143_v9, %v10148_v4  ;;  %v2662_v49 = vmax.f32 %v2484_v54, 0.0 }
 0x497   : > { %v2487_v59 = vpop.f32.mrf.mxu1  ;;  %v2600_v51 = vpop.f32.mrf.mxu0  ;;  %4373 = vmatmul.mubr.bf16.gmra.mxu1 %v10130_v43  ;;  %4486 = vmatmul.mubr.bf16.gmra.mxu0 %v10132_v57  ;;  %v10178_v48 = vld [vmem:[%s12566_s6 + $0x2a8] sm:$0xff] }
 0x498   : > { %v2488_v16 = vadd.f32 %v2487_v59, %v9737_v5  ;;  %v2601_v17 = vadd.f32 %v2600_v51, %v9740_v6  ;;  %4537 = vmatpush2.bf16.msra.mxu1 %v7663_v13  ;;  %v2665_v60 = vmax.f32 %v2486_v1, 0.0  ;;  %v2667_v21 = vmax.f32 %v2599_v3, 0.0  ;;  %4650 = vmatpush2.bf16.msra.mxu0 %v7791_v44  ;;  %v10183_v40 = vld [vmem:[%s12566_s6 + $0x688] sm:$0xff] }
 0x499   : > { %v2491_v13 = vpop.f32.mrf.mxu1  ;;  %v2604_v14 = vpop.f32.mrf.mxu0  ;;  %4538 = vmatprep.subr.bf16.mxu1 %v7656_v56  ;;  %v10188_v44 = vld [vmem:[%s12566_s6 + $0x6a8] sm:$0xff]  ;;  %v2664_v56 = vmax.f32 %v2597_v2, 0.0  ;;  %4651 = vmatprep.subr.bf16.mxu0 %v7784_v37  ;;  %v2661_v1 = vmax.f32 %v2482_v11, 0.0  ;;  %v2663_v3 = vmax.f32 %v2595_v12, 0.0  ;;  %v7775_v59 = vcombine.low %v2926_v63, %v2930_v18 }
 0x49a   : > { %v2666_v55 = vmax.f32 %v2488_v16, 0.0  ;;  %v2668_v52 = vmax.f32 %v2601_v17, 0.0  ;;  %v7776_v51 = vcombine.high %v2926_v63, %v2930_v18  ;;  %v7640_v25 = vcombine.high %v10169_v61, %v10178_v48  ;;  %v2782_v18 = vld [vmem:[%s12566_s6 + $0x248] sm:$0xff] }
 0x49b   : > { %v2493_v9 = vpop.f32.mrf.mxu1  ;;  %v2606_v4 = vpop.f32.mrf.mxu0  ;;  %v7768_v54 = vcombine.high %v10183_v40, %v10188_v44  ;;  %v10198_v2 = vpack.c.bf16 %v2665_v60, %v2661_v1  ;;  %v10200_v37 = vpack.c.bf16 %v2667_v21, %v2663_v3  ;;  %v2492_v60 = vadd.f32 %v2491_v13, %v9743_v7  ;;  %v2910_v13 = vld [vmem:[%s12566_s6 + $0x648] sm:$0xff] }
 0x49c   : > { %v10190_v26 = vpack.c.bf16 %v2666_v55, %v2662_v49  ;;  %v10192_v45 = vpack.c.bf16 %v2668_v52, %v2664_v56  ;;  %4539 = vmatpush2.bf16.msra.mxu1 %v7655_v15  ;;  %v2494_v11 = vadd.f32 %v2493_v9, %v9737_v5  ;;  %4652 = vmatpush2.bf16.msra.mxu0 %v7783_v10  ;;  %v2786_v10 = vld [vmem:[%s12566_s6 + $0x268] sm:$0xff] }
 0x49d   : > { %v2495_v12 = vpop.f32.mrf.mxu1  ;;  %v2608_v16 = vpop.f32.mrf.mxu0  ;;  %4540 = vmatprep.subr.bf16.mxu1 %v7648_v0  ;;  %v2607_v17 = vadd.f32 %v2606_v4, %v9740_v6  ;;  %v2605_v21 = vadd.f32 %v2604_v14, %v9746_v8  ;;  %4653 = vmatprep.subr.bf16.mxu0 %v7776_v51  ;;  %v7639_v52 = vcombine.low %v10169_v61, %v10178_v48  ;;  %v2669_v48 = vmax.f32 %v2492_v60, 0.0  ;;  %v2895_v60 = vld [vmem:[%s12566_s6 + $0x5d0] sm:$0xff] }
 0x49e   : > { %v2496_v15 = vadd.f32 %v2495_v12, %v9743_v7  ;;  %v2609_v63 = vadd.f32 %v2608_v16, %v9746_v8  ;;  %4382 = vmatprep.mubr.bf16.mxu1 %v10190_v26  ;;  %4495 = vmatprep.mubr.bf16.mxu0 %v10192_v45  ;;  %v7767_v7 = vcombine.low %v10183_v40, %v10188_v44  ;;  %v2778_v40 = vld [vmem:[%s12566_s6 + $0x228] sm:$0xff] }
 0x49f   : > { %v2497_v0 = vpop.f32.mrf.mxu1  ;;  %v2610_v49 = vpop.f32.mrf.mxu0  ;;  %4383 = vmatmul.mubr.bf16.gmra.mxu1 %v10198_v2  ;;  %4496 = vmatmul.mubr.bf16.gmra.mxu0 %v10200_v37  ;;  %v7632_v8 = vcombine.high %v2782_v18, %v2786_v10  ;;  %v2672_v14 = vmax.f32 %v2607_v17, 0.0  ;;  %v2671_v9 = vmax.f32 %v2605_v21, 0.0  ;;  %v2899_v21 = vld [vmem:[%s12566_s6 + $0x5f0] sm:$0xff] }
 0x4a0   : > { %v2498_v56 = vadd.f32 %v2497_v0, %v9737_v5  ;;  %v2611_v55 = vadd.f32 %v2610_v49, %v9740_v6  ;;  %4541 = vmatpush2.bf16.msra.mxu1 %v7647_v62  ;;  %v2673_v1 = vmax.f32 %v2496_v15, 0.0  ;;  %v2675_v3 = vmax.f32 %v2609_v63, 0.0  ;;  %4654 = vmatpush2.bf16.msra.mxu0 %v7775_v59  ;;  %v2914_v5 = vld [vmem:[%s12566_s6 + $0x668] sm:$0xff]  ;;  %v2767_v63 = vld [vmem:[%s12566_s6 + $0x1d0] sm:$0xff] }
 0x4a1   : > { %4542 = vmatprep.subr.bf16.mxu1 %v7640_v25  ;;  %v2670_v6 = vmax.f32 %v2494_v11, 0.0  ;;  %4655 = vmatprep.subr.bf16.mxu0 %v7768_v54  ;;  %v2774_v25 = vld [vmem:[%s12566_s6 + $0x208] sm:$0xff]  ;;  %v7631_v59 = vcombine.low %v2782_v18, %v2786_v10  ;;  %v7760_v51 = vcombine.high %v2910_v13, %v2914_v5  ;;  %v7759_v17 = vcombine.low %v2910_v13, %v2914_v5  ;;  %v2771_v18 = vld [vmem:[%s12566_s6 + $0x1f0] sm:$0xff] }
 0x4a2   : > { %v2674_v62 = vmax.f32 %v2498_v56, 0.0  ;;  %v2676_v61 = vmax.f32 %v2611_v55, 0.0  ;;  %v2902_v54 = vld [vmem:[%s12566_s6 + $0x608] sm:$0xff]  ;;  %v10246_v12 = vpack.c.bf16 %v2673_v1, %v2669_v48  ;;  %v10248_v16 = vpack.c.bf16 %v2675_v3, %v2671_v9  ;;  %v2763_v1 = vld [vmem:[%s12566_s6 + $0x1b0] sm:$0xff] }
 0x4a3   : > { %v2906_v11 = vld [vmem:[%s12566_s6 + $0x628] sm:$0xff]  ;;  %v7624_v15 = vcombine.high %v2774_v25, %v2778_v40  ;;  %v7623_v0 = vcombine.low %v2774_v25, %v2778_v40  ;;  %v7618_v56 = vcombine.high %v2767_v63, %v2771_v18  ;;  %v7746_v55 = vcombine.high %v2895_v60, %v2899_v21  ;;  %v2879_v48 = vld [vmem:[%s12566_s6 + $0x550] sm:$0xff] }
 0x4a4   : > { %v10236_v44 = vpack.c.bf16 %v2674_v62, %v2670_v6  ;;  %v10238_v4 = vpack.c.bf16 %v2676_v61, %v2672_v14  ;;  %4543 = vmatpush2.bf16.msra.mxu1 %v7639_v52  ;;  %4656 = vmatpush2.bf16.msra.mxu0 %v7767_v7  ;;  %v7752_v10 = vcombine.high %v2902_v54, %v2906_v11  ;;  %v2759_v52 = vld [vmem:[%s12566_s6 + $0x190] sm:$0xff] }
 0x4a5   : > { %4544 = vmatprep.subr.bf16.mxu1 %v7632_v8  ;;  %4657 = vmatprep.subr.bf16.mxu0 %v7760_v51  ;;  %v7751_v49 = vcombine.low %v2902_v54, %v2906_v11  ;;  %v7617_v3 = vcombine.low %v2767_v63, %v2771_v18  ;;  %v2887_v7 = vld [vmem:[%s12566_s6 + $0x590] sm:$0xff]  ;;  %v7745_v13 = vcombine.low %v2895_v60, %v2899_v21 }
 0x4a6   : > { %4392 = vmatprep.mubr.bf16.mxu1 %v10236_v44  ;;  %4505 = vmatprep.mubr.bf16.mxu0 %v10238_v4  ;;  %v2891_v8 = vld [vmem:[%s12566_s6 + $0x5b0] sm:$0xff]  ;;  %v7610_v5 = vcombine.high %v2759_v52, %v2763_v1  ;;  %v7609_v61 = vcombine.low %v2759_v52, %v2763_v1 }
 0x4a7   : > { %4393 = vmatmul.mubr.bf16.gmra.mxu1 %v10246_v12  ;;  %4506 = vmatmul.mubr.bf16.gmra.mxu0 %v10248_v16  ;;  %v2751_v6 = vld [vmem:[%s12566_s6 + $0x150] sm:$0xff]  ;;  %v7738_v62 = vcombine.high %v2887_v7, %v2891_v8  ;;  %v7737_v40 = vcombine.low %v2887_v7, %v2891_v8 }
 0x4a8   : > { %4545 = vmatpush2.bf16.msra.mxu1 %v7631_v59  ;;  %4548 = vmatprep.mubr.bf16.mxu1 %v9776_v38  ;;  %v2755_v14 = vld [vmem:[%s12566_s6 + $0x170] sm:$0xff] }
 0x4a9   : > { %4658 = vmatpush2.bf16.msra.mxu0 %v7759_v17  ;;  %4661 = vmatprep.mubr.bf16.mxu0 %v9778_v39  ;;  %v2883_v9 = vld [vmem:[%s12566_s6 + $0x570] sm:$0xff]  ;;  %v7602_v25 = vcombine.high %v2751_v6, %v2755_v14  ;;  %v7601_v11 = vcombine.low %v2751_v6, %v2755_v14 }
 0x4aa   : > { %4546 = vmatprep.subr.bf16.mxu1 %v7624_v15  ;;  %4659 = vmatprep.subr.bf16.mxu0 %v7752_v10  ;;  %v7730_v59 = vcombine.high %v2879_v48, %v2883_v9  ;;  %v2743_v51 = vld [vmem:[%s12566_s6 + $0x110] sm:$0xff]  ;;  %v7729_v63 = vcombine.low %v2879_v48, %v2883_v9 }
 0x4ab   : > { %v2747_v54 = vld [vmem:[%s12566_s6 + $0x130] sm:$0xff] }
 0x4ac   : > { %4547 = vmatpush2.bf16.msra.mxu1 %v7623_v0  ;;  %v2871_v17 = vld [vmem:[%s12566_s6 + $0x510] sm:$0xff]  ;;  %v7594_v18 = vcombine.high %v2743_v51, %v2747_v54  ;;  %v7593_v0 = vcombine.low %v2743_v51, %v2747_v54 }
 0x4ad   : > { %4660 = vmatpush2.bf16.msra.mxu0 %v7751_v49  ;;  %4742 = vmatprep.subr.bf16.mxu1 %v7618_v56  ;;  %v2875_v15 = vld [vmem:[%s12566_s6 + $0x530] sm:$0xff] }
 0x4ae   : > { %4855 = vmatprep.subr.bf16.mxu0 %v7746_v55  ;;  %v2735_v10 = vld [vmem:[%s12566_s6 + $0xd0] sm:$0xff]  ;;  %v7722_v21 = vcombine.high %v2871_v17, %v2875_v15  ;;  %v7721_v52 = vcombine.low %v2871_v17, %v2875_v15 }
 0x4af   : > { %4549 = vmatmul.mubr.bf16.vlgmr.msra.gmra.mxu1 %v9782_v41  ;;  %v2739_v60 = vld [vmem:[%s12566_s6 + $0xf0] sm:$0xff] }
 0x4b0   : > { %4662 = vmatmul.mubr.bf16.vlgmr.msra.gmra.mxu0 %v9784_v42  ;;  %4743 = vmatpush1.bf16.msra.mxu1 %v7617_v3  ;;  %v2863_v49 = vld [vmem:[%s12566_s6 + $0x4d0] sm:$0xff]  ;;  %v7586_v55 = vcombine.high %v2735_v10, %v2739_v60  ;;  %v7585_v8 = vcombine.low %v2735_v10, %v2739_v60 }
 0x4b1   : > { %4558 = vmatprep.mubr.bf16.mxu1 %v9850_v30  ;;  %4671 = vmatprep.mubr.bf16.mxu0 %v9852_v58  ;;  %v2867_v56 = vld [vmem:[%s12566_s6 + $0x4f0] sm:$0xff] }
 0x4b2   : > { %4856 = vmatpush1.bf16.msra.mxu0 %v7745_v13  ;;  %4744 = vmatprep.subr.bf16.mxu1 %v7610_v5  ;;  %v7714_v1 = vcombine.high %v2863_v49, %v2867_v56  ;;  %v2727_v3 = vld [vmem:[%s12566_s6 + $0x90] sm:$0xff]  ;;  %v7713_v6 = vcombine.low %v2863_v49, %v2867_v56 }
 0x4b3   : > { %4857 = vmatprep.subr.bf16.mxu0 %v7738_v62  ;;  %v2731_v7 = vld [vmem:[%s12566_s6 + $0xb0] sm:$0xff] }
 0x4b4   : > { %4745 = vmatpush1.bf16.msra.mxu1 %v7609_v61  ;;  %v2855_v13 = vld [vmem:[%s12566_s6 + $0x490] sm:$0xff]  ;;  %v7578_v14 = vcombine.high %v2727_v3, %v2731_v7  ;;  %v7577_v9 = vcombine.low %v2727_v3, %v2731_v7 }
 0x4b5   : > { %4746 = vmatprep.subr.bf16.mxu1 %v7602_v25  ;;  %v2859_v5 = vld [vmem:[%s12566_s6 + $0x4b0] sm:$0xff] }
 0x4b6   : > { %4858 = vmatpush1.bf16.msra.mxu0 %v7737_v40  ;;  %v2719_v62 = vld [vmem:[%s12566_s6 + $0x50] sm:$0xff]  ;;  %v7706_v48 = vcombine.high %v2855_v13, %v2859_v5  ;;  %v7705_v51 = vcombine.low %v2855_v13, %v2859_v5 }
 0x4b7   : > { %4559 = vmatmul.mubr.bf16.gmra.mxu1 %v9858_v33  ;;  %4859 = vmatprep.subr.bf16.mxu0 %v7730_v59  ;;  %v2723_v61 = vld [vmem:[%s12566_s6 + $0x70] sm:$0xff] }
 0x4b8   : > { %4672 = vmatmul.mubr.bf16.gmra.mxu0 %v9860_v34  ;;  %4747 = vmatpush1.bf16.msra.mxu1 %v7601_v11  ;;  %v2847_v25 = vld [vmem:[%s12566_s6 + $0x450] sm:$0xff]  ;;  %v7570_v59 = vcombine.high %v2719_v62, %v2723_v61  ;;  %v7569_v15 = vcombine.low %v2719_v62, %v2723_v61 }
 0x4b9   : > { %4568 = vmatprep.mubr.bf16.mxu1 %v9918_v28  ;;  %4681 = vmatprep.mubr.bf16.mxu0 %v9920_v22  ;;  %v2851_v40 = vld [vmem:[%s12566_s6 + $0x470] sm:$0xff] }
 0x4ba   : > { %4860 = vmatpush1.bf16.msra.mxu0 %v7729_v63  ;;  %4748 = vmatprep.subr.bf16.mxu1 %v7594_v18  ;;  %v7698_v54 = vcombine.high %v2847_v25, %v2851_v40  ;;  %v2711_v11 = vld [vmem:[%s12566_s6 + $0x10] sm:$0xff]  ;;  %v7697_v10 = vcombine.low %v2847_v25, %v2851_v40 }
 0x4bb   : > { %4861 = vmatprep.subr.bf16.mxu0 %v7722_v21  ;;  %v2715_v17 = vld [vmem:[%s12566_s6 + $0x30] sm:$0xff] }
 0x4bc   : > { %4749 = vmatpush1.bf16.msra.mxu1 %v7593_v0  ;;  %v2839_v63 = vld [vmem:[%s12566_s6 + $0x410] sm:$0xff]  ;;  %v7562_v60 = vcombine.high %v2711_v11, %v2715_v17  ;;  %v7561_v56 = vcombine.low %v2711_v11, %v2715_v17 }
 0x4bd   : > { %4750 = vmatprep.subr.bf16.mxu1 %v7586_v55  ;;  %v2843_v18 = vld [vmem:[%s12566_s6 + $0x430] sm:$0xff] }
 0x4be   : > { %4862 = vmatpush1.bf16.msra.mxu0 %v7721_v52  ;;  %v2831_v21 = vld [vmem:[%s12566_s6 + $0x3d0] sm:$0xff]  ;;  %v7690_v49 = vcombine.high %v2839_v63, %v2843_v18  ;;  %v7689_v3 = vcombine.low %v2839_v63, %v2843_v18 }
 0x4bf   : > { %4569 = vmatmul.mubr.bf16.gmra.mxu1 %v9926_v24  ;;  %4863 = vmatprep.subr.bf16.mxu0 %v7714_v1  ;;  %v2835_v0 = vld [vmem:[%s12566_s6 + $0x3f0] sm:$0xff] }
 0x4c0   : > { %4682 = vmatmul.mubr.bf16.gmra.mxu0 %v9928_v27  ;;  %4751 = vmatpush1.bf16.msra.mxu1 %v7585_v8  ;;  %v2959_v55 = vld [vmem:[%s12566_s6 + $0x7d0] sm:$0xff]  ;;  %v7682_v1 = vcombine.high %v2831_v21, %v2835_v0  ;;  %v7681_v5 = vcombine.low %v2831_v21, %v2835_v0 }
 0x4c1   : > { %4578 = vmatprep.mubr.bf16.mxu1 %v9986_v19  ;;  %4691 = vmatprep.mubr.bf16.mxu0 %v9988_v20  ;;  %v2963_v52 = vld [vmem:[%s12566_s6 + $0x7f0] sm:$0xff] }
 0x4c2   : > { %4864 = vmatpush1.bf16.msra.mxu0 %v7713_v6  ;;  %4752 = vmatprep.subr.bf16.mxu1 %v7578_v14  ;;  %v7810_v7 = vcombine.high %v2959_v55, %v2963_v52  ;;  %v2823_v8 = vld [vmem:[%s12566_s6 + $0x390] sm:$0xff]  ;;  %v7809_v62 = vcombine.low %v2959_v55, %v2963_v52 }
 0x4c3   : > { %4865 = vmatprep.subr.bf16.mxu0 %v7706_v48  ;;  %v2827_v13 = vld [vmem:[%s12566_s6 + $0x3b0] sm:$0xff] }
 0x4c4   : > { %4753 = vmatpush1.bf16.msra.mxu1 %v7577_v9  ;;  %v2951_v6 = vld [vmem:[%s12566_s6 + $0x790] sm:$0xff]  ;;  %v7674_v61 = vcombine.high %v2823_v8, %v2827_v13  ;;  %v7673_v40 = vcombine.low %v2823_v8, %v2827_v13 }
 0x4c5   : > { %4754 = vmatprep.subr.bf16.mxu1 %v7570_v59  ;;  %v2955_v14 = vld [vmem:[%s12566_s6 + $0x7b0] sm:$0xff] }
 0x4c6   : > { %4866 = vmatpush1.bf16.msra.mxu0 %v7705_v51  ;;  %v2815_v48 = vld [vmem:[%s12566_s6 + $0x350] sm:$0xff]  ;;  %v7802_v25 = vcombine.high %v2951_v6, %v2955_v14  ;;  %v7801_v11 = vcombine.low %v2951_v6, %v2955_v14 }
 0x4c7   : > { %4579 = vmatmul.mubr.bf16.gmra.mxu1 %v9994_v32  ;;  %4867 = vmatprep.subr.bf16.mxu0 %v7698_v54  ;;  %v2819_v9 = vld [vmem:[%s12566_s6 + $0x370] sm:$0xff] }
 0x4c8   : > { %4692 = vmatmul.mubr.bf16.gmra.mxu0 %v9996_v23  ;;  %4755 = vmatpush1.bf16.msra.mxu1 %v7569_v15  ;;  %v2943_v59 = vld [vmem:[%s12566_s6 + $0x750] sm:$0xff]  ;;  %v7666_v54 = vcombine.high %v2815_v48, %v2819_v9  ;;  %v7665_v18 = vcombine.low %v2815_v48, %v2819_v9 }
 0x4c9   : > { %4588 = vmatprep.mubr.bf16.mxu1 %v10054_v31  ;;  %4701 = vmatprep.mubr.bf16.mxu0 %v10056_v35  ;;  %v2947_v51 = vld [vmem:[%s12566_s6 + $0x770] sm:$0xff] }
 0x4ca   : > { %4868 = vmatpush1.bf16.msra.mxu0 %v7697_v10  ;;  %4756 = vmatprep.subr.bf16.mxu1 %v7562_v60  ;;  %v7794_v17 = vcombine.high %v2943_v59, %v2947_v51  ;;  %v2807_v15 = vld [vmem:[%s12566_s6 + $0x310] sm:$0xff]  ;;  %v7793_v21 = vcombine.low %v2943_v59, %v2947_v51 }
 0x4cb   : > { %4869 = vmatprep.subr.bf16.mxu0 %v7690_v49  ;;  %v2811_v63 = vld [vmem:[%s12566_s6 + $0x330] sm:$0xff] }
 0x4cc   : > { %4757 = vmatpush1.bf16.msra.mxu1 %v7561_v56  ;;  %v2935_v10 = vld [vmem:[%s12566_s6 + $0x710] sm:$0xff]  ;;  %v7658_v0 = vcombine.high %v2807_v15, %v2811_v63  ;;  %v7657_v52 = vcombine.low %v2807_v15, %v2811_v63 }
 0x4cd   : > { %4758 = vmatprep.subr.bf16.mxu1 %v7682_v1  ;;  %v2939_v60 = vld [vmem:[%s12566_s6 + $0x730] sm:$0xff] }
 0x4ce   : > { %4870 = vmatpush1.bf16.msra.mxu0 %v7689_v3  ;;  %v2799_v49 = vld [vmem:[%s12566_s6 + $0x2d0] sm:$0xff]  ;;  %v7786_v55 = vcombine.high %v2935_v10, %v2939_v60  ;;  %v7785_v8 = vcombine.low %v2935_v10, %v2939_v60 }
 0x4cf   : > { %4589 = vmatmul.mubr.bf16.gmra.mxu1 %v10062_v36  ;;  %4871 = vmatprep.subr.bf16.mxu0 %v7810_v7  ;;  %v2803_v56 = vld [vmem:[%s12566_s6 + $0x2f0] sm:$0xff] }
 0x4d0   : > { %4702 = vmatmul.mubr.bf16.gmra.mxu0 %v10064_v29  ;;  %4759 = vmatpush2.bf16.msra.mxu1 %v7681_v5  ;;  %v2927_v1 = vld [vmem:[%s12566_s6 + $0x6d0] sm:$0xff]  ;;  %v7650_v7 = vcombine.high %v2799_v49, %v2803_v56  ;;  %v7649_v14 = vcombine.low %v2799_v49, %v2803_v56 }
 0x4d1   : > { %4598 = vmatprep.mubr.bf16.mxu1 %v10122_v50  ;;  %4711 = vmatprep.mubr.bf16.mxu0 %v10124_v53  ;;  %v2931_v3 = vld [vmem:[%s12566_s6 + $0x6f0] sm:$0xff] }
 0x4d2   : > { %4872 = vmatpush2.bf16.msra.mxu0 %v7809_v62  ;;  %4760 = vmatprep.subr.bf16.mxu1 %v7674_v61  ;;  %v7778_v13 = vcombine.high %v2927_v1, %v2931_v3  ;;  %v2791_v5 = vld [vmem:[%s12566_s6 + $0x290] sm:$0xff]  ;;  %v7777_v48 = vcombine.low %v2927_v1, %v2931_v3 }
 0x4d3   : > { %4873 = vmatprep.subr.bf16.mxu0 %v7802_v25  ;;  %v2795_v6 = vld [vmem:[%s12566_s6 + $0x2b0] sm:$0xff] }
 0x4d4   : > { %4761 = vmatpush2.bf16.msra.mxu1 %v7673_v40  ;;  %v2919_v62 = vld [vmem:[%s12566_s6 + $0x690] sm:$0xff]  ;;  %v7642_v9 = vcombine.high %v2791_v5, %v2795_v6  ;;  %v7641_v51 = vcombine.low %v2791_v5, %v2795_v6  ;;  %v2760_v6 = vld [vmem:[%s12566_s6 + $0x198] sm:$0xff] }
 0x4d5   : > { %4762 = vmatprep.subr.bf16.mxu1 %v7666_v54  ;;  %v2923_v61 = vld [vmem:[%s12566_s6 + $0x6b0] sm:$0xff] }
 0x4d6   : > { %4874 = vmatpush2.bf16.msra.mxu0 %v7801_v11  ;;  %v2783_v25 = vld [vmem:[%s12566_s6 + $0x250] sm:$0xff]  ;;  %v7770_v59 = vcombine.high %v2919_v62, %v2923_v61  ;;  %v7769_v15 = vcombine.low %v2919_v62, %v2923_v61 }
 0x4d7   : > { %4599 = vmatmul.mubr.bf16.gmra.mxu1 %v10130_v43  ;;  %4875 = vmatprep.subr.bf16.mxu0 %v7794_v17  ;;  %v2787_v40 = vld [vmem:[%s12566_s6 + $0x270] sm:$0xff] }
 0x4d8   : > { %4712 = vmatmul.mubr.bf16.gmra.mxu0 %v10132_v57  ;;  %4763 = vmatpush2.bf16.msra.mxu1 %v7665_v18  ;;  %v2911_v54 = vld [vmem:[%s12566_s6 + $0x650] sm:$0xff]  ;;  %v7634_v17 = vcombine.high %v2783_v25, %v2787_v40  ;;  %v7633_v60 = vcombine.low %v2783_v25, %v2787_v40 }
 0x4d9   : > { %4608 = vmatprep.mubr.bf16.mxu1 %v10190_v26  ;;  %4721 = vmatprep.mubr.bf16.mxu0 %v10192_v45  ;;  %v2915_v11 = vld [vmem:[%s12566_s6 + $0x670] sm:$0xff] }
 0x4da   : > { %4876 = vmatpush2.bf16.msra.mxu0 %v7793_v21  ;;  %4764 = vmatprep.subr.bf16.mxu1 %v7658_v0  ;;  %v7762_v63 = vcombine.high %v2911_v54, %v2915_v11  ;;  %v2775_v18 = vld [vmem:[%s12566_s6 + $0x210] sm:$0xff]  ;;  %v7761_v49 = vcombine.low %v2911_v54, %v2915_v11 }
 0x4db   : > { %4877 = vmatprep.subr.bf16.mxu0 %v7786_v55  ;;  %v2779_v10 = vld [vmem:[%s12566_s6 + $0x230] sm:$0xff]  ;;  %v2768_v55 = vld [vmem:[%s12566_s6 + $0x1d8] sm:$0xff] }
 0x4dc   : > { %4765 = vmatpush2.bf16.msra.mxu1 %v7657_v52  ;;  %v2903_v21 = vld [vmem:[%s12566_s6 + $0x610] sm:$0xff]  ;;  %v7626_v56 = vcombine.high %v2775_v18, %v2779_v10  ;;  %v2772_v52 = vld [vmem:[%s12566_s6 + $0x1f8] sm:$0xff]  ;;  %v7625_v3 = vcombine.low %v2775_v18, %v2779_v10 }
 0x4dd   : > { %4766 = vmatprep.subr.bf16.mxu1 %v7650_v7  ;;  %v2907_v0 = vld [vmem:[%s12566_s6 + $0x630] sm:$0xff]  ;;  %v2896_v7 = vld [vmem:[%s12566_s6 + $0x5d8] sm:$0xff]  ;;  %v7619_v61 = vcombine.low %v2768_v55, %v2772_v52 }
 0x4de   : > { %4878 = vmatpush2.bf16.msra.mxu0 %v7785_v8  ;;  %v7754_v1 = vcombine.high %v2903_v21, %v2907_v0  ;;  %v2900_v8 = vld [vmem:[%s12566_s6 + $0x5f8] sm:$0xff]  ;;  %v7753_v5 = vcombine.low %v2903_v21, %v2907_v0 }
 0x4df   : > { %4609 = vmatmul.mubr.bf16.gmra.mxu1 %v10198_v2  ;;  %4879 = vmatprep.subr.bf16.mxu0 %v7778_v13  ;;  %v7620_v13 = vcombine.high %v2768_v55, %v2772_v52  ;;  %v7748_v62 = vcombine.high %v2896_v7, %v2900_v8  ;;  %v7747_v40 = vcombine.low %v2896_v7, %v2900_v8  ;;  %v2744_v10 = vld [vmem:[%s12566_s6 + $0x118] sm:$0xff] }
 0x4e0   : > { %4722 = vmatmul.mubr.bf16.gmra.mxu0 %v10200_v37  ;;  %4767 = vmatpush2.bf16.msra.mxu1 %v7649_v14  ;;  %v2764_v14 = vld [vmem:[%s12566_s6 + $0x1b8] sm:$0xff] }
 0x4e1   : > { %4618 = vmatprep.mubr.bf16.mxu1 %v10236_v44  ;;  %4731 = vmatprep.mubr.bf16.mxu0 %v10238_v4  ;;  %v7612_v25 = vcombine.high %v2760_v6, %v2764_v14  ;;  %v7611_v11 = vcombine.low %v2760_v6, %v2764_v14 }
 0x4e2   : > { %4880 = vmatpush2.bf16.msra.mxu0 %v7777_v48  ;;  %4768 = vmatprep.subr.bf16.mxu1 %v7642_v9  ;;  %v2888_v48 = vld [vmem:[%s12566_s6 + $0x598] sm:$0xff] }
 0x4e3   : > { %4881 = vmatprep.subr.bf16.mxu0 %v7770_v59  ;;  %v2892_v9 = vld [vmem:[%s12566_s6 + $0x5b8] sm:$0xff] }
 0x4e4   : > { %4769 = vmatpush2.bf16.msra.mxu1 %v7641_v51  ;;  %v2752_v59 = vld [vmem:[%s12566_s6 + $0x158] sm:$0xff]  ;;  %v7740_v54 = vcombine.high %v2888_v48, %v2892_v9  ;;  %v7739_v18 = vcombine.low %v2888_v48, %v2892_v9 }
 0x4e5   : > { %4770 = vmatprep.subr.bf16.mxu1 %v7634_v17  ;;  %v2756_v51 = vld [vmem:[%s12566_s6 + $0x178] sm:$0xff] }
 0x4e6   : > { %4882 = vmatpush2.bf16.msra.mxu0 %v7769_v15  ;;  %v2880_v17 = vld [vmem:[%s12566_s6 + $0x558] sm:$0xff]  ;;  %v7603_v0 = vcombine.low %v2752_v59, %v2756_v51 }
 0x4e7   : > { %4619 = vmatmul.mubr.bf16.gmra.mxu1 %v10246_v12  ;;  %4883 = vmatprep.subr.bf16.mxu0 %v7762_v63  ;;  %v2884_v15 = vld [vmem:[%s12566_s6 + $0x578] sm:$0xff]  ;;  %v7604_v63 = vcombine.high %v2752_v59, %v2756_v51 }
 0x4e8   : > { %4732 = vmatmul.mubr.bf16.gmra.mxu0 %v10248_v16  ;;  %4771 = vmatpush2.bf16.msra.mxu1 %v7633_v60  ;;  %v2748_v60 = vld [vmem:[%s12566_s6 + $0x138] sm:$0xff]  ;;  %v7732_v21 = vcombine.high %v2880_v17, %v2884_v15  ;;  %v7731_v52 = vcombine.low %v2880_v17, %v2884_v15 }
 0x4e9   : > { %4774 = vmatprep.mubr.bf16.mxu1 %v9776_v38  ;;  %4887 = vmatprep.mubr.bf16.mxu0 %v9778_v39  ;;  %v7596_v55 = vcombine.high %v2744_v10, %v2748_v60  ;;  %v7595_v8 = vcombine.low %v2744_v10, %v2748_v60 }
 0x4ea   : > { %4884 = vmatpush2.bf16.msra.mxu0 %v7761_v49  ;;  %4772 = vmatprep.subr.bf16.mxu1 %v7626_v56  ;;  %v2872_v49 = vld [vmem:[%s12566_s6 + $0x518] sm:$0xff] }
 0x4eb   : > { %4885 = vmatprep.subr.bf16.mxu0 %v7754_v1  ;;  %v2876_v56 = vld [vmem:[%s12566_s6 + $0x538] sm:$0xff] }
 0x4ec   : > { %4773 = vmatpush2.bf16.msra.mxu1 %v7625_v3  ;;  %v2736_v1 = vld [vmem:[%s12566_s6 + $0xd8] sm:$0xff]  ;;  %v7724_v7 = vcombine.high %v2872_v49, %v2876_v56  ;;  %v7723_v14 = vcombine.low %v2872_v49, %v2876_v56 }
 0x4ed   : > { %4968 = vmatprep.subr.bf16.mxu1 %v7620_v13  ;;  %v2740_v3 = vld [vmem:[%s12566_s6 + $0xf8] sm:$0xff] }
 0x4ee   : > { %4886 = vmatpush2.bf16.msra.mxu0 %v7753_v5  ;;  %v2864_v13 = vld [vmem:[%s12566_s6 + $0x4d8] sm:$0xff]  ;;  %v7588_v6 = vcombine.high %v2736_v1, %v2740_v3  ;;  %v7587_v9 = vcombine.low %v2736_v1, %v2740_v3 }
 0x4ef   : > { %4775 = vmatmul.mubr.bf16.vlgmr.msra.gmra.mxu1 %v9782_v41  ;;  %5081 = vmatprep.subr.bf16.mxu0 %v7748_v62  ;;  %v2868_v5 = vld [vmem:[%s12566_s6 + $0x4f8] sm:$0xff] }
 0x4f0   : > { %4969 = vmatpush1.bf16.msra.mxu1 %v7619_v61  ;;  %4784 = vmatprep.mubr.bf16.mxu1 %v9850_v30  ;;  %v2728_v62 = vld [vmem:[%s12566_s6 + $0x98] sm:$0xff]  ;;  %v7716_v48 = vcombine.high %v2864_v13, %v2868_v5  ;;  %v7715_v51 = vcombine.low %v2864_v13, %v2868_v5 }
 0x4f1   : > { %4888 = vmatmul.mubr.bf16.vlgmr.msra.gmra.mxu0 %v9784_v42  ;;  %4970 = vmatprep.subr.bf16.mxu1 %v7612_v25  ;;  %v2732_v61 = vld [vmem:[%s12566_s6 + $0xb8] sm:$0xff] }
 0x4f2   : > { %4897 = vmatprep.mubr.bf16.mxu0 %v9852_v58  ;;  %5082 = vmatpush1.bf16.msra.mxu0 %v7747_v40  ;;  %v2856_v25 = vld [vmem:[%s12566_s6 + $0x498] sm:$0xff]  ;;  %v7580_v59 = vcombine.high %v2728_v62, %v2732_v61  ;;  %v7579_v15 = vcombine.low %v2728_v62, %v2732_v61 }
 0x4f3   : > { %5083 = vmatprep.subr.bf16.mxu0 %v7740_v54  ;;  %v2860_v40 = vld [vmem:[%s12566_s6 + $0x4b8] sm:$0xff] }
 0x4f4   : > { %4971 = vmatpush1.bf16.msra.mxu1 %v7611_v11  ;;  %v2720_v54 = vld [vmem:[%s12566_s6 + $0x58] sm:$0xff]  ;;  %v7708_v17 = vcombine.high %v2856_v25, %v2860_v40  ;;  %v7707_v60 = vcombine.low %v2856_v25, %v2860_v40 }
 0x4f5   : > { %4972 = vmatprep.subr.bf16.mxu1 %v7604_v63  ;;  %v2724_v11 = vld [vmem:[%s12566_s6 + $0x78] sm:$0xff] }
 0x4f6   : > { %5084 = vmatpush1.bf16.msra.mxu0 %v7739_v18  ;;  %v2848_v63 = vld [vmem:[%s12566_s6 + $0x458] sm:$0xff]  ;;  %v7572_v10 = vcombine.high %v2720_v54, %v2724_v11  ;;  %v7571_v56 = vcombine.low %v2720_v54, %v2724_v11 }
 0x4f7   : > { %4785 = vmatmul.mubr.bf16.gmra.mxu1 %v9858_v33  ;;  %5085 = vmatprep.subr.bf16.mxu0 %v7732_v21  ;;  %v2852_v18 = vld [vmem:[%s12566_s6 + $0x478] sm:$0xff] }
 0x4f8   : > { %4973 = vmatpush1.bf16.msra.mxu1 %v7603_v0  ;;  %4794 = vmatprep.mubr.bf16.mxu1 %v9918_v28  ;;  %v2712_v21 = vld [vmem:[%s12566_s6 + $0x18] sm:$0xff]  ;;  %v7700_v49 = vcombine.high %v2848_v63, %v2852_v18  ;;  %v7699_v3 = vcombine.low %v2848_v63, %v2852_v18 }
 0x4f9   : > { %4898 = vmatmul.mubr.bf16.gmra.mxu0 %v9860_v34  ;;  %4974 = vmatprep.subr.bf16.mxu1 %v7596_v55  ;;  %v2716_v0 = vld [vmem:[%s12566_s6 + $0x38] sm:$0xff] }
 0x4fa   : > { %4907 = vmatprep.mubr.bf16.mxu0 %v9920_v22  ;;  %5086 = vmatpush1.bf16.msra.mxu0 %v7731_v52  ;;  %v2840_v55 = vld [vmem:[%s12566_s6 + $0x418] sm:$0xff]  ;;  %v7564_v1 = vcombine.high %v2712_v21, %v2716_v0  ;;  %v7563_v5 = vcombine.low %v2712_v21, %v2716_v0 }
 0x4fb   : > { %5087 = vmatprep.subr.bf16.mxu0 %v7724_v7  ;;  %v2844_v52 = vld [vmem:[%s12566_s6 + $0x438] sm:$0xff] }
 0x4fc   : > { %4975 = vmatpush1.bf16.msra.mxu1 %v7595_v8  ;;  %v2832_v7 = vld [vmem:[%s12566_s6 + $0x3d8] sm:$0xff]  ;;  %v7692_v13 = vcombine.high %v2840_v55, %v2844_v52  ;;  %v7691_v61 = vcombine.low %v2840_v55, %v2844_v52 }
 0x4fd   : > { %4976 = vmatprep.subr.bf16.mxu1 %v7588_v6  ;;  %v2836_v8 = vld [vmem:[%s12566_s6 + $0x3f8] sm:$0xff] }
 0x4fe   : > { %5088 = vmatpush1.bf16.msra.mxu0 %v7723_v14  ;;  %v2960_v6 = vld [vmem:[%s12566_s6 + $0x7d8] sm:$0xff]  ;;  %v7684_v62 = vcombine.high %v2832_v7, %v2836_v8  ;;  %v7683_v40 = vcombine.low %v2832_v7, %v2836_v8 }
 0x4ff   : > { %4795 = vmatmul.mubr.bf16.gmra.mxu1 %v9926_v24  ;;  %5089 = vmatprep.subr.bf16.mxu0 %v7716_v48  ;;  %v2964_v14 = vld [vmem:[%s12566_s6 + $0x7f8] sm:$0xff] }
 0x500   : > { %4977 = vmatpush1.bf16.msra.mxu1 %v7587_v9  ;;  %4804 = vmatprep.mubr.bf16.mxu1 %v9986_v19  ;;  %v2824_v48 = vld [vmem:[%s12566_s6 + $0x398] sm:$0xff]  ;;  %v7812_v25 = vcombine.high %v2960_v6, %v2964_v14  ;;  %v7811_v11 = vcombine.low %v2960_v6, %v2964_v14 }
 0x501   : > { %4908 = vmatmul.mubr.bf16.gmra.mxu0 %v9928_v27  ;;  %4978 = vmatprep.subr.bf16.mxu1 %v7580_v59  ;;  %v2828_v9 = vld [vmem:[%s12566_s6 + $0x3b8] sm:$0xff] }
 0x502   : > { %4917 = vmatprep.mubr.bf16.mxu0 %v9988_v20  ;;  %5090 = vmatpush1.bf16.msra.mxu0 %v7715_v51  ;;  %v2952_v59 = vld [vmem:[%s12566_s6 + $0x798] sm:$0xff]  ;;  %v7676_v54 = vcombine.high %v2824_v48, %v2828_v9  ;;  %v7675_v18 = vcombine.low %v2824_v48, %v2828_v9 }
 0x503   : > { %5091 = vmatprep.subr.bf16.mxu0 %v7708_v17  ;;  %v2956_v51 = vld [vmem:[%s12566_s6 + $0x7b8] sm:$0xff] }
 0x504   : > { %4979 = vmatpush1.bf16.msra.mxu1 %v7579_v15  ;;  %v2816_v17 = vld [vmem:[%s12566_s6 + $0x358] sm:$0xff]  ;;  %v7804_v63 = vcombine.high %v2952_v59, %v2956_v51  ;;  %v7803_v0 = vcombine.low %v2952_v59, %v2956_v51 }
 0x505   : > { %4980 = vmatprep.subr.bf16.mxu1 %v7572_v10  ;;  %v2820_v15 = vld [vmem:[%s12566_s6 + $0x378] sm:$0xff] }
 0x506   : > { %5092 = vmatpush1.bf16.msra.mxu0 %v7707_v60  ;;  %v2944_v10 = vld [vmem:[%s12566_s6 + $0x758] sm:$0xff]  ;;  %v7668_v21 = vcombine.high %v2816_v17, %v2820_v15  ;;  %v7667_v52 = vcombine.low %v2816_v17, %v2820_v15 }
 0x507   : > { %4805 = vmatmul.mubr.bf16.gmra.mxu1 %v9994_v32  ;;  %5093 = vmatprep.subr.bf16.mxu0 %v7700_v49  ;;  %v2948_v60 = vld [vmem:[%s12566_s6 + $0x778] sm:$0xff] }
 0x508   : > { %4981 = vmatpush1.bf16.msra.mxu1 %v7571_v56  ;;  %4814 = vmatprep.mubr.bf16.mxu1 %v10054_v31  ;;  %v2808_v49 = vld [vmem:[%s12566_s6 + $0x318] sm:$0xff]  ;;  %v7796_v55 = vcombine.high %v2944_v10, %v2948_v60  ;;  %v7795_v8 = vcombine.low %v2944_v10, %v2948_v60 }
 0x509   : > { %4918 = vmatmul.mubr.bf16.gmra.mxu0 %v9996_v23  ;;  %4982 = vmatprep.subr.bf16.mxu1 %v7564_v1  ;;  %v2812_v56 = vld [vmem:[%s12566_s6 + $0x338] sm:$0xff] }
 0x50a   : > { %4927 = vmatprep.mubr.bf16.mxu0 %v10056_v35  ;;  %5094 = vmatpush1.bf16.msra.mxu0 %v7699_v3  ;;  %v2936_v1 = vld [vmem:[%s12566_s6 + $0x718] sm:$0xff]  ;;  %v7660_v7 = vcombine.high %v2808_v49, %v2812_v56  ;;  %v7659_v14 = vcombine.low %v2808_v49, %v2812_v56 }
 0x50b   : > { %5095 = vmatprep.subr.bf16.mxu0 %v7692_v13  ;;  %v2940_v3 = vld [vmem:[%s12566_s6 + $0x738] sm:$0xff] }
 0x50c   : > { %4983 = vmatpush1.bf16.msra.mxu1 %v7563_v5  ;;  %v2800_v13 = vld [vmem:[%s12566_s6 + $0x2d8] sm:$0xff]  ;;  %v7788_v6 = vcombine.high %v2936_v1, %v2940_v3  ;;  %v7787_v9 = vcombine.low %v2936_v1, %v2940_v3 }
 0x50d   : > { %4984 = vmatprep.subr.bf16.mxu1 %v7684_v62  ;;  %v2804_v5 = vld [vmem:[%s12566_s6 + $0x2f8] sm:$0xff] }
 0x50e   : > { %5096 = vmatpush1.bf16.msra.mxu0 %v7691_v61  ;;  %v2928_v62 = vld [vmem:[%s12566_s6 + $0x6d8] sm:$0xff]  ;;  %v7652_v48 = vcombine.high %v2800_v13, %v2804_v5  ;;  %v7651_v51 = vcombine.low %v2800_v13, %v2804_v5 }
 0x50f   : > { %4815 = vmatmul.mubr.bf16.gmra.mxu1 %v10062_v36  ;;  %5097 = vmatprep.subr.bf16.mxu0 %v7812_v25  ;;  %v2932_v61 = vld [vmem:[%s12566_s6 + $0x6f8] sm:$0xff] }
 0x510   : > { %4985 = vmatpush2.bf16.msra.mxu1 %v7683_v40  ;;  %4824 = vmatprep.mubr.bf16.mxu1 %v10122_v50  ;;  %v2792_v25 = vld [vmem:[%s12566_s6 + $0x298] sm:$0xff]  ;;  %v7780_v59 = vcombine.high %v2928_v62, %v2932_v61  ;;  %v7779_v15 = vcombine.low %v2928_v62, %v2932_v61 }
 0x511   : > { %4928 = vmatmul.mubr.bf16.gmra.mxu0 %v10064_v29  ;;  %4986 = vmatprep.subr.bf16.mxu1 %v7676_v54  ;;  %v2796_v40 = vld [vmem:[%s12566_s6 + $0x2b8] sm:$0xff] }
 0x512   : > { %4937 = vmatprep.mubr.bf16.mxu0 %v10124_v53  ;;  %5098 = vmatpush2.bf16.msra.mxu0 %v7811_v11  ;;  %v2920_v54 = vld [vmem:[%s12566_s6 + $0x698] sm:$0xff]  ;;  %v7644_v17 = vcombine.high %v2792_v25, %v2796_v40  ;;  %v7643_v60 = vcombine.low %v2792_v25, %v2796_v40 }
 0x513   : > { %5099 = vmatprep.subr.bf16.mxu0 %v7804_v63  ;;  %v2924_v11 = vld [vmem:[%s12566_s6 + $0x6b8] sm:$0xff] }
 0x514   : > { %4987 = vmatpush2.bf16.msra.mxu1 %v7675_v18  ;;  %v2784_v63 = vld [vmem:[%s12566_s6 + $0x258] sm:$0xff]  ;;  %v7772_v10 = vcombine.high %v2920_v54, %v2924_v11  ;;  %v7771_v56 = vcombine.low %v2920_v54, %v2924_v11 }
 0x515   : > { %4988 = vmatprep.subr.bf16.mxu1 %v7668_v21  ;;  %v2788_v18 = vld [vmem:[%s12566_s6 + $0x278] sm:$0xff] }
 0x516   : > { %5100 = vmatpush2.bf16.msra.mxu0 %v7803_v0  ;;  %v2912_v21 = vld [vmem:[%s12566_s6 + $0x658] sm:$0xff]  ;;  %v7636_v49 = vcombine.high %v2784_v63, %v2788_v18  ;;  %v7635_v3 = vcombine.low %v2784_v63, %v2788_v18 }
 0x517   : > { %4825 = vmatmul.mubr.bf16.gmra.mxu1 %v10130_v43  ;;  %5101 = vmatprep.subr.bf16.mxu0 %v7796_v55  ;;  %v2916_v0 = vld [vmem:[%s12566_s6 + $0x678] sm:$0xff] }
 0x518   : > { %4989 = vmatpush2.bf16.msra.mxu1 %v7667_v52  ;;  %4834 = vmatprep.mubr.bf16.mxu1 %v10190_v26  ;;  %v2776_v55 = vld [vmem:[%s12566_s6 + $0x218] sm:$0xff]  ;;  %v7764_v1 = vcombine.high %v2912_v21, %v2916_v0 }
 0x519   : > { %4938 = vmatmul.mubr.bf16.gmra.mxu0 %v10132_v57  ;;  %4990 = vmatprep.subr.bf16.mxu1 %v7660_v7  ;;  %v2780_v52 = vld [vmem:[%s12566_s6 + $0x238] sm:$0xff] }
 0x51a   : > { %4947 = vmatprep.mubr.bf16.mxu0 %v10192_v45  ;;  %5102 = vmatpush2.bf16.msra.mxu0 %v7795_v8  ;;  %v2904_v7 = vld [vmem:[%s12566_s6 + $0x618] sm:$0xff]  ;;  %v7628_v13 = vcombine.high %v2776_v55, %v2780_v52  ;;  %v7627_v61 = vcombine.low %v2776_v55, %v2780_v52 }
 0x51b   : > { %5103 = vmatprep.subr.bf16.mxu0 %v7788_v6  ;;  %v2908_v8 = vld [vmem:[%s12566_s6 + $0x638] sm:$0xff] }
 0x51c   : > { %4991 = vmatpush2.bf16.msra.mxu1 %v7659_v14  ;;  %v7555_v5 = vld [vmem:[%s12571_s11 + $0x5] ss:$8 sm:$0xf]  ;;  %v7763_v14 = vcombine.low %v2912_v21, %v2916_v0  ;;  %v7756_v62 = vcombine.high %v2904_v7, %v2908_v8 }
 0x51d   : > { %4992 = vmatprep.subr.bf16.mxu1 %v7652_v48  ;;  %v7556_v6 = vld [vmem:[%s12571_s11 + $0x5] ss:$8 sm:$0xf0] }
 0x51e   : > { %5104 = vmatpush2.bf16.msra.mxu0 %v7787_v9  ;;  %v10708_v48 = vor.u32 %v7556_v6, %v7555_v5  ;;  %v7755_v9 = vcombine.low %v2904_v7, %v2908_v8 }
 0x51f   : > { %4835 = vmatmul.mubr.bf16.gmra.mxu1 %v10198_v2  ;;  %5105 = vmatprep.subr.bf16.mxu0 %v7780_v59 }
 0x520   : > { %4993 = vmatpush2.bf16.msra.mxu1 %v7651_v51  ;;  %4844 = vmatprep.mubr.bf16.mxu1 %v10236_v44  ;;  %v10714_v25 = vrot.slane %v10708_v48, %v9291_v47 }
 0x521   : > { %4948 = vmatmul.mubr.bf16.gmra.mxu0 %v10200_v37  ;;  %4994 = vmatprep.subr.bf16.mxu1 %v7644_v17 }
 0x522   : > { %4957 = vmatprep.mubr.bf16.mxu0 %v10238_v4  ;;  %5106 = vmatpush2.bf16.msra.mxu0 %v7779_v15 }
 0x523   : > { %5107 = vmatprep.subr.bf16.mxu0 %v7772_v10 }
 0x524   : > { %4995 = vmatpush2.bf16.msra.mxu1 %v7643_v60 }
 0x525   : > { %4996 = vmatprep.subr.bf16.mxu1 %v7636_v49 }
 0x526   : > { %5108 = vmatpush2.bf16.msra.mxu0 %v7771_v56 }
 0x527   : > { %4845 = vmatmul.mubr.bf16.gmra.mxu1 %v10246_v12  ;;  %5109 = vmatprep.subr.bf16.mxu0 %v7764_v1 }
 0x528   : > { %4997 = vmatpush2.bf16.msra.mxu1 %v7635_v3  ;;  %5000 = vmatprep.mubr.bf16.mxu1 %v9776_v38  ;;  %v10718_v38 = vrot.slane %v10708_v48, %v9288_v46 }
 0x529   : > { %4958 = vmatmul.mubr.bf16.gmra.mxu0 %v10248_v16  ;;  %4998 = vmatprep.subr.bf16.mxu1 %v7628_v13 }
 0x52a   : > { %5110 = vmatpush2.bf16.msra.mxu0 %v7763_v14  ;;  %5113 = vmatprep.mubr.bf16.mxu0 %v9778_v39 }
 0x52b   : > { %5111 = vmatprep.subr.bf16.mxu0 %v7756_v62 }
 0x52c   : > { %4999 = vmatpush2.bf16.msra.mxu1 %v7627_v61  ;;  %v5449_v61 = vld [vmem:[%s12567_s7 + $0xf8] sm:$0xff] }
 0x52d   : > { %7944 = vmatprep.subr.mxu1 %v5449_v61 }
 0x52e   : > { %5112 = vmatpush2.bf16.msra.mxu0 %v7755_v9  ;;  %v4324_v40 = vpop.f32.mrf.mxu1  ;;  %v4437_v59 = vpop.f32.mrf.mxu0 }
 0x52f   : > { %5001 = vmatmul.mubr.bf16.vlgmr.msra.gmra.mxu1 %v9782_v41  ;;  %v4325_v51 = vadd.f32 %v4324_v40, %v10714_v25 }
 0x530   : > { %5010 = vmatprep.mubr.bf16.mxu1 %v9850_v30  ;;  %v4326_v39 = vpop.f32.mrf.mxu1  ;;  %v4439_v54 = vpop.f32.mrf.mxu0 }
 0x531   : > { %5114 = vmatmul.mubr.bf16.vlgmr.msra.gmra.mxu0 %v9784_v42  ;;  %v10724_v11 = vadd.f32 %v4437_v59, %v4325_v51  ;;  %v4327_v17 = vadd.f32 %v4326_v39, %v10718_v38  ;;  %v5433_v51 = vld [vmem:[%s12567_s7 + $0x78] sm:$0xff] }
 0x532   : > { %5123 = vmatprep.mubr.bf16.mxu0 %v9852_v58  ;;  %v4328_v15 = vpop.f32.mrf.mxu1  ;;  %v4441_v63 = vpop.f32.mrf.mxu0  ;;  %7945 = vmatpush3.msra.mxu1 %v5433_v51 }
 0x533   : > { %v10728_v18 = vadd.f32 %v4439_v54, %v4327_v17  ;;  %v4329_v41 = vadd.f32 %v4328_v15, %v10714_v25  ;;  %v5448_v17 = vld [vmem:[%s12567_s7 + $0xf0] sm:$0xff] }
 0x534   : > { %v4330_v10 = vpop.f32.mrf.mxu1  ;;  %v4443_v60 = vpop.f32.mrf.mxu0  ;;  %7946 = vmatprep.subr.mxu1 %v5448_v17 }
 0x535   : > { %v10731_v21 = vadd.f32 %v4441_v63, %v4329_v41  ;;  %v4331_v42 = vadd.f32 %v4330_v10, %v10718_v38  ;;  %v5432_v10 = vld [vmem:[%s12567_s7 + $0x70] sm:$0xff] }
 0x536   : > { %7947 = vmatpush3.msra.mxu1 %v5432_v10 }
 0x537   : > { %v4334_v30 = vpop.f32.mrf.mxu1  ;;  %v4447_v0 = vpop.f32.mrf.mxu0  ;;  %5011 = vmatmul.mubr.bf16.gmra.mxu1 %v9858_v33  ;;  %v10735_v49 = vadd.f32 %v4443_v60, %v4331_v42 }
 0x538   : > { %v4335_v58 = vadd.f32 %v4334_v30, %v10714_v25  ;;  %5020 = vmatprep.mubr.bf16.mxu1 %v9918_v28 }
 0x539   : > { %5124 = vmatmul.mubr.bf16.gmra.mxu0 %v9860_v34  ;;  %v4336_v56 = vpop.f32.mrf.mxu1  ;;  %v4449_v55 = vpop.f32.mrf.mxu0 }
 0x53a   : > { %v10740_v52 = vadd.f32 %v4447_v0, %v4335_v58  ;;  %5133 = vmatprep.mubr.bf16.mxu0 %v9920_v22  ;;  %v4337_v1 = vadd.f32 %v4336_v56, %v10718_v38  ;;  %v5447_v58 = vld [vmem:[%s12567_s7 + $0xe8] sm:$0xff] }
 0x53b   : > { %v4338_v3 = vpop.f32.mrf.mxu1  ;;  %v4451_v7 = vpop.f32.mrf.mxu0  ;;  %7948 = vmatprep.subr.mxu1 %v5447_v58 }
 0x53c   : > { %v10744_v8 = vadd.f32 %v4449_v55, %v4337_v1  ;;  %v4339_v33 = vadd.f32 %v4338_v3, %v10714_v25 }
 0x53d   : > { %v4340_v13 = vpop.f32.mrf.mxu1  ;;  %v4453_v5 = vpop.f32.mrf.mxu0 }
 0x53e   : > { %v10747_v6 = vadd.f32 %v4451_v7, %v4339_v33  ;;  %v4341_v34 = vadd.f32 %v4340_v13, %v10718_v38  ;;  %v5446_v13 = vld [vmem:[%s12567_s7 + $0xe0] sm:$0xff] }
 0x53f   : > { %v4344_v28 = vpop.f32.mrf.mxu1  ;;  %v4457_v14 = vpop.f32.mrf.mxu0  ;;  %5021 = vmatmul.mubr.bf16.gmra.mxu1 %v9926_v24 }
 0x540   : > { %v10751_v62 = vadd.f32 %v4453_v5, %v4341_v34  ;;  %v4345_v22 = vadd.f32 %v4344_v28, %v10714_v25  ;;  %5030 = vmatprep.mubr.bf16.mxu1 %v9986_v19 }
 0x541   : > { %5134 = vmatmul.mubr.bf16.gmra.mxu0 %v9928_v27  ;;  %v4346_v9 = vpop.f32.mrf.mxu1  ;;  %v4459_v40 = vpop.f32.mrf.mxu0 }
 0x542   : > { %v10759_v59 = vadd.f32 %v4457_v14, %v4345_v22  ;;  %5143 = vmatprep.mubr.bf16.mxu0 %v9988_v20  ;;  %v4347_v24 = vadd.f32 %v4346_v9, %v10718_v38  ;;  %v5430_v14 = vld [vmem:[%s12567_s7 + $0x60] sm:$0xff] }
 0x543   : > { %v4348_v19 = vpop.f32.mrf.mxu1  ;;  %v4461_v39 = vpop.f32.mrf.mxu0 }
 0x544   : > { %v10766_v54 = vadd.f32 %v4459_v40, %v4347_v24  ;;  %v4349_v27 = vadd.f32 %v4348_v19, %v10714_v25  ;;  %v5445_v24 = vld [vmem:[%s12567_s7 + $0xd8] sm:$0xff] }
 0x545   : > { %v4350_v15 = vpop.f32.mrf.mxu1  ;;  %v4463_v63 = vpop.f32.mrf.mxu0 }
 0x546   : > { %v10772_v20 = vadd.f32 %v4461_v39, %v4349_v27  ;;  %v4351_v41 = vadd.f32 %v4350_v15, %v10718_v38 }
 0x547   : > { %v4354_v60 = vpop.f32.mrf.mxu1  ;;  %v4467_v42 = vpop.f32.mrf.mxu0  ;;  %5031 = vmatmul.mubr.bf16.gmra.mxu1 %v9994_v32 }
 0x548   : > { %v10779_v30 = vadd.f32 %v4463_v63, %v4351_v41  ;;  %v4355_v0 = vadd.f32 %v4354_v60, %v10714_v25  ;;  %5040 = vmatprep.mubr.bf16.mxu1 %v10054_v31  ;;  %v5431_v31 = vld [vmem:[%s12567_s7 + $0x68] sm:$0xff] }
 0x549   : > { %5144 = vmatmul.mubr.bf16.gmra.mxu0 %v9996_v23  ;;  %v4356_v56 = vpop.f32.mrf.mxu1  ;;  %v4469_v55 = vpop.f32.mrf.mxu0  ;;  %7949 = vmatpush3.msra.mxu1 %v5431_v31 }
 0x54a   : > { %v10787_v1 = vadd.f32 %v4467_v42, %v4355_v0  ;;  %5153 = vmatprep.mubr.bf16.mxu0 %v10056_v35  ;;  %v4357_v32 = vadd.f32 %v4356_v56, %v10718_v38  ;;  %7950 = vmatprep.subr.mxu1 %v5446_v13  ;;  %v5443_v0 = vld [vmem:[%s12567_s7 + $0xc8] sm:$0xff] }
 0x54b   : > { %v4358_v3 = vpop.f32.mrf.mxu1  ;;  %v4471_v7 = vpop.f32.mrf.mxu0  ;;  %7951 = vmatpush3.msra.mxu1 %v5430_v14  ;;  %v10877_v14 = vld [vmem:[%s12567_s7 + $0x178] sm:$0xff] }
 0x54c   : > { %v10794_v33 = vadd.f32 %v4469_v55, %v4357_v32  ;;  %v4359_v23 = vadd.f32 %v4358_v3, %v10714_v25  ;;  %7952 = vmatprep.subr.mxu1 %v5445_v24  ;;  %12599 = vst [vmem:[#allocation17_spill] sm:$0xff] %v10877_v14  ;;  %8128 = vmatprep.subr.mxu0 %v10877_v14 }
 0x54d   : > { %v4360_v5 = vpop.f32.mrf.mxu1  ;;  %v4473_v34 = vpop.f32.mrf.mxu0  ;;  %8129 = vmatpush3.msra.mxu0 %v10877_v14 }
 0x54e   : > { %v10800_v35 = vadd.f32 %v4471_v7, %v4359_v23  ;;  %v4361_v28 = vadd.f32 %v4360_v5, %v10718_v38 }
 0x54f   : > { %v4364_v22 = vpop.f32.mrf.mxu1  ;;  %v4477_v61 = vpop.f32.mrf.mxu0  ;;  %5041 = vmatmul.mubr.bf16.gmra.mxu1 %v10062_v36  ;;  %v5429_v36 = vld [vmem:[%s12567_s7 + $0x58] sm:$0xff] }
 0x550   : > { %v10807_v9 = vadd.f32 %v4473_v34, %v4361_v28  ;;  %v4365_v40 = vadd.f32 %v4364_v22, %v10714_v25  ;;  %5050 = vmatprep.mubr.bf16.mxu1 %v10122_v50  ;;  %7953 = vmatpush3.msra.mxu1 %v5429_v36  ;;  %v5441_v28 = vld [vmem:[%s12567_s7 + $0xb8] sm:$0xff]  ;;  %v5440_v36 = vld [vmem:[%s12567_s7 + $0xb0] sm:$0xff] }
 0x551   : > { %5154 = vmatmul.mubr.bf16.gmra.mxu0 %v10064_v29  ;;  %v10815_v51 = vpop.f32.mrf.mxu1  ;;  %v10817_v19 = vpop.f32.mrf.mxu0  ;;  %v5444_v29 = vld [vmem:[%s12567_s7 + $0xd0] sm:$0xff] }
 0x552   : > { %v10819_v39 = vadd.f32 %v4477_v61, %v4365_v40  ;;  %5163 = vmatprep.mubr.bf16.mxu0 %v10124_v53  ;;  %7954 = vmatprep.subr.mxu1 %v5444_v29  ;;  %v5428_v53 = vld [vmem:[%s12567_s7 + $0x50] sm:$0xff] }
 0x553   : > { %v4368_v50 = vpop.f32.mrf.mxu1  ;;  %v4481_v27 = vpop.f32.mrf.mxu0  ;;  %7955 = vmatpush3.msra.mxu1 %v5428_v53  ;;  %v5424_v29 = vld [vmem:[%s12567_s7 + $0x30] sm:$0xff]  ;;  %v10915_v53 = vld [vmem:[%s12567_s7 + $0x168] sm:$0xff] }
 0x554   : > { %v4369_v17 = vadd.f32 %v4368_v50, %v10714_v25  ;;  %7956 = vmatprep.subr.mxu1 %v5443_v0  ;;  %12601 = vst [vmem:[#allocation19_spill] sm:$0xff] %v10915_v53  ;;  %v5439_v0 = vld [vmem:[%s12567_s7 + $0xa8] sm:$0xff] }
 0x555   : > { %v10829_v15 = vpop.f32.mrf.mxu1  ;;  %v10831_v63 = vpop.f32.mrf.mxu0 }
 0x556   : > { %v10833_v41 = vadd.f32 %v4481_v27, %v4369_v17 }
 0x557   : > { %v4374_v10 = vpop.f32.mrf.mxu1  ;;  %v4487_v60 = vpop.f32.mrf.mxu0  ;;  %5051 = vmatmul.mubr.bf16.gmra.mxu1 %v10130_v43 }
 0x558   : > { %v4375_v42 = vadd.f32 %v4374_v10, %v10714_v25  ;;  %5060 = vmatprep.mubr.bf16.mxu1 %v10190_v26  ;;  %v5427_v26 = vld [vmem:[%s12567_s7 + $0x48] sm:$0xff] }
 0x559   : > { %5164 = vmatmul.mubr.bf16.gmra.mxu0 %v10132_v57  ;;  %v10845_v58 = vpop.f32.mrf.mxu1  ;;  %v10847_v56 = vpop.f32.mrf.mxu0  ;;  %7957 = vmatpush3.msra.mxu1 %v5427_v26  ;;  %v5442_v57 = vld [vmem:[%s12567_s7 + $0xc0] sm:$0xff] }
 0x55a   : > { %v10849_v55 = vadd.f32 %v4487_v60, %v4375_v42  ;;  %5173 = vmatprep.mubr.bf16.mxu0 %v10192_v45  ;;  %7958 = vmatprep.subr.mxu1 %v5442_v57  ;;  %v5426_v45 = vld [vmem:[%s12567_s7 + $0x40] sm:$0xff]  ;;  %v10943_v57 = vld [vmem:[%s12567_s7 + $0x158] sm:$0xff] }
 0x55b   : > { %v4378_v43 = vpop.f32.mrf.mxu1  ;;  %v4491_v32 = vpop.f32.mrf.mxu0  ;;  %7959 = vmatpush3.msra.mxu1 %v5426_v45  ;;  %v10927_v26 = vld [vmem:[%s12567_s7 + $0x160] sm:$0xff]  ;;  %12603 = vst [vmem:[#allocation21_spill] sm:$0xff] %v10943_v57 }
 0x55c   : > { %v4379_v31 = vadd.f32 %v4378_v43, %v10714_v25  ;;  %7960 = vmatprep.subr.mxu1 %v5441_v28  ;;  %12602 = vst [vmem:[#allocation20_spill] sm:$0xff] %v10927_v26  ;;  %v8842_v45 = vld [vmem:[%s9187_s25] sm:$0xff] }
 0x55d   : > { %v10859_v3 = vpop.f32.mrf.mxu1  ;;  %v10861_v7 = vpop.f32.mrf.mxu0 }
 0x55e   : > { %v10863_v23 = vadd.f32 %v4491_v32, %v4379_v31  ;;  %v5423_v31 = vld [vmem:[%s12567_s7 + $0x28] sm:$0xff] }
 0x55f   : > { %v4384_v13 = vpop.f32.mrf.mxu1  ;;  %v4497_v5 = vpop.f32.mrf.mxu0  ;;  %5061 = vmatmul.mubr.bf16.gmra.mxu1 %v10198_v2 }
 0x560   : > { %v4385_v34 = vadd.f32 %v4384_v13, %v10714_v25  ;;  %5070 = vmatprep.mubr.bf16.mxu1 %v10236_v44  ;;  %v5425_v44 = vld [vmem:[%s12567_s7 + $0x38] sm:$0xff] }
 0x561   : > { %5174 = vmatmul.mubr.bf16.gmra.mxu0 %v10200_v37  ;;  %v10880_v22 = vpop.f32.mrf.mxu1  ;;  %v10882_v61 = vpop.f32.mrf.mxu0  ;;  %7961 = vmatpush3.msra.mxu1 %v5425_v44  ;;  %v5438_v44 = vld [vmem:[%s12567_s7 + $0xa0] sm:$0xff] }
 0x562   : > { %v10884_v2 = vadd.f32 %v4497_v5, %v4385_v34  ;;  %5183 = vmatprep.mubr.bf16.mxu0 %v10238_v4  ;;  %v10899_v4 = vld [vmem:[%s12567_s7 + $0x170] sm:$0xff]  ;;  %7962 = vmatprep.subr.mxu1 %v5440_v36  ;;  %v12604_v34 = vld [vmem:[#allocation15_spill] sm:$0xff]  ;;  %v5422_v36 = vld [vmem:[%s12567_s7 + $0x20] sm:$0xff] }
 0x563   : > { %v4388_v40 = vpop.f32.mrf.mxu1  ;;  %v4501_v24 = vpop.f32.mrf.mxu0  ;;  %12600 = vst [vmem:[#allocation18_spill] sm:$0xff] %v10899_v4  ;;  %8130 = vmatprep.subr.mxu0 %v10899_v4  ;;  %7963 = vmatpush3.msra.mxu1 %v5424_v29  ;;  %v10950_v28 = vrot.slane %v10708_v48, %v12604_v34  ;;  %v5459_v29 = vld [vmem:[%s12567_s7 + $0x148] sm:$0xff] }
 0x564   : > { %v4389_v37 = vadd.f32 %v4388_v40, %v10714_v25  ;;  %8131 = vmatpush3.msra.mxu0 %v10899_v4  ;;  %7964 = vmatprep.subr.mxu1 %v5439_v0  ;;  %v10959_v40 = vld [vmem:[%s12567_s7 + $0x150] sm:$0xff]  ;;  %v5437_v0 = vld [vmem:[%s12567_s7 + $0x98] sm:$0xff] }
 0x565   : > { %v10901_v50 = vpop.f32.mrf.mxu1  ;;  %v10903_v27 = vpop.f32.mrf.mxu0  ;;  %8132 = vmatprep.subr.mxu0 %v10915_v53  ;;  %7965 = vmatpush3.msra.mxu1 %v5423_v31  ;;  %12605 = vst [vmem:[#allocation22_spill] sm:$0xff] %v10959_v40  ;;  %v5458_v31 = vld [vmem:[%s12567_s7 + $0x140] sm:$0xff] }
 0x566   : > { %v10906_v17 = vadd.f32 %v4501_v24, %v4389_v37  ;;  %8133 = vmatpush3.msra.mxu0 %v10915_v53  ;;  %7966 = vmatprep.subr.mxu1 %v5438_v44  ;;  %v5457_v44 = vld [vmem:[%s12567_s7 + $0x138] sm:$0xff] }
 0x567   : > { %v4394_v10 = vpop.f32.mrf.mxu1  ;;  %v4507_v60 = vpop.f32.mrf.mxu0  ;;  %5071 = vmatmul.mubr.bf16.gmra.mxu1 %v10246_v12  ;;  %8134 = vmatprep.subr.mxu0 %v10927_v26 }
 0x568   : > { %v4395_v42 = vadd.f32 %v4394_v10, %v10714_v25  ;;  %8135 = vmatpush3.msra.mxu0 %v10927_v26  ;;  %7967 = vmatpush3.msra.mxu1 %v5422_v36 }
 0x569   : > { %5184 = vmatmul.mubr.bf16.gmra.mxu0 %v10248_v16  ;;  %v10930_v43 = vpop.f32.mrf.mxu1  ;;  %v10932_v12 = vpop.f32.mrf.mxu0  ;;  %8136 = vmatprep.subr.mxu0 %v10943_v57 }
 0x56a   : > { %v10934_v32 = vadd.f32 %v4507_v60, %v4395_v42  ;;  %8160 = vmatprep.mubr.f32.mxu0 %v8842_v45  ;;  %8137 = vmatpush3.msra.mxu0 %v10943_v57 }
 0x56b   : > { %v4398_v16 = vpop.f32.mrf.mxu1  ;;  %v4511_v13 = vpop.f32.mrf.mxu0  ;;  %8138 = vmatprep.subr.mxu0 %v10959_v40  ;;  %7968 = vmatprep.subr.mxu1 %v5437_v0 }
 0x56c   : > { %v4399_v5 = vadd.f32 %v4398_v16, %v10714_v25  ;;  %8139 = vmatpush3.msra.mxu0 %v10959_v40 }
 0x56d   : > { %v10961_v24 = vpop.f32.mrf.mxu1  ;;  %v10963_v37 = vpop.f32.mrf.mxu0  ;;  %8140 = vmatprep.subr.mxu0 %v5459_v29 }
 0x56e   : > { %12606 = vst [vmem:[#allocation23_spill] sm:$0xff] %v10961_v24  ;;  %12607 = vst [vmem:[#allocation24_spill] sm:$0xff] %v10963_v37  ;;  %v10966_v25 = vadd.f32 %v4511_v13, %v4399_v5  ;;  %8141 = vmatpush3.msra.mxu0 %v5459_v29  ;;  %v5421_v5 = vld [vmem:[%s12567_s7 + $0x18] sm:$0xff]  ;;  %v8846_v37 = vld [vmem:[%s9187_s25 + $0x20] sm:$0xff] }
 0x56f   : > { %v4550_v10 = vpop.f32.mrf.mxu1  ;;  %8142 = vmatprep.subr.mxu0 %v5458_v31  ;;  %7969 = vmatpush3.msra.mxu1 %v5421_v5 }
 0x570   : > { %v4551_v60 = vadd.f32 %v4550_v10, %v10950_v28  ;;  %v4663_v42 = vpop.f32.mrf.mxu0  ;;  %8143 = vmatpush3.msra.mxu0 %v5458_v31  ;;  %v5194_v10 = vmax.f32 %v10724_v11, 0.0  ;;  %v5455_v11 = vld [vmem:[%s12567_s7 + $0x128] sm:$0xff] }
 0x571   : > { %v10983_v45 = vpop.f32.mrf.mxu1  ;;  %8144 = vmatprep.subr.mxu0 %v5457_v44 }
 0x572   : > { %v4664_v16 = vadd.f32 %v4663_v42, %v4551_v60  ;;  %v10985_v13 = vpop.f32.mrf.mxu0  ;;  %v5456_v42 = vld [vmem:[%s12567_s7 + $0x130] sm:$0xff]  ;;  %8145 = vmatpush3.msra.mxu0 %v5457_v44 }
 0x573   : > { %v4554_v36 = vpop.f32.mrf.mxu1  ;;  %8146 = vmatprep.subr.mxu0 %v5456_v42  ;;  %v5420_v44 = vld [vmem:[%s12567_s7 + $0x10] sm:$0xff] }
 0x574   : > { %v5196_v34 = vmax.f32 %v4664_v16, 0.0  ;;  %v4555_v29 = vadd.f32 %v4554_v36, %v10950_v28  ;;  %v4667_v60 = vpop.f32.mrf.mxu0  ;;  %8147 = vmatpush3.msra.mxu0 %v5456_v42  ;;  %v5202_v16 = vmax.f32 %v10731_v21, 0.0  ;;  %v5435_v42 = vld [vmem:[%s12567_s7 + $0x88] sm:$0xff] }
 0x575   : > { %v10998_v0 = vpop.f32.mrf.mxu1  ;;  %8148 = vmatprep.subr.mxu0 %v5455_v11 }
 0x576   : > { %v11000_v46 = vmax.f32 %v5194_v10, %v5196_v34  ;;  %v4668_v47 = vadd.f32 %v4667_v60, %v4555_v29  ;;  %v11002_v40 = vpop.f32.mrf.mxu0  ;;  %v5436_v34 = vld [vmem:[%s12567_s7 + $0x90] sm:$0xff]  ;;  %v5454_v10 = vld [vmem:[%s12567_s7 + $0x120] sm:$0xff]  ;;  %8149 = vmatpush3.msra.mxu0 %v5455_v11  ;;  %v5419_v11 = vld [vmem:[%s12567_s7 + $0x8] sm:$0xff] }
 0x577   : > { %v4560_v31 = vpop.f32.mrf.mxu1  ;;  %7970 = vmatprep.subr.mxu1 %v5436_v34  ;;  %8150 = vmatprep.subr.mxu0 %v5454_v10  ;;  %v5434_v34 = vld [vmem:[%s12567_s7 + $0x80] sm:$0xff] }
 0x578   : > { %12608 = vst [vmem:[#allocation25_spill] sm:$0xff] %v11000_v46  ;;  %v5204_v5 = vmax.f32 %v4668_v47, 0.0  ;;  %v4561_v36 = vadd.f32 %v4560_v31, %v10950_v28  ;;  %v4673_v57 = vpop.f32.mrf.mxu0  ;;  %7971 = vmatpush3.msra.mxu1 %v5420_v44  ;;  %v5453_v31 = vld [vmem:[%s12567_s7 + $0x118] sm:$0xff]  ;;  %8151 = vmatpush3.msra.mxu0 %v5454_v10  ;;  %v5452_v44 = vld [vmem:[%s12567_s7 + $0x110] sm:$0xff] }
 0x579   : > { %v11018_v29 = vpop.f32.mrf.mxu1  ;;  %7972 = vmatprep.subr.mxu1 %v5435_v42  ;;  %8152 = vmatprep.subr.mxu0 %v5453_v31 }
 0x57a   : > { %v11020_v47 = vmax.f32 %v5202_v16, %v5204_v5  ;;  %v4674_v21 = vadd.f32 %v4673_v57, %v4561_v36  ;;  %v11022_v60 = vpop.f32.mrf.mxu0  ;;  %v5210_v57 = vmax.f32 %v10740_v52, 0.0  ;;  %7973 = vmatpush3.msra.mxu1 %v5419_v11  ;;  %v5418_v52 = vld [vmem:[%s12567_s7] sm:$0xff]  ;;  %8153 = vmatpush3.msra.mxu0 %v5453_v31  ;;  %v5451_v11 = vld [vmem:[%s12567_s7 + $0x108] sm:$0xff] }
 0x57b   : > { %v4564_v26 = vpop.f32.mrf.mxu1  ;;  %7974 = vmatprep.subr.mxu1 %v5434_v34  ;;  %8154 = vmatprep.subr.mxu0 %v5452_v44  ;;  %v5218_v34 = vmax.f32 %v10747_v6, 0.0 }
 0x57c   : > { %12609 = vst [vmem:[#allocation26_spill] sm:$0xff] %v11020_v47  ;;  %v5212_v16 = vmax.f32 %v4674_v21, 0.0  ;;  %v4565_v5 = vadd.f32 %v4564_v26, %v10950_v28  ;;  %v4677_v36 = vpop.f32.mrf.mxu0  ;;  %7975 = vmatpush3.msra.mxu1 %v5418_v52  ;;  %8155 = vmatpush3.msra.mxu0 %v5452_v44  ;;  %v8843_v47 = vld [vmem:[%s9187_s25 + $0x8] sm:$0xff] }
 0x57d   : > { %v11041_v42 = vpop.f32.mrf.mxu1  ;;  %8248 = vmatprep.subr.mxu1 %v10877_v14  ;;  %8156 = vmatprep.subr.mxu0 %v5451_v11 }
 0x57e   : > { %v11046_v26 = vmax.f32 %v5210_v57, %v5212_v16  ;;  %v4678_v10 = vadd.f32 %v4677_v36, %v4565_v5  ;;  %v11048_v21 = vpop.f32.mrf.mxu0  ;;  %v5450_v16 = vld [vmem:[%s12567_s7 + $0x100] sm:$0xff]  ;;  %8157 = vmatpush3.msra.mxu0 %v5451_v11 }
 0x57f   : > { %v4570_v53 = vpop.f32.mrf.mxu1  ;;  %8158 = vmatprep.subr.mxu0 %v5450_v16 }
 0x580   : > { %12610 = vst [vmem:[#allocation27_spill] sm:$0xff] %v11046_v26  ;;  %v5220_v4 = vmax.f32 %v4678_v10, 0.0  ;;  %v4571_v31 = vadd.f32 %v4570_v53, %v10950_v28  ;;  %v4683_v57 = vpop.f32.mrf.mxu0  ;;  %8159 = vmatpush3.msra.mxu0 %v5450_v16  ;;  %v5226_v53 = vmax.f32 %v10759_v59, 0.0  ;;  %v5234_v59 = vmax.f32 %v10772_v20, 0.0 }
 0x581   : > { %v11059_v5 = vpop.f32.mrf.mxu1  ;;  %8161 = vmatmul.mubr.f32.vlgmr.msra.gmra.mxu0 %v8843_v47  ;;  %v5242_v20 = vmax.f32 %v10787_v1, 0.0 }
 0x582   : > { %v11061_v36 = vmax.f32 %v5218_v34, %v5220_v4  ;;  %v4684_v52 = vadd.f32 %v4683_v57, %v4571_v31  ;;  %v11063_v44 = vpop.f32.mrf.mxu0  ;;  %v8844_v4 = vld [vmem:[%s9187_s25 + $0x10] sm:$0xff] }
 0x583   : > { %v4574_v6 = vpop.f32.mrf.mxu1  ;;  %8163 = vmatprep.mubr.f32.mxu0 %v8844_v4 }
 0x584   : > { %12611 = vst [vmem:[#allocation28_spill] sm:$0xff] %v11061_v36  ;;  %v5228_v10 = vmax.f32 %v4684_v52, 0.0  ;;  %v4575_v26 = vadd.f32 %v4574_v6, %v10950_v28  ;;  %v4687_v14 = vpop.f32.mrf.mxu0  ;;  %v8845_v36 = vld [vmem:[%s9187_s25 + $0x18] sm:$0xff] }
 0x585   : > { %v11068_v46 = vpop.f32.mrf.mxu1  ;;  %8164 = vmatmul.mubr.f32.gmra.mxu0 %v8845_v36 }
 0x586   : > { %v11071_v11 = vmax.f32 %v5226_v53, %v5228_v10  ;;  %v4688_v34 = vadd.f32 %v4687_v14, %v4575_v26  ;;  %v11073_v31 = vpop.f32.mrf.mxu0  ;;  %8166 = vmatprep.mubr.f32.mxu0 %v8846_v37 }
 0x587   : > { %12613 = vst [vmem:[#allocation30_spill] sm:$0xff] %v11073_v31  ;;  %v4580_v57 = vpop.f32.mrf.mxu1  ;;  %v8848_v31 = vld [vmem:[%s9187_s25 + $0x30] sm:$0xff] }
 0x588   : > { %12612 = vst [vmem:[#allocation29_spill] sm:$0xff] %v11071_v11  ;;  %v5236_v16 = vmax.f32 %v4688_v34, 0.0  ;;  %v4581_v52 = vadd.f32 %v4580_v57, %v10950_v28  ;;  %v4693_v6 = vpop.f32.mrf.mxu0  ;;  %v8847_v11 = vld [vmem:[%s9187_s25 + $0x28] sm:$0xff] }
 0x589   : > { %v11078_v47 = vpop.f32.mrf.mxu1  ;;  %8167 = vmatmul.mubr.f32.gmra.mxu0 %v8847_v11 }
 0x58a   : > { %v11081_v53 = vmax.f32 %v5234_v59, %v5236_v16  ;;  %v4694_v14 = vadd.f32 %v4693_v6, %v4581_v52  ;;  %v11083_v26 = vpop.f32.mrf.mxu0  ;;  %8169 = vmatprep.mubr.f32.mxu0 %v8848_v31  ;;  %v5250_v6 = vmax.f32 %v10800_v35, 0.0 }
 0x58b   : > { %12615 = vst [vmem:[#allocation32_spill] sm:$0xff] %v11083_v26  ;;  %v4584_v10 = vpop.f32.mrf.mxu1 }
 0x58c   : > { %12614 = vst [vmem:[#allocation31_spill] sm:$0xff] %v11081_v53  ;;  %v5244_v4 = vmax.f32 %v4694_v14, 0.0  ;;  %v4585_v34 = vadd.f32 %v4584_v10, %v10950_v28  ;;  %v4697_v57 = vpop.f32.mrf.mxu0  ;;  %v8849_v10 = vld [vmem:[%s9187_s25 + $0x38] sm:$0xff] }
 0x58d   : > { %v11088_v36 = vpop.f32.mrf.mxu1  ;;  %8170 = vmatmul.mubr.f32.gmra.mxu0 %v8849_v10 }
 0x58e   : > { %v11091_v37 = vmax.f32 %v5242_v20, %v5244_v4  ;;  %v4698_v59 = vadd.f32 %v4697_v57, %v4585_v34  ;;  %v11093_v16 = vpop.f32.mrf.mxu0  ;;  %v5258_v4 = vmax.f32 %v10819_v39, 0.0 }
 0x58f   : > { %v4590_v52 = vpop.f32.mrf.mxu1 }
 0x590   : > { %12616 = vst [vmem:[#allocation33_spill] sm:$0xff] %v11091_v37  ;;  %v5252_v1 = vmax.f32 %v4698_v59, 0.0  ;;  %v4591_v14 = vadd.f32 %v4590_v52, %v10950_v28  ;;  %v4703_v53 = vpop.f32.mrf.mxu0 }
 0x591   : > { %v11098_v26 = vpop.f32.mrf.mxu1 }
 0x592   : > { %12617 = vst [vmem:[#allocation34_spill] sm:$0xff] %v11098_v26  ;;  %v11100_v11 = vmax.f32 %v5250_v6, %v5252_v1  ;;  %v4704_v24 = vadd.f32 %v4703_v53, %v4591_v14  ;;  %v11102_v31 = vpop.f32.mrf.mxu0  ;;  %v5266_v6 = vmax.f32 %v10833_v41, 0.0 }
 0x593   : > { %v4594_v20 = vpop.f32.mrf.mxu1 }
 0x594   : > { %12618 = vst [vmem:[#allocation35_spill] sm:$0xff] %v11100_v11  ;;  %v5260_v34 = vmax.f32 %v4704_v24, 0.0  ;;  %v4595_v57 = vadd.f32 %v4594_v20, %v10950_v28  ;;  %v4707_v35 = vpop.f32.mrf.mxu0 }
 0x595   : > { %v11106_v59 = vpop.f32.mrf.mxu1 }
 0x596   : > { %12619 = vst [vmem:[#allocation36_spill] sm:$0xff] %v11106_v59  ;;  %v11108_v52 = vmax.f32 %v5258_v4, %v5260_v34  ;;  %v4708_v37 = vadd.f32 %v4707_v35, %v4595_v57  ;;  %v11110_v10 = vpop.f32.mrf.mxu0  ;;  %v5274_v4 = vmax.f32 %v10849_v55, 0.0 }
 0x597   : > { %12621 = vst [vmem:[#allocation38_spill] sm:$0xff] %v11110_v10  ;;  %v4600_v26 = vpop.f32.mrf.mxu1 }
 0x598   : > { %12620 = vst [vmem:[#allocation37_spill] sm:$0xff] %v11108_v52  ;;  %v5268_v53 = vmax.f32 %v4708_v37, 0.0  ;;  %v4601_v1 = vadd.f32 %v4600_v26, %v10950_v28  ;;  %v4713_v14 = vpop.f32.mrf.mxu0 }
 0x599   : > { %v11114_v11 = vpop.f32.mrf.mxu1 }
 0x59a   : > { %12622 = vst [vmem:[#allocation39_spill] sm:$0xff] %v11114_v11  ;;  %v11116_v39 = vmax.f32 %v5266_v6, %v5268_v53  ;;  %v4714_v24 = vadd.f32 %v4713_v14, %v4601_v1  ;;  %v11118_v20 = vpop.f32.mrf.mxu0  ;;  %v5282_v6 = vmax.f32 %v10863_v23, 0.0 }
 0x59b   : > { %12624 = vst [vmem:[#allocation41_spill] sm:$0xff] %v11118_v20  ;;  %v4604_v59 = vpop.f32.mrf.mxu1 }
 0x59c   : > { %12623 = vst [vmem:[#allocation40_spill] sm:$0xff] %v11116_v39  ;;  %v5276_v34 = vmax.f32 %v4714_v24, 0.0  ;;  %v4605_v57 = vadd.f32 %v4604_v59, %v10950_v28  ;;  %v4717_v35 = vpop.f32.mrf.mxu0 }
 0x59d   : > { %v11122_v52 = vpop.f32.mrf.mxu1 }
 0x59e   : > { %12625 = vst [vmem:[#allocation42_spill] sm:$0xff] %v11122_v52  ;;  %v11124_v41 = vmax.f32 %v5274_v4, %v5276_v34  ;;  %v4718_v26 = vadd.f32 %v4717_v35, %v4605_v57  ;;  %v11126_v37 = vpop.f32.mrf.mxu0  ;;  %v5290_v4 = vmax.f32 %v10884_v2, 0.0 }
 0x59f   : > { %12627 = vst [vmem:[#allocation44_spill] sm:$0xff] %v11126_v37  ;;  %v4610_v11 = vpop.f32.mrf.mxu1 }
 0x5a0   : > { %12626 = vst [vmem:[#allocation43_spill] sm:$0xff] %v11124_v41  ;;  %v5284_v53 = vmax.f32 %v4718_v26, 0.0  ;;  %v4611_v1 = vadd.f32 %v4610_v11, %v10950_v28  ;;  %v4723_v14 = vpop.f32.mrf.mxu0 }
 0x5a1   : > { %v11130_v39 = vpop.f32.mrf.mxu1 }
 0x5a2   : > { %12628 = vst [vmem:[#allocation45_spill] sm:$0xff] %v11130_v39  ;;  %v11132_v55 = vmax.f32 %v5282_v6, %v5284_v53  ;;  %v4724_v59 = vadd.f32 %v4723_v14, %v4611_v1  ;;  %v11134_v24 = vpop.f32.mrf.mxu0  ;;  %v5298_v6 = vmax.f32 %v10906_v17, 0.0 }
 0x5a3   : > { %12630 = vst [vmem:[#allocation47_spill] sm:$0xff] %v11134_v24  ;;  %v4614_v52 = vpop.f32.mrf.mxu1 }
 0x5a4   : > { %12629 = vst [vmem:[#allocation46_spill] sm:$0xff] %v11132_v55  ;;  %v5292_v34 = vmax.f32 %v4724_v59, 0.0  ;;  %v4615_v57 = vadd.f32 %v4614_v52, %v10950_v28  ;;  %v4727_v35 = vpop.f32.mrf.mxu0  ;;  %v12634_v55 = vld [vmem:[#allocation12_spill] sm:$0xff] }
 0x5a5   : > { %v11138_v41 = vpop.f32.mrf.mxu1  ;;  %v2988_v2 = vsub.s32 4, %v12634_v55 }
 0x5a6   : > { %12631 = vst [vmem:[#allocation48_spill] sm:$0xff] %v11138_v41  ;;  %v11140_v23 = vmax.f32 %v5290_v4, %v5292_v34  ;;  %v4728_v11 = vadd.f32 %v4727_v35, %v4615_v57  ;;  %v11142_v26 = vpop.f32.mrf.mxu0  ;;  %v5306_v34 = vmax.f32 %v10934_v32, 0.0 }
 0x5a7   : > { %12633 = vst [vmem:[#allocation50_spill] sm:$0xff] %v11142_v26  ;;  %v4620_v39 = vpop.f32.mrf.mxu1 }
 0x5a8   : > { %12632 = vst [vmem:[#allocation49_spill] sm:$0xff] %v11140_v23  ;;  %v5300_v53 = vmax.f32 %v4728_v11, 0.0  ;;  %v4621_v1 = vadd.f32 %v4620_v39, %v10950_v28  ;;  %v4733_v14 = vpop.f32.mrf.mxu0  ;;  %v11156_v11 = vrot.slane %v10708_v48, %v2988_v2 }
 0x5a9   : > { %v11147_v59 = vpop.f32.mrf.mxu1 }
 0x5aa   : > { %12635 = vst [vmem:[#allocation12_spill] sm:$0xff] %v11147_v59  ;;  %v11149_v52 = vmax.f32 %v5298_v6, %v5300_v53  ;;  %v4734_v24 = vadd.f32 %v4733_v14, %v4621_v1  ;;  %v11151_v41 = vpop.f32.mrf.mxu0  ;;  %v5314_v1 = vmax.f32 %v10966_v25, 0.0 }
 0x5ab   : > { %12637 = vst [vmem:[#allocation52_spill] sm:$0xff] %v11151_v41  ;;  %v4624_v4 = vpop.f32.mrf.mxu1 }
 0x5ac   : > { %12636 = vst [vmem:[#allocation51_spill] sm:$0xff] %v11149_v52  ;;  %v5308_v57 = vmax.f32 %v4734_v24, 0.0  ;;  %v4625_v35 = vadd.f32 %v4624_v4, %v10950_v28  ;;  %v4737_v17 = vpop.f32.mrf.mxu0 }
 0x5ad   : > { %v11158_v39 = vpop.f32.mrf.mxu1 }
 0x5ae   : > { %12638 = vst [vmem:[#allocation53_spill] sm:$0xff] %v11158_v39  ;;  %v11160_v23 = vmax.f32 %v5306_v34, %v5308_v57  ;;  %v4738_v59 = vadd.f32 %v4737_v17, %v4625_v35  ;;  %v11162_v6 = vpop.f32.mrf.mxu0 }
 0x5af   : > { %12640 = vst [vmem:[#allocation55_spill] sm:$0xff] %v11162_v6  ;;  %v4776_v53 = vpop.f32.mrf.mxu1 }
 0x5b0   : > { %12639 = vst [vmem:[#allocation54_spill] sm:$0xff] %v11160_v23  ;;  %v5316_v14 = vmax.f32 %v4738_v59, 0.0  ;;  %v4777_v32 = vadd.f32 %v4776_v53, %v11156_v11 }
 0x5b1   : > { %v4889_v24 = vpop.f32.mrf.mxu0  ;;  %v11166_v52 = vpop.f32.mrf.mxu1 }
 0x5b2   : > { %v11168_v28 = vmax.f32 %v5314_v1, %v5316_v14  ;;  %v11170_v2 = vadd.f32 %v4889_v24, %v4777_v32 }
 0x5b3   : > { %v11172_v4 = vpop.f32.mrf.mxu0  ;;  %v4780_v34 = vpop.f32.mrf.mxu1 }
 0x5b4   : > { %12641 = vst [vmem:[#allocation56_spill] sm:$0xff] %v11168_v28  ;;  %v4781_v57 = vadd.f32 %v4780_v34, %v11156_v11 }
 0x5b5   : > { %v4893_v35 = vpop.f32.mrf.mxu0  ;;  %v11175_v17 = vpop.f32.mrf.mxu1 }
 0x5b6   : > { %v11177_v23 = vadd.f32 %v4893_v35, %v4781_v57 }
 0x5b7   : > { %v11179_v25 = vpop.f32.mrf.mxu0  ;;  %v4786_v59 = vpop.f32.mrf.mxu1 }
 0x5b8   : > { %v4787_v53 = vadd.f32 %v4786_v59, %v11156_v11 }
 0x5b9   : > { %v4899_v6 = vpop.f32.mrf.mxu0  ;;  %v11182_v1 = vpop.f32.mrf.mxu1 }
 0x5ba   : > { %v11184_v14 = vadd.f32 %v4899_v6, %v4787_v53 }
 0x5bb   : > { %v11186_v32 = vpop.f32.mrf.mxu0  ;;  %v4790_v24 = vpop.f32.mrf.mxu1 }
 0x5bc   : > { %12642 = vst [vmem:[#allocation57_spill] sm:$0xff] %v11184_v14  ;;  %v4791_v34 = vadd.f32 %v4790_v24, %v11156_v11 }
 0x5bd   : > { %v4903_v28 = vpop.f32.mrf.mxu0  ;;  %v11189_v39 = vpop.f32.mrf.mxu1 }
 0x5be   : > { %12643 = vst [vmem:[#allocation58_spill] sm:$0xff] %v11189_v39  ;;  %v11191_v57 = vadd.f32 %v4903_v28, %v4791_v34 }
 0x5bf   : > { %v11193_v35 = vpop.f32.mrf.mxu0  ;;  %v4796_v41 = vpop.f32.mrf.mxu1 }
 0x5c0   : > { %12644 = vst [vmem:[#allocation59_spill] sm:$0xff] %v11191_v57  ;;  %12645 = vst [vmem:[#allocation60_spill] sm:$0xff] %v11193_v35  ;;  %v4797_v59 = vadd.f32 %v4796_v41, %v11156_v11 }
 0x5c1   : > { %v4909_v26 = vpop.f32.mrf.mxu0  ;;  %v11196_v37 = vpop.f32.mrf.mxu1 }
 0x5c2   : > { %12646 = vst [vmem:[#allocation61_spill] sm:$0xff] %v11196_v37  ;;  %v11198_v6 = vadd.f32 %v4909_v26, %v4797_v59 }
 0x5c3   : > { %v11200_v53 = vpop.f32.mrf.mxu0  ;;  %v4800_v20 = vpop.f32.mrf.mxu1 }
 0x5c4   : > { %12647 = vst [vmem:[#allocation62_spill] sm:$0xff] %v11198_v6  ;;  %12648 = vst [vmem:[#allocation63_spill] sm:$0xff] %v11200_v53  ;;  %v4801_v24 = vadd.f32 %v4800_v20, %v11156_v11 }
 0x5c5   : > { %v4913_v10 = vpop.f32.mrf.mxu0  ;;  %v11203_v14 = vpop.f32.mrf.mxu1 }
 0x5c6   : > { %12649 = vst [vmem:[#allocation64_spill] sm:$0xff] %v11203_v14  ;;  %v11205_v28 = vadd.f32 %v4913_v10, %v4801_v24 }
 0x5c7   : > { %v11207_v34 = vpop.f32.mrf.mxu0  ;;  %v4806_v57 = vpop.f32.mrf.mxu1 }
 0x5c8   : > { %12650 = vst [vmem:[#allocation65_spill] sm:$0xff] %v11205_v28  ;;  %12651 = vst [vmem:[#allocation66_spill] sm:$0xff] %v11207_v34  ;;  %v4807_v41 = vadd.f32 %v4806_v57, %v11156_v11 }
 0x5c9   : > { %v4919_v35 = vpop.f32.mrf.mxu0  ;;  %v11210_v39 = vpop.f32.mrf.mxu1 }
 0x5ca   : > { %12652 = vst [vmem:[#allocation67_spill] sm:$0xff] %v11210_v39  ;;  %v11212_v26 = vadd.f32 %v4919_v35, %v4807_v41 }
 0x5cb   : > { %v11214_v59 = vpop.f32.mrf.mxu0  ;;  %v4810_v6 = vpop.f32.mrf.mxu1 }
 0x5cc   : > { %12653 = vst [vmem:[#allocation68_spill] sm:$0xff] %v11212_v26  ;;  %12654 = vst [vmem:[#allocation69_spill] sm:$0xff] %v11214_v59  ;;  %v4811_v20 = vadd.f32 %v4810_v6, %v11156_v11 }
 0x5cd   : > { %v4923_v53 = vpop.f32.mrf.mxu0  ;;  %v11217_v37 = vpop.f32.mrf.mxu1 }
 0x5ce   : > { %12655 = vst [vmem:[#allocation70_spill] sm:$0xff] %v11217_v37  ;;  %v11219_v10 = vadd.f32 %v4923_v53, %v4811_v20 }
 0x5cf   : > { %v11221_v24 = vpop.f32.mrf.mxu0  ;;  %v4816_v28 = vpop.f32.mrf.mxu1 }
 0x5d0   : > { %12656 = vst [vmem:[#allocation71_spill] sm:$0xff] %v11219_v10  ;;  %12657 = vst [vmem:[#allocation72_spill] sm:$0xff] %v11221_v24  ;;  %v4817_v57 = vadd.f32 %v4816_v28, %v11156_v11 }
 0x5d1   : > { %v4929_v34 = vpop.f32.mrf.mxu0  ;;  %v11224_v14 = vpop.f32.mrf.mxu1 }
 0x5d2   : > { %v11226_v35 = vadd.f32 %v4929_v34, %v4817_v57 }
 0x5d3   : > { %v11228_v41 = vpop.f32.mrf.mxu0  ;;  %v4820_v26 = vpop.f32.mrf.mxu1 }
 0x5d4   : > { %12658 = vst [vmem:[#allocation73_spill] sm:$0xff] %v11226_v35  ;;  %12659 = vst [vmem:[#allocation74_spill] sm:$0xff] %v11228_v41  ;;  %v4821_v6 = vadd.f32 %v4820_v26, %v11156_v11  ;;  %v2992_v41 = vsub.s32 5, %v12634_v55 }
 0x5d5   : > { %v4933_v59 = vpop.f32.mrf.mxu0  ;;  %v11231_v39 = vpop.f32.mrf.mxu1 }
 0x5d6   : > { %12660 = vst [vmem:[#allocation75_spill] sm:$0xff] %v11231_v39  ;;  %v11233_v53 = vadd.f32 %v4933_v59, %v4821_v6  ;;  %v4367_v6 = vadd.f32 %v10815_v51, %v10718_v38 }
 0x5d7   : > { %v11235_v20 = vpop.f32.mrf.mxu0  ;;  %v4826_v10 = vpop.f32.mrf.mxu1 }
 0x5d8   : > { %12661 = vst [vmem:[#allocation76_spill] sm:$0xff] %v11233_v53  ;;  %v4827_v28 = vadd.f32 %v4826_v10, %v11156_v11  ;;  %v4371_v10 = vadd.f32 %v10829_v15, %v10718_v38  ;;  %v11268_v15 = vrot.slane %v10708_v48, %v2992_v41 }
 0x5d9   : > { %v4939_v24 = vpop.f32.mrf.mxu0  ;;  %v11238_v37 = vpop.f32.mrf.mxu1 }
 0x5da   : > { %12662 = vst [vmem:[#allocation77_spill] sm:$0xff] %v11238_v37  ;;  %v11240_v34 = vadd.f32 %v4939_v24, %v4827_v28  ;;  %v4377_v24 = vadd.f32 %v10845_v58, %v10718_v38  ;;  %v11275_v37 = vadd.f32 %v10817_v19, %v4367_v6 }
 0x5db   : > { %v11242_v57 = vpop.f32.mrf.mxu0  ;;  %v4830_v35 = vpop.f32.mrf.mxu1 }
 0x5dc   : > { %12663 = vst [vmem:[#allocation78_spill] sm:$0xff] %v11240_v34  ;;  %12664 = vst [vmem:[#allocation79_spill] sm:$0xff] %v11242_v57  ;;  %v4831_v26 = vadd.f32 %v4830_v35, %v11156_v11  ;;  %v4381_v35 = vadd.f32 %v10859_v3, %v10718_v38  ;;  %v12668_v57 = vld [vmem:[#allocation16_spill] sm:$0xff]  ;;  %v11285_v41 = vadd.f32 %v10847_v56, %v4377_v24 }
 0x5dd   : > { %v4943_v39 = vpop.f32.mrf.mxu0  ;;  %v11246_v59 = vpop.f32.mrf.mxu1  ;;  %v4391_v56 = vadd.f32 %v10901_v50, %v10718_v38 }
 0x5de   : > { %12665 = vst [vmem:[#allocation80_spill] sm:$0xff] %v11246_v59  ;;  %v11250_v53 = vadd.f32 %v4943_v39, %v4831_v26  ;;  %v11262_v59 = vrot.slane %v10708_v48, %v12668_v57  ;;  %v11282_v26 = vadd.f32 %v10831_v63, %v4371_v10  ;;  %v11291_v19 = vadd.f32 %v10861_v7, %v4381_v35 }
 0x5df   : > { %v11256_v28 = vpop.f32.mrf.mxu0  ;;  %v4836_v34 = vpop.f32.mrf.mxu1  ;;  %v4387_v63 = vadd.f32 %v10880_v22, %v10718_v38  ;;  %v11328_v50 = vadd.f32 %v10903_v27, %v4391_v56 }
 0x5e0   : > { %12666 = vst [vmem:[#allocation81_spill] sm:$0xff] %v11250_v53  ;;  %12667 = vst [vmem:[#allocation82_spill] sm:$0xff] %v11256_v28  ;;  %v4837_v51 = vadd.f32 %v4836_v34, %v11156_v11  ;;  %v4553_v6 = vadd.f32 %v10983_v45, %v11262_v59  ;;  %v4557_v10 = vadd.f32 %v10998_v0, %v11262_v59 }
 0x5e1   : > { %v4949_v58 = vpop.f32.mrf.mxu0  ;;  %v11270_v53 = vpop.f32.mrf.mxu1  ;;  %v4563_v45 = vadd.f32 %v11018_v29, %v11262_v59  ;;  %v4397_v0 = vadd.f32 %v10930_v43, %v10718_v38 }
 0x5e2   : > { %12669 = vst [vmem:[#allocation83_spill] sm:$0xff] %v11270_v53  ;;  %v11277_v57 = vadd.f32 %v4949_v58, %v4837_v51  ;;  %v4573_v58 = vadd.f32 %v11059_v5, %v11262_v59  ;;  %v4666_v34 = vadd.f32 %v10985_v13, %v4553_v6  ;;  %v4670_v43 = vadd.f32 %v11002_v40, %v4557_v10 }
 0x5e3   : > { %v11287_v53 = vpop.f32.mrf.mxu0  ;;  %v4840_v28 = vpop.f32.mrf.mxu1  ;;  %v4577_v5 = vadd.f32 %v11068_v46, %v11262_v59  ;;  %v4676_v13 = vadd.f32 %v11022_v60, %v4563_v45  ;;  %v4583_v40 = vadd.f32 %v11078_v47, %v11262_v59  ;;  %v4587_v46 = vadd.f32 %v11088_v36, %v11262_v59 }
 0x5e4   : > { %v4841_v51 = vadd.f32 %v4840_v28, %v11156_v11  ;;  %v4567_v28 = vadd.f32 %v11041_v42, %v11262_v59  ;;  %v4686_v27 = vadd.f32 %v11063_v44, %v4573_v58  ;;  %v5197_v45 = vmax.f32 %v4666_v34, 0.0  ;;  %v12674_v44 = vld [vmem:[#allocation24_spill] sm:$0xff] }
 0x5e5   : > { %v4953_v24 = vpop.f32.mrf.mxu0  ;;  %v11303_v3 = vpop.f32.mrf.mxu1  ;;  %v5205_v58 = vmax.f32 %v4670_v43, 0.0  ;;  %v4779_v36 = vadd.f32 %v11166_v52, %v11268_v15  ;;  %v5299_v34 = vmax.f32 %v11328_v50, 0.0 }
 0x5e6   : > { %v11310_v35 = vadd.f32 %v4953_v24, %v4841_v51  ;;  %v2996_v51 = vsub.s32 6, %v12634_v55  ;;  %v11325_v24 = vadd.f32 %v10882_v61, %v4387_v63  ;;  %v4680_v6 = vadd.f32 %v11048_v21, %v4567_v28  ;;  %v12671_v21 = vld [vmem:[#allocation23_spill] sm:$0xff]  ;;  %v12672_v28 = vld [vmem:[#allocation30_spill] sm:$0xff] }
 0x5e7   : > { %v11318_v39 = vpop.f32.mrf.mxu0  ;;  %v4846_v7 = vpop.f32.mrf.mxu1  ;;  %v3000_v61 = vsub.s32 7, %v12634_v55  ;;  %v11341_v63 = vadd.f32 %v10932_v12, %v4397_v0  ;;  %v4401_v10 = vadd.f32 %v12671_v21, %v10718_v38  ;;  %v4690_v47 = vadd.f32 %v12672_v28, %v4577_v5 }
 0x5e8   : > { %12670 = vst [vmem:[#allocation84_spill] sm:$0xff] %v11310_v35  ;;  %v4847_v42 = vadd.f32 %v4846_v7, %v11156_v11  ;;  %v11354_v12 = vrot.slane %v10708_v48, %v2996_v51  ;;  %v5221_v29 = vmax.f32 %v4680_v6, 0.0  ;;  %v5229_v51 = vmax.f32 %v4686_v27, 0.0 }
 0x5e9   : > { %v4959_v22 = vpop.f32.mrf.mxu0  ;;  %v11333_v35 = vpop.f32.mrf.mxu1  ;;  %v4700_v5 = vadd.f32 %v11093_v16, %v4587_v46  ;;  %v5307_v28 = vmax.f32 %v11341_v63, 0.0  ;;  %v12675_v6 = vmax.f32 %v10728_v18, 0.0  ;;  %v4892_v16 = vadd.f32 %v11172_v4, %v4779_v36 }
 0x5ea   : > { %v11337_v7 = vadd.f32 %v4959_v22, %v4847_v42  ;;  %v5213_v42 = vmax.f32 %v4676_v13, 0.0  ;;  %v11374_v13 = vadd.f32 %v12674_v44, %v4401_v10  ;;  %v4783_v46 = vadd.f32 %v11175_v17, %v11268_v15  ;;  %v12680_v17 = vld [vmem:[#allocation34_spill] sm:$0xff] }
 0x5eb   : > { %v11348_v56 = vpop.f32.mrf.mxu0  ;;  %v4850_v60 = vpop.f32.mrf.mxu1  ;;  %v12677_v10 = vmax.f32 %v10744_v8, 0.0  ;;  %v12678_v18 = vmax.f32 %v10751_v62, 0.0  ;;  %v5253_v36 = vmax.f32 %v4700_v5, 0.0 }
 0x5ec   : > { %v4851_v55 = vadd.f32 %v4850_v60, %v11156_v11  ;;  %v11365_v11 = vrot.slane %v10708_v48, %v3000_v61  ;;  %v12673_v60 = vld [vmem:[#allocation32_spill] sm:$0xff]  ;;  %v12676_v61 = vmax.f32 %v10735_v49, 0.0 }
 0x5ed   : > { %v4963_v22 = vpop.f32.mrf.mxu0  ;;  %v11360_v0 = vpop.f32.mrf.mxu1  ;;  %v4696_v43 = vadd.f32 %v12673_v60, %v4583_v40  ;;  %v5237_v40 = vmax.f32 %v4690_v47, 0.0  ;;  %v11388_v44 = vmax.f32 %v12677_v10, %v5213_v42  ;;  %v5198_v42 = vmax.f32 %v11170_v2, 0.0 }
 0x5ee   : > { %v11362_v38 = vadd.f32 %v4963_v22, %v4851_v55  ;;  %v5323_v55 = vmax.f32 %v12675_v6, %v5197_v45  ;;  %v11381_v27 = vmax.f32 %v12676_v61, %v5205_v58  ;;  %v11392_v45 = vmax.f32 %v12678_v18, %v5221_v29 }
 0x5ef   : > { %v11370_v21 = vpop.f32.mrf.mxu0  ;;  %v5002_v52 = vpop.f32.mrf.mxu1  ;;  %v12679_v58 = vmax.f32 %v10766_v54, 0.0  ;;  %v5245_v4 = vmax.f32 %v4696_v43, 0.0  ;;  %v4593_v6 = vadd.f32 %v12680_v17, %v11262_v59  ;;  %v5199_v54 = vmax.f32 %v4892_v16, 0.0 }
 0x5f0   : > { %v5003_v48 = vadd.f32 %v5002_v52, %v11354_v12  ;;  %v4789_v43 = vadd.f32 %v11182_v1, %v11268_v15  ;;  %v5206_v16 = vmax.f32 %v11177_v23, 0.0 }
 0x5f1   : > { %v5115_v22 = vpop.f32.mrf.mxu0  ;;  %v5004_v60 = vpop.f32.mrf.mxu1  ;;  %v11397_v47 = vmax.f32 %v12679_v58, %v5229_v51  ;;  %v4896_v51 = vadd.f32 %v11179_v25, %v4783_v46  ;;  %v4706_v25 = vadd.f32 %v11102_v31, %v4593_v6 }
 0x5f2   : > { %v5116_v52 = vadd.f32 %v5115_v22, %v5003_v48  ;;  %v5005_v49 = vadd.f32 %v5004_v60, %v11365_v11  ;;  %v12681_v48 = vmax.f32 %v10779_v30, 0.0  ;;  %v12683_v30 = vmax.f32 %v10807_v9, 0.0 }
 0x5f3   : > { %v5117_v61 = vpop.f32.mrf.mxu0  ;;  %v5006_v8 = vpop.f32.mrf.mxu1 }
 0x5f4   : > { %v5200_v10 = vmax.f32 %v5116_v52, 0.0  ;;  %v5118_v62 = vadd.f32 %v5117_v61, %v5005_v49  ;;  %v5007_v29 = vadd.f32 %v5006_v8, %v11354_v12  ;;  %v11405_v22 = vmax.f32 %v12681_v48, %v5237_v40  ;;  %v12684_v61 = vld [vmem:[#allocation25_spill] sm:$0xff] }
 0x5f5   : > { %v5119_v5 = vpop.f32.mrf.mxu0  ;;  %v5008_v60 = vpop.f32.mrf.mxu1  ;;  %v12682_v52 = vmax.f32 %v10794_v33, 0.0  ;;  %v11417_v40 = vmax.f32 %v12683_v30, %v5253_v36  ;;  %v4902_v33 = vadd.f32 %v11186_v32, %v4789_v43 }
 0x5f6   : > { %v5354_v18 = vmax.f32 %v5198_v42, %v5200_v10  ;;  %v5201_v58 = vmax.f32 %v5118_v62, 0.0  ;;  %v5120_v17 = vadd.f32 %v5119_v5, %v5007_v29  ;;  %v5009_v2 = vadd.f32 %v5008_v60, %v11365_v11 }
 0x5f7   : > { %v11413_v49 = vmax.f32 %v12682_v52, %v5245_v4  ;;  %v5121_v1 = vpop.f32.mrf.mxu0  ;;  %v5012_v46 = vpop.f32.mrf.mxu1  ;;  %v5207_v29 = vmax.f32 %v4896_v51, 0.0  ;;  %v12685_v4 = vld [vmem:[#allocation58_spill] sm:$0xff]  ;;  %v5261_v52 = vmax.f32 %v4706_v25, 0.0 }
 0x5f8   : > { %v5386_v8 = vmax.f32 %v12684_v61, %v5354_v18  ;;  %v5355_v42 = vmax.f32 %v5199_v54, %v5201_v58  ;;  %v5208_v10 = vmax.f32 %v5120_v17, 0.0  ;;  %v5122_v62 = vadd.f32 %v5121_v1, %v5009_v2  ;;  %v12686_v54 = vld [vmem:[#allocation36_spill] sm:$0xff]  ;;  %v12687_v58 = vld [vmem:[#allocation57_spill] sm:$0xff]  ;;  %v12688_v2 = vld [vmem:[#allocation26_spill] sm:$0xff] }
 0x5f9   : > { %v4793_v48 = vadd.f32 %v12685_v4, %v11268_v15  ;;  %v5013_v9 = vadd.f32 %v5012_v46, %v11354_v12  ;;  %v5125_v36 = vpop.f32.mrf.mxu0  ;;  %v5014_v5 = vpop.f32.mrf.mxu1  ;;  %v4597_v18 = vadd.f32 %v12686_v54, %v11262_v59  ;;  %v5214_v51 = vmax.f32 %v12687_v58, 0.0 }
 0x5fa   : > { %v5356_v31 = vmax.f32 %v5206_v16, %v5208_v10  ;;  %v5209_v6 = vmax.f32 %v5122_v62, 0.0  ;;  %v5015_v23 = vadd.f32 %v5014_v5, %v11365_v11  ;;  %v5387_v60 = vmax.f32 %v5323_v55, %v5355_v42  ;;  %v12689_v10 = vld [vmem:[#allocation60_spill] sm:$0xff]  ;;  %v12690_v55 = vld [vmem:[#allocation61_spill] sm:$0xff] }
 0x5fb   : > { %v5126_v17 = vadd.f32 %v5125_v36, %v5013_v9  ;;  %v5127_v32 = vpop.f32.mrf.mxu0  ;;  %v5016_v43 = vpop.f32.mrf.mxu1  ;;  %v5215_v16 = vmax.f32 %v4902_v33, 0.0  ;;  %v4906_v62 = vadd.f32 %v12689_v10, %v4793_v48  ;;  %v4799_v25 = vadd.f32 %v12690_v55, %v11268_v15  ;;  %v12693_v48 = vld [vmem:[#allocation38_spill] sm:$0xff]  ;;  %v12698_v55 = vld [vmem:[#allocation27_spill] sm:$0xff] }
 0x5fc   : > { %v5388_v30 = vmax.f32 %v12688_v2, %v5356_v31  ;;  %v5357_v1 = vmax.f32 %v5207_v29, %v5209_v6  ;;  %v5128_v46 = vadd.f32 %v5127_v32, %v5015_v23  ;;  %v5017_v61 = vadd.f32 %v5016_v43, %v11354_v12  ;;  %5531 = vmatprep.mubr.f32.mxu1 %v5387_v60  ;;  %v12691_v31 = vld [vmem:[#allocation17_spill] sm:$0xff]  ;;  %v12694_v60 = vld [vmem:[#allocation59_spill] sm:$0xff] }
 0x5fd   : > { %v5216_v42 = vmax.f32 %v5126_v17, 0.0  ;;  %v5129_v4 = vpop.f32.mrf.mxu0  ;;  %v5018_v5 = vpop.f32.mrf.mxu1  ;;  %5532 = vmatmul.mubr.f32.vlgmr.msra.gmra.mxu1 %v5386_v8  ;;  %v12692_v6 = vmax.f32 %v11275_v37, 0.0  ;;  %v4710_v23 = vadd.f32 %v12693_v48, %v4597_v18  ;;  %v5222_v58 = vmax.f32 %v12694_v60, 0.0  ;;  %v12695_v8 = vld [vmem:[#allocation18_spill] sm:$0xff]  ;;  %v12697_v18 = vld [vmem:[#allocation64_spill] sm:$0xff] }
 0x5fe   : > { %v5217_v9 = vmax.f32 %v5128_v46, 0.0  ;;  %v5130_v36 = vadd.f32 %v5129_v4, %v5017_v61  ;;  %v5019_v54 = vadd.f32 %v5018_v5, %v11365_v11  ;;  %8264 = vmatpush3.msra.mxu1 %v12691_v31  ;;  %v5389_v29 = vmax.f32 %v11381_v27, %v5357_v1  ;;  %v12696_v27 = vld [vmem:[#allocation63_spill] sm:$0xff] }
 0x5ff   : > { %v11440_v33 = vmax.f32 %v12692_v6, %v5261_v52  ;;  %v5358_v17 = vmax.f32 %v5214_v51, %v5216_v42  ;;  %v5131_v32 = vpop.f32.mrf.mxu0  ;;  %v5022_v43 = vpop.f32.mrf.mxu1  ;;  %8249 = vmatprep.subr.mxu1 %v12695_v8  ;;  %v5223_v37 = vmax.f32 %v4906_v62, 0.0  ;;  %v4912_v52 = vadd.f32 %v12696_v27, %v4799_v25  ;;  %v12699_v5 = vld [vmem:[#allocation19_spill] sm:$0xff] }
 0x600   : > { %v5359_v2 = vmax.f32 %v5215_v16, %v5217_v9  ;;  %v5224_v46 = vmax.f32 %v5130_v36, 0.0  ;;  %v5132_v61 = vadd.f32 %v5131_v32, %v5019_v54  ;;  %v5023_v10 = vadd.f32 %v5022_v43, %v11354_v12  ;;  %5536 = vmatprep.mubr.f32.mxu1 %v5389_v29  ;;  %8265 = vmatpush3.msra.mxu1 %v12695_v8  ;;  %v12700_v25 = vld [vmem:[#allocation39_spill] sm:$0xff]  ;;  %v12701_v29 = vld [vmem:[#allocation62_spill] sm:$0xff]  ;;  %v12703_v32 = vld [vmem:[#allocation28_spill] sm:$0xff] }
 0x601   : > { %v4803_v1 = vadd.f32 %v12697_v18, %v11268_v15  ;;  %v5390_v51 = vmax.f32 %v12698_v55, %v5358_v17  ;;  %v5135_v42 = vpop.f32.mrf.mxu0  ;;  %v5024_v4 = vpop.f32.mrf.mxu1  ;;  %5537 = vmatmul.mubr.f32.gmra.mxu1 %v5388_v30  ;;  %8250 = vmatprep.subr.mxu1 %v12699_v5  ;;  %v5269_v62 = vmax.f32 %v4710_v23, 0.0  ;;  %v4603_v31 = vadd.f32 %v12700_v25, %v11262_v59  ;;  %v12702_v30 = vld [vmem:[#allocation20_spill] sm:$0xff]  ;;  %v12704_v23 = vld [vmem:[#allocation66_spill] sm:$0xff]  ;;  %v12705_v27 = vld [vmem:[#allocation67_spill] sm:$0xff] }
 0x602   : > { %v5360_v16 = vmax.f32 %v5222_v58, %v5224_v46  ;;  %v5225_v9 = vmax.f32 %v5132_v61, 0.0  ;;  %v5136_v36 = vadd.f32 %v5135_v42, %v5023_v10  ;;  %v5025_v54 = vadd.f32 %v5024_v4, %v11365_v11  ;;  %8266 = vmatpush3.msra.mxu1 %v12699_v5 }
 0x603   : > { %v5230_v6 = vmax.f32 %v12701_v29, 0.0  ;;  %v5137_v48 = vpop.f32.mrf.mxu0  ;;  %v5026_v60 = vpop.f32.mrf.mxu1  ;;  %v5391_v17 = vmax.f32 %v11388_v44, %v5359_v2  ;;  %8251 = vmatprep.subr.mxu1 %v12702_v30  ;;  %v5231_v61 = vmax.f32 %v4912_v52, 0.0  ;;  %v4916_v10 = vadd.f32 %v12704_v23, %v4803_v1  ;;  %v12706_v2 = vld [vmem:[#allocation21_spill] sm:$0xff] }
 0x604   : > { %v5392_v58 = vmax.f32 %v12703_v32, %v5360_v16  ;;  %v5361_v43 = vmax.f32 %v5223_v37, %v5225_v9  ;;  %v5232_v8 = vmax.f32 %v5136_v36, 0.0  ;;  %v5138_v46 = vadd.f32 %v5137_v48, %v5025_v54  ;;  %8267 = vmatpush3.msra.mxu1 %v12702_v30  ;;  %v12708_v9 = vld [vmem:[#allocation41_spill] sm:$0xff] }
 0x605   : > { %v4809_v18 = vadd.f32 %v12705_v27, %v11268_v15  ;;  %v5027_v55 = vadd.f32 %v5026_v60, %v11354_v12  ;;  %v5139_v42 = vpop.f32.mrf.mxu0  ;;  %5541 = vmatprep.mubr.f32.mxu1 %v5391_v17  ;;  %v5028_v44 = vpop.f32.mrf.mxu1  ;;  %8252 = vmatprep.subr.mxu1 %v12706_v2  ;;  %v12707_v52 = vmax.f32 %v11282_v26, 0.0  ;;  %v4716_v36 = vadd.f32 %v12708_v9, %v4603_v31  ;;  %v12709_v54 = vld [vmem:[#allocation65_spill] sm:$0xff]  ;;  %v12713_v27 = vld [vmem:[#allocation22_spill] sm:$0xff] }
 0x606   : > { %v5362_v4 = vmax.f32 %v5230_v6, %v5232_v8  ;;  %v5233_v5 = vmax.f32 %v5138_v46, 0.0  ;;  %v5029_v37 = vadd.f32 %v5028_v44, %v11365_v11  ;;  %5542 = vmatmul.mubr.f32.gmra.mxu1 %v5390_v51  ;;  %v5393_v16 = vmax.f32 %v11392_v45, %v5361_v43  ;;  %v12710_v6 = vld [vmem:[#allocation29_spill] sm:$0xff]  ;;  %v12712_v43 = vld [vmem:[#allocation70_spill] sm:$0xff] }
 0x607   : > { %v11470_v1 = vmax.f32 %v12707_v52, %v5269_v62  ;;  %v5238_v25 = vmax.f32 %v12709_v54, 0.0  ;;  %v5140_v29 = vadd.f32 %v5139_v42, %v5027_v55  ;;  %v5141_v48 = vpop.f32.mrf.mxu0  ;;  %v5032_v60 = vpop.f32.mrf.mxu1  ;;  %8268 = vmatpush3.msra.mxu1 %v12706_v2  ;;  %v5239_v45 = vmax.f32 %v4916_v10, 0.0  ;;  %v12711_v26 = vld [vmem:[#allocation69_spill] sm:$0xff]  ;;  %v12714_v10 = vld [vmem:[#allocation42_spill] sm:$0xff] }
 0x608   : > { %v5394_v17 = vmax.f32 %v12710_v6, %v5362_v4  ;;  %v5363_v30 = vmax.f32 %v5231_v61, %v5233_v5  ;;  %v5142_v32 = vadd.f32 %v5141_v48, %v5029_v37  ;;  %v5033_v51 = vadd.f32 %v5032_v60, %v11354_v12  ;;  %5546 = vmatprep.mubr.f32.mxu1 %v5393_v16  ;;  %v8850_v9 = vld [vmem:[%s12567_s7 + $0x150] sm:$0xff] }
 0x609   : > { %v4922_v62 = vadd.f32 %v12711_v26, %v4809_v18  ;;  %v4813_v31 = vadd.f32 %v12712_v43, %v11268_v15  ;;  %v5240_v8 = vmax.f32 %v5140_v29, 0.0  ;;  %v5145_v46 = vpop.f32.mrf.mxu0  ;;  %v5034_v23 = vpop.f32.mrf.mxu1  ;;  %8253 = vmatprep.subr.mxu1 %v12713_v27  ;;  %v5277_v2 = vmax.f32 %v4716_v36, 0.0  ;;  %v12715_v18 = vld [vmem:[#allocation68_spill] sm:$0xff] }
 0x60a   : > { %v5241_v55 = vmax.f32 %v5142_v32, 0.0  ;;  %v5146_v42 = vadd.f32 %v5145_v46, %v5033_v51  ;;  %v5035_v44 = vadd.f32 %v5034_v23, %v11365_v11  ;;  %5547 = vmatmul.mubr.f32.gmra.mxu1 %v5392_v58  ;;  %v5395_v61 = vmax.f32 %v11397_v47, %v5363_v30  ;;  %v8851_v47 = vld [vmem:[%s12567_s7 + $0x148] sm:$0xff]  ;;  %v12717_v30 = vld [vmem:[#allocation31_spill] sm:$0xff] }
 0x60b   : > { %v4607_v4 = vadd.f32 %v12714_v10, %v11262_v59  ;;  %v5246_v5 = vmax.f32 %v12715_v18, 0.0  ;;  %v5364_v37 = vmax.f32 %v5238_v25, %v5240_v8  ;;  %v5147_v16 = vpop.f32.mrf.mxu0  ;;  %v5036_v52 = vpop.f32.mrf.mxu1  ;;  %8269 = vmatpush3.msra.mxu1 %v8850_v9  ;;  %v5247_v36 = vmax.f32 %v4922_v62, 0.0  ;;  %v12716_v25 = vld [vmem:[#allocation72_spill] sm:$0xff]  ;;  %v12721_v18 = vld [vmem:[#allocation33_spill] sm:$0xff]  ;;  %v12723_v9 = vld [vmem:[#allocation75_spill] sm:$0xff] }
 0x60c   : > { %v5365_v54 = vmax.f32 %v5239_v45, %v5241_v55  ;;  %v5248_v29 = vmax.f32 %v5146_v42, 0.0  ;;  %v5148_v48 = vadd.f32 %v5147_v16, %v5035_v44  ;;  %v5037_v58 = vadd.f32 %v5036_v52, %v11354_v12  ;;  %5551 = vmatprep.mubr.f32.mxu1 %v5395_v61  ;;  %8254 = vmatprep.subr.mxu1 %v8851_v47  ;;  %v8852_v62 = vld [vmem:[%s12567_s7 + $0x140] sm:$0xff]  ;;  %v12720_v55 = vld [vmem:[#allocation71_spill] sm:$0xff]  ;;  %v12722_v52 = vld [vmem:[#allocation74_spill] sm:$0xff] }
 0x60d   : > { %v4926_v60 = vadd.f32 %v12716_v25, %v4813_v31  ;;  %v4819_v6 = vadd.f32 %v11224_v14, %v11268_v15  ;;  %v5396_v32 = vmax.f32 %v12717_v30, %v5364_v37  ;;  %v5149_v51 = vpop.f32.mrf.mxu0  ;;  %v5038_v45 = vpop.f32.mrf.mxu1  ;;  %8270 = vmatpush3.msra.mxu1 %v8851_v47  ;;  %v12718_v31 = vmax.f32 %v11285_v41, 0.0  ;;  %v12719_v14 = vld [vmem:[#allocation44_spill] sm:$0xff]  ;;  %v8853_v41 = vld [vmem:[%s12567_s7 + $0x138] sm:$0xff]  ;;  %v12724_v30 = vld [vmem:[#allocation45_spill] sm:$0xff] }
 0x60e   : > { %v5366_v26 = vmax.f32 %v5246_v5, %v5248_v29  ;;  %v5249_v43 = vmax.f32 %v5148_v48, 0.0  ;;  %v5150_v8 = vadd.f32 %v5149_v51, %v5037_v58  ;;  %v5039_v46 = vadd.f32 %v5038_v45, %v11365_v11  ;;  %5552 = vmatmul.mubr.f32.gmra.mxu1 %v5394_v17  ;;  %8255 = vmatprep.subr.mxu1 %v8852_v62  ;;  %v12725_v45 = vld [vmem:[#allocation73_spill] sm:$0xff] }
 0x60f   : > { %v11503_v23 = vmax.f32 %v12718_v31, %v5277_v2  ;;  %v4720_v27 = vadd.f32 %v12719_v14, %v4607_v4  ;;  %v5254_v42 = vmax.f32 %v12720_v55, 0.0  ;;  %v5151_v44 = vpop.f32.mrf.mxu0  ;;  %v5042_v61 = vpop.f32.mrf.mxu1  ;;  %v5397_v10 = vmax.f32 %v11405_v22, %v5365_v54  ;;  %8271 = vmatpush3.msra.mxu1 %v8852_v62  ;;  %v12726_v62 = vld [vmem:[#allocation35_spill] sm:$0xff] }
 0x610   : > { %v5398_v17 = vmax.f32 %v12721_v18, %v5366_v26  ;;  %v5367_v5 = vmax.f32 %v5247_v36, %v5249_v43  ;;  %v5256_v37 = vmax.f32 %v5150_v8, 0.0  ;;  %v5152_v16 = vadd.f32 %v5151_v44, %v5039_v46  ;;  %8256 = vmatprep.subr.mxu1 %v8853_v41 }
 0x611   : > { %v5255_v2 = vmax.f32 %v4926_v60, 0.0  ;;  %v4932_v4 = vadd.f32 %v12722_v52, %v4819_v6  ;;  %v4823_v29 = vadd.f32 %v12723_v9, %v11268_v15  ;;  %v5043_v48 = vadd.f32 %v5042_v61, %v11354_v12  ;;  %v5155_v22 = vpop.f32.mrf.mxu0  ;;  %5556 = vmatprep.mubr.f32.mxu1 %v5397_v10  ;;  %v5044_v54 = vpop.f32.mrf.mxu1  ;;  %8272 = vmatpush3.msra.mxu1 %v8853_v41  ;;  %v8854_v60 = vld [vmem:[%s12567_s7 + $0x130] sm:$0xff] }
 0x612   : > { %v5368_v58 = vmax.f32 %v5254_v42, %v5256_v37  ;;  %v5257_v47 = vmax.f32 %v5152_v16, 0.0  ;;  %v5045_v36 = vadd.f32 %v5044_v54, %v11365_v11  ;;  %5557 = vmatmul.mubr.f32.gmra.mxu1 %v5396_v32  ;;  %v5399_v25 = vmax.f32 %v11413_v49, %v5367_v5  ;;  %8257 = vmatprep.subr.mxu1 %v8854_v60  ;;  %v8855_v5 = vld [vmem:[%s12567_s7 + $0x128] sm:$0xff] }
 0x613   : > { %v5285_v6 = vmax.f32 %v4720_v27, 0.0  ;;  %v4613_v51 = vadd.f32 %v12724_v30, %v11262_v59  ;;  %v5262_v26 = vmax.f32 %v12725_v45, 0.0  ;;  %v5156_v43 = vadd.f32 %v5155_v22, %v5043_v48  ;;  %v5157_v8 = vpop.f32.mrf.mxu0  ;;  %v5046_v46 = vpop.f32.mrf.mxu1  ;;  %8273 = vmatpush3.msra.mxu1 %v8854_v60  ;;  %v12727_v27 = vld [vmem:[#allocation77_spill] sm:$0xff]  ;;  %v12732_v30 = vld [vmem:[#allocation80_spill] sm:$0xff] }
 0x614   : > { %v5400_v31 = vmax.f32 %v12726_v62, %v5368_v58  ;;  %v5369_v32 = vmax.f32 %v5255_v2, %v5257_v47  ;;  %v5158_v14 = vadd.f32 %v5157_v8, %v5045_v36  ;;  %v5047_v49 = vadd.f32 %v5046_v46, %v11354_v12  ;;  %5561 = vmatprep.mubr.f32.mxu1 %v5399_v25  ;;  %v12733_v45 = vld [vmem:[#allocation37_spill] sm:$0xff] }
 0x615   : > { %v5263_v55 = vmax.f32 %v4932_v4, 0.0  ;;  %v4936_v42 = vadd.f32 %v11235_v20, %v4823_v29  ;;  %v4829_v44 = vadd.f32 %v12727_v27, %v11268_v15  ;;  %v5264_v61 = vmax.f32 %v5156_v43, 0.0  ;;  %v5159_v10 = vpop.f32.mrf.mxu0  ;;  %v5048_v18 = vpop.f32.mrf.mxu1  ;;  %8258 = vmatprep.subr.mxu1 %v8855_v5  ;;  %v12729_v4 = vld [vmem:[#allocation47_spill] sm:$0xff]  ;;  %v12730_v29 = vld [vmem:[#allocation76_spill] sm:$0xff] }
 0x616   : > { %v5265_v37 = vmax.f32 %v5158_v14, 0.0  ;;  %v5160_v16 = vadd.f32 %v5159_v10, %v5047_v49  ;;  %v5049_v41 = vadd.f32 %v5048_v18, %v11365_v11  ;;  %5562 = vmatmul.mubr.f32.gmra.mxu1 %v5398_v17  ;;  %v5401_v2 = vmax.f32 %v11417_v40, %v5369_v32  ;;  %v12731_v17 = vld [vmem:[#allocation79_spill] sm:$0xff] }
 0x617   : > { %v12728_v20 = vmax.f32 %v11291_v19, 0.0  ;;  %v4726_v9 = vadd.f32 %v12729_v4, %v4613_v51  ;;  %v5270_v48 = vmax.f32 %v12730_v29, 0.0  ;;  %v5370_v22 = vmax.f32 %v5262_v26, %v5264_v61  ;;  %v5161_v54 = vpop.f32.mrf.mxu0  ;;  %v5052_v58 = vpop.f32.mrf.mxu1  ;;  %8274 = vmatpush3.msra.mxu1 %v8855_v5  ;;  %v8856_v19 = vld [vmem:[%s12567_s7 + $0x120] sm:$0xff]  ;;  %v8857_v49 = vld [vmem:[%s12567_s7 + $0x118] sm:$0xff] }
 0x618   : > { %v5371_v47 = vmax.f32 %v5263_v55, %v5265_v37  ;;  %v5272_v36 = vmax.f32 %v5160_v16, 0.0  ;;  %v5162_v25 = vadd.f32 %v5161_v54, %v5049_v41  ;;  %v5053_v60 = vadd.f32 %v5052_v58, %v11354_v12  ;;  %5566 = vmatprep.mubr.f32.mxu1 %v5401_v2  ;;  %8259 = vmatprep.subr.mxu1 %v8856_v19  ;;  %v12736_v37 = vld [vmem:[#allocation40_spill] sm:$0xff] }
 0x619   : > { %v11536_v52 = vmax.f32 %v12728_v20, %v5285_v6  ;;  %v5271_v40 = vmax.f32 %v4936_v42, 0.0  ;;  %v4942_v6 = vadd.f32 %v12731_v17, %v4829_v44  ;;  %v4833_v51 = vadd.f32 %v12732_v30, %v11268_v15  ;;  %v5165_v43 = vpop.f32.mrf.mxu0  ;;  %v5054_v8 = vpop.f32.mrf.mxu1  ;;  %8275 = vmatpush3.msra.mxu1 %v8856_v19  ;;  %v12734_v42 = vld [vmem:[#allocation48_spill] sm:$0xff]  ;;  %v12735_v44 = vld [vmem:[#allocation78_spill] sm:$0xff]  ;;  %v8859_v19 = vld [vmem:[%s12567_s7 + $0x108] sm:$0xff] }
 0x61a   : > { %v5402_v26 = vmax.f32 %v12733_v45, %v5370_v22  ;;  %v5372_v46 = vmax.f32 %v5270_v48, %v5272_v36  ;;  %v5273_v62 = vmax.f32 %v5162_v25, 0.0  ;;  %v5166_v32 = vadd.f32 %v5165_v43, %v5053_v60  ;;  %5567 = vmatmul.mubr.f32.gmra.mxu1 %v5400_v31  ;;  %8260 = vmatprep.subr.mxu1 %v8857_v49  ;;  %v8858_v20 = vld [vmem:[%s12567_s7 + $0x110] sm:$0xff]  ;;  %v12738_v48 = vld [vmem:[#allocation83_spill] sm:$0xff] }
 0x61b   : > { %v5055_v14 = vadd.f32 %v5054_v8, %v11365_v11  ;;  %v5293_v55 = vmax.f32 %v4726_v9, 0.0  ;;  %v4617_v27 = vadd.f32 %v12734_v42, %v11262_v59  ;;  %v5278_v61 = vmax.f32 %v12735_v44, 0.0  ;;  %v5167_v10 = vpop.f32.mrf.mxu0  ;;  %v5056_v18 = vpop.f32.mrf.mxu1  ;;  %8276 = vmatpush3.msra.mxu1 %v8857_v49  ;;  %v12737_v9 = vld [vmem:[#allocation82_spill] sm:$0xff] }
 0x61c   : > { %v5403_v5 = vmax.f32 %v11440_v33, %v5371_v47  ;;  %v5404_v16 = vmax.f32 %v12736_v37, %v5372_v46  ;;  %v5373_v41 = vmax.f32 %v5271_v40, %v5273_v62  ;;  %v5280_v31 = vmax.f32 %v5166_v32, 0.0  ;;  %8261 = vmatprep.subr.mxu1 %v8858_v20 }
 0x61d   : > { %v5168_v2 = vadd.f32 %v5167_v10, %v5055_v14  ;;  %v5279_v4 = vmax.f32 %v4942_v6, 0.0  ;;  %v4946_v29 = vadd.f32 %v12737_v9, %v4833_v51  ;;  %v4839_v22 = vadd.f32 %v12738_v48, %v11268_v15  ;;  %v5169_v33 = vpop.f32.mrf.mxu0  ;;  %v5058_v58 = vpop.f32.mrf.mxu1  ;;  %8277 = vmatpush3.msra.mxu1 %v8858_v20  ;;  %v12740_v6 = vld [vmem:[#allocation50_spill] sm:$0xff]  ;;  %v12741_v51 = vld [vmem:[#allocation81_spill] sm:$0xff] }
 0x61e   : > { %v5057_v54 = vadd.f32 %v5056_v18, %v11354_v12  ;;  %5571 = vmatprep.mubr.f32.mxu1 %v5403_v5  ;;  %v5374_v47 = vmax.f32 %v5278_v61, %v5280_v31  ;;  %v5059_v25 = vadd.f32 %v5058_v58, %v11365_v11  ;;  %v5405_v60 = vmax.f32 %v11470_v1, %v5373_v41  ;;  %v8860_v61 = vld [vmem:[%s12567_s7 + $0x100] sm:$0xff] }
 0x61f   : > { %v5281_v36 = vmax.f32 %v5168_v2, 0.0  ;;  %5572 = vmatmul.mubr.f32.gmra.mxu1 %v5402_v26  ;;  %8262 = vmatprep.subr.mxu1 %v8859_v19  ;;  %v12739_v40 = vmax.f32 %v11325_v24, 0.0  ;;  %v11574_v30 = vadd.f32 %v12740_v6, %v4617_v27  ;;  %v5286_v45 = vmax.f32 %v12741_v51, 0.0  ;;  %v5171_v8 = vpop.f32.mrf.mxu0  ;;  %v5062_v46 = vpop.f32.mrf.mxu1  ;;  %v12742_v26 = vld [vmem:[#allocation43_spill] sm:$0xff]  ;;  %v12743_v41 = vld [vmem:[#allocation12_spill] sm:$0xff] }
 0x620   : > { %v5170_v43 = vadd.f32 %v5169_v33, %v5057_v54  ;;  %8278 = vmatpush3.msra.mxu1 %v8859_v19  ;;  %v5406_v1 = vmax.f32 %v12742_v26, %v5374_v47  ;;  %v5172_v32 = vadd.f32 %v5171_v8, %v5059_v25  ;;  %v5063_v14 = vadd.f32 %v5062_v46, %v11354_v12  ;;  %v12744_v33 = vld [vmem:[#allocation46_spill] sm:$0xff]  ;;  %v12748_v46 = vld [vmem:[#allocation49_spill] sm:$0xff] }
 0x621   : > { %v11571_v17 = vmax.f32 %v12739_v40, %v5293_v55  ;;  %v5375_v62 = vmax.f32 %v5279_v4, %v5281_v36  ;;  %5576 = vmatprep.mubr.f32.mxu1 %v5405_v60  ;;  %v5287_v49 = vmax.f32 %v4946_v29, 0.0  ;;  %v4952_v24 = vadd.f32 %v11287_v53, %v4839_v22  ;;  %v5175_v27 = vpop.f32.mrf.mxu0  ;;  %v5064_v44 = vpop.f32.mrf.mxu1  ;;  %8263 = vmatprep.subr.mxu1 %v8860_v61  ;;  %v12745_v40 = vld [vmem:[#allocation52_spill] sm:$0xff] }
 0x622   : > { %v4843_v55 = vadd.f32 %v11303_v3, %v11268_v15  ;;  %v5288_v42 = vmax.f32 %v5170_v43, 0.0  ;;  %v5289_v10 = vmax.f32 %v5172_v32, 0.0  ;;  %v5176_v18 = vadd.f32 %v5175_v27, %v5063_v14  ;;  %8279 = vmatpush3.msra.mxu1 %v8860_v61 }
 0x623   : > { %v5065_v5 = vadd.f32 %v5064_v44, %v11365_v11  ;;  %5577 = vmatmul.mubr.f32.gmra.mxu1 %v5404_v16  ;;  %v5407_v37 = vmax.f32 %v11503_v23, %v5375_v62  ;;  %v5301_v53 = vmax.f32 %v11574_v30, 0.0  ;;  %v4623_v3 = vadd.f32 %v12743_v41, %v11262_v59  ;;  %v5177_v20 = vpop.f32.mrf.mxu0  ;;  %v5066_v4 = vpop.f32.mrf.mxu1  ;;  %v12746_v30 = vld [vmem:[#allocation53_spill] sm:$0xff]  ;;  %v12750_v41 = vld [vmem:[#allocation51_spill] sm:$0xff] }
 0x624   : > { %v5294_v31 = vmax.f32 %v11277_v57, 0.0  ;;  %v5376_v2 = vmax.f32 %v5286_v45, %v5288_v42  ;;  %v5377_v9 = vmax.f32 %v5287_v49, %v5289_v10  ;;  %v5296_v29 = vmax.f32 %v5176_v18, 0.0  ;;  %v12747_v45 = vld [vmem:[#allocation84_spill] sm:$0xff] }
 0x625   : > { %v5178_v48 = vadd.f32 %v5177_v20, %v5065_v5  ;;  %v5067_v22 = vadd.f32 %v5066_v4, %v11354_v12  ;;  %5581 = vmatprep.mubr.f32.mxu1 %v5407_v37  ;;  %v5295_v16 = vmax.f32 %v4952_v24, 0.0  ;;  %v4956_v23 = vadd.f32 %v11318_v39, %v4843_v55  ;;  %v5179_v47 = vpop.f32.mrf.mxu0  ;;  %v5068_v57 = vpop.f32.mrf.mxu1 }
 0x626   : > { %v4849_v54 = vadd.f32 %v11333_v35, %v11268_v15  ;;  %v5408_v58 = vmax.f32 %v12744_v33, %v5376_v2  ;;  %v5378_v36 = vmax.f32 %v5294_v31, %v5296_v29  ;;  %v5069_v19 = vadd.f32 %v5068_v57, %v11365_v11 }
 0x627   : > { %v5297_v25 = vmax.f32 %v5178_v48, 0.0  ;;  %v5180_v60 = vadd.f32 %v5179_v47, %v5067_v22  ;;  %5582 = vmatmul.mubr.f32.gmra.mxu1 %v5406_v1  ;;  %v4736_v6 = vadd.f32 %v12745_v40, %v4623_v3  ;;  %v4627_v51 = vadd.f32 %v12746_v30, %v11262_v59  ;;  %v5181_v43 = vpop.f32.mrf.mxu0  ;;  %v5072_v8 = vpop.f32.mrf.mxu1  ;;  %v12752_v40 = vld [vmem:[#allocation56_spill] sm:$0xff] }
 0x628   : > { %v5302_v39 = vmax.f32 %v12747_v45, 0.0  ;;  %v5409_v35 = vmax.f32 %v11536_v52, %v5377_v9  ;;  %v5410_v26 = vmax.f32 %v12748_v46, %v5378_v36  ;;  %v5182_v14 = vadd.f32 %v5181_v43, %v5069_v19  ;;  %v12751_v36 = vld [vmem:[#allocation54_spill] sm:$0xff]  ;;  %v11640_v43 = vld [vmem:[%s9187_s25 + $0x60] sm:$0xff] }
 0x629   : > { %v5379_v62 = vmax.f32 %v5295_v16, %v5297_v25  ;;  %v5304_v32 = vmax.f32 %v5180_v60, 0.0  ;;  %v5303_v49 = vmax.f32 %v4956_v23, 0.0  ;;  %v4962_v24 = vadd.f32 %v11348_v56, %v4849_v54  ;;  %v5185_v59 = vpop.f32.mrf.mxu0  ;;  %v5074_v42 = vpop.f32.mrf.mxu1  ;;  %v12749_v56 = vld [vmem:[#allocation55_spill] sm:$0xff]  ;;  %v11632_v45 = vld [vmem:[%s9187_s25 + $0x50] sm:$0xff] }
 0x62a   : > { %v4853_v1 = vadd.f32 %v11360_v0, %v11268_v15  ;;  %v5073_v55 = vadd.f32 %v5072_v8, %v11354_v12  ;;  %5586 = vmatprep.mubr.f32.mxu1 %v5409_v35  ;;  %v5305_v44 = vmax.f32 %v5182_v14, 0.0  ;;  %v5075_v52 = vadd.f32 %v5074_v42, %v11365_v11  ;;  %v5776_v8 = vld [vmem:[%s12568_s8 + $0x18] sm:$0xff]  ;;  %v11647_v35 = vld [vmem:[%s9187_s25 + $0x68] sm:$0xff]  ;;  %v11651_v46 = vld [vmem:[%s9187_s25 + $0x70] sm:$0xff] }
 0x62b   : > { %v5380_v27 = vmax.f32 %v5302_v39, %v5304_v32  ;;  %5587 = vmatmul.mubr.f32.gmra.mxu1 %v5408_v58  ;;  %v5411_v61 = vmax.f32 %v11571_v17, %v5379_v62  ;;  %v5349_v10 = vmax.f32 %v5299_v34, %v5301_v53  ;;  %v5309_v18 = vmax.f32 %v4736_v6, 0.0  ;;  %v5187_v15 = vpop.f32.mrf.mxu0  ;;  %v5076_v0 = vpop.f32.mrf.mxu1  ;;  %v11636_v39 = vld [vmem:[%s9187_s25 + $0x58] sm:$0xff]  ;;  %8184 = vmatprep.subr.mxu1 %v5776_v8  ;;  %v5774_v62 = vld [vmem:[%s12568_s8 + $0x8] sm:$0xff]  ;;  %v5773_v14 = vld [vmem:[%s12568_s8] sm:$0xff] }
 0x62c   : > { %v4740_v5 = vadd.f32 %v12749_v56, %v4627_v51  ;;  %v5186_v37 = vadd.f32 %v5185_v59, %v5073_v55  ;;  %v5381_v31 = vmax.f32 %v5303_v49, %v5305_v44  ;;  %v5188_v2 = vadd.f32 %v5187_v15, %v5075_v52  ;;  %v11628_v51 = vld [vmem:[%s9187_s25 + $0x48] sm:$0xff]  ;;  %v11661_v32 = vld [vmem:[%s9187_s25 + $0x78] sm:$0xff]  ;;  %v11670_v55 = vld [vmem:[%s12571_s11 + $0x6] ss:$0 sm:$0xff] }
 0x62d   : > { %v5412_v3 = vmax.f32 %v12750_v41, %v5380_v27  ;;  %v5077_v20 = vadd.f32 %v5076_v0, %v11354_v12  ;;  %5591 = vmatprep.mubr.f32.mxu1 %v5411_v61  ;;  %v5310_v4 = vmax.f32 %v11337_v7, 0.0  ;;  %v5311_v9 = vmax.f32 %v4962_v24, 0.0  ;;  %v5189_v34 = vpop.f32.mrf.mxu0  ;;  %v5078_v53 = vpop.f32.mrf.mxu1 }
 0x62e   : > { %v4966_v17 = vadd.f32 %v11370_v21, %v4853_v1  ;;  %v5312_v50 = vmax.f32 %v5186_v37, 0.0  ;;  %v5313_v29 = vmax.f32 %v5188_v2, 0.0  ;;  %v5079_v22 = vadd.f32 %v5078_v53, %v11365_v11 }
 0x62f   : > { %v5190_v48 = vadd.f32 %v5189_v34, %v5077_v20  ;;  %5592 = vmatmul.mubr.f32.gmra.mxu1 %v5410_v26  ;;  %v5413_v16 = vmax.f32 %v5349_v10, %v5381_v31  ;;  %v5351_v23 = vmax.f32 %v5307_v28, %v5309_v18  ;;  %v5317_v54 = vmax.f32 %v4740_v5, 0.0  ;;  %v5191_v33 = vpop.f32.mrf.mxu0  ;;  %v5775_v26 = vld [vmem:[%s12568_s8 + $0x10] sm:$0xff] }
 0x630   : > { %v5382_v12 = vmax.f32 %v5310_v4, %v5312_v50  ;;  %v5318_v7 = vmax.f32 %v11362_v38, 0.0  ;;  %v5383_v58 = vmax.f32 %v5311_v9, %v5313_v29  ;;  %v5192_v21 = vadd.f32 %v5191_v33, %v5079_v22 }
 0x631   : > { %v5320_v47 = vmax.f32 %v5190_v48, 0.0  ;;  %5596 = vmatprep.mubr.f32.mxu1 %v5413_v16  ;;  %v5315_v57 = vmax.f32 %v11374_v13, 0.0  ;;  %v5319_v11 = vmax.f32 %v4966_v17, 0.0  ;;  %v11624_v13 = vld [vmem:[%s9187_s25 + $0x40] sm:$0xff] }
 0x632   : > { %v5414_v25 = vmax.f32 %v12751_v36, %v5382_v12  ;;  %v5321_v63 = vmax.f32 %v5192_v21, 0.0  ;;  %v5415_v28 = vmax.f32 %v5351_v23, %v5383_v58 }
 0x633   : > { %v5384_v60 = vmax.f32 %v5318_v7, %v5320_v47  ;;  %5597 = vmatmul.mubr.f32.gmra.mxu1 %v5412_v3  ;;  %v5353_v19 = vmax.f32 %v5315_v57, %v5317_v54 }
 0x634   : > { %v5385_v6 = vmax.f32 %v5319_v11, %v5321_v63  ;;  %5601 = vmatprep.mubr.f32.mxu1 %v5415_v28 }
 0x635   : > { %v5416_v38 = vmax.f32 %v12752_v40, %v5384_v60 }
 0x636   : > { %v5417_v30 = vmax.f32 %v5353_v19, %v5385_v6 }
 0x637   : > { %5602 = vmatmul.mubr.f32.gmra.mxu1 %v5414_v25 }
 0x638   : > { %5606 = vmatprep.mubr.f32.mxu1 %v5417_v30 }
 0x63b   : > { %5607 = vmatmul.mubr.f32.gmra.mxu1 %v5416_v38 }
 0x63c   : > { %8172 = vmatprep.mubr.f32.mxu1 %v11624_v13 }
 0x63f   : > { %8173 = vmatmul.mubr.f32.vlgmr.msra.gmra.mxu1 %v11628_v51 }
 0x640   : > { %8175 = vmatprep.mubr.f32.mxu1 %v11632_v45  ;;  %8185 = vmatpush3.msra.mxu1 %v5776_v8 }
 0x641   : > { %8186 = vmatprep.subr.mxu1 %v5775_v26  ;;  %v8162_v24 = vpop.f32.mrf.mxu0 }
 0x642   : > { %8187 = vmatpush3.msra.mxu1 %v5775_v26 }
 0x643   : > { %8176 = vmatmul.mubr.f32.gmra.mxu1 %v11636_v39  ;;  %8188 = vmatprep.subr.mxu1 %v5774_v62  ;;  %v5678_v27 = vpop.f32.mrf.mxu0 }
 0x644   : > { %8178 = vmatprep.mubr.f32.mxu1 %v11640_v43  ;;  %8189 = vmatpush3.msra.mxu1 %v5774_v62 }
 0x645   : > { %8190 = vmatprep.subr.mxu1 %v5773_v14  ;;  %v8165_v37 = vpop.f32.mrf.mxu0 }
 0x646   : > { %8191 = vmatpush3.msra.mxu1 %v5773_v14 }
 0x647   : > { %8179 = vmatmul.mubr.f32.gmra.mxu1 %v11647_v35  ;;  %v5688_v2 = vpop.f32.mrf.mxu0 }
 0x648   : > { %8181 = vmatprep.mubr.f32.mxu1 %v11651_v46 }
 0x649   : > { %v8168_v34 = vpop.f32.mrf.mxu0 }
 0x64b   : > { %8182 = vmatmul.mubr.f32.gmra.mxu1 %v11661_v32  ;;  %v5698_v54 = vpop.f32.mrf.mxu0 }
 0x64d   : > { %v8171_v57 = vpop.f32.mrf.mxu0 }
 0x64f   : > { %v5708_v19 = vpop.f32.mrf.mxu0 }
 0x6bd   : > { %v7976_v49 = vpop.f32.mrf.mxu1 }
 0x6bf   : > { %v7977_v1 = vpop.f32.mrf.mxu1 }
 0x6c0   : > { %v7978_v59 = vadd.f32 %v7977_v1, %v7976_v49 }
 0x6c1   : > { %v7979_v42 = vpop.f32.mrf.mxu1 }
 0x6c2   : > { %v5534_v44 = vadd.f32 %v7978_v59, %v11670_v55 }
 0x6c3   : > { %v7980_v52 = vpop.f32.mrf.mxu1 }
 0x6c4   : > { %v7981_v61 = vadd.f32 %v7980_v52, %v7979_v42  ;;  %v11673_v10 = vadd.f32 %v5678_v27, %v5534_v44 }
 0x6c6   : > { %v5539_v18 = vadd.f32 %v7981_v61, %v11670_v55  ;;  %v5757_v56 = vmax.f32 %v11673_v10, 0.0  ;;  %v7982_v5 = vpop.f32.mrf.mxu1 }
 0x6c8   : > { %v11677_v15 = vadd.f32 %v8162_v24, %v5539_v18  ;;  %v7983_v0 = vpop.f32.mrf.mxu1  ;;  %8192 = vmatprep.mubr.msk.f32.mxu1 %vm5778_vm0, %v5757_v56 }
 0x6c9   : > { %v7984_v41 = vadd.f32 %v7983_v0, %v7982_v5 }
 0x6ca   : > { %v5758_v3 = vmax.f32 %v11677_v15, 0.0  ;;  %v7985_v31 = vpop.f32.mrf.mxu1 }
 0x6cb   : > { %v5544_v20 = vadd.f32 %v7984_v41, %v11670_v55 }
 0x6cc   : > { %v7986_v4 = vpop.f32.mrf.mxu1  ;;  %8193 = vmatmul.mubr.msk.f32.vlgmr.msra.gmra.mxu1 %vm5778_vm0, %v5758_v3 }
 0x6cd   : > { %v7987_v9 = vadd.f32 %v7986_v4, %v7985_v31  ;;  %v11687_v17 = vadd.f32 %v5688_v2, %v5544_v20 }
 0x6ce   : > { %v7988_v50 = vpop.f32.mrf.mxu1 }
 0x6cf   : > { %v5549_v53 = vadd.f32 %v7987_v9, %v11670_v55  ;;  %v5759_v29 = vmax.f32 %v11687_v17, 0.0 }
 0x6d0   : > { %v7989_v48 = vpop.f32.mrf.mxu1 }
 0x6d1   : > { %v11691_v22 = vadd.f32 %v8165_v37, %v5549_v53  ;;  %v7990_v16 = vadd.f32 %v7989_v48, %v7988_v50  ;;  %8195 = vmatprep.mubr.msk.f32.mxu1 %vm5778_vm0, %v5759_v29 }
 0x6d2   : > { %v7991_v23 = vpop.f32.mrf.mxu1 }
 0x6d3   : > { %v5760_v12 = vmax.f32 %v11691_v22, 0.0  ;;  %v5554_v33 = vadd.f32 %v7990_v16, %v11670_v55 }
 0x6d4   : > { %v7992_v7 = vpop.f32.mrf.mxu1 }
 0x6d5   : > { %v7993_v58 = vadd.f32 %v7992_v7, %v7991_v23  ;;  %v11698_v47 = vadd.f32 %v5698_v54, %v5554_v33  ;;  %8196 = vmatmul.mubr.msk.f32.gmra.mxu1 %vm5778_vm0, %v5760_v12 }
 0x6d6   : > { %v7994_v21 = vpop.f32.mrf.mxu1 }
 0x6d7   : > { %v5559_v36 = vadd.f32 %v7993_v58, %v11670_v55  ;;  %v5761_v25 = vmax.f32 %v11698_v47, 0.0 }
 0x6d8   : > { %v7995_v11 = vpop.f32.mrf.mxu1 }
 0x6d9   : > { %v11705_v60 = vadd.f32 %v8168_v34, %v5559_v36  ;;  %v7996_v63 = vadd.f32 %v7995_v11, %v7994_v21  ;;  %8198 = vmatprep.mubr.msk.f32.mxu1 %vm5778_vm0, %v5761_v25 }
 0x6da   : > { %v7997_v28 = vpop.f32.mrf.mxu1 }
 0x6db   : > { %v5762_v40 = vmax.f32 %v11705_v60, 0.0  ;;  %v5564_v38 = vadd.f32 %v7996_v63, %v11670_v55 }
 0x6dc   : > { %v7998_v6 = vpop.f32.mrf.mxu1 }
 0x6dd   : > { %v7999_v30 = vadd.f32 %v7998_v6, %v7997_v28  ;;  %v11712_v8 = vadd.f32 %v5708_v19, %v5564_v38  ;;  %8199 = vmatmul.mubr.msk.f32.gmra.mxu1 %vm5778_vm0, %v5762_v40 }
 0x6df   : > { %v8000_v26 = vpop.f32.mrf.mxu1  ;;  %v5569_v62 = vadd.f32 %v7999_v30, %v11670_v55  ;;  %v5763_v14 = vmax.f32 %v11712_v8, 0.0  ;;  %v12174_v8 = vld [vmem:[%s9187_s25 + $0x38] sm:$0xff] }
 0x6e1   : > { %v8001_v49 = vpop.f32.mrf.mxu1  ;;  %v11719_v24 = vadd.f32 %v8171_v57, %v5569_v62  ;;  %8201 = vmatprep.mubr.msk.f32.mxu1 %vm5778_vm0, %v5763_v14 }
 0x6e2   : > { %v8002_v4 = vadd.f32 %v8001_v49, %v8000_v26 }
 0x6e3   : > { %v8003_v1 = vpop.f32.mrf.mxu1  ;;  %v5764_v59 = vmax.f32 %v11719_v24, 0.0  ;;  %v12165_v24 = vld [vmem:[%s9187_s25 + $0x30] sm:$0xff] }
 0x6e4   : > { %v5574_v16 = vadd.f32 %v8002_v4, %v11670_v55 }
 0x6e5   : > { %v8004_v42 = vpop.f32.mrf.mxu1  ;;  %8202 = vmatmul.mubr.msk.f32.gmra.mxu1 %vm5778_vm0, %v5764_v59 }
 0x6e6   : > { %v8005_v2 = vadd.f32 %v8004_v42, %v8003_v1 }
 0x6e7   : > { %v8006_v27 = vpop.f32.mrf.mxu1 }
 0x6e8   : > { %v5579_v34 = vadd.f32 %v8005_v2, %v11670_v55 }
 0x6e9   : > { %v8007_v44 = vpop.f32.mrf.mxu1 }
 0x6ea   : > { %v8008_v48 = vadd.f32 %v8007_v44, %v8006_v27 }
 0x6eb   : > { %v8009_v52 = vpop.f32.mrf.mxu1 }
 0x6ec   : > { %v5584_v11 = vadd.f32 %v8008_v48, %v11670_v55  ;;  %v6281_v48 = vld [vmem:[%s12570_s10 + $0x1f8] sm:$0xff] }
 0x6ed   : > { %v8010_v61 = vpop.f32.mrf.mxu1 }
 0x6ee   : > { %v8011_v50 = vadd.f32 %v8010_v61, %v8009_v52 }
 0x6ef   : > { %v8012_v18 = vpop.f32.mrf.mxu1 }
 0x6f0   : > { %v5589_v58 = vadd.f32 %v8011_v50, %v11670_v55  ;;  %v5989_v50 = vld [vmem:[#allocation7 + $0x8] sm:$0xff] }
 0x6f1   : > { %v8013_v5 = vpop.f32.mrf.mxu1 }
 0x6f2   : > { %v8014_v57 = vadd.f32 %v8013_v5, %v8012_v18 }
 0x6f3   : > { %v8015_v37 = vpop.f32.mrf.mxu1 }
 0x6f4   : > { %v5594_v1 = vadd.f32 %v8014_v57, %v11670_v55  ;;  %v6267_v57 = vld [vmem:[%s12570_s10 + $0x188] sm:$0xff] }
 0x6f5   : > { %v8016_v0 = vpop.f32.mrf.mxu1 }
 0x6f6   : > { %v8017_v7 = vadd.f32 %v8016_v0, %v8015_v37 }
 0x6f7   : > { %v8018_v41 = vpop.f32.mrf.mxu1 }
 0x6f8   : > { %v5599_v30 = vadd.f32 %v8017_v7, %v11670_v55  ;;  %v6274_v7 = vld [vmem:[%s12570_s10 + $0x1c0] sm:$0xff] }
 0x6f9   : > { %v8019_v31 = vpop.f32.mrf.mxu1 }
 0x6fa   : > { %v8020_v62 = vadd.f32 %v8019_v31, %v8018_v41 }
 0x6fb   : > { %v8021_v20 = vpop.f32.mrf.mxu1 }
 0x6fc   : > { %v5604_v37 = vadd.f32 %v8020_v62, %v11670_v55  ;;  %v6255_v62 = vld [vmem:[%s12570_s10 + $0x128] sm:$0xff] }
 0x6fd   : > { %v8022_v9 = vpop.f32.mrf.mxu1 }
 0x6fe   : > { %v8023_v6 = vadd.f32 %v8022_v9, %v8021_v20  ;;  %v5991_v20 = vld [vmem:[#allocation7 + $0x18] sm:$0xff] }
 0x6ff   : > { %v8174_v53 = vpop.f32.mrf.mxu1  ;;  %8216 = vmatprep.subr.mxu0 %v5991_v20 }
 0x700   : > { %v11730_v23 = vadd.f32 %v8174_v53, %v5579_v34  ;;  %v5609_v61 = vadd.f32 %v8023_v6, %v11670_v55  ;;  %8217 = vmatpush3.msra.mxu0 %v5991_v20  ;;  %v5990_v55 = vld [vmem:[#allocation7 + $0x10] sm:$0xff]  ;;  %v5988_v34 = vld [vmem:[#allocation7] sm:$0xff]  ;;  %v6279_v53 = vld [vmem:[%s12570_s10 + $0x1e8] sm:$0xff] }
 0x701   : > { %v5718_v54 = vpop.f32.mrf.mxu1  ;;  %8218 = vmatprep.subr.mxu0 %v5990_v55  ;;  %6369 = vmatprep.subr.mxu1 %v6279_v53  ;;  %v6262_v6 = vld [vmem:[%s12570_s10 + $0x160] sm:$0xff] }
 0x702   : > { %v11732_v33 = vadd.f32 %v5718_v54, %v5574_v16  ;;  %v5766_v63 = vmax.f32 %v11730_v23, 0.0  ;;  %8219 = vmatpush3.msra.mxu0 %v5990_v55  ;;  %v6278_v16 = vld [vmem:[%s12570_s10 + $0x1e0] sm:$0xff]  ;;  %v6275_v54 = vld [vmem:[%s12570_s10 + $0x1c8] sm:$0xff] }
 0x703   : > { %v8177_v21 = vpop.f32.mrf.mxu1  ;;  %8220 = vmatprep.subr.mxu0 %v5989_v50  ;;  %6370 = vmatpush1.msra.mxu1 %v6278_v16  ;;  %v6242_v20 = vld [vmem:[%s12570_s10 + $0xc0] sm:$0xff]  ;;  %v6239_v55 = vld [vmem:[%s12570_s10 + $0xa8] sm:$0xff] }
 0x704   : > { %v5765_v36 = vmax.f32 %v11732_v33, 0.0  ;;  %v11738_v28 = vadd.f32 %v8177_v21, %v5589_v58  ;;  %8221 = vmatpush3.msra.mxu0 %v5989_v50  ;;  %v6271_v58 = vld [vmem:[%s12570_s10 + $0x1a8] sm:$0xff]  ;;  %6371 = vmatprep.subr.mxu1 %v6275_v54  ;;  %v6270_v21 = vld [vmem:[%s12570_s10 + $0x1a0] sm:$0xff] }
 0x705   : > { %v5728_v19 = vpop.f32.mrf.mxu1  ;;  %8222 = vmatprep.subr.mxu0 %v5988_v34  ;;  %6372 = vmatpush1.msra.mxu1 %v6274_v7  ;;  %v6238_v50 = vld [vmem:[%s12570_s10 + $0xa0] sm:$0xff]  ;;  %v6227_v54 = vld [vmem:[%s12570_s10 + $0x48] sm:$0xff] }
 0x706   : > { %v11740_v38 = vadd.f32 %v5728_v19, %v5584_v11  ;;  %8204 = vmatprep.mubr.msk.f32.mxu1 %vm5778_vm0, %v5765_v36  ;;  %v5768_v42 = vmax.f32 %v11738_v28, 0.0  ;;  %8223 = vmatpush3.msra.mxu0 %v5988_v34  ;;  %v6266_v11 = vld [vmem:[%s12570_s10 + $0x180] sm:$0xff]  ;;  %v6263_v19 = vld [vmem:[%s12570_s10 + $0x168] sm:$0xff] }
 0x707   : > { %v8180_v26 = vpop.f32.mrf.mxu1  ;;  %8205 = vmatmul.mubr.msk.f32.gmra.mxu1 %vm5778_vm0, %v5766_v63  ;;  %6530 = vmatprep.subr.mxu0 %v6281_v48  ;;  %v6235_v34 = vld [vmem:[%s12570_s10 + $0x88] sm:$0xff]  ;;  %v6234_v53 = vld [vmem:[%s12570_s10 + $0x80] sm:$0xff] }
 0x708   : > { %v5767_v49 = vmax.f32 %v11740_v38, 0.0  ;;  %v11752_v27 = vadd.f32 %v8180_v26, %v5599_v30  ;;  %6373 = vmatprep.subr.mxu1 %v6271_v58  ;;  %v6259_v30 = vld [vmem:[%s12570_s10 + $0x148] sm:$0xff]  ;;  %v6258_v26 = vld [vmem:[%s12570_s10 + $0x140] sm:$0xff] }
 0x709   : > { %v5738_v44 = vpop.f32.mrf.mxu1  ;;  %6374 = vmatpush1.msra.mxu1 %v6270_v21  ;;  %v6231_v48 = vld [vmem:[%s12570_s10 + $0x68] sm:$0xff]  ;;  %v6230_v16 = vld [vmem:[%s12570_s10 + $0x60] sm:$0xff] }
 0x70a   : > { %v11754_v52 = vadd.f32 %v5738_v44, %v5594_v1  ;;  %8207 = vmatprep.mubr.msk.f32.mxu1 %vm5778_vm0, %v5767_v49  ;;  %v5770_v0 = vmax.f32 %v11752_v27, 0.0  ;;  %6375 = vmatprep.subr.mxu1 %v6267_v57  ;;  %v6254_v1 = vld [vmem:[%s12570_s10 + $0x120] sm:$0xff]  ;;  %v6251_v44 = vld [vmem:[%s12570_s10 + $0x108] sm:$0xff] }
 0x70b   : > { %v8183_v18 = vpop.f32.mrf.mxu1  ;;  %8208 = vmatmul.mubr.msk.f32.gmra.mxu1 %vm5778_vm0, %v5768_v42  ;;  %v6226_v7 = vld [vmem:[%s12570_s10 + $0x40] sm:$0xff]  ;;  %v6223_v58 = vld [vmem:[%s12570_s10 + $0x28] sm:$0xff] }
 0x70c   : > { %v5769_v5 = vmax.f32 %v11754_v52, 0.0  ;;  %v11766_v41 = vadd.f32 %v8183_v18, %v5609_v61  ;;  %6376 = vmatpush1.msra.mxu1 %v6266_v11  ;;  %v6250_v61 = vld [vmem:[%s12570_s10 + $0x100] sm:$0xff]  ;;  %v6247_v18 = vld [vmem:[%s12570_s10 + $0xe8] sm:$0xff] }
 0x70d   : > { %v5748_v31 = vpop.f32.mrf.mxu1  ;;  %6377 = vmatprep.subr.mxu1 %v6263_v19  ;;  %v6222_v21 = vld [vmem:[%s12570_s10 + $0x20] sm:$0xff] }
 0x70e   : > { %v11768_v2 = vadd.f32 %v5748_v31, %v5604_v37  ;;  %8210 = vmatprep.mubr.msk.f32.mxu1 %vm5778_vm0, %v5769_v5  ;;  %v5772_v9 = vmax.f32 %v11766_v41, 0.0  ;;  %6378 = vmatpush1.msra.mxu1 %v6262_v6  ;;  %v6246_v37 = vld [vmem:[%s12570_s10 + $0xe0] sm:$0xff]  ;;  %v6243_v31 = vld [vmem:[%s12570_s10 + $0xc8] sm:$0xff] }
 0x70f   : > { %8211 = vmatmul.mubr.msk.f32.gmra.mxu1 %vm5778_vm0, %v5770_v0  ;;  %6379 = vmatprep.subr.mxu1 %v6259_v30  ;;  %v11880_v57 = vld [vmem:[%s12571_s11 + $0x7] ss:$0 sm:$0xff] }
 0x710   : > { %v5771_v4 = vmax.f32 %v11768_v2, 0.0  ;;  %6380 = vmatpush1.msra.mxu1 %v6258_v26  ;;  %v12754_v2 = vld [vmem:[#allocation13_spill] sm:$0xff] }
 0x711   : > { %6381 = vmatprep.subr.mxu1 %v6255_v62 }
 0x712   : > { %8213 = vmatprep.mubr.msk.f32.mxu1 %vm5778_vm0, %v5771_v4  ;;  %6382 = vmatpush1.msra.mxu1 %v6254_v1  ;;  %v6280_v1 = vld [vmem:[%s12570_s10 + $0x1f0] sm:$0xff] }
 0x713   : > { %8214 = vmatmul.mubr.msk.f32.gmra.mxu1 %vm5778_vm0, %v5772_v9  ;;  %6383 = vmatprep.subr.mxu1 %v6251_v44  ;;  %v6277_v44 = vld [vmem:[%s12570_s10 + $0x1d8] sm:$0xff] }
 0x714   : > { %6384 = vmatpush1.msra.mxu1 %v6250_v61  ;;  %v6276_v61 = vld [vmem:[%s12570_s10 + $0x1d0] sm:$0xff] }
 0x715   : > { %6385 = vmatprep.subr.mxu1 %v6247_v18 }
 0x716   : > { %6386 = vmatpush1.msra.mxu1 %v6246_v37  ;;  %v6273_v37 = vld [vmem:[%s12570_s10 + $0x1b8] sm:$0xff] }
 0x717   : > { %6387 = vmatprep.subr.mxu1 %v6243_v31  ;;  %v6272_v31 = vld [vmem:[%s12570_s10 + $0x1b0] sm:$0xff] }
 0x718   : > { %6388 = vmatpush1.msra.mxu1 %v6242_v20 }
 0x719   : > { %6389 = vmatprep.subr.mxu1 %v6239_v55 }
 0x71a   : > { %6390 = vmatpush1.msra.mxu1 %v6238_v50  ;;  %v6269_v50 = vld [vmem:[%s12570_s10 + $0x198] sm:$0xff] }
 0x71b   : > { %6391 = vmatprep.subr.mxu1 %v6235_v34 }
 0x71c   : > { %6392 = vmatpush1.msra.mxu1 %v6234_v53  ;;  %v6268_v53 = vld [vmem:[%s12570_s10 + $0x190] sm:$0xff] }
 0x71d   : > { %6393 = vmatprep.subr.mxu1 %v6231_v48  ;;  %v6265_v48 = vld [vmem:[%s12570_s10 + $0x178] sm:$0xff] }
 0x71e   : > { %6394 = vmatpush1.msra.mxu1 %v6230_v16 }
 0x71f   : > { %6395 = vmatprep.subr.mxu1 %v6227_v54 }
 0x720   : > { %6396 = vmatpush1.msra.mxu1 %v6226_v7  ;;  %v6264_v7 = vld [vmem:[%s12570_s10 + $0x170] sm:$0xff] }
 0x721   : > { %6397 = vmatprep.subr.mxu1 %v6223_v58  ;;  %v6261_v58 = vld [vmem:[%s12570_s10 + $0x158] sm:$0xff] }
 0x722   : > { %6398 = vmatpush1.msra.mxu1 %v6222_v21 }
 0x78c   : > { %v8194_v11 = vpop.f32.mrf.mxu1 }
 0x78d   : > { %v5899_v19 = vadd.f32 %v8194_v11, %v11880_v57  ;;  %v6260_v11 = vld [vmem:[%s12570_s10 + $0x150] sm:$0xff] }
 0x78e   : > { %v5893_v6 = vpop.f32.mrf.mxu1 }
 0x78f   : > { %v5894_v30 = vadd.f32 %v5893_v6, %v11880_v57  ;;  %v5973_v62 = vmax.f32 %v5899_v19, 0.0  ;;  %v6257_v19 = vld [vmem:[%s12570_s10 + $0x138] sm:$0xff] }
 0x791   : > { %v5972_v26 = vmax.f32 %v5894_v30, 0.0 }
 0x793   : > { %8224 = vmatprep.mubr.msk.f32.mxu0 %vm5778_vm0, %v5972_v26  ;;  %v6256_v26 = vld [vmem:[%s12570_s10 + $0x130] sm:$0xff] }
 0x794   : > { %8225 = vmatmul.mubr.msk.f32.vlgmr.msra.gmra.mxu0 %vm5778_vm0, %v5973_v62 }
 0x795   : > { %v8197_v18 = vpop.f32.mrf.mxu1  ;;  %6531 = vmatpush1.msra.mxu0 %v6280_v1  ;;  %v6253_v1 = vld [vmem:[%s12570_s10 + $0x118] sm:$0xff] }
 0x796   : > { %6532 = vmatprep.subr.mxu0 %v6277_v44  ;;  %v5909_v20 = vadd.f32 %v8197_v18, %v11880_v57  ;;  %v6252_v44 = vld [vmem:[%s12570_s10 + $0x110] sm:$0xff]  ;;  %v6249_v18 = vld [vmem:[%s12570_s10 + $0xf8] sm:$0xff] }
 0x797   : > { %v5903_v55 = vpop.f32.mrf.mxu1  ;;  %6533 = vmatpush1.msra.mxu0 %v6276_v61 }
 0x798   : > { %v5904_v34 = vadd.f32 %v5903_v55, %v11880_v57  ;;  %6534 = vmatprep.subr.mxu0 %v6273_v37  ;;  %v5975_v54 = vmax.f32 %v5909_v20, 0.0  ;;  %v6245_v20 = vld [vmem:[%s12570_s10 + $0xd8] sm:$0xff] }
 0x799   : > { %6535 = vmatpush1.msra.mxu0 %v6272_v31  ;;  %v6248_v31 = vld [vmem:[%s12570_s10 + $0xf0] sm:$0xff] }
 0x79a   : > { %v5974_v16 = vmax.f32 %v5904_v34, 0.0  ;;  %6536 = vmatprep.subr.mxu0 %v6269_v50  ;;  %v6244_v50 = vld [vmem:[%s12570_s10 + $0xd0] sm:$0xff]  ;;  %v6241_v34 = vld [vmem:[%s12570_s10 + $0xb8] sm:$0xff] }
 0x79b   : > { %6537 = vmatpush1.msra.mxu0 %v6268_v53 }
 0x79c   : > { %8227 = vmatprep.mubr.msk.f32.mxu0 %vm5778_vm0, %v5974_v16  ;;  %6538 = vmatprep.subr.mxu0 %v6265_v48  ;;  %v6240_v16 = vld [vmem:[%s12570_s10 + $0xb0] sm:$0xff] }
 0x79d   : > { %v8200_v21 = vpop.f32.mrf.mxu1  ;;  %8228 = vmatmul.mubr.msk.f32.gmra.mxu0 %vm5778_vm0, %v5975_v54 }
 0x79e   : > { %6539 = vmatpush1.msra.mxu0 %v6264_v7  ;;  %v5919_v6 = vadd.f32 %v8200_v21, %v11880_v57  ;;  %v6237_v7 = vld [vmem:[%s12570_s10 + $0x98] sm:$0xff] }
 0x79f   : > { %v5913_v30 = vpop.f32.mrf.mxu1  ;;  %6540 = vmatprep.subr.mxu0 %v6261_v58  ;;  %v6236_v58 = vld [vmem:[%s12570_s10 + $0x90] sm:$0xff] }
 0x7a0   : > { %v5914_v62 = vadd.f32 %v5913_v30, %v11880_v57  ;;  %6541 = vmatpush1.msra.mxu0 %v6260_v11  ;;  %v5977_v37 = vmax.f32 %v5919_v6, 0.0  ;;  %v6233_v11 = vld [vmem:[%s12570_s10 + $0x78] sm:$0xff]  ;;  %v6232_v6 = vld [vmem:[%s12570_s10 + $0x70] sm:$0xff] }
 0x7a1   : > { %6542 = vmatprep.subr.mxu0 %v6257_v19  ;;  %v6229_v30 = vld [vmem:[%s12570_s10 + $0x58] sm:$0xff] }
 0x7a2   : > { %v5976_v61 = vmax.f32 %v5914_v62, 0.0  ;;  %6543 = vmatpush1.msra.mxu0 %v6256_v26  ;;  %v6228_v26 = vld [vmem:[%s12570_s10 + $0x50] sm:$0xff]  ;;  %v6225_v62 = vld [vmem:[%s12570_s10 + $0x38] sm:$0xff] }
 0x7a3   : > { %6544 = vmatprep.subr.mxu0 %v6253_v1  ;;  %v6224_v1 = vld [vmem:[%s12570_s10 + $0x30] sm:$0xff] }
 0x7a4   : > { %8230 = vmatprep.mubr.msk.f32.mxu0 %vm5778_vm0, %v5976_v61  ;;  %6545 = vmatpush1.msra.mxu0 %v6252_v44 }
 0x7a5   : > { %v8203_v55 = vpop.f32.mrf.mxu1  ;;  %8231 = vmatmul.mubr.msk.f32.gmra.mxu0 %vm5778_vm0, %v5977_v37  ;;  %6546 = vmatprep.subr.mxu0 %v6249_v18 }
 0x7a6   : > { %6547 = vmatpush1.msra.mxu0 %v6248_v31  ;;  %v5929_v53 = vadd.f32 %v8203_v55, %v11880_v57 }
 0x7a7   : > { %v5923_v48 = vpop.f32.mrf.mxu1  ;;  %6548 = vmatprep.subr.mxu0 %v6245_v20 }
 0x7a8   : > { %v5924_v54 = vadd.f32 %v5923_v48, %v11880_v57  ;;  %6549 = vmatpush1.msra.mxu0 %v6244_v50  ;;  %v5979_v19 = vmax.f32 %v5929_v53, 0.0 }
 0x7a9   : > { %6550 = vmatprep.subr.mxu0 %v6241_v34 }
 0x7aa   : > { %v5978_v21 = vmax.f32 %v5924_v54, 0.0  ;;  %6551 = vmatpush1.msra.mxu0 %v6240_v16 }
 0x7ab   : > { %6552 = vmatprep.subr.mxu0 %v6237_v7 }
 0x7ac   : > { %8233 = vmatprep.mubr.msk.f32.mxu0 %vm5778_vm0, %v5978_v21  ;;  %6553 = vmatpush1.msra.mxu0 %v6236_v58 }
 0x7ad   : > { %8234 = vmatmul.mubr.msk.f32.gmra.mxu0 %vm5778_vm0, %v5979_v19  ;;  %6554 = vmatprep.subr.mxu0 %v6233_v11 }
 0x7ae   : > { %6555 = vmatpush1.msra.mxu0 %v6232_v6 }
 0x7af   : > { %6556 = vmatprep.subr.mxu0 %v6229_v30 }
 0x7b0   : > { %6557 = vmatpush1.msra.mxu0 %v6228_v26 }
 0x7b1   : > { %6558 = vmatprep.subr.mxu0 %v6225_v62 }
 0x7b2   : > { %6559 = vmatpush1.msra.mxu0 %v6224_v1  ;;  %v6219_v1 = vld [vmem:[%s12570_s10 + $0x8] sm:$0xff] }
 0x7b3   : > { %6399 = vmatprep.subr.mxu1 %v6219_v1 }
 0x7c7   : > { %v8206_v44 = vpop.f32.mrf.mxu1 }
 0x7c8   : > { %v5939_v61 = vadd.f32 %v8206_v44, %v11880_v57  ;;  %v6221_v44 = vld [vmem:[%s12570_s10 + $0x18] sm:$0xff] }
 0x7c9   : > { %v5933_v18 = vpop.f32.mrf.mxu1  ;;  %6560 = vmatprep.subr.mxu0 %v6221_v44 }
 0x7ca   : > { %v5934_v37 = vadd.f32 %v5933_v18, %v11880_v57  ;;  %v5981_v55 = vmax.f32 %v5939_v61, 0.0  ;;  %v6218_v61 = vld [vmem:[%s12570_s10] sm:$0xff] }
 0x7cb   : > { %v8209_v31 = vpop.f32.mrf.mxu1  ;;  %6400 = vmatpush1.msra.mxu1 %v6218_v61 }
 0x7cc   : > { %v5980_v20 = vmax.f32 %v5934_v37, 0.0  ;;  %v5949_v50 = vadd.f32 %v8209_v31, %v11880_v57  ;;  %v6295_v37 = vld [vmem:[%s12570_s10 + $0x268] sm:$0xff]  ;;  %v6297_v31 = vld [vmem:[%s12570_s10 + $0x278] sm:$0xff] }
 0x7cd   : > { %v5943_v34 = vpop.f32.mrf.mxu1  ;;  %6425 = vmatprep.subr.mxu1 %v6295_v37 }
 0x7ce   : > { %v5944_v53 = vadd.f32 %v5943_v34, %v11880_v57  ;;  %8236 = vmatprep.mubr.msk.f32.mxu0 %vm5778_vm0, %v5980_v20  ;;  %v5983_v54 = vmax.f32 %v5949_v50, 0.0  ;;  %v6296_v50 = vld [vmem:[%s12570_s10 + $0x270] sm:$0xff]  ;;  %v6291_v34 = vld [vmem:[%s12570_s10 + $0x248] sm:$0xff] }
 0x7cf   : > { %v8212_v48 = vpop.f32.mrf.mxu1  ;;  %8237 = vmatmul.mubr.msk.f32.gmra.mxu0 %vm5778_vm0, %v5981_v55  ;;  %v6294_v55 = vld [vmem:[%s12570_s10 + $0x260] sm:$0xff] }
 0x7d0   : > { %v5982_v16 = vmax.f32 %v5944_v53, 0.0  ;;  %v5959_v7 = vadd.f32 %v8212_v48, %v11880_v57  ;;  %v6293_v53 = vld [vmem:[%s12570_s10 + $0x258] sm:$0xff]  ;;  %6426 = vmatpush2.msra.mxu1 %v6294_v55  ;;  %v6290_v48 = vld [vmem:[%s12570_s10 + $0x240] sm:$0xff] }
 0x7d1   : > { %v5953_v58 = vpop.f32.mrf.mxu1  ;;  %6427 = vmatprep.subr.mxu1 %v6291_v34  ;;  %v12096_v34 = vld [vmem:[%s9187_s25 + $0x8] sm:$0xff] }
 0x7d2   : > { %v5954_v21 = vadd.f32 %v5953_v58, %v11880_v57  ;;  %8239 = vmatprep.mubr.msk.f32.mxu0 %vm5778_vm0, %v5982_v16  ;;  %v5985_v6 = vmax.f32 %v5959_v7, 0.0  ;;  %v6292_v16 = vld [vmem:[%s12570_s10 + $0x250] sm:$0xff]  ;;  %v6289_v7 = vld [vmem:[%s12570_s10 + $0x238] sm:$0xff]  ;;  %v6286_v58 = vld [vmem:[%s12570_s10 + $0x220] sm:$0xff]  ;;  %6428 = vmatpush2.msra.mxu1 %v6290_v48 }
 0x7d3   : > { %v8215_v11 = vpop.f32.mrf.mxu1  ;;  %8240 = vmatmul.mubr.msk.f32.gmra.mxu0 %vm5778_vm0, %v5983_v54  ;;  %v6287_v54 = vld [vmem:[%s12570_s10 + $0x228] sm:$0xff] }
 0x7d4   : > { %v5984_v19 = vmax.f32 %v5954_v21, 0.0  ;;  %v5969_v30 = vadd.f32 %v8215_v11, %v11880_v57  ;;  %v6288_v21 = vld [vmem:[%s12570_s10 + $0x230] sm:$0xff]  ;;  %6429 = vmatprep.subr.mxu1 %v6287_v54  ;;  %v6283_v11 = vld [vmem:[%s12570_s10 + $0x208] sm:$0xff] }
 0x7d5   : > { %v5963_v26 = vpop.f32.mrf.mxu1  ;;  %6430 = vmatpush2.msra.mxu1 %v6286_v58  ;;  %v12124_v58 = vld [vmem:[%s9187_s25 + $0x18] sm:$0xff] }
 0x7d6   : > { %v5964_v62 = vadd.f32 %v5963_v26, %v11880_v57  ;;  %8242 = vmatprep.mubr.msk.f32.mxu0 %vm5778_vm0, %v5984_v19  ;;  %v6220_v57 = vld [vmem:[%s12570_s10 + $0x10] sm:$0xff]  ;;  %v5987_v20 = vmax.f32 %v5969_v30, 0.0  ;;  %v6285_v19 = vld [vmem:[%s12570_s10 + $0x218] sm:$0xff]  ;;  %6431 = vmatprep.subr.mxu1 %v6283_v11  ;;  %v12064_v26 = vld [vmem:[%s12571_s11 + $0x40] ss:$0 sm:$0xff] }
 0x7d7   : > { %8243 = vmatmul.mubr.msk.f32.gmra.mxu0 %vm5778_vm0, %v5985_v6  ;;  %v6282_v6 = vld [vmem:[%s12570_s10 + $0x200] sm:$0xff]  ;;  %v6284_v30 = vld [vmem:[%s12570_s10 + $0x210] sm:$0xff] }
 0x7d8   : > { %v5986_v18 = vmax.f32 %v5964_v62, 0.0  ;;  %6561 = vmatpush1.msra.mxu0 %v6220_v57  ;;  %6432 = vmatpush2.msra.mxu1 %v6282_v6 }
 0x7d9   : > { %6586 = vmatprep.subr.mxu0 %v6297_v31 }
 0x7da   : > { %8245 = vmatprep.mubr.msk.f32.mxu0 %vm5778_vm0, %v5986_v18  ;;  %6587 = vmatpush2.msra.mxu0 %v6296_v50  ;;  %v12082_v50 = vld [vmem:[%s9187_s25] sm:$0xff] }
 0x7db   : > { %8246 = vmatmul.mubr.msk.f32.gmra.mxu0 %vm5778_vm0, %v5987_v20  ;;  %6588 = vmatprep.subr.mxu0 %v6293_v53 }
 0x7dc   : > { %6589 = vmatpush2.msra.mxu0 %v6292_v16 }
 0x7dd   : > { %6590 = vmatprep.subr.mxu0 %v6289_v7 }
 0x7de   : > { %6591 = vmatpush2.msra.mxu0 %v6288_v21 }
 0x7df   : > { %6592 = vmatprep.subr.mxu0 %v6285_v19 }
 0x7e0   : > { %6593 = vmatpush2.msra.mxu0 %v6284_v30 }
 0x854   : > { %v8226_v62 = vpop.f32.mrf.mxu0 }
 0x855   : > { %v6113_v1 = vadd.f32 %v8226_v62, %v12064_v26  ;;  %v12152_v62 = vld [vmem:[%s9187_s25 + $0x28] sm:$0xff] }
 0x856   : > { %v6107_v44 = vpop.f32.mrf.mxu0 }
 0x857   : > { %v6108_v61 = vadd.f32 %v6107_v44, %v12064_v26  ;;  %v6187_v57 = vadd.f32 %v6113_v1, %v5758_v3 }
 0x859   : > { %v6186_v18 = vadd.f32 %v6108_v61, %v5757_v56  ;;  %v12074_v31 = vmax.f32 %v6187_v57, 0.0 }
 0x85b   : > { %v12072_v37 = vmax.f32 %v6186_v18, 0.0 }
 0x85d   : > { %v8229_v20 = vpop.f32.mrf.mxu0  ;;  %7846 = vmatprep.mubr.msk.f32.mxu1 %vm5778_vm0, %v12072_v37  ;;  %7862 = vmatprep.mubr.msk.f32.mxu0 %vm5778_vm0, %v12072_v37 }
 0x85e   : > { %v6123_v55 = vadd.f32 %v8229_v20, %v12064_v26  ;;  %6434 = vmatmul.mubr.f32.vlgmr.msra.gmra.mxu1 %v12082_v50  ;;  %6595 = vmatmul.mubr.f32.vlgmr.msra.gmra.mxu0 %v12082_v50 }
 0x85f   : > { %v6117_v10 = vpop.f32.mrf.mxu0  ;;  %7847 = vmatprep.mubr.msk.f32.mxu1 %vm5778_vm0, %v12074_v31  ;;  %7863 = vmatprep.mubr.msk.f32.mxu0 %vm5778_vm0, %v12074_v31 }
 0x860   : > { %v6118_v56 = vadd.f32 %v6117_v10, %v12064_v26  ;;  %v6189_v15 = vadd.f32 %v6123_v55, %v5760_v12 }
 0x862   : > { %v6188_v3 = vadd.f32 %v6118_v56, %v5759_v29  ;;  %6440 = vmatmul.mubr.f32.gmra.mxu1 %v12096_v34  ;;  %6601 = vmatmul.mubr.f32.gmra.mxu0 %v12096_v34  ;;  %v12102_v16 = vmax.f32 %v6189_v15, 0.0  ;;  %v12110_v29 = vld [vmem:[%s9187_s25 + $0x10] sm:$0xff] }
 0x864   : > { %v12100_v53 = vmax.f32 %v6188_v3, 0.0 }
 0x865   : > { %v8232_v48 = vpop.f32.mrf.mxu0 }
 0x866   : > { %v6133_v54 = vadd.f32 %v8232_v48, %v12064_v26  ;;  %7848 = vmatprep.mubr.msk.f32.mxu1 %vm5778_vm0, %v12100_v53  ;;  %7864 = vmatprep.mubr.msk.f32.mxu0 %vm5778_vm0, %v12100_v53 }
 0x867   : > { %v6127_v17 = vpop.f32.mrf.mxu0  ;;  %6446 = vmatmul.mubr.f32.gmra.mxu1 %v12110_v29  ;;  %6607 = vmatmul.mubr.f32.gmra.mxu0 %v12110_v29 }
 0x868   : > { %v6128_v22 = vadd.f32 %v6127_v17, %v12064_v26  ;;  %7849 = vmatprep.mubr.msk.f32.mxu1 %vm5778_vm0, %v12102_v16  ;;  %7865 = vmatprep.mubr.msk.f32.mxu0 %vm5778_vm0, %v12102_v16  ;;  %v6191_v12 = vadd.f32 %v6133_v54, %v5762_v40 }
 0x86a   : > { %v6190_v7 = vadd.f32 %v6128_v22, %v5761_v25  ;;  %v12130_v19 = vmax.f32 %v6191_v12, 0.0  ;;  %v12138_v25 = vld [vmem:[%s9187_s25 + $0x20] sm:$0xff] }
 0x86b   : > { %6452 = vmatmul.mubr.f32.gmra.mxu1 %v12124_v58  ;;  %6613 = vmatmul.mubr.f32.gmra.mxu0 %v12124_v58 }
 0x86c   : > { %v12128_v21 = vmax.f32 %v6190_v7, 0.0 }
 0x86d   : > { %v8235_v11 = vpop.f32.mrf.mxu0 }
 0x86e   : > { %v6143_v6 = vadd.f32 %v8235_v11, %v12064_v26  ;;  %7850 = vmatprep.mubr.msk.f32.mxu1 %vm5778_vm0, %v12128_v21  ;;  %7866 = vmatprep.mubr.msk.f32.mxu0 %vm5778_vm0, %v12128_v21 }
 0x86f   : > { %v6137_v47 = vpop.f32.mrf.mxu0  ;;  %6458 = vmatmul.mubr.f32.gmra.mxu1 %v12138_v25  ;;  %6619 = vmatmul.mubr.f32.gmra.mxu0 %v12138_v25 }
 0x870   : > { %v6138_v60 = vadd.f32 %v6137_v47, %v12064_v26  ;;  %7851 = vmatprep.mubr.msk.f32.mxu1 %vm5778_vm0, %v12130_v19  ;;  %7867 = vmatprep.mubr.msk.f32.mxu0 %vm5778_vm0, %v12130_v19  ;;  %v6193_v40 = vadd.f32 %v6143_v6, %v5764_v59  ;;  %v12756_v47 = vld [vmem:[#allocation15_spill] sm:$0xff] }
 0x872   : > { %v6192_v30 = vadd.f32 %v6138_v60, %v5763_v14  ;;  %v12158_v44 = vmax.f32 %v6193_v40, 0.0 }
 0x873   : > { %6464 = vmatmul.mubr.f32.gmra.mxu1 %v12152_v62  ;;  %6625 = vmatmul.mubr.f32.gmra.mxu0 %v12152_v62 }
 0x874   : > { %v12156_v1 = vmax.f32 %v6192_v30, 0.0 }
 0x876   : > { %7852 = vmatprep.mubr.msk.f32.mxu1 %vm5778_vm0, %v12156_v1  ;;  %7868 = vmatprep.mubr.msk.f32.mxu0 %vm5778_vm0, %v12156_v1 }
 0x877   : > { %6470 = vmatmul.mubr.f32.gmra.mxu1 %v12165_v24  ;;  %6631 = vmatmul.mubr.f32.gmra.mxu0 %v12165_v24 }
 0x878   : > { %7853 = vmatprep.mubr.msk.f32.mxu1 %vm5778_vm0, %v12158_v44  ;;  %7869 = vmatprep.mubr.msk.f32.mxu0 %vm5778_vm0, %v12158_v44 }
 0x87b   : > { %6476 = vmatmul.mubr.f32.gmra.mxu1 %v12174_v8  ;;  %6637 = vmatmul.mubr.f32.gmra.mxu0 %v12174_v8 }
 0x88f   : > { %v8238_v14 = vpop.f32.mrf.mxu0 }
 0x890   : > { %v6153_v59 = vadd.f32 %v8238_v14, %v12064_v26 }
 0x891   : > { %v6147_v61 = vpop.f32.mrf.mxu0 }
 0x892   : > { %v6148_v57 = vadd.f32 %v6147_v61, %v12064_v26  ;;  %v6195_v20 = vadd.f32 %v6153_v59, %v5766_v63 }
 0x893   : > { %v8241_v18 = vpop.f32.mrf.mxu0 }
 0x894   : > { %v6194_v55 = vadd.f32 %v6148_v57, %v5765_v36  ;;  %v12187_v48 = vmax.f32 %v6195_v20, 0.0  ;;  %v6163_v54 = vadd.f32 %v8241_v18, %v12064_v26 }
 0x895   : > { %v6157_v10 = vpop.f32.mrf.mxu0 }
 0x896   : > { %v12184_v56 = vmax.f32 %v6194_v55, 0.0  ;;  %v6158_v15 = vadd.f32 %v6157_v10, %v12064_v26  ;;  %v6197_v33 = vadd.f32 %v6163_v54, %v5768_v42 }
 0x897   : > { %v8244_v3 = vpop.f32.mrf.mxu0 }
 0x898   : > { %v6196_v17 = vadd.f32 %v6158_v15, %v5767_v49  ;;  %7854 = vmatprep.mubr.msk.f32.mxu1 %vm5778_vm0, %v12184_v56  ;;  %7870 = vmatprep.mubr.msk.f32.mxu0 %vm5778_vm0, %v12184_v56  ;;  %v6173_v28 = vadd.f32 %v8244_v3, %v12064_v26 }
 0x899   : > { %v6167_v23 = vpop.f32.mrf.mxu0  ;;  %6482 = vmatmul.mubr.f32.gmra.mxu1 %v11624_v13  ;;  %6643 = vmatmul.mubr.f32.gmra.mxu0 %v11624_v13  ;;  %v12213_v13 = vmax.f32 %v6197_v33, 0.0 }
 0x89a   : > { %7855 = vmatprep.mubr.msk.f32.mxu1 %vm5778_vm0, %v12187_v48  ;;  %7871 = vmatprep.mubr.msk.f32.mxu0 %vm5778_vm0, %v12187_v48  ;;  %v12204_v36 = vmax.f32 %v6196_v17, 0.0  ;;  %v6168_v63 = vadd.f32 %v6167_v23, %v12064_v26 }
 0x89b   : > { %v8247_v38 = vpop.f32.mrf.mxu0 }
 0x89c   : > { %v6198_v49 = vadd.f32 %v6168_v63, %v5769_v5  ;;  %v6183_v52 = vadd.f32 %v8247_v38, %v12064_v26 }
 0x89d   : > { %6488 = vmatmul.mubr.f32.gmra.mxu1 %v11628_v51  ;;  %6649 = vmatmul.mubr.f32.gmra.mxu0 %v11628_v51  ;;  %v6177_v42 = vpop.f32.mrf.mxu0  ;;  %v6199_v51 = vadd.f32 %v6173_v28, %v5770_v0  ;;  %v12753_v0 = vld [vmem:[#allocation14_spill] sm:$0xff] }
 0x89e   : > { %7856 = vmatprep.mubr.msk.f32.mxu1 %vm5778_vm0, %v12204_v36  ;;  %7872 = vmatprep.mubr.msk.f32.mxu0 %vm5778_vm0, %v12204_v36  ;;  %v12226_v22 = vmax.f32 %v6198_v49, 0.0  ;;  %v6178_v12 = vadd.f32 %v6177_v42, %v12064_v26 }
 0x8a0   : > { %v6200_v27 = vadd.f32 %v6178_v12, %v5771_v4 }
 0x8a1   : > { %6494 = vmatmul.mubr.f32.gmra.mxu1 %v11632_v45  ;;  %6655 = vmatmul.mubr.f32.gmra.mxu0 %v11632_v45  ;;  %v12235_v45 = vmax.f32 %v6199_v51, 0.0 }
 0x8a2   : > { %7857 = vmatprep.mubr.msk.f32.mxu1 %vm5778_vm0, %v12213_v13  ;;  %7873 = vmatprep.mubr.msk.f32.mxu0 %vm5778_vm0, %v12213_v13  ;;  %v12248_v5 = vmax.f32 %v6200_v27, 0.0 }
 0x8a5   : > { %6500 = vmatmul.mubr.f32.gmra.mxu1 %v11636_v39  ;;  %6661 = vmatmul.mubr.f32.gmra.mxu0 %v11636_v39  ;;  %v6201_v39 = vadd.f32 %v6183_v52, %v5772_v9 }
 0x8a6   : > { %7858 = vmatprep.mubr.msk.f32.mxu1 %vm5778_vm0, %v12226_v22  ;;  %7874 = vmatprep.mubr.msk.f32.mxu0 %vm5778_vm0, %v12226_v22 }
 0x8a9   : > { %6506 = vmatmul.mubr.f32.gmra.mxu1 %v11640_v43  ;;  %6667 = vmatmul.mubr.f32.gmra.mxu0 %v11640_v43  ;;  %v12256_v43 = vmax.f32 %v6201_v39, 0.0 }
 0x8aa   : > { %7859 = vmatprep.mubr.msk.f32.mxu1 %vm5778_vm0, %v12235_v45  ;;  %7875 = vmatprep.mubr.msk.f32.mxu0 %vm5778_vm0, %v12235_v45 }
 0x8ad   : > { %6512 = vmatmul.mubr.f32.gmra.mxu1 %v11647_v35  ;;  %6673 = vmatmul.mubr.f32.gmra.mxu0 %v11647_v35  ;;  %v7845_v35 = vld [vmem:[%s12571_s11 + $0x41] ss:$8 sm:$0xf] }
 0x8ae   : > { %7860 = vmatprep.mubr.msk.f32.mxu1 %vm5778_vm0, %v12248_v5  ;;  %7876 = vmatprep.mubr.msk.f32.mxu0 %vm5778_vm0, %v12248_v5  ;;  %v12270_v41 = vrot.slane %v7845_v35, %v12753_v0  ;;  %v12273_v4 = vrot.slane %v7845_v35, %v12754_v2 }
 0x8b1   : > { %6518 = vmatmul.mubr.f32.gmra.mxu1 %v11651_v46  ;;  %6679 = vmatmul.mubr.f32.gmra.mxu0 %v11651_v46  ;;  %v12755_v46 = vld [vmem:[#allocation16_spill] sm:$0xff] }
 0x8b2   : > { %7861 = vmatprep.mubr.msk.f32.mxu1 %vm5778_vm0, %v12256_v43  ;;  %7877 = vmatprep.mubr.msk.f32.mxu0 %vm5778_vm0, %v12256_v43  ;;  %v12276_v9 = vrot.slane %v7845_v35, %v12755_v46 }
 0x8b5   : > { %6524 = vmatmul.mubr.f32.gmra.mxu1 %v11661_v32  ;;  %6685 = vmatmul.mubr.f32.gmra.mxu0 %v11661_v32  ;;  %v12280_v32 = vrot.slane %v7845_v35, %v12756_v47 }
 0x91e   : > { %v6435_v26 = vpop.f32.mrf.mxu1  ;;  %v6596_v7 = vpop.f32.mrf.mxu0 }
 0x91f   : > { %v6436_v11 = vadd.f32 %v6435_v26, %v12270_v41  ;;  %v6597_v10 = vadd.f32 %v6596_v7, %v12280_v32 }
 0x920   : > { %v6437_v6 = vpop.f32.mrf.mxu1  ;;  %v6598_v60 = vpop.f32.mrf.mxu0 }
 0x921   : > { %v7878_v40 = vmul.f32 -1.442695, %v6436_v11  ;;  %v6438_v30 = vadd.f32 %v6437_v6, %v12273_v4  ;;  %v6599_v14 = vadd.f32 %v6598_v60, %v12276_v9 }
 0x922   : > { %v6441_v59 = vpop.f32.mrf.mxu1  ;;  %v6602_v61 = vpop.f32.mrf.mxu0 }
 0x923   : > { %8586 = vpow2.f32 %v7878_v40  ;;  %v7894_v57 = vmul.f32 -1.442695, %v6438_v30  ;;  %v6442_v18 = vadd.f32 %v6441_v59, %v12270_v41  ;;  %v7910_v20 = vmul.f32 -1.442695, %v6599_v14 }
 0x924   : > { %v6443_v55 = vpop.f32.mrf.mxu1  ;;  %v6604_v15 = vpop.f32.mrf.mxu0  ;;  %v6603_v23 = vadd.f32 %v6602_v61, %v12280_v32 }
 0x925   : > { %8588 = vpow2.f32 %v7894_v57  ;;  %v7879_v3 = vmul.f32 -1.442695, %v6442_v18  ;;  %v6444_v54 = vadd.f32 %v6443_v55, %v12273_v4  ;;  %v6605_v17 = vadd.f32 %v6604_v15, %v12276_v9 }
 0x926   : > { %8590 = vpow2.f32 %v7910_v20 }
 0x927   : > { %8592 = vpow2.f32 %v7879_v3  ;;  %v7895_v33 = vmul.f32 -1.442695, %v6444_v54  ;;  %v6447_v63 = vpop.f32.mrf.mxu1  ;;  %v7911_v38 = vmul.f32 -1.442695, %v6605_v17  ;;  %v6608_v28 = vpop.f32.mrf.mxu0 }
 0x928   : > { %v6448_v49 = vadd.f32 %v6447_v63, %v12270_v41  ;;  %8594 = vtanh.f32 %v6597_v10  ;;  %v6609_v51 = vadd.f32 %v6608_v28, %v12280_v32 }
 0x929   : > { %8596 = vpow2.f32 %v7895_v33  ;;  %v6449_v42 = vpop.f32.mrf.mxu1  ;;  %v6610_v12 = vpop.f32.mrf.mxu0 }
 0x92a   : > { %v7880_v52 = vmul.f32 -1.442695, %v6448_v49  ;;  %v6450_v27 = vadd.f32 %v6449_v42, %v12273_v4  ;;  %8598 = vtanh.f32 %v6603_v23  ;;  %v6611_v39 = vadd.f32 %v6610_v12, %v12276_v9 }
 0x92b   : > { %v6453_v35 = vpop.f32.mrf.mxu1  ;;  %8600 = vpow2.f32 %v7911_v38  ;;  %v6614_v0 = vpop.f32.mrf.mxu0 }
 0x92c   : > { %8602 = vpow2.f32 %v7880_v52  ;;  %v7896_v2 = vmul.f32 -1.442695, %v6450_v27  ;;  %v6454_v46 = vadd.f32 %v6453_v35, %v12270_v41  ;;  %v7912_v26 = vmul.f32 -1.442695, %v6611_v39 }
 0x92d   : > { %v6455_v7 = vpop.f32.mrf.mxu1  ;;  %8604 = vtanh.f32 %v6609_v51  ;;  %v6615_v11 = vadd.f32 %v6614_v0, %v12280_v32  ;;  %v12295_v6 = vpop.f32.mrf.mxu0 }
 0x92e   : > { %8606 = vpow2.f32 %v7896_v2  ;;  %v7881_v47 = vmul.f32 -1.442695, %v6454_v46  ;;  %v6456_v60 = vadd.f32 %v6455_v7, %v12273_v4 }
 0x92f   : > { %v6459_v40 = vpop.f32.mrf.mxu1  ;;  %8608 = vpow2.f32 %v7912_v26  ;;  %v12298_v30 = vpop.f32.mrf.mxu0 }
 0x930   : > { %v8587_v14 = vpop.eup %8586  ;;  %8610 = vpow2.f32 %v7881_v47  ;;  %v7897_v59 = vmul.f32 -1.442695, %v6456_v60  ;;  %v6460_v61 = vadd.f32 %v6459_v40, %v12270_v41 }
 0x931   : > { %v6739_v57 = vadd.f32 1.0, %v8587_v14  ;;  %v6461_v18 = vpop.f32.mrf.mxu1  ;;  %8612 = vtanh.f32 %v6615_v11  ;;  %v12302_v15 = vpop.f32.mrf.mxu0 }
 0x932   : > { %v8589_v20 = vpop.eup %8588  ;;  %8614 = vpow2.f32 %v7897_v59  ;;  %v7882_v55 = vmul.f32 -1.442695, %v6460_v61  ;;  %v6462_v10 = vadd.f32 %v6461_v18, %v12273_v4 }
 0x933   : > { %v8591_v3 = vpop.eup %8590  ;;  %8616 = vrcp.f32 %v6739_v57  ;;  %v6835_v54 = vadd.f32 1.0, %v8589_v20  ;;  %v6465_v17 = vpop.f32.mrf.mxu1 }
 0x934   : > { %v8593_v23 = vpop.eup %8592  ;;  %8618 = vpow2.f32 %v7882_v55  ;;  %v7898_v33 = vmul.f32 -1.442695, %v6462_v10  ;;  %v6466_v63 = vadd.f32 %v6465_v17, %v12270_v41  ;;  %v6947_v12 = vadd.f32 1.0, %v8591_v3  ;;  %v12306_v27 = vpop.f32.mrf.mxu0 }
 0x935   : > { %v8595_v38 = vpop.eup %8594  ;;  %8620 = vrcp.f32 %v6835_v54  ;;  %v6740_v28 = vadd.f32 1.0, %v8593_v23  ;;  %v6467_v49 = vpop.f32.mrf.mxu1 }
 0x936   : > { %v8597_v42 = vpop.eup %8596  ;;  %8622 = vpow2.f32 %v7898_v33  ;;  %v7883_v51 = vmul.f32 -1.442695, %v6466_v63  ;;  %v6468_v52 = vadd.f32 %v6467_v49, %v12273_v4  ;;  %v6628_v59 = vpop.f32.mrf.mxu0 }
 0x937   : > { %v8599_v39 = vpop.eup %8598  ;;  %8624 = vrcp.f32 %v6740_v28  ;;  %v6836_v35 = vadd.f32 1.0, %v8597_v42  ;;  %v6471_v0 = vpop.f32.mrf.mxu1 }
 0x938   : > { %v8601_v2 = vpop.eup %8600  ;;  %8626 = vpow2.f32 %v7883_v51  ;;  %v7899_v46 = vmul.f32 -1.442695, %v6468_v52  ;;  %v6472_v26 = vadd.f32 %v6471_v0, %v12270_v41  ;;  %v6632_v63 = vpop.f32.mrf.mxu0  ;;  %v6617_v0 = vadd.f32 %v12295_v6, %v12276_v9 }
 0x939   : > { %v8603_v7 = vpop.eup %8602  ;;  %8628 = vrcp.f32 %v6836_v35  ;;  %v6473_v11 = vpop.f32.mrf.mxu1  ;;  %v6948_v57 = vadd.f32 1.0, %v8601_v2 }
 0x93a   : > { %v12309_v47 = vpop.eup %8604  ;;  %v6741_v60 = vadd.f32 1.0, %v8603_v7  ;;  %8630 = vrcp.f32 %v6947_v12  ;;  %v7884_v40 = vmul.f32 -1.442695, %v6472_v26  ;;  %v6474_v14 = vadd.f32 %v6473_v11, %v12273_v4  ;;  %v6634_v7 = vpop.f32.mrf.mxu0 }
 0x93b   : > { %v8607_v61 = vpop.eup %8606  ;;  %8632 = vpow2.f32 %v7899_v46  ;;  %v6477_v18 = vpop.f32.mrf.mxu1 }
 0x93c   : > { %v8609_v20 = vpop.eup %8608  ;;  %8634 = vrcp.f32 %v6741_v60  ;;  %v6837_v55 = vadd.f32 1.0, %v8607_v61  ;;  %v6478_v10 = vadd.f32 %v6477_v18, %v12270_v41  ;;  %v7900_v54 = vmul.f32 -1.442695, %v6474_v14 }
 0x93d   : > { %v8611_v3 = vpop.eup %8610  ;;  %8636 = vpow2.f32 %v7884_v40  ;;  %v6479_v17 = vpop.f32.mrf.mxu1  ;;  %v6949_v35 = vadd.f32 1.0, %v8609_v20  ;;  %v7913_v20 = vmul.f32 -1.442695, %v6617_v0 }
 0x93e   : > { %v12313_v23 = vpop.eup %8612  ;;  %8638 = vrcp.f32 %v6837_v55  ;;  %v6742_v33 = vadd.f32 1.0, %v8611_v3  ;;  %v7885_v49 = vmul.f32 -1.442695, %v6478_v10  ;;  %v6480_v42 = vadd.f32 %v6479_v17, %v12273_v4 }
 0x93f   : > { %v8615_v28 = vpop.eup %8614  ;;  %8640 = vrcp.f32 %v6948_v57  ;;  %v6623_v57 = vadd.f32 %v12302_v15, %v12276_v9  ;;  %v6621_v3 = vadd.f32 %v12298_v30, %v12280_v32  ;;  %v6629_v17 = vadd.f32 %v6628_v59, %v12276_v9 }
 0x940   : > { %v8617_v51 = vpop.eup %8616  ;;  %8642 = vrcp.f32 %v6742_v33  ;;  %v6838_v12 = vadd.f32 1.0, %v8615_v28  ;;  %v7901_v60 = vmul.f32 -1.442695, %v6480_v42  ;;  %v6635_v59 = vadd.f32 %v6634_v7, %v12276_v9 }
 0x941   : > { %v8619_v52 = vpop.eup %8618  ;;  %8644 = vpow2.f32 %v7900_v54  ;;  %v7011_v2 = vmul.f32 %v8617_v51, %v8595_v38  ;;  %v6638_v54 = vpop.f32.mrf.mxu0  ;;  %v6627_v51 = vadd.f32 %v12306_v27, %v12280_v32  ;;  %v7915_v0 = vmul.f32 -1.442695, %v6629_v17 }
 0x942   : > { %v8621_v46 = vpop.eup %8620  ;;  %8646 = vrcp.f32 %v6838_v12  ;;  %v6743_v26 = vadd.f32 1.0, %v8619_v52 }
 0x943   : > { %v8623_v11 = vpop.eup %8622  ;;  %8648 = vpow2.f32 %v7885_v49  ;;  %v6995_v40 = vmul.f32 %v12082_v50, %v8621_v46  ;;  %v6640_v12 = vpop.f32.mrf.mxu0  ;;  %v6633_v46 = vadd.f32 %v6632_v63, %v12280_v32 }
 0x944   : > { %v8625_v14 = vpop.eup %8624  ;;  %8650 = vrcp.f32 %v6743_v26  ;;  %v6839_v61 = vadd.f32 1.0, %v8623_v11  ;;  %v6641_v27 = vadd.f32 %v6640_v12, %v12276_v9 }
 0x945   : > { %v8627_v18 = vpop.eup %8626  ;;  %8652 = vrcp.f32 %v6949_v35  ;;  %v12321_v6 = vadd.f32 %v7011_v2, %v6995_v40  ;;  %v7012_v38 = vmul.f32 %v8625_v14, %v8599_v39  ;;  %v7914_v39 = vmul.f32 -1.442695, %v6623_v57 }
 0x946   : > { %v8629_v55 = vpop.eup %8628  ;;  %8654 = vrcp.f32 %v6839_v61  ;;  %v6744_v10 = vadd.f32 1.0, %v8627_v18  ;;  %v6639_v18 = vadd.f32 %v6638_v54, %v12280_v32 }
 0x947   : > { %v12325_v50 = vpop.eup %8630  ;;  %8656 = vpow2.f32 %v7901_v60  ;;  %7155 = vrot.lane.b32.xlu0 %v12321_v6, %s9020_s30  ;;  %v6996_v15 = vmul.f32 %v12096_v34, %v8629_v55 }
 0x948   : > { %v8633_v33 = vpop.eup %8632  ;;  %8658 = vrcp.f32 %v6744_v10 }
 0x949   : > { %v8635_v28 = vpop.eup %8634  ;;  %v6840_v49 = vadd.f32 1.0, %v8633_v33  ;;  %8660 = vpow2.f32 %v7913_v20  ;;  %v7028_v42 = vadd.f32 %v7012_v38, %v6996_v15  ;;  %v7917_v38 = vmul.f32 -1.442695, %v6641_v27 }
 0x94a   : > { %v8637_v30 = vpop.eup %8636  ;;  %8662 = vtanh.f32 %v6621_v3  ;;  %v7013_v52 = vmul.f32 %v8635_v28, %v12309_v47  ;;  %v7916_v47 = vmul.f32 -1.442695, %v6635_v59 }
 0x94b   : > { %v8639_v35 = vpop.eup %8638  ;;  %8664 = vrcp.f32 %v6840_v49  ;;  %v6745_v34 = vadd.f32 1.0, %v8637_v30  ;;  %7157 = vrot.lane.b32.xlu1 %v7028_v42, %s9020_s30 }
 0x94c   : > { %v12336_v2 = vpop.eup %8640  ;;  %8666 = vpow2.f32 %v7914_v39  ;;  %v6997_v26 = vmul.f32 %v12110_v29, %v8639_v35 }
 0x94d   : > { %v8643_v11 = vpop.eup %8642  ;;  %8668 = vrcp.f32 %v6745_v34 }
 0x94e   : > { %v8645_v7 = vpop.eup %8644  ;;  %8670 = vtanh.f32 %v6627_v51  ;;  %v7029_v60 = vadd.f32 %v7013_v52, %v6997_v26  ;;  %v7014_v40 = vmul.f32 %v8643_v11, %v12313_v23 }
 0x94f   : > { %v8647_v14 = vpop.eup %8646  ;;  %v6841_v61 = vadd.f32 1.0, %v8645_v7  ;;  %8672 = vpow2.f32 %v7915_v0 }
 0x950   : > { %v8649_v57 = vpop.eup %8648  ;;  %8674 = vtanh.f32 %v6633_v46  ;;  %7159 = vrot.lane.b32.xlu0 %v7029_v60, %s9020_s30  ;;  %v6998_v29 = vmul.f32 %v12124_v58, %v8647_v14 }
 0x951   : > { %v8651_v63 = vpop.eup %8650  ;;  %8676 = vrcp.f32 %v6841_v61  ;;  %v6746_v20 = vadd.f32 1.0, %v8649_v57 }
 0x952   : > { %v12345_v55 = vpop.eup %8652  ;;  %8678 = vpow2.f32 %v7916_v47  ;;  %v7030_v10 = vadd.f32 %v7014_v40, %v6998_v29 }
 0x953   : > { %v8655_v23 = vpop.eup %8654  ;;  %8680 = vrcp.f32 %v6746_v20 }
 0x954   : > { %v8657_v3 = vpop.eup %8656  ;;  %8682 = vtanh.f32 %v6639_v18  ;;  %7161 = vrot.lane.b32.xlu1 %v7030_v10, %s9020_s30  ;;  %v6999_v58 = vmul.f32 %v12138_v25, %v8655_v23 }
 0x955   : > { %v8659_v17 = vpop.eup %8658  ;;  %v6842_v54 = vadd.f32 1.0, %v8657_v3  ;;  %8684 = vpow2.f32 %v7917_v38 }
 0x956   : > { %v8661_v15 = vpop.eup %8660  ;;  %8686 = vtanh.f32 %v12321_v6 }
 0x957   : > { %v8663_v33 = vpop.eup %8662  ;;  %8688 = vrcp.f32 %v6842_v54  ;;  %v6950_v39 = vadd.f32 1.0, %v8661_v15 }
 0x958   : > { %v8665_v28 = vpop.eup %8664  ;;  %8690 = vtanh.f32 %v7028_v42  ;;  %v7015_v30 = vmul.f32 %v8663_v33, %v8651_v63 }
 0x959   : > { %v6483_v49 = vpop.f32.mrf.mxu1  ;;  %v12350_v51 = vpop.f32.mrf.mxu0  ;;  %8692 = vrcp.f32 %v6950_v39  ;;  %v7000_v6 = vmul.f32 %v12152_v62, %v8665_v28 }
 0x95a   : > { %v8667_v59 = vpop.eup %8666  ;;  %v6484_v12 = vadd.f32 %v6483_v49, %v12270_v41  ;;  %8694 = vtanh.f32 %v7029_v60  ;;  %v12354_v25 = vadd.f32 %v7015_v30, %v6999_v58 }
 0x95b   : > { %v8669_v52 = vpop.eup %8668  ;;  %v6951_v35 = vadd.f32 1.0, %v8667_v59  ;;  %v6485_v34 = vpop.f32.mrf.mxu1  ;;  %8696 = vtanh.f32 %v7030_v10 }
 0x95c   : > { %v12356_v0 = vpop.f32.mrf.mxu0  ;;  %v8671_v46 = vpop.eup %8670  ;;  %v7886_v42 = vmul.f32 -1.442695, %v6484_v12  ;;  %v6486_v26 = vadd.f32 %v6485_v34, %v12273_v4 }
 0x95d   : > { %v8673_v11 = vpop.eup %8672  ;;  %8698 = vrcp.f32 %v6951_v35  ;;  %v6489_v27 = vpop.f32.mrf.mxu1  ;;  %v7016_v7 = vmul.f32 %v8671_v46, %v8659_v17 }
 0x95e   : > { %v12359_v47 = vpop.f32.mrf.mxu0  ;;  %v8675_v40 = vpop.eup %8674  ;;  %v6952_v60 = vadd.f32 1.0, %v8673_v11  ;;  %8700 = vpow2.f32 %v7886_v42  ;;  %v7902_v14 = vmul.f32 -1.442695, %v6486_v26  ;;  %v6490_v62 = vadd.f32 %v6489_v27, %v12270_v41 }
 0x95f   : > { %v8677_v61 = vpop.eup %8676  ;;  %v7032_v57 = vadd.f32 %v7016_v7, %v7000_v6  ;;  %8702 = vtanh.f32 %v12354_v25  ;;  %v6491_v18 = vpop.f32.mrf.mxu1  ;;  %v7017_v54 = vmul.f32 %v8675_v40, %v8669_v52 }
 0x960   : > { %v12363_v29 = vpop.f32.mrf.mxu0  ;;  %v8679_v63 = vpop.eup %8678  ;;  %8704 = vrcp.f32 %v6952_v60  ;;  %v7887_v20 = vmul.f32 -1.442695, %v6490_v62  ;;  %v6492_v38 = vadd.f32 %v6491_v18, %v12273_v4  ;;  %v7001_v17 = vmul.f32 %v12165_v24, %v8677_v61 }
 0x961   : > { %v8681_v10 = vpop.eup %8680  ;;  %v6953_v23 = vadd.f32 1.0, %v8679_v63  ;;  %8706 = vpow2.f32 %v7902_v14  ;;  %7165 = vrot.lane.b32.xlu1 %v7032_v57, %s9020_s30  ;;  %v6495_v3 = vpop.f32.mrf.mxu1 }
 0x962   : > { %v8683_v15 = vpop.eup %8682  ;;  %8708 = vpow2.f32 %v7887_v20  ;;  %v7903_v58 = vmul.f32 -1.442695, %v6492_v38  ;;  %v6496_v33 = vadd.f32 %v6495_v3, %v12270_v41  ;;  %v12369_v49 = vpop.f32.mrf.mxu0  ;;  %v12373_v6 = vadd.f32 %v7017_v54, %v7001_v17 }
 0x963   : > { %v8685_v39 = vpop.eup %8684  ;;  %8710 = vrcp.f32 %v6953_v23  ;;  %v6497_v28 = vpop.f32.mrf.mxu1  ;;  %v7018_v46 = vmul.f32 %v8683_v15, %v8681_v10  ;;  %v6647_v17 = vadd.f32 %v12356_v0, %v12276_v9 }
 0x964   : > { %v8687_v30 = vpop.eup %8686  ;;  %v6954_v59 = vadd.f32 1.0, %v8685_v39  ;;  %8712 = vtanh.f32 %v7032_v57  ;;  %v7888_v12 = vmul.f32 -1.442695, %v6496_v33  ;;  %v6498_v35 = vadd.f32 %v6497_v28, %v12273_v4  ;;  %v12380_v60 = vpop.f32.mrf.mxu0 }
 0x965   : > { %v8689_v34 = vpop.eup %8688  ;;  %v7059_v24 = vmul.f32 %v8687_v30, %v12325_v50  ;;  %8714 = vpow2.f32 %v7903_v58  ;;  %v6501_v52 = vpop.f32.mrf.mxu1  ;;  %v6645_v50 = vadd.f32 %v12350_v51, %v12280_v32  ;;  %v7918_v0 = vmul.f32 -1.442695, %v6647_v17 }
 0x966   : > { %v8691_v42 = vpop.eup %8690  ;;  %8716 = vrcp.f32 %v6954_v59  ;;  %v7904_v26 = vmul.f32 -1.442695, %v6498_v35  ;;  %v6502_v11 = vadd.f32 %v6501_v52, %v12270_v41  ;;  %v7002_v27 = vmul.f32 %v12174_v8, %v8689_v34  ;;  %v12392_v54 = vpop.f32.mrf.mxu0 }
 0x967   : > { %v8693_v7 = vpop.eup %8692  ;;  %7091 = vrot.lane.b32.xlu0 %v7059_v24, %s9021_s14  ;;  %8718 = vpow2.f32 %v7888_v12  ;;  %v6503_v40 = vpop.f32.mrf.mxu1  ;;  %v7060_v23 = vmul.f32 %v8691_v42, %v12336_v2 }
 0x968   : > { %v8695_v14 = vpop.eup %8694  ;;  %8720 = vpow2.f32 %v7904_v26  ;;  %v7889_v62 = vmul.f32 -1.442695, %v6502_v11  ;;  %v6504_v61 = vadd.f32 %v6503_v40, %v12273_v4  ;;  %v7034_v63 = vadd.f32 %v7018_v46, %v7002_v27  ;;  %v12398_v24 = vpop.f32.mrf.mxu0 }
 0x969   : > { %v8697_v57 = vpop.eup %8696  ;;  %v7061_v18 = vmul.f32 %v8695_v14, %v12345_v55  ;;  %8722 = vtanh.f32 %v12373_v6  ;;  %v6507_v8 = vpop.f32.mrf.mxu1  ;;  %v6651_v40 = vadd.f32 %v12359_v47, %v12280_v32 }
 0x96a   : > { %v8699_v20 = vpop.eup %8698  ;;  %8724 = vpow2.f32 %v7889_v62  ;;  %v7905_v38 = vmul.f32 -1.442695, %v6504_v61  ;;  %v6508_v10 = vadd.f32 %v6507_v8, %v12270_v41  ;;  %v7062_v3 = vmul.f32 %v8697_v57, %v8693_v7  ;;  %v12406_v57 = vpop.f32.mrf.mxu0 }
 0x96b   : > { %v8701_v51 = vpop.eup %8700  ;;  %7163 = vrot.lane.b32.xlu0 %v12354_v25, %s9020_s30  ;;  %7095 = vrot.lane.b32.xlu1 %v7061_v18, %s9021_s14  ;;  %8726 = vtanh.f32 %v6645_v50  ;;  %v6509_v55 = vpop.f32.mrf.mxu1  ;;  %v6653_v8 = vadd.f32 %v12363_v29, %v12276_v9 }
 0x96c   : > { %v8703_v15 = vpop.eup %8702  ;;  %v6747_v58 = vadd.f32 1.0, %v8701_v51  ;;  %8728 = vpow2.f32 %v7905_v38  ;;  %v7890_v33 = vmul.f32 -1.442695, %v6508_v10  ;;  %v6510_v39 = vadd.f32 %v6509_v55, %v12273_v4  ;;  %v6670_v55 = vpop.f32.mrf.mxu0 }
 0x96d   : > { %v8705_v28 = vpop.eup %8704  ;;  %8730 = vtanh.f32 %v7034_v63  ;;  %v6513_v25 = vpop.f32.mrf.mxu1  ;;  %v7063_v62 = vmul.f32 %v8703_v15, %v8699_v20  ;;  %v7919_v15 = vmul.f32 -1.442695, %v6653_v8 }
 0x96e   : > { %v8707_v30 = vpop.eup %8706  ;;  %8732 = vrcp.f32 %v6747_v58  ;;  %v7906_v2 = vmul.f32 -1.442695, %v6510_v39  ;;  %v6514_v59 = vadd.f32 %v6513_v25, %v12270_v41 }
 0x96f   : > { %v8709_v12 = vpop.eup %8708  ;;  %v6843_v35 = vadd.f32 1.0, %v8707_v30  ;;  %7093 = vrot.lane.b32.xlu0 %v7060_v23, %s9021_s14  ;;  %7097 = vrot.lane.b32.xlu1 %v7062_v3, %s9021_s14  ;;  %8734 = vpow2.f32 %v7890_v33  ;;  %v6515_v34 = vpop.f32.mrf.mxu1  ;;  %v6657_v30 = vadd.f32 %v12369_v49, %v12280_v32 }
 0x970   : > { %v8711_v52 = vpop.eup %8710  ;;  %v6748_v46 = vadd.f32 1.0, %v8709_v12  ;;  %8736 = vpow2.f32 %v7906_v2  ;;  %v7891_v42 = vmul.f32 -1.442695, %v6514_v59  ;;  %v6516_v11 = vadd.f32 %v6515_v34, %v12273_v4 }
 0x971   : > { %v8713_v26 = vpop.eup %8712  ;;  %8738 = vrcp.f32 %v6843_v35  ;;  %v6519_v27 = vpop.f32.mrf.mxu1  ;;  %v6659_v2 = vadd.f32 %v12380_v60, %v12276_v9 }
 0x972   : > { %v8715_v7 = vpop.eup %8714  ;;  %8740 = vrcp.f32 %v6748_v46  ;;  %v7064_v61 = vmul.f32 %v8713_v26, %v8705_v28  ;;  %v7907_v51 = vmul.f32 -1.442695, %v6516_v11  ;;  %v6520_v23 = vadd.f32 %v6519_v27, %v12270_v41 }
 0x973   : > { %v8717_v50 = vpop.eup %8716  ;;  %v6844_v14 = vadd.f32 1.0, %v8715_v7  ;;  %7167 = vrot.lane.b32.xlu0 %v12373_v6, %s9020_s30  ;;  %7169 = vrot.lane.b32.xlu1 %v7034_v63, %s9020_s30  ;;  %8742 = vpow2.f32 %v7918_v0  ;;  %v6521_v38 = vpop.f32.mrf.mxu1  ;;  %v7920_v27 = vmul.f32 -1.442695, %v6659_v2 }
 0x974   : > { %v8719_v18 = vpop.eup %8718  ;;  %8744 = vpow2.f32 %v7891_v42  ;;  %v7892_v39 = vmul.f32 -1.442695, %v6520_v23  ;;  %v6522_v28 = vadd.f32 %v6521_v38, %v12273_v4  ;;  %v12419_v0 = vpop.f32.mrf.mxu0 }
 0x975   : > { %v8721_v10 = vpop.eup %8720  ;;  %8746 = vrcp.f32 %v6844_v14  ;;  %v6749_v47 = vadd.f32 1.0, %v8719_v18  ;;  %v6525_v58 = vpop.f32.mrf.mxu1  ;;  %v8877_v14 = vld [vmem:[%s9187_s25 + $0x40] sm:$0xff] }
 0x976   : > { %v8723_v6 = vpop.eup %8722  ;;  %v6845_v3 = vadd.f32 1.0, %v8721_v10  ;;  %8748 = vtanh.f32 %v6651_v40  ;;  %v7908_v26 = vmul.f32 -1.442695, %v6522_v28  ;;  %v6526_v49 = vadd.f32 %v6525_v58, %v12270_v41 }
 0x977   : > { %v8725_v63 = vpop.eup %8724  ;;  %7099 = vrot.lane.b32.xlu0 %v7063_v62, %s9021_s14  ;;  %7101 = vrot.lane.b32.xlu1 %v7064_v61, %s9021_s14  ;;  %v7065_v20 = vmul.f32 %v8723_v6, %v8711_v52  ;;  %8750 = vrcp.f32 %v6749_v47  ;;  %v6527_v52 = vpop.f32.mrf.mxu1  ;;  %v6665_v6 = vadd.f32 %v12398_v24, %v12276_v9 }
 0x978   : > { %v8727_v17 = vpop.eup %8726  ;;  %v6750_v29 = vadd.f32 1.0, %v8725_v63  ;;  %8752 = vpow2.f32 %v7907_v51  ;;  %v6528_v40 = vadd.f32 %v6527_v52, %v12273_v4  ;;  %v7893_v41 = vmul.f32 -1.442695, %v6526_v49  ;;  %v8878_v63 = vld [vmem:[%s9187_s25 + $0x48] sm:$0xff] }
 0x979   : > { %v8729_v33 = vpop.eup %8728  ;;  %8754 = vrcp.f32 %v6845_v3  ;;  %v6663_v51 = vadd.f32 %v12392_v54, %v12280_v32 }
 0x97a   : > { %v8731_v25 = vpop.eup %8730  ;;  %8756 = vrcp.f32 %v6750_v29  ;;  %v6846_v12 = vadd.f32 1.0, %v8729_v33  ;;  %v7909_v4 = vmul.f32 -1.442695, %v6528_v40  ;;  %v6671_v29 = vadd.f32 %v6670_v55, %v12276_v9 }
 0x97b   : > { %v8733_v59 = vpop.eup %8732  ;;  %7103 = vrot.lane.b32.xlu0 %v7065_v20, %s9021_s14  ;;  %v7066_v35 = vmul.f32 %v8731_v25, %v8717_v50  ;;  %8758 = vpow2.f32 %v7919_v15  ;;  %v6676_v50 = vpop.f32.mrf.mxu0  ;;  %v6669_v33 = vadd.f32 %v12406_v57, %v12280_v32  ;;  %v7921_v25 = vmul.f32 -1.442695, %v6665_v6 }
 0x97c   : > { %v8735_v34 = vpop.eup %8734  ;;  %8760 = vpow2.f32 %v7892_v39  ;;  %v7019_v61 = vmul.f32 %v8733_v59, %v8727_v17  ;;  %v7922_v55 = vmul.f32 -1.442695, %v6671_v29  ;;  %v6675_v57 = vadd.f32 %v12419_v0, %v12280_v32 }
 0x97d   : > { %v8737_v46 = vpop.eup %8736  ;;  %v6751_v42 = vadd.f32 1.0, %v8735_v34  ;;  %7105 = vrot.lane.b32.xlu1 %v7066_v35, %s9021_s14  ;;  %8762 = vtanh.f32 %v6657_v30  ;;  %v6680_v3 = vpop.f32.mrf.mxu0  ;;  %v6677_v30 = vadd.f32 %v6676_v50, %v12276_v9  ;;  %v8879_v34 = vld [vmem:[%s9187_s25 + $0x50] sm:$0xff] }
 0x97e   : > { %v8739_v60 = vpop.eup %8738  ;;  %v6847_v11 = vadd.f32 1.0, %v8737_v46  ;;  %8764 = vrcp.f32 %v6846_v12 }
 0x97f   : > { %v8741_v7 = vpop.eup %8740  ;;  %v7003_v62 = vmul.f32 %v8877_v14, %v8739_v60  ;;  %8766 = vrcp.f32 %v6751_v42  ;;  %v6682_v2 = vpop.f32.mrf.mxu0 }
 0x980   : > { %v8743_v18 = vpop.eup %8742  ;;  %8768 = vpow2.f32 %v7908_v26  ;;  %v7923_v26 = vmul.f32 -1.442695, %v6677_v30 }
 0x981   : > { %v8745_v8 = vpop.eup %8744  ;;  %v6955_v38 = vadd.f32 1.0, %v8743_v18  ;;  %v12425_v10 = vadd.f32 %v7019_v61, %v7003_v62  ;;  %8770 = vrcp.f32 %v6847_v11  ;;  %v6686_v49 = vpop.f32.mrf.mxu0  ;;  %v6681_v11 = vadd.f32 %v6680_v3, %v12280_v32 }
 0x982   : > { %v8747_v47 = vpop.eup %8746  ;;  %8772 = vpow2.f32 %v7920_v27  ;;  %v6752_v17 = vadd.f32 1.0, %v8745_v8  ;;  %v6683_v27 = vadd.f32 %v6682_v2, %v12276_v9 }
 0x983   : > { %v8749_v23 = vpop.eup %8748  ;;  %7171 = vrot.lane.b32.xlu0 %v12425_v10, %s9020_s30  ;;  %v7004_v20 = vmul.f32 %v8878_v63, %v8747_v47  ;;  %8774 = vrcp.f32 %v6955_v38  ;;  %v6688_v18 = vpop.f32.mrf.mxu0 }
 0x984   : > { %v7020_v15 = vmul.f32 %v8749_v23, %v8741_v7  ;;  %v8751_v58 = vpop.eup %8750  ;;  %8776 = vpow2.f32 %v7893_v41  ;;  %v7924_v38 = vmul.f32 -1.442695, %v6683_v27  ;;  %v6689_v23 = vadd.f32 %v6688_v18, %v12276_v9  ;;  %v8881_v9 = vld [vmem:[%s9187_s25 + $0x60] sm:$0xff] }
 0x985   : > { %v8753_v54 = vpop.eup %8752  ;;  %8778 = vtanh.f32 %v6663_v51  ;;  %v6687_v51 = vadd.f32 %v6686_v49, %v12280_v32 }
 0x986   : > { %v12437_v39 = vadd.f32 %v7020_v15, %v7004_v20  ;;  %v8755_v24 = vpop.eup %8754  ;;  %v6848_v28 = vadd.f32 1.0, %v8753_v54  ;;  %8780 = vpow2.f32 %v7909_v4  ;;  %v8880_v4 = vld [vmem:[%s9187_s25 + $0x58] sm:$0xff] }
 0x987   : > { %v8757_v59 = vpop.eup %8756  ;;  %8782 = vrcp.f32 %v6752_v17  ;;  %v7005_v52 = vmul.f32 %v8879_v34, %v8755_v24 }
 0x988   : > { %7173 = vrot.lane.b32.xlu1 %v12437_v39, %s9020_s30  ;;  %v8759_v12 = vpop.eup %8758  ;;  %8784 = vrcp.f32 %v6848_v28 }
 0x989   : > { %v8761_v35 = vpop.eup %8760  ;;  %8786 = vtanh.f32 %v6669_v33  ;;  %v6956_v14 = vadd.f32 1.0, %v8759_v12  ;;  %v7925_v33 = vmul.f32 -1.442695, %v6689_v23  ;;  %v8882_v12 = vld [vmem:[%s9187_s25 + $0x68] sm:$0xff] }
 0x98a   : > { %v8763_v46 = vpop.eup %8762  ;;  %v6753_v42 = vadd.f32 1.0, %v8761_v35  ;;  %8788 = vpow2.f32 %v7921_v25 }
 0x98b   : > { %v8765_v60 = vpop.eup %8764  ;;  %8790 = vpow2.f32 %v7922_v55  ;;  %v7021_v7 = vmul.f32 %v8763_v46, %v8751_v58 }
 0x98c   : > { %v8767_v40 = vpop.eup %8766  ;;  %8792 = vrcp.f32 %v6753_v42  ;;  %v7006_v6 = vmul.f32 %v8880_v4, %v8765_v60 }
 0x98d   : > { %v8769_v50 = vpop.eup %8768  ;;  %8794 = vtanh.f32 %v6675_v57  ;;  %v7037_v0 = vadd.f32 %v7021_v7, %v7005_v52 }
 0x98e   : > { %v8771_v62 = vpop.eup %8770  ;;  %v6849_v61 = vadd.f32 1.0, %v8769_v50  ;;  %8796 = vpow2.f32 %v7923_v26 }
 0x98f   : > { %v8773_v8 = vpop.eup %8772  ;;  %8798 = vtanh.f32 %v6681_v11  ;;  %7175 = vrot.lane.b32.xlu0 %v7037_v0, %s9020_s30  ;;  %v7007_v24 = vmul.f32 %v8881_v9, %v8771_v62  ;;  %v8883_v11 = vld [vmem:[%s9187_s25 + $0x70] sm:$0xff] }
 0x990   : > { %v8775_v41 = vpop.eup %8774  ;;  %8800 = vrcp.f32 %v6849_v61  ;;  %v6957_v17 = vadd.f32 1.0, %v8773_v8 }
 0x991   : > { %v8777_v47 = vpop.eup %8776  ;;  %8802 = vrcp.f32 %v6956_v14 }
 0x992   : > { %v8779_v3 = vpop.eup %8778  ;;  %v6754_v63 = vadd.f32 1.0, %v8777_v47  ;;  %8804 = vtanh.f32 %v12425_v10  ;;  %v8884_v47 = vld [vmem:[%s9187_s25 + $0x78] sm:$0xff] }
 0x993   : > { %v8781_v20 = vpop.eup %8780  ;;  %8806 = vpow2.f32 %v7924_v38  ;;  %v7022_v29 = vmul.f32 %v8779_v3, %v8757_v59 }
 0x994   : > { %v8783_v15 = vpop.eup %8782  ;;  %8808 = vrcp.f32 %v6754_v63  ;;  %v6850_v58 = vadd.f32 1.0, %v8781_v20 }
 0x995   : > { %v8785_v54 = vpop.eup %8784  ;;  %8810 = vtanh.f32 %v6687_v51  ;;  %v7038_v32 = vadd.f32 %v7022_v29, %v7006_v6 }
 0x996   : > { %v8787_v28 = vpop.eup %8786  ;;  %8812 = vrcp.f32 %v6850_v58  ;;  %v7008_v35 = vmul.f32 %v8882_v12, %v8785_v54 }
 0x997   : > { %v8789_v25 = vpop.eup %8788  ;;  %8814 = vrcp.f32 %v6957_v17  ;;  %7177 = vrot.lane.b32.xlu1 %v7038_v32, %s9020_s30  ;;  %v7023_v10 = vmul.f32 %v8787_v28, %v8767_v40 }
 0x998   : > { %v8791_v30 = vpop.eup %8790  ;;  %8816 = vtanh.f32 %v12437_v39  ;;  %v6958_v34 = vadd.f32 1.0, %v8789_v25 }
 0x999   : > { %v8793_v2 = vpop.eup %8792  ;;  %v6959_v59 = vadd.f32 1.0, %v8791_v30  ;;  %8818 = vpow2.f32 %v7925_v33  ;;  %v7039_v55 = vadd.f32 %v7023_v10, %v7007_v24 }
 0x99a   : > { %v8795_v57 = vpop.eup %8794  ;;  %8820 = vtanh.f32 %v7037_v0 }
 0x99b   : > { %v8797_v52 = vpop.eup %8796  ;;  %8822 = vrcp.f32 %v6959_v59  ;;  %v7024_v46 = vmul.f32 %v8795_v57, %v8783_v15 }
 0x99c   : > { %v8799_v42 = vpop.eup %8798  ;;  %8824 = vtanh.f32 %v7038_v32  ;;  %v6960_v49 = vadd.f32 1.0, %v8797_v52 }
 0x99d   : > { %v8801_v26 = vpop.eup %8800  ;;  %8826 = vtanh.f32 %v7039_v55  ;;  %v7040_v60 = vadd.f32 %v7024_v46, %v7008_v35  ;;  %v7025_v7 = vmul.f32 %v8799_v42, %v8793_v2 }
 0x99e   : > { %v8803_v39 = vpop.eup %8802  ;;  %8828 = vrcp.f32 %v6958_v34  ;;  %v7009_v27 = vmul.f32 %v8883_v11, %v8801_v26 }
 0x99f   : > { %v8805_v40 = vpop.eup %8804  ;;  %8830 = vtanh.f32 %v7040_v60 }
 0x9a0   : > { %v8807_v50 = vpop.eup %8806  ;;  %v7041_v14 = vadd.f32 %v7025_v7, %v7009_v27  ;;  %v7067_v62 = vmul.f32 %v8805_v40, %v8775_v41  ;;  %8832 = vrcp.f32 %v6960_v49 }
 0x9a1   : > { %v8809_v0 = vpop.eup %8808  ;;  %v6961_v61 = vadd.f32 1.0, %v8807_v50 }
 0x9a2   : > { %v8811_v18 = vpop.eup %8810  ;;  %7107 = vrot.lane.b32.xlu0 %v7067_v62, %s9021_s14  ;;  %8834 = vtanh.f32 %v7041_v14 }
 0x9a3   : > { %v8813_v8 = vpop.eup %8812  ;;  %8836 = vrcp.f32 %v6961_v61  ;;  %v7026_v23 = vmul.f32 %v8811_v18, %v8809_v0 }
 0x9a4   : > { %v8815_v38 = vpop.eup %8814  ;;  %v7010_v51 = vmul.f32 %v8884_v47, %v8813_v8 }
 0x9a5   : > { %v8817_v4 = vpop.eup %8816 }
 0x9a6   : > { %v8819_v6 = vpop.eup %8818  ;;  %v7042_v3 = vadd.f32 %v7026_v23, %v7010_v51  ;;  %v7068_v63 = vmul.f32 %v8817_v4, %v8803_v39  ;;  %7179 = vrot.lane.b32.xlu0 %v7039_v55, %s9020_s30 }
 0x9a7   : > { %v8821_v41 = vpop.eup %8820  ;;  %v6962_v20 = vadd.f32 1.0, %v8819_v6 }
 0x9a8   : > { %v8823_v17 = vpop.eup %8822  ;;  %7109 = vrot.lane.b32.xlu1 %v7068_v63, %s9021_s14  ;;  %v7069_v29 = vmul.f32 %v8821_v41, %v8815_v38  ;;  %8838 = vtanh.f32 %v7042_v3 }
 0x9a9   : > { %v8825_v15 = vpop.eup %8824  ;;  %8840 = vrcp.f32 %v6962_v20 }
 0x9aa   : > { %v8827_v58 = vpop.eup %8826  ;;  %7111 = vrot.lane.b32.xlu0 %v7069_v29, %s9021_s14 }
 0x9ab   : > { %v8829_v54 = vpop.eup %8828  ;;  %v7071_v33 = vmul.f32 %v8827_v58, %v8823_v17 }
 0x9ac   : > { %7181 = vrot.lane.b32.xlu1 %v7040_v60, %s9020_s30  ;;  %v7070_v32 = vmul.f32 %v8829_v54, %v8825_v15  ;;  %v8831_v9 = vpop.eup %8830 }
 0x9ad   : > { %v8833_v24 = vpop.eup %8832 }
 0x9ae   : > { %7115 = vrot.lane.b32.xlu0 %v7071_v33, %s9021_s14  ;;  %v7072_v10 = vmul.f32 %v8833_v24, %v8831_v9 }
 0x9af   : > { %v8835_v28 = vpop.eup %8834 }
 0x9b0   : > { %v8837_v25 = vpop.eup %8836  ;;  %7113 = vrot.lane.b32.xlu1 %v7070_v32, %s9021_s14 }
 0x9b1   : > { %v7073_v30 = vmul.f32 %v8837_v25, %v8835_v28 }
 0x9b3   : > { %7119 = vrot.lane.b32.xlu0 %v7073_v30, %s9021_s14 }
 0x9b4   : > { %7117 = vrot.lane.b32.xlu1 %v7072_v10, %s9021_s14 }
 0x9b5   : > { %v8839_v2 = vpop.eup %8838 }
 0x9b6   : > { %v8841_v59 = vpop.eup %8840 }
 0x9b7   : > { %v7074_v55 = vmul.f32 %v8841_v59, %v8839_v2  ;;  %7183 = vrot.lane.b32.xlu0 %v7041_v14, %s9020_s30 }
 0x9b9   : > { %7121 = vrot.lane.b32.xlu1 %v7074_v55, %s9021_s14  ;;  %v7156_v35 = vpop.permute.xlu0 %7155 }
 0x9bd   : > { %7185 = vrot.lane.b32.xlu1 %v7042_v3, %s9020_s30  ;;  %v7158_v12 = vpop.permute.xlu1 %7157 }
 0x9c2   : > { %v7160_v34 = vpop.permute.xlu0 %7159 }
 0x9c6   : > { %v7162_v57 = vpop.permute.xlu1 %7161 }
 0x9d3   : > { %v7166_v52 = vpop.permute.xlu1 %7165 }
 0x9d9   : > { %v7092_v46 = vpop.permute.xlu0 %7091 }
 0x9da   : > { %v7203_v42 = vsel %vm5778_vm0, %v12072_v37, %v7092_v46 }
 0x9db   : > { %v7220_v26 = vsel %vm7219_vm1, %v7203_v42, %v7156_v35 }
 0x9dc   : > { %v7237_v49 = vsel %vm7236_vm2, %v7220_v26, 0.0 }
 0x9dd   : > { %7253 = vst [vmem:[%s12475_s28] sm:$0xff] %v7237_v49  ;;  %v7164_v60 = vpop.permute.xlu0 %7163  ;;  %v7096_v39 = vpop.permute.xlu1 %7095 }
 0x9de   : > { %v7205_v11 = vsel %vm5778_vm0, %v12100_v53, %v7096_v39 }
 0x9df   : > { %v7222_v27 = vsel %vm7219_vm1, %v7205_v11, %v7160_v34 }
 0x9e0   : > { %v7239_v7 = vsel %vm7236_vm2, %v7222_v27, 0.0 }
 0x9e1   : > { %7255 = vst [vmem:[%s12475_s28 + $0x10] sm:$0xff] %v7239_v7  ;;  %v7094_v40 = vpop.permute.xlu0 %7093  ;;  %v7098_v50 = vpop.permute.xlu1 %7097 }
 0x9e2   : > { %v7204_v37 = vsel %vm5778_vm0, %v12074_v31, %v7094_v40  ;;  %v7206_v14 = vsel %vm5778_vm0, %v12102_v16, %v7098_v50 }
 0x9e3   : > { %v7221_v62 = vsel %vm7219_vm1, %v7204_v37, %v7158_v12  ;;  %v7223_v0 = vsel %vm7219_vm1, %v7206_v14, %v7162_v57 }
 0x9e4   : > { %v7238_v53 = vsel %vm7236_vm2, %v7221_v62, 0.0  ;;  %v7240_v61 = vsel %vm7236_vm2, %v7223_v0, 0.0 }
 0x9e5   : > { %7254 = vst [vmem:[%s12475_s28 + $0x8] sm:$0xff] %v7238_v53  ;;  %7256 = vst [vmem:[%s12475_s28 + $0x18] sm:$0xff] %v7240_v61  ;;  %v7168_v18 = vpop.permute.xlu0 %7167  ;;  %v7170_v8 = vpop.permute.xlu1 %7169 }
 0x9e9   : > { %v7100_v38 = vpop.permute.xlu0 %7099  ;;  %v7102_v31 = vpop.permute.xlu1 %7101 }
 0x9ea   : > { %v7207_v16 = vsel %vm5778_vm0, %v12128_v21, %v7100_v38  ;;  %v7208_v47 = vsel %vm5778_vm0, %v12130_v19, %v7102_v31 }
 0x9eb   : > { %v7224_v51 = vsel %vm7219_vm1, %v7207_v16, %v7164_v60  ;;  %v7225_v23 = vsel %vm7219_vm1, %v7208_v47, %v7166_v52 }
 0x9ec   : > { %v7241_v4 = vsel %vm7236_vm2, %v7224_v51, 0.0  ;;  %v7242_v6 = vsel %vm7236_vm2, %v7225_v23, 0.0 }
 0x9ed   : > { %7257 = vst [vmem:[%s12475_s28 + $0x20] sm:$0xff] %v7241_v4  ;;  %7258 = vst [vmem:[%s12475_s28 + $0x28] sm:$0xff] %v7242_v6  ;;  %v7104_v3 = vpop.permute.xlu0 %7103 }
 0x9ee   : > { %v7209_v63 = vsel %vm5778_vm0, %v12156_v1, %v7104_v3 }
 0x9ef   : > { %v7226_v21 = vsel %vm7219_vm1, %v7209_v63, %v7168_v18  ;;  %v7106_v41 = vpop.permute.xlu1 %7105 }
 0x9f0   : > { %v7243_v19 = vsel %vm7236_vm2, %v7226_v21, 0.0  ;;  %v7210_v20 = vsel %vm5778_vm0, %v12158_v44, %v7106_v41 }
 0x9f1   : > { %7259 = vst [vmem:[%s12475_s28 + $0x30] sm:$0xff] %v7243_v19  ;;  %v7227_v17 = vsel %vm7219_vm1, %v7210_v20, %v7170_v8 }
 0x9f2   : > { %v7244_v29 = vsel %vm7236_vm2, %v7227_v17, 0.0 }
 0x9f3   : > { %7260 = vst [vmem:[%s12475_s28 + $0x38] sm:$0xff] %v7244_v29 }
 0x9f5   : > { %v7172_v15 = vpop.permute.xlu0 %7171 }
 0x9fa   : > { %v7174_v54 = vpop.permute.xlu1 %7173 }
 0xa01   : > { %v7176_v58 = vpop.permute.xlu0 %7175 }
 0xa09   : > { %v7178_v32 = vpop.permute.xlu1 %7177 }
 0xa14   : > { %v7108_v1 = vpop.permute.xlu0 %7107 }
 0xa15   : > { %v7211_v33 = vsel %vm5778_vm0, %v12184_v56, %v7108_v1 }
 0xa16   : > { %v7228_v9 = vsel %vm7219_vm1, %v7211_v33, %v7172_v15 }
 0xa17   : > { %v7245_v44 = vsel %vm7236_vm2, %v7228_v9, 0.0 }
 0xa18   : > { %7261 = vst [vmem:[%s12475_s28 + $0x40] sm:$0xff] %v7245_v44  ;;  %v7180_v24 = vpop.permute.xlu0 %7179 }
 0xa1a   : > { %v7110_v28 = vpop.permute.xlu1 %7109 }
 0xa1b   : > { %v7212_v25 = vsel %vm5778_vm0, %v12187_v48, %v7110_v28 }
 0xa1c   : > { %v7229_v10 = vsel %vm7219_vm1, %v7212_v25, %v7174_v54  ;;  %v7112_v30 = vpop.permute.xlu0 %7111 }
 0xa1d   : > { %v7246_v2 = vsel %vm7236_vm2, %v7229_v10, 0.0  ;;  %v7213_v56 = vsel %vm5778_vm0, %v12204_v36, %v7112_v30 }
 0xa1e   : > { %7262 = vst [vmem:[%s12475_s28 + $0x48] sm:$0xff] %v7246_v2  ;;  %v7182_v59 = vpop.permute.xlu1 %7181  ;;  %v7230_v55 = vsel %vm7219_vm1, %v7213_v56, %v7176_v58 }
 0xa1f   : > { %v7247_v12 = vsel %vm7236_vm2, %v7230_v55, 0.0 }
 0xa20   : > { %7263 = vst [vmem:[%s12475_s28 + $0x50] sm:$0xff] %v7247_v12  ;;  %v7116_v35 = vpop.permute.xlu0 %7115 }
 0xa21   : > { %v7215_v48 = vsel %vm5778_vm0, %v12226_v22, %v7116_v35 }
 0xa22   : > { %v7114_v57 = vpop.permute.xlu1 %7113  ;;  %v7232_v34 = vsel %vm7219_vm1, %v7215_v48, %v7180_v24 }
 0xa23   : > { %v7214_v52 = vsel %vm5778_vm0, %v12213_v13, %v7114_v57  ;;  %v7249_v36 = vsel %vm7236_vm2, %v7232_v34, 0.0 }
 0xa24   : > { %v7231_v46 = vsel %vm7219_vm1, %v7214_v52, %v7178_v32  ;;  %7265 = vst [vmem:[%s12475_s28 + $0x60] sm:$0xff] %v7249_v36 }
 0xa25   : > { %v7248_v42 = vsel %vm7236_vm2, %v7231_v46, 0.0  ;;  %v7120_v26 = vpop.permute.xlu0 %7119 }
 0xa26   : > { %7264 = vst [vmem:[%s12475_s28 + $0x58] sm:$0xff] %v7248_v42  ;;  %v7118_v49 = vpop.permute.xlu1 %7117  ;;  %v7217_v13 = vsel %vm5778_vm0, %v12248_v5, %v7120_v26 }
 0xa27   : > { %v7216_v22 = vsel %vm5778_vm0, %v12235_v45, %v7118_v49 }
 0xa28   : > { %v7233_v60 = vsel %vm7219_vm1, %v7216_v22, %v7182_v59 }
 0xa29   : > { %v7250_v39 = vsel %vm7236_vm2, %v7233_v60, 0.0  ;;  %v7184_v11 = vpop.permute.xlu0 %7183 }
 0xa2a   : > { %7266 = vst [vmem:[%s12475_s28 + $0x68] sm:$0xff] %v7250_v39  ;;  %v7234_v27 = vsel %vm7219_vm1, %v7217_v13, %v7184_v11 }
 0xa2b   : > { %v7122_v7 = vpop.permute.xlu1 %7121  ;;  %v7251_v40 = vsel %vm7236_vm2, %v7234_v27, 0.0 }
 0xa2c   : > { %7267 = vst [vmem:[%s12475_s28 + $0x70] sm:$0xff] %v7251_v40  ;;  %v7218_v50 = vsel %vm5778_vm0, %v12256_v43, %v7122_v7 }
 0xa2f   : > { %v7186_v37 = vpop.permute.xlu1 %7185 }
 0xa30   : > { %v7235_v45 = vsel %vm7219_vm1, %v7218_v50, %v7186_v37 }
 0xa31   : > { %v7252_v14 = vsel %vm7236_vm2, %v7235_v45, 0.0 }
 0xa32   : > { %7268 = vst [vmem:[%s12475_s28 + $0x78] sm:$0xff] %v7252_v14 }
 0xa33 PF: > { %s25_s21 = sadd.s32 1, %s9007_s21  }
 0xa34   : > { %p22_p2 = scmp.ge.s32.totalorder %s25_s21, 4  }
 0xa36   :  { %24 = sbr.rel (!%p22_p2) target bundleno = 3 (0x3), region = 121 }
 0xa3b   :  { %7291 = vsyncpa [#allocation3], 1 }
 0xa3c   :  { %7293 = vsyncpa [#allocation3 + $0x1], 1 }
 0xa3d   :  { %7294 = vsyncpa [#allocation5], 1 }
 0xa3e   :  { %7295 = vsyncpa [#allocation8], 1 }

</bundles_post_ra>
